<compile_context>
chip_gen: v7x
topology: tpu7x:2x2x1
jax: 0.10.0
libtpu: 0.0.40
codegen_flags: <defaults>
</compile_context>

<pallas_src>
import functools

import jax
import jax.numpy as jnp
from jax import lax
from jax.experimental import pallas as pl
from jax.experimental.pallas import tpu as pltpu

BN_EPS = 1e-5
VMEM_LIMIT = 48 * 1024 * 1024  # > v5e 16 MiB default, < v7x 64 MiB physical


# --------------------------------------------------------------------------
# Small helpers
# --------------------------------------------------------------------------
def _round_up(x, m):
    return (x + m - 1) // m * m


def _pick_tm(m):
    """Pad-aware row tile (<=256): largest tile wasting at most ~m/8 pad rows."""
    for tm in (256, 128, 64, 32, 16):
        if _round_up(m, tm) - m <= max(m // 8, 0):
            return tm
    return 16


def _pick_tn(n):
    for tn in (512, 256, 128):
        if n % tn == 0:
            return tn
    return n


def _cparams(n_axes):
    return pltpu.CompilerParams(
        dimension_semantics=("parallel",) * n_axes,
        vmem_limit_bytes=VMEM_LIMIT)


def _bn_scale_shift(col_sum, col_sq, count, gamma_p, beta_p):
    mean = col_sum / count
    var = jnp.maximum(col_sq / count - mean * mean, 0.0)  # biased batch variance
    inv = lax.rsqrt(var + BN_EPS)
    scale = gamma_p * inv
    shift = beta_p - mean * scale
    return scale, shift


def _phase_taps(k, s, p):
    """For each output phase: (input offset d, kernel index kh) taps, one dim."""
    pad = k - 1 - p
    taps = []
    for ph in range(s):
        t = []
        for kh in range(k):
            if (ph + kh - pad) % s == 0:
                t.append(((ph + kh - pad) // s, kh))
        taps.append(t)
    return taps


def _taps_2d(k, s, p):
    """Per phase (ph,pw): list of (tap9_index, kh, kw) with tap9 = (dh+1)*3+(dw+1)."""
    taps1d = _phase_taps(k, s, p)
    out = []
    for ph in range(s):
        for pw in range(s):
            t = []
            for dh, kh in taps1d[ph]:
                for dw, kw in taps1d[pw]:
                    assert -1 <= dh <= 1 and -1 <= dw <= 1
                    t.append(((dh + 1) * 3 + (dw + 1), kh, kw))
            out.append(t)
    assert all(len(t) == len(out[0]) for t in out)
    return out


# --------------------------------------------------------------------------
# Pallas kernels
# --------------------------------------------------------------------------
def _mm_stats_kernel(cols_ref, w_ref, ps_ref, pq_ref):
    # Layer-0 pass 1: matmul for per-column sum / sum-of-squares only
    # (y is never stored; it is recomputed in the fused pass-2 kernel).
    y = jnp.dot(cols_ref[...], w_ref[...], preferred_element_type=jnp.float32)
    s = jnp.sum(y, axis=0, keepdims=True)
    q = jnp.sum(y * y, axis=0, keepdims=True)
    # (8, TN) partial blocks keep the stat stores (8,128)-aligned.
    ps_ref[...] = jnp.broadcast_to(s, ps_ref.shape)
    pq_ref[...] = jnp.broadcast_to(q, pq_ref.shape)


def _mm_affine_relu_kernel(cols_ref, w_ref, scale_ref, shift_ref, o_ref):
    # Layer-0 pass 2: matmul + folded BN scale/shift + ReLU, bf16 store.
    y = jnp.dot(cols_ref[...], w_ref[...], preferred_element_type=jnp.float32)
    o_ref[...] = jnp.maximum(y * scale_ref[...] + shift_ref[...],
                             0.0).astype(o_ref.dtype)


def _scale_relu_kernel(y_ref, scale_ref, shift_ref, o_ref):
    # BN apply for the stride-2 layers: bf16 in, f32 FMA + ReLU, bf16 out.
    y = y_ref[...].astype(jnp.float32)
    o_ref[...] = jnp.maximum(y * scale_ref[...] + shift_ref[...],
                             0.0).astype(o_ref.dtype)


def _mm9_stats_kernel(cols_ref, w_ref, y_ref, ps_ref, pq_ref, *, tap_ids, coutp):
    # All s*s output phases of ConvTranspose2d(4,2,1) for one row tile:
    #   y[:, p*Coutp:(p+1)*Coutp] = sum_t cols9[tap(p,t)] @ w16[p*ntap + t]
    # cols_ref: (9, TM, Cinp), w_ref: (16, Cinp, Coutp) (constant block, resident).
    # Taps are indexed only on leading dims; lane slices are 128-aligned.
    ntap = len(tap_ids[0])
    tm = cols_ref.shape[1]
    for p, ids in enumerate(tap_ids):
        acc = jnp.zeros((tm, coutp), jnp.float32)
        for t in range(ntap):
            acc = acc + jnp.dot(cols_ref[ids[t]], w_ref[p * ntap + t],
                                preferred_element_type=jnp.float32)
        sl = slice(p * coutp, (p + 1) * coutp)
        y_ref[:, sl] = acc.astype(y_ref.dtype)  # bf16 pre-BN store
        ps_ref[:, sl] = jnp.broadcast_to(
            jnp.sum(acc, axis=0, keepdims=True), (8, coutp))
        pq_ref[:, sl] = jnp.broadcast_to(
            jnp.sum(acc * acc, axis=0, keepdims=True), (8, coutp))


def _mmT_tanh_kernel(cols_ref, w_ref, o_ref, *, tap_ids, coutp):
    # Final layer, channels-in-sublane / spatial-in-lane formulation:
    # output tile is (4*coutp, TM) with coutp = 8, so nc=3 only pads sublanes.
    ntap = len(tap_ids[0])
    tml = cols_ref.shape[2]
    for p, ids in enumerate(tap_ids):
        acc = jnp.zeros((coutp, tml), jnp.float32)
        for t in range(ntap):
            acc = acc + jnp.dot(w_ref[p * ntap + t], cols_ref[ids[t]],
                                preferred_element_type=jnp.float32)
        o_ref[p * coutp:(p + 1) * coutp, :] = jnp.tanh(acc)


# --------------------------------------------------------------------------
# Layer wrappers
# --------------------------------------------------------------------------
def _layer0_bn_relu(cols, wmat, gamma_p, beta_p, n_taps):
    """Layer 0: (N, Kp) @ (Kp, n_taps*Coutp) with train-mode BN + ReLU.

    Pass 1 computes per-column stats only (no y intermediate in HBM); pass 2
    recomputes the (tiny) matmul fused with scale/shift + ReLU, storing bf16.
    cols stay resident across the column-tile axis (weights streamed once).
    """
    n, kp = cols.shape
    ncol = wmat.shape[1]
    coutp = ncol // n_taps
    tm = _pick_tm(n)
    mp = _round_up(n, tm)
    nm = mp // tm
    tn = _pick_tn(ncol)
    nn = ncol // tn

    cols_b = cols.astype(jnp.bfloat16)
    if mp != n:
        cols_b = jnp.pad(cols_b, ((0, mp - n), (0, 0)))
    w_b = wmat.astype(jnp.bfloat16)

    ps, pq = pl.pallas_call(
        _mm_stats_kernel,
        grid=(nm, nn),
        in_specs=[pl.BlockSpec((tm, kp), lambda i, j: (i, 0)),
                  pl.BlockSpec((kp, tn), lambda i, j: (0, j))],
        out_specs=[pl.BlockSpec((8, tn), lambda i, j: (i, j)),
                   pl.BlockSpec((8, tn), lambda i, j: (i, j))],
        out_shape=[jax.ShapeDtypeStruct((nm * 8, ncol), jnp.float32)] * 2,
        compiler_params=_cparams(2),
    )(cols_b, w_b)

    col_sum = ps[0::8].sum(axis=0)
    col_sq = pq[0::8].sum(axis=0)
    ch_sum = col_sum.reshape(n_taps, coutp).sum(axis=0)
    ch_sq = col_sq.reshape(n_taps, coutp).sum(axis=0)
    scale, shift = _bn_scale_shift(ch_sum, ch_sq, n * n_taps, gamma_p, beta_p)
    scale_c = jnp.tile(scale, n_taps).reshape(1, ncol)
    shift_c = jnp.tile(shift, n_taps).reshape(1, ncol)

    out = pl.pallas_call(
        _mm_affine_relu_kernel,
        grid=(nm, nn),
        in_specs=[pl.BlockSpec((tm, kp), lambda i, j: (i, 0)),
                  pl.BlockSpec((kp, tn), lambda i, j: (0, j)),
                  pl.BlockSpec((1, tn), lambda i, j: (0, j)),
                  pl.BlockSpec((1, tn), lambda i, j: (0, j))],
        out_specs=pl.BlockSpec((tm, tn), lambda i, j: (i, j)),
        out_shape=jax.ShapeDtypeStruct((mp, ncol), jnp.bfloat16),
        compiler_params=_cparams(2),
    )(cols_b, w_b, scale_c, shift_c)
    return out[:n]


def _first_layer(x_nchw, layer):
    """ConvTranspose2d(nz, C, 8, 1, 0) on a 1x1 input + BN + ReLU -> (N,8,8,Coutp)."""
    w_pt = layer["w"]                       # (nz, Cout, k, k)
    nz, cout, k, _ = w_pt.shape
    n = x_nchw.shape[0]
    coutp = _round_up(cout, 128)
    kp = _round_up(nz, 128)                 # pad tiny contraction dim to 128 lanes

    cols = jnp.pad(x_nchw.reshape(n, nz), ((0, 0), (0, kp - nz)))
    w0 = jnp.transpose(w_pt, (0, 2, 3, 1))  # (nz, k, k, Cout)
    w0 = jnp.pad(w0, ((0, kp - nz), (0, 0), (0, 0), (0, coutp - cout)))
    w0 = w0.reshape(kp, k * k * coutp)
    gamma_p = jnp.pad(layer["gamma"], (0, coutp - cout)).astype(jnp.float32)
    beta_p = jnp.pad(layer["beta"], (0, coutp - cout)).astype(jnp.float32)

    y = _layer0_bn_relu(cols, w0, gamma_p, beta_p, k * k)   # (N, k*k*Coutp) bf16
    return y.reshape(n, k, k, coutp)


def _deconv_s2_bn_relu(x, layer):
    """ConvTranspose2d(k=4,s=2,p=1) + BN(batch stats) + ReLU.

    x: (N, H, W, Cinp) bf16 with Cinp possibly zero-padded.  Returns
    (N, 2H, 2W, Coutp) bf16 (Coutp = Cout rounded to 128, zero-padded channels).
    """
    w_pt = layer["w"]
    cin, cout, k, _ = w_pt.shape
    assert (k, layer["s"], layer["p"]) == (4, 2, 1)
    n, h, wd, cinp = x.shape
    assert cinp >= cin
    coutp = _round_up(cout, 128)
    m = n * h * wd
    ncol = 4 * coutp

    # 9-tap slab stack: one shifted window of the padded input per (dh,dw)
    # offset, shared by all 4 phases, taps on a leading axis.
    xpad = jnp.pad(x, ((0, 0), (1, 1), (1, 1), (0, 0)))
    slabs = [xpad[:, a:a + h, b:b + wd, :] for a in range(3) for b in range(3)]
    cols9 = jnp.stack(slabs, axis=0).reshape(9, m, cinp)

    taps = _taps_2d(4, 2, 1)
    tap_ids = tuple(tuple(t[0] for t in phase) for phase in taps)
    wmats = []
    for phase in taps:
        for (_, kh, kw) in phase:
            wmats.append(w_pt[:, :, k - 1 - kh, k - 1 - kw])   # (Cin, Cout)
    w16 = jnp.stack(wmats, axis=0)                             # (16, Cin, Cout)
    w16 = jnp.pad(w16, ((0, 0), (0, cinp - cin), (0, coutp - cout)))
    w16 = w16.astype(jnp.bfloat16)

    tm = _pick_tm(m)
    mp = _round_up(m, tm)
    nm = mp // tm
    if mp != m:
        cols9 = jnp.pad(cols9, ((0, 0), (0, mp - m), (0, 0)))

    kern = functools.partial(_mm9_stats_kernel, tap_ids=tap_ids, coutp=coutp)
    y, ps, pq = pl.pallas_call(
        kern,
        grid=(nm,),
        in_specs=[pl.BlockSpec((9, tm, cinp), lambda i: (0, i, 0)),
                  pl.BlockSpec((16, cinp, coutp), lambda i: (0, 0, 0))],
        out_specs=[pl.BlockSpec((tm, ncol), lambda i: (i, 0)),
                   pl.BlockSpec((8, ncol), lambda i: (i, 0)),
                   pl.BlockSpec((8, ncol), lambda i: (i, 0))],
        out_shape=[jax.ShapeDtypeStruct((mp, ncol), jnp.bfloat16),
                   jax.ShapeDtypeStruct((nm * 8, ncol), jnp.float32),
                   jax.ShapeDtypeStruct((nm * 8, ncol), jnp.float32)],
        compiler_params=_cparams(1),
    )(cols9, w16)

    # Fold gamma/beta with the batch stats into one scale/shift per column.
    col_sum = ps[0::8].sum(axis=0)
    col_sq = pq[0::8].sum(axis=0)
    gamma_p = jnp.pad(layer["gamma"], (0, coutp - cout)).astype(jnp.float32)
    beta_p = jnp.pad(layer["beta"], (0, coutp - cout)).astype(jnp.float32)
    ch_sum = col_sum.reshape(4, coutp).sum(axis=0)
    ch_sq = col_sq.reshape(4, coutp).sum(axis=0)
    scale, shift = _bn_scale_shift(ch_sum, ch_sq, 4 * m, gamma_p, beta_p)
    scale_c = jnp.tile(scale, 4).reshape(1, ncol)
    shift_c = jnp.tile(shift, 4).reshape(1, ncol)

    tn = _pick_tn(ncol)
    y_act = pl.pallas_call(
        _scale_relu_kernel,
        grid=(nm, ncol // tn),
        in_specs=[pl.BlockSpec((tm, tn), lambda i, j: (i, j)),
                  pl.BlockSpec((1, tn), lambda i, j: (0, j)),
                  pl.BlockSpec((1, tn), lambda i, j: (0, j))],
        out_specs=pl.BlockSpec((tm, tn), lambda i, j: (i, j)),
        out_shape=jax.ShapeDtypeStruct((mp, ncol), jnp.bfloat16),
        compiler_params=_cparams(2),
    )(y, scale_c, shift_c)

    # Phase interleave (depth-to-space): one bf16 reshape/transpose per layer.
    # TODO(synk): fold into the Pallas epilogue via a phase-major output layout.
    y_act = y_act[:m].reshape(n, h, wd, 2, 2, coutp)
    return y_act.transpose(0, 1, 3, 2, 4, 5).reshape(n, 2 * h, 2 * wd, coutp)


def _deconv_s2_tanh(x, layer):
    """Final ConvTranspose2d(k=4,s=2,p=1) + Tanh, channels-first formulation."""
    w_pt = layer["w"]
    cin, cout, k, _ = w_pt.shape
    assert (k, layer["s"], layer["p"]) == (4, 2, 1)
    n, h, wd, cinp = x.shape
    assert cinp >= cin
    m = n * h * wd
    coutp = _round_up(cout, 8)              # nc=3 -> 8 sublanes only

    xcf = jnp.transpose(x, (3, 0, 1, 2))    # (Cinp, N, H, W)
    xcf = jnp.pad(xcf, ((0, 0), (0, 0), (1, 1), (1, 1)))
    slabs = [xcf[:, :, a:a + h, b:b + wd] for a in range(3) for b in range(3)]
    colsT = jnp.stack(slabs, axis=0).reshape(9, cinp, m)

    taps = _taps_2d(4, 2, 1)
    tap_ids = tuple(tuple(t[0] for t in phase) for phase in taps)
    wmats = []
    for phase in taps:
        for (_, kh, kw) in phase:
            wt = jnp.transpose(w_pt[:, :, k - 1 - kh, k - 1 - kw])   # (Cout, Cin)
            wmats.append(jnp.pad(wt, ((0, coutp - cout), (0, cinp - cin))))
    w16t = jnp.stack(wmats, axis=0).astype(jnp.bfloat16)             # (16, 8, Cinp)

    mp = _round_up(m, 128)
    tml = 512 if mp % 512 == 0 else (256 if mp % 256 == 0 else 128)
    if mp != m:
        colsT = jnp.pad(colsT, ((0, 0), (0, 0), (0, mp - m)))
    colsT = colsT.astype(jnp.bfloat16)

    kern = functools.partial(_mmT_tanh_kernel, tap_ids=tap_ids, coutp=coutp)
    out32 = pl.pallas_call(
        kern,
        grid=(mp // tml,),
        in_specs=[pl.BlockSpec((9, cinp, tml), lambda j: (0, 0, j)),
                  pl.BlockSpec((16, coutp, cinp), lambda j: (0, 0, 0))],
        out_specs=pl.BlockSpec((4 * coutp, tml), lambda j: (0, j)),
        out_shape=jax.ShapeDtypeStruct((4 * coutp, mp), jnp.float32),
        compiler_params=_cparams(1),
    )(colsT, w16t)

    # Rows are (ph, pw, cpad); columns are (n, i, j).  Interleave to NCHW.
    out = out32[:, :m].reshape(2, 2, coutp, n, h, wd)[:, :, :cout]
    out = out.transpose(3, 2, 4, 0, 5, 1).reshape(n, cout, 2 * h, 2 * wd)
    return out


# --------------------------------------------------------------------------
# Net_G forward
# --------------------------------------------------------------------------
def net_g_forward(x_nchw, layers):
    x = None
    out = None
    for li, layer in enumerate(layers):
        if li == 0:
            assert x_nchw.shape[2] == 1 and x_nchw.shape[3] == 1
            x = _first_layer(x_nchw, layer)
        elif "gamma" in layer:
            x = _deconv_s2_bn_relu(x, layer)
        else:
            out = _deconv_s2_tanh(x, layer)
    return out


# --------------------------------------------------------------------------
# Pure-JAX reference (independent path via lax.conv_general_dilated).
# Mirrors the kernel numerics: bf16 conv operands, f32 accumulation,
# bf16 inter-layer activation storage.
# --------------------------------------------------------------------------
def ref_forward(x_nchw, layers):
    x = x_nchw
    for layer in layers:
        k, s, p = layer["k"], layer["s"], layer["p"]
        w_pt = layer["w"]
        w_conv = jnp.transpose(w_pt[:, :, ::-1, ::-1], (1, 0, 2, 3))  # OIHW
        y = lax.conv_general_dilated(
            x.astype(jnp.bfloat16), w_conv.astype(jnp.bfloat16),
            window_strides=(1, 1),
            padding=[(k - 1 - p, k - 1 - p)] * 2,
            lhs_dilation=(s, s),
            dimension_numbers=("NCHW", "OIHW", "NCHW"),
            preferred_element_type=jnp.float32)
        if "gamma" in layer:
            mean = y.mean(axis=(0, 2, 3), keepdims=True)
            var = jnp.square(y - mean).mean(axis=(0, 2, 3), keepdims=True)
            y_hat = (y - mean) * lax.rsqrt(var + BN_EPS)
            g = layer["gamma"].reshape(1, -1, 1, 1)
            b = layer["beta"].reshape(1, -1, 1, 1)
            y = jnp.maximum(y_hat * g + b, 0.0)
            y = y.astype(jnp.bfloat16).astype(jnp.float32)
        else:
            y = jnp.tanh(y)
        x = y
    return x


# --------------------------------------------------------------------------
# Deterministic parameter construction (matches Net_G(nz, ngf, nc, l) shapes)
# --------------------------------------------------------------------------
def make_params(key, nz, ngf, nc, l):
    layers = []
    specs = []
    specs.append((nz, ngf * 2 ** (l - 2), 8, 1, 0, True))
    for i in range(1, l - 1):
        specs.append((ngf * 2 ** (l - 1 - i), ngf * 2 ** (l - 2 - i), 4, 2, 1, True))
    specs.append((ngf, nc, 4, 2, 1, False))

    for (cin, cout, k, s, p, has_bn) in specs:
        key, kw, kg, kb = jax.random.split(key, 4)
        layer = {
            "w": 0.02 * jax.random.normal(kw, (cin, cout, k, k), jnp.float32),
            "k": k, "s": s, "p": p,
        }
        if has_bn:
            layer["gamma"] = 1.0 + 0.1 * jax.random.normal(kg, (cout,), jnp.float32)
            layer["beta"] = 0.1 * jax.random.normal(kb, (cout,), jnp.float32)
        layers.append(layer)
    return layers


if __name__ == "__main__":
    # Small config: Net_G(nz=16, ngf=8, nc=3, l=3); latent input (2, 16, 1, 1)
    nz, ngf, nc, l = 16, 8, 3, 3
    N = 2

    key = jax.random.PRNGKey(0)
    key, kx = jax.random.split(key)
    x = jax.random.normal(kx, (N, nz, 1, 1), jnp.float32)
    layers = make_params(key, nz, ngf, nc, l)

    fwd = jax.jit(lambda inp: net_g_forward(inp, layers))
    out = jax.block_until_ready(fwd(x))
    assert out.shape == (N, nc, 8 * 2 ** (l - 1), 8 * 2 ** (l - 1)), out.shape

    ref = jax.block_until_ready(jax.jit(lambda inp: ref_forward(inp, layers))(x))
    max_err = float(jnp.max(jnp.abs(out - ref)))
    assert jnp.allclose(out, ref, atol=2e-2, rtol=2e-2), max_err

    print("KERNEL_OK")
</pallas_src>

<mosaic_0001>
module attributes {stable_mosaic.version = 11 : i64} {
  func.func @_mm_stats_kernel(%arg0: i32, %arg1: i32, %arg2: memref<16x128xbf16, #tpu.memory_space<vmem>>, %arg3: memref<128x512xbf16, #tpu.memory_space<vmem>>, %arg4: memref<8x512xf32, #tpu.memory_space<vmem>>, %arg5: memref<8x512xf32, #tpu.memory_space<vmem>>) attributes {dimension_semantics = [#tpu.dimension_semantics<parallel>, #tpu.dimension_semantics<parallel>], iteration_bounds = array<i64: 1, 16>, scalar_prefetch = 0 : i64, scratch_operands = 0 : i64, tpu.core_type = #tpu.core_type<tc>, window_params = [{transform_indices = @transform_0, window_bounds = array<i64: 16, 128>}, {transform_indices = @transform_1, window_bounds = array<i64: 128, 512>}, {transform_indices = @transform_2, window_bounds = array<i64: 8, 512>}, {transform_indices = @transform_3, window_bounds = array<i64: 8, 512>}]} {
    %c0 = arith.constant 0 : index
    %c0_0 = arith.constant 0 : index
    %0 = vector.load %arg2[%c0, %c0_0] : memref<16x128xbf16, #tpu.memory_space<vmem>>, vector<16x128xbf16>
    %c0_1 = arith.constant 0 : index
    %c0_2 = arith.constant 0 : index
    %1 = vector.load %arg3[%c0_1, %c0_2] : memref<128x512xbf16, #tpu.memory_space<vmem>>, vector<128x512xbf16>
    %cst = arith.constant dense<0.000000e+00> : vector<16x512xf32>
    %2 = tpu.matmul %0, %1, %cst {dimension_numbers = #tpu.dot_dimension_numbers<[1], [0], [0], [1], [0, 0, 1, 1], [], []>} : vector<16x128xbf16>, vector<128x512xbf16>, vector<16x512xf32> -> vector<16x512xf32>
    %cst_3 = arith.constant dense<0.000000e+00> : vector<512xf32>
    %3 = vector.multi_reduction <add>, %2, %cst_3 [0] : vector<16x512xf32> to vector<512xf32>
    %4 = vector.shape_cast %3 : vector<512xf32> to vector<1x512xf32>
    %5 = arith.mulf %2, %2 : vector<16x512xf32>
    %cst_4 = arith.constant dense<0.000000e+00> : vector<512xf32>
    %6 = vector.multi_reduction <add>, %5, %cst_4 [0] : vector<16x512xf32> to vector<512xf32>
    %7 = vector.shape_cast %6 : vector<512xf32> to vector<1x512xf32>
    %8 = vector.shape_cast %4 : vector<1x512xf32> to vector<1x512xf32>
    %9 = vector.broadcast %8 : vector<1x512xf32> to vector<8x512xf32>
    %c0_5 = arith.constant 0 : index
    %c0_6 = arith.constant 0 : index
    %10 = vector.load %arg4[%c0_5, %c0_6] : memref<8x512xf32, #tpu.memory_space<vmem>>, vector<8x512xf32>
    tpu.vector_store %arg4[%c0_5, %c0_6], %9 {strides = array<i32>} : memref<8x512xf32, #tpu.memory_space<vmem>>, vector<8x512xf32>,
    %11 = vector.shape_cast %7 : vector<1x512xf32> to vector<1x512xf32>
    %12 = vector.broadcast %11 : vector<1x512xf32> to vector<8x512xf32>
    %c0_7 = arith.constant 0 : index
    %c0_8 = arith.constant 0 : index
    %13 = vector.load %arg5[%c0_7, %c0_8] : memref<8x512xf32, #tpu.memory_space<vmem>>, vector<8x512xf32>
    tpu.vector_store %arg5[%c0_7, %c0_8], %12 {strides = array<i32>} : memref<8x512xf32, #tpu.memory_space<vmem>>, vector<8x512xf32>,
    return
  }
  func.func @transform_0(%arg0: i32, %arg1: i32) -> (i32, i32) {
    %c0_i32 = arith.constant 0 : i32
    %c0_i32_0 = arith.constant 0 : i32
    return %arg0, %c0_i32 : i32, i32
  }
  func.func @transform_1(%arg0: i32, %arg1: i32) -> (i32, i32) {
    %c0_i32 = arith.constant 0 : i32
    %c0_i32_0 = arith.constant 0 : i32
    return %c0_i32, %arg1 : i32, i32
  }
  func.func @transform_2(%arg0: i32, %arg1: i32) -> (i32, i32) {
    %c0_i32 = arith.constant 0 : i32
    return %arg0, %arg1 : i32, i32
  }
  func.func @transform_3(%arg0: i32, %arg1: i32) -> (i32, i32) {
    %c0_i32 = arith.constant 0 : i32
    return %arg0, %arg1 : i32, i32
  }
}

module attributes {stable_mosaic.version = 11 : i64} {
  func.func @_mm_affine_relu_kernel(%arg0: i32, %arg1: i32, %arg2: memref<16x128xbf16, #tpu.memory_space<vmem>>, %arg3: memref<128x512xbf16, #tpu.memory_space<vmem>>, %arg4: memref<1x512xf32, #tpu.memory_space<vmem>>, %arg5: memref<1x512xf32, #tpu.memory_space<vmem>>, %arg6: memref<16x512xbf16, #tpu.memory_space<vmem>>) attributes {dimension_semantics = [#tpu.dimension_semantics<parallel>, #tpu.dimension_semantics<parallel>], iteration_bounds = array<i64: 1, 16>, scalar_prefetch = 0 : i64, scratch_operands = 0 : i64, tpu.core_type = #tpu.core_type<tc>, window_params = [{transform_indices = @transform_0, window_bounds = array<i64: 16, 128>}, {transform_indices = @transform_1, window_bounds = array<i64: 128, 512>}, {transform_indices = @transform_2, window_bounds = array<i64: 1, 512>}, {transform_indices = @transform_3, window_bounds = array<i64: 1, 512>}, {transform_indices = @transform_4, window_bounds = array<i64: 16, 512>}]} {
    %c0 = arith.constant 0 : index
    %c0_0 = arith.constant 0 : index
    %0 = vector.load %arg2[%c0, %c0_0] : memref<16x128xbf16, #tpu.memory_space<vmem>>, vector<16x128xbf16>
    %c0_1 = arith.constant 0 : index
    %c0_2 = arith.constant 0 : index
    %1 = vector.load %arg3[%c0_1, %c0_2] : memref<128x512xbf16, #tpu.memory_space<vmem>>, vector<128x512xbf16>
    %cst = arith.constant dense<0.000000e+00> : vector<16x512xf32>
    %2 = tpu.matmul %0, %1, %cst {dimension_numbers = #tpu.dot_dimension_numbers<[1], [0], [0], [1], [0, 0, 1, 1], [], []>} : vector<16x128xbf16>, vector<128x512xbf16>, vector<16x512xf32> -> vector<16x512xf32>
    %c0_3 = arith.constant 0 : index
    %c0_4 = arith.constant 0 : index
    %3 = vector.load %arg4[%c0_3, %c0_4] : memref<1x512xf32, #tpu.memory_space<vmem>>, vector<1x512xf32>
    %4 = vector.broadcast %3 : vector<1x512xf32> to vector<16x512xf32>
    %5 = arith.mulf %2, %4 : vector<16x512xf32>
    %c0_5 = arith.constant 0 : index
    %c0_6 = arith.constant 0 : index
    %6 = vector.load %arg5[%c0_5, %c0_6] : memref<1x512xf32, #tpu.memory_space<vmem>>, vector<1x512xf32>
    %7 = vector.broadcast %6 : vector<1x512xf32> to vector<16x512xf32>
    %8 = arith.addf %5, %7 : vector<16x512xf32>
    %cst_7 = arith.constant 0.000000e+00 : f32
    %9 = vector.broadcast %cst_7 : f32 to vector<16x512xf32>
    %10 = arith.maximumf %8, %9 : vector<16x512xf32>
    %11 = arith.truncf %10 : vector<16x512xf32> to vector<16x512xbf16>
    %c0_8 = arith.constant 0 : index
    %c0_9 = arith.constant 0 : index
    %12 = vector.load %arg6[%c0_8, %c0_9] : memref<16x512xbf16, #tpu.memory_space<vmem>>, vector<16x512xbf16>
    tpu.vector_store %arg6[%c0_8, %c0_9], %11 {strides = array<i32>} : memref<16x512xbf16, #tpu.memory_space<vmem>>, vector<16x512xbf16>,
    return
  }
  func.func @transform_0(%arg0: i32, %arg1: i32) -> (i32, i32) {
    %c0_i32 = arith.constant 0 : i32
    %c0_i32_0 = arith.constant 0 : i32
    return %arg0, %c0_i32 : i32, i32
  }
  func.func @transform_1(%arg0: i32, %arg1: i32) -> (i32, i32) {
    %c0_i32 = arith.constant 0 : i32
    %c0_i32_0 = arith.constant 0 : i32
    return %c0_i32, %arg1 : i32, i32
  }
  func.func @transform_2(%arg0: i32, %arg1: i32) -> (i32, i32) {
    %c0_i32 = arith.constant 0 : i32
    %c0_i32_0 = arith.constant 0 : i32
    return %c0_i32, %arg1 : i32, i32
  }
  func.func @transform_3(%arg0: i32, %arg1: i32) -> (i32, i32) {
    %c0_i32 = arith.constant 0 : i32
    %c0_i32_0 = arith.constant 0 : i32
    return %c0_i32, %arg1 : i32, i32
  }
  func.func @transform_4(%arg0: i32, %arg1: i32) -> (i32, i32) {
    %c0_i32 = arith.constant 0 : i32
    return %arg0, %arg1 : i32, i32
  }
}

module attributes {stable_mosaic.version = 11 : i64} {
  func.func @_mm9_stats_kernel(%arg0: i32, %arg1: memref<9x128x128xbf16, #tpu.memory_space<vmem>>, %arg2: memref<16x128x128xbf16, #tpu.memory_space<vmem>>, %arg3: memref<128x512xbf16, #tpu.memory_space<vmem>>, %arg4: memref<8x512xf32, #tpu.memory_space<vmem>>, %arg5: memref<8x512xf32, #tpu.memory_space<vmem>>) attributes {dimension_semantics = [#tpu.dimension_semantics<parallel>], iteration_bounds = array<i64: 1>, scalar_prefetch = 0 : i64, scratch_operands = 0 : i64, tpu.core_type = #tpu.core_type<tc>, window_params = [{transform_indices = @transform_0, window_bounds = array<i64: 9, 128, 128>}, {pipeline_mode = #tpu.pipeline_mode<synchronous>, transform_indices = @transform_1, window_bounds = array<i64: 16, 128, 128>}, {transform_indices = @transform_2, window_bounds = array<i64: 128, 512>}, {transform_indices = @transform_3, window_bounds = array<i64: 8, 512>}, {transform_indices = @transform_4, window_bounds = array<i64: 8, 512>}]} {
    %cst = arith.constant 0.000000e+00 : f32
    %0 = vector.broadcast %cst : f32 to vector<128x128xf32>
    %c0 = arith.constant 0 : index
    %c0_0 = arith.constant 0 : index
    %c0_1 = arith.constant 0 : index
    %1 = vector.load %arg1[%c0, %c0_0, %c0_1] : memref<9x128x128xbf16, #tpu.memory_space<vmem>>, vector<1x128x128xbf16>
    %2 = vector.shape_cast %1 : vector<1x128x128xbf16> to vector<128x128xbf16>
    %c0_2 = arith.constant 0 : index
    %c0_3 = arith.constant 0 : index
    %c0_4 = arith.constant 0 : index
    %3 = vector.load %arg2[%c0_2, %c0_3, %c0_4] : memref<16x128x128xbf16, #tpu.memory_space<vmem>>, vector<1x128x128xbf16>
    %4 = vector.shape_cast %3 : vector<1x128x128xbf16> to vector<128x128xbf16>
    %cst_5 = arith.constant dense<0.000000e+00> : vector<128x128xf32>
    %5 = tpu.matmul %2, %4, %cst_5 {dimension_numbers = #tpu.dot_dimension_numbers<[1], [0], [0], [1], [0, 0, 1, 1], [], []>} : vector<128x128xbf16>, vector<128x128xbf16>, vector<128x128xf32> -> vector<128x128xf32>
    %6 = arith.addf %0, %5 : vector<128x128xf32>
    %c1 = arith.constant 1 : index
    %c0_6 = arith.constant 0 : index
    %c0_7 = arith.constant 0 : index
    %7 = vector.load %arg1[%c1, %c0_6, %c0_7] : memref<9x128x128xbf16, #tpu.memory_space<vmem>>, vector<1x128x128xbf16>
    %8 = vector.shape_cast %7 : vector<1x128x128xbf16> to vector<128x128xbf16>
    %c1_8 = arith.constant 1 : index
    %c0_9 = arith.constant 0 : index
    %c0_10 = arith.constant 0 : index
    %9 = vector.load %arg2[%c1_8, %c0_9, %c0_10] : memref<16x128x128xbf16, #tpu.memory_space<vmem>>, vector<1x128x128xbf16>
    %10 = vector.shape_cast %9 : vector<1x128x128xbf16> to vector<128x128xbf16>
    %cst_11 = arith.constant dense<0.000000e+00> : vector<128x128xf32>
    %11 = tpu.matmul %8, %10, %cst_11 {dimension_numbers = #tpu.dot_dimension_numbers<[1], [0], [0], [1], [0, 0, 1, 1], [], []>} : vector<128x128xbf16>, vector<128x128xbf16>, vector<128x128xf32> -> vector<128x128xf32>
    %12 = arith.addf %6, %11 : vector<128x128xf32>
    %c3 = arith.constant 3 : index
    %c0_12 = arith.constant 0 : index
    %c0_13 = arith.constant 0 : index
    %13 = vector.load %arg1[%c3, %c0_12, %c0_13] : memref<9x128x128xbf16, #tpu.memory_space<vmem>>, vector<1x128x128xbf16>
    %14 = vector.shape_cast %13 : vector<1x128x128xbf16> to vector<128x128xbf16>
    %c2 = arith.constant 2 : index
    %c0_14 = arith.constant 0 : index
    %c0_15 = arith.constant 0 : index
    %15 = vector.load %arg2[%c2, %c0_14, %c0_15] : memref<16x128x128xbf16, #tpu.memory_space<vmem>>, vector<1x128x128xbf16>
    %16 = vector.shape_cast %15 : vector<1x128x128xbf16> to vector<128x128xbf16>
    %cst_16 = arith.constant dense<0.000000e+00> : vector<128x128xf32>
    %17 = tpu.matmul %14, %16, %cst_16 {dimension_numbers = #tpu.dot_dimension_numbers<[1], [0], [0], [1], [0, 0, 1, 1], [], []>} : vector<128x128xbf16>, vector<128x128xbf16>, vector<128x128xf32> -> vector<128x128xf32>
    %18 = arith.addf %12, %17 : vector<128x128xf32>
    %c4 = arith.constant 4 : index
    %c0_17 = arith.constant 0 : index
    %c0_18 = arith.constant 0 : index
    %19 = vector.load %arg1[%c4, %c0_17, %c0_18] : memref<9x128x128xbf16, #tpu.memory_space<vmem>>, vector<1x128x128xbf16>
    %20 = vector.shape_cast %19 : vector<1x128x128xbf16> to vector<128x128xbf16>
    %c3_19 = arith.constant 3 : index
    %c0_20 = arith.constant 0 : index
    %c0_21 = arith.constant 0 : index
    %21 = vector.load %arg2[%c3_19, %c0_20, %c0_21] : memref<16x128x128xbf16, #tpu.memory_space<vmem>>, vector<1x128x128xbf16>
    %22 = vector.shape_cast %21 : vector<1x128x128xbf16> to vector<128x128xbf16>
    %cst_22 = arith.constant dense<0.000000e+00> : vector<128x128xf32>
    %23 = tpu.matmul %20, %22, %cst_22 {dimension_numbers = #tpu.dot_dimension_numbers<[1], [0], [0], [1], [0, 0, 1, 1], [], []>} : vector<128x128xbf16>, vector<128x128xbf16>, vector<128x128xf32> -> vector<128x128xf32>
    %24 = arith.addf %18, %23 : vector<128x128xf32>
    %25 = arith.truncf %24 : vector<128x128xf32> to vector<128x128xbf16>
    %c0_23 = arith.constant 0 : index
    %c0_24 = arith.constant 0 : index
    %26 = vector.load %arg3[%c0_23, %c0_24] : memref<128x512xbf16, #tpu.memory_space<vmem>>, vector<128x128xbf16>
    tpu.vector_store %arg3[%c0_23, %c0_24], %25 {strides = array<i32>} : memref<128x512xbf16, #tpu.memory_space<vmem>>, vector<128x128xbf16>,
    %cst_25 = arith.constant dense<0.000000e+00> : vector<128xf32>
    %27 = vector.multi_reduction <add>, %24, %cst_25 [0] : vector<128x128xf32> to vector<128xf32>
    %28 = vector.shape_cast %27 : vector<128xf32> to vector<1x128xf32>
    %29 = vector.shape_cast %28 : vector<1x128xf32> to vector<1x128xf32>
    %30 = vector.broadcast %29 : vector<1x128xf32> to vector<8x128xf32>
    %c0_26 = arith.constant 0 : index
    %c0_27 = arith.constant 0 : index
    %31 = vector.load %arg4[%c0_26, %c0_27] : memref<8x512xf32, #tpu.memory_space<vmem>>, vector<8x128xf32>
    tpu.vector_store %arg4[%c0_26, %c0_27], %30 {strides = array<i32>} : memref<8x512xf32, #tpu.memory_space<vmem>>, vector<8x128xf32>,
    %32 = arith.mulf %24, %24 : vector<128x128xf32>
    %cst_28 = arith.constant dense<0.000000e+00> : vector<128xf32>
    %33 = vector.multi_reduction <add>, %32, %cst_28 [0] : vector<128x128xf32> to vector<128xf32>
    %34 = vector.shape_cast %33 : vector<128xf32> to vector<1x128xf32>
    %35 = vector.shape_cast %34 : vector<1x128xf32> to vector<1x128xf32>
    %36 = vector.broadcast %35 : vector<1x128xf32> to vector<8x128xf32>
    %c0_29 = arith.constant 0 : index
    %c0_30 = arith.constant 0 : index
    %37 = vector.load %arg5[%c0_29, %c0_30] : memref<8x512xf32, #tpu.memory_space<vmem>>, vector<8x128xf32>
    tpu.vector_store %arg5[%c0_29, %c0_30], %36 {strides = array<i32>} : memref<8x512xf32, #tpu.memory_space<vmem>>, vector<8x128xf32>,
    %cst_31 = arith.constant 0.000000e+00 : f32
    %38 = vector.broadcast %cst_31 : f32 to vector<128x128xf32>
    %c1_32 = arith.constant 1 : index
    %c0_33 = arith.constant 0 : index
    %c0_34 = arith.constant 0 : index
    %39 = vector.load %arg1[%c1_32, %c0_33, %c0_34] : memref<9x128x128xbf16, #tpu.memory_space<vmem>>, vector<1x128x128xbf16>
    %40 = vector.shape_cast %39 : vector<1x128x128xbf16> to vector<128x128xbf16>
    %c4_35 = arith.constant 4 : index
    %c0_36 = arith.constant 0 : index
    %c0_37 = arith.constant 0 : index
    %41 = vector.load %arg2[%c4_35, %c0_36, %c0_37] : memref<16x128x128xbf16, #tpu.memory_space<vmem>>, vector<1x128x128xbf16>
    %42 = vector.shape_cast %41 : vector<1x128x128xbf16> to vector<128x128xbf16>
    %cst_38 = arith.constant dense<0.000000e+00> : vector<128x128xf32>
    %43 = tpu.matmul %40, %42, %cst_38 {dimension_numbers = #tpu.dot_dimension_numbers<[1], [0], [0], [1], [0, 0, 1, 1], [], []>} : vector<128x128xbf16>, vector<128x128xbf16>, vector<128x128xf32> -> vector<128x128xf32>
    %44 = arith.addf %38, %43 : vector<128x128xf32>
    %c2_39 = arith.constant 2 : index
    %c0_40 = arith.constant 0 : index
    %c0_41 = arith.constant 0 : index
    %45 = vector.load %arg1[%c2_39, %c0_40, %c0_41] : memref<9x128x128xbf16, #tpu.memory_space<vmem>>, vector<1x128x128xbf16>
    %46 = vector.shape_cast %45 : vector<1x128x128xbf16> to vector<128x128xbf16>
    %c5 = arith.constant 5 : index
    %c0_42 = arith.constant 0 : index
    %c0_43 = arith.constant 0 : index
    %47 = vector.load %arg2[%c5, %c0_42, %c0_43] : memref<16x128x128xbf16, #tpu.memory_space<vmem>>, vector<1x128x128xbf16>
    %48 = vector.shape_cast %47 : vector<1x128x128xbf16> to vector<128x128xbf16>
    %cst_44 = arith.constant dense<0.000000e+00> : vector<128x128xf32>
    %49 = tpu.matmul %46, %48, %cst_44 {dimension_numbers = #tpu.dot_dimension_numbers<[1], [0], [0], [1], [0, 0, 1, 1], [], []>} : vector<128x128xbf16>, vector<128x128xbf16>, vector<128x128xf32> -> vector<128x128xf32>
    %50 = arith.addf %44, %49 : vector<128x128xf32>
    %c4_45 = arith.constant 4 : index
    %c0_46 = arith.constant 0 : index
    %c0_47 = arith.constant 0 : index
    %51 = vector.load %arg1[%c4_45, %c0_46, %c0_47] : memref<9x128x128xbf16, #tpu.memory_space<vmem>>, vector<1x128x128xbf16>
    %52 = vector.shape_cast %51 : vector<1x128x128xbf16> to vector<128x128xbf16>
    %c6 = arith.constant 6 : index
    %c0_48 = arith.constant 0 : index
    %c0_49 = arith.constant 0 : index
    %53 = vector.load %arg2[%c6, %c0_48, %c0_49] : memref<16x128x128xbf16, #tpu.memory_space<vmem>>, vector<1x128x128xbf16>
    %54 = vector.shape_cast %53 : vector<1x128x128xbf16> to vector<128x128xbf16>
    %cst_50 = arith.constant dense<0.000000e+00> : vector<128x128xf32>
    %55 = tpu.matmul %52, %54, %cst_50 {dimension_numbers = #tpu.dot_dimension_numbers<[1], [0], [0], [1], [0, 0, 1, 1], [], []>} : vector<128x128xbf16>, vector<128x128xbf16>, vector<128x128xf32> -> vector<128x128xf32>
    %56 = arith.addf %50, %55 : vector<128x128xf32>
    %c5_51 = arith.constant 5 : index
    %c0_52 = arith.constant 0 : index
    %c0_53 = arith.constant 0 : index
    %57 = vector.load %arg1[%c5_51, %c0_52, %c0_53] : memref<9x128x128xbf16, #tpu.memory_space<vmem>>, vector<1x128x128xbf16>
    %58 = vector.shape_cast %57 : vector<1x128x128xbf16> to vector<128x128xbf16>
    %c7 = arith.constant 7 : index
    %c0_54 = arith.constant 0 : index
    %c0_55 = arith.constant 0 : index
    %59 = vector.load %arg2[%c7, %c0_54, %c0_55] : memref<16x128x128xbf16, #tpu.memory_space<vmem>>, vector<1x128x128xbf16>
    %60 = vector.shape_cast %59 : vector<1x128x128xbf16> to vector<128x128xbf16>
    %cst_56 = arith.constant dense<0.000000e+00> : vector<128x128xf32>
    %61 = tpu.matmul %58, %60, %cst_56 {dimension_numbers = #tpu.dot_dimension_numbers<[1], [0], [0], [1], [0, 0, 1, 1], [], []>} : vector<128x128xbf16>, vector<128x128xbf16>, vector<128x128xf32> -> vector<128x128xf32>
    %62 = arith.addf %56, %61 : vector<128x128xf32>
    %63 = arith.truncf %62 : vector<128x128xf32> to vector<128x128xbf16>
    %c0_57 = arith.constant 0 : index
    %c128 = arith.constant 128 : index
    %64 = vector.load %arg3[%c0_57, %c128] : memref<128x512xbf16, #tpu.memory_space<vmem>>, vector<128x128xbf16>
    tpu.vector_store %arg3[%c0_57, %c128], %63 {strides = array<i32>} : memref<128x512xbf16, #tpu.memory_space<vmem>>, vector<128x128xbf16>,
    %cst_58 = arith.constant dense<0.000000e+00> : vector<128xf32>
    %65 = vector.multi_reduction <add>, %62, %cst_58 [0] : vector<128x128xf32> to vector<128xf32>
    %66 = vector.shape_cast %65 : vector<128xf32> to vector<1x128xf32>
    %67 = vector.shape_cast %66 : vector<1x128xf32> to vector<1x128xf32>
    %68 = vector.broadcast %67 : vector<1x128xf32> to vector<8x128xf32>
    %c0_59 = arith.constant 0 : index
    %c128_60 = arith.constant 128 : index
    %69 = vector.load %arg4[%c0_59, %c128_60] : memref<8x512xf32, #tpu.memory_space<vmem>>, vector<8x128xf32>
    tpu.vector_store %arg4[%c0_59, %c128_60], %68 {strides = array<i32>} : memref<8x512xf32, #tpu.memory_space<vmem>>, vector<8x128xf32>,
    %70 = arith.mulf %62, %62 : vector<128x128xf32>
    %cst_61 = arith.constant dense<0.000000e+00> : vector<128xf32>
    %71 = vector.multi_reduction <add>, %70, %cst_61 [0] : vector<128x128xf32> to vector<128xf32>
    %72 = vector.shape_cast %71 : vector<128xf32> to vector<1x128xf32>
    %73 = vector.shape_cast %72 : vector<1x128xf32> to vector<1x128xf32>
    %74 = vector.broadcast %73 : vector<1x128xf32> to vector<8x128xf32>
    %c0_62 = arith.constant 0 : index
    %c128_63 = arith.constant 128 : index
    %75 = vector.load %arg5[%c0_62, %c128_63] : memref<8x512xf32, #tpu.memory_space<vmem>>, vector<8x128xf32>
    tpu.vector_store %arg5[%c0_62, %c128_63], %74 {strides = array<i32>} : memref<8x512xf32, #tpu.memory_space<vmem>>, vector<8x128xf32>,
    %cst_64 = arith.constant 0.000000e+00 : f32
    %76 = vector.broadcast %cst_64 : f32 to vector<128x128xf32>
    %c3_65 = arith.constant 3 : index
    %c0_66 = arith.constant 0 : index
    %c0_67 = arith.constant 0 : index
    %77 = vector.load %arg1[%c3_65, %c0_66, %c0_67] : memref<9x128x128xbf16, #tpu.memory_space<vmem>>, vector<1x128x128xbf16>
    %78 = vector.shape_cast %77 : vector<1x128x128xbf16> to vector<128x128xbf16>
    %c8 = arith.constant 8 : index
    %c0_68 = arith.constant 0 : index
    %c0_69 = arith.constant 0 : index
    %79 = vector.load %arg2[%c8, %c0_68, %c0_69] : memref<16x128x128xbf16, #tpu.memory_space<vmem>>, vector<1x128x128xbf16>
    %80 = vector.shape_cast %79 : vector<1x128x128xbf16> to vector<128x128xbf16>
    %cst_70 = arith.constant dense<0.000000e+00> : vector<128x128xf32>
    %81 = tpu.matmul %78, %80, %cst_70 {dimension_numbers = #tpu.dot_dimension_numbers<[1], [0], [0], [1], [0, 0, 1, 1], [], []>} : vector<128x128xbf16>, vector<128x128xbf16>, vector<128x128xf32> -> vector<128x128xf32>
    %82 = arith.addf %76, %81 : vector<128x128xf32>
    %c4_71 = arith.constant 4 : index
    %c0_72 = arith.constant 0 : index
    %c0_73 = arith.constant 0 : index
    %83 = vector.load %arg1[%c4_71, %c0_72, %c0_73] : memref<9x128x128xbf16, #tpu.memory_space<vmem>>, vector<1x128x128xbf16>
    %84 = vector.shape_cast %83 : vector<1x128x128xbf16> to vector<128x128xbf16>
    %c9 = arith.constant 9 : index
    %c0_74 = arith.constant 0 : index
    %c0_75 = arith.constant 0 : index
    %85 = vector.load %arg2[%c9, %c0_74, %c0_75] : memref<16x128x128xbf16, #tpu.memory_space<vmem>>, vector<1x128x128xbf16>
    %86 = vector.shape_cast %85 : vector<1x128x128xbf16> to vector<128x128xbf16>
    %cst_76 = arith.constant dense<0.000000e+00> : vector<128x128xf32>
    %87 = tpu.matmul %84, %86, %cst_76 {dimension_numbers = #tpu.dot_dimension_numbers<[1], [0], [0], [1], [0, 0, 1, 1], [], []>} : vector<128x128xbf16>, vector<128x128xbf16>, vector<128x128xf32> -> vector<128x128xf32>
    %88 = arith.addf %82, %87 : vector<128x128xf32>
    %c6_77 = arith.constant 6 : index
    %c0_78 = arith.constant 0 : index
    %c0_79 = arith.constant 0 : index
    %89 = vector.load %arg1[%c6_77, %c0_78, %c0_79] : memref<9x128x128xbf16, #tpu.memory_space<vmem>>, vector<1x128x128xbf16>
    %90 = vector.shape_cast %89 : vector<1x128x128xbf16> to vector<128x128xbf16>
    %c10 = arith.constant 10 : index
    %c0_80 = arith.constant 0 : index
    %c0_81 = arith.constant 0 : index
    %91 = vector.load %arg2[%c10, %c0_80, %c0_81] : memref<16x128x128xbf16, #tpu.memory_space<vmem>>, vector<1x128x128xbf16>
    %92 = vector.shape_cast %91 : vector<1x128x128xbf16> to vector<128x128xbf16>
    %cst_82 = arith.constant dense<0.000000e+00> : vector<128x128xf32>
    %93 = tpu.matmul %90, %92, %cst_82 {dimension_numbers = #tpu.dot_dimension_numbers<[1], [0], [0], [1], [0, 0, 1, 1], [], []>} : vector<128x128xbf16>, vector<128x128xbf16>, vector<128x128xf32> -> vector<128x128xf32>
    %94 = arith.addf %88, %93 : vector<128x128xf32>
    %c7_83 = arith.constant 7 : index
    %c0_84 = arith.constant 0 : index
    %c0_85 = arith.constant 0 : index
    %95 = vector.load %arg1[%c7_83, %c0_84, %c0_85] : memref<9x128x128xbf16, #tpu.memory_space<vmem>>, vector<1x128x128xbf16>
    %96 = vector.shape_cast %95 : vector<1x128x128xbf16> to vector<128x128xbf16>
    %c11 = arith.constant 11 : index
    %c0_86 = arith.constant 0 : index
    %c0_87 = arith.constant 0 : index
    %97 = vector.load %arg2[%c11, %c0_86, %c0_87] : memref<16x128x128xbf16, #tpu.memory_space<vmem>>, vector<1x128x128xbf16>
    %98 = vector.shape_cast %97 : vector<1x128x128xbf16> to vector<128x128xbf16>
    %cst_88 = arith.constant dense<0.000000e+00> : vector<128x128xf32>
    %99 = tpu.matmul %96, %98, %cst_88 {dimension_numbers = #tpu.dot_dimension_numbers<[1], [0], [0], [1], [0, 0, 1, 1], [], []>} : vector<128x128xbf16>, vector<128x128xbf16>, vector<128x128xf32> -> vector<128x128xf32>
    %100 = arith.addf %94, %99 : vector<128x128xf32>
    %101 = arith.truncf %100 : vector<128x128xf32> to vector<128x128xbf16>
    %c0_89 = arith.constant 0 : index
    %c256 = arith.constant 256 : index
    %102 = vector.load %arg3[%c0_89, %c256] : memref<128x512xbf16, #tpu.memory_space<vmem>>, vector<128x128xbf16>
    tpu.vector_store %arg3[%c0_89, %c256], %101 {strides = array<i32>} : memref<128x512xbf16, #tpu.memory_space<vmem>>, vector<128x128xbf16>,
    %cst_90 = arith.constant dense<0.000000e+00> : vector<128xf32>
    %103 = vector.multi_reduction <add>, %100, %cst_90 [0] : vector<128x128xf32> to vector<128xf32>
    %104 = vector.shape_cast %103 : vector<128xf32> to vector<1x128xf32>
    %105 = vector.shape_cast %104 : vector<1x128xf32> to vector<1x128xf32>
    %106 = vector.broadcast %105 : vector<1x128xf32> to vector<8x128xf32>
    %c0_91 = arith.constant 0 : index
    %c256_92 = arith.constant 256 : index
    %107 = vector.load %arg4[%c0_91, %c256_92] : memref<8x512xf32, #tpu.memory_space<vmem>>, vector<8x128xf32>
    tpu.vector_store %arg4[%c0_91, %c256_92], %106 {strides = array<i32>} : memref<8x512xf32, #tpu.memory_space<vmem>>, vector<8x128xf32>,
    %108 = arith.mulf %100, %100 : vector<128x128xf32>
    %cst_93 = arith.constant dense<0.000000e+00> : vector<128xf32>
    %109 = vector.multi_reduction <add>, %108, %cst_93 [0] : vector<128x128xf32> to vector<128xf32>
    %110 = vector.shape_cast %109 : vector<128xf32> to vector<1x128xf32>
    %111 = vector.shape_cast %110 : vector<1x128xf32> to vector<1x128xf32>
    %112 = vector.broadcast %111 : vector<1x128xf32> to vector<8x128xf32>
    %c0_94 = arith.constant 0 : index
    %c256_95 = arith.constant 256 : index
    %113 = vector.load %arg5[%c0_94, %c256_95] : memref<8x512xf32, #tpu.memory_space<vmem>>, vector<8x128xf32>
    tpu.vector_store %arg5[%c0_94, %c256_95], %112 {strides = array<i32>} : memref<8x512xf32, #tpu.memory_space<vmem>>, vector<8x128xf32>,
    %cst_96 = arith.constant 0.000000e+00 : f32
    %114 = vector.broadcast %cst_96 : f32 to vector<128x128xf32>
    %c4_97 = arith.constant 4 : index
    %c0_98 = arith.constant 0 : index
    %c0_99 = arith.constant 0 : index
    %115 = vector.load %arg1[%c4_97, %c0_98, %c0_99] : memref<9x128x128xbf16, #tpu.memory_space<vmem>>, vector<1x128x128xbf16>
    %116 = vector.shape_cast %115 : vector<1x128x128xbf16> to vector<128x128xbf16>
    %c12 = arith.constant 12 : index
    %c0_100 = arith.constant 0 : index
    %c0_101 = arith.constant 0 : index
    %117 = vector.load %arg2[%c12, %c0_100, %c0_101] : memref<16x128x128xbf16, #tpu.memory_space<vmem>>, vector<1x128x128xbf16>
    %118 = vector.shape_cast %117 : vector<1x128x128xbf16> to vector<128x128xbf16>
    %cst_102 = arith.constant dense<0.000000e+00> : vector<128x128xf32>
    %119 = tpu.matmul %116, %118, %cst_102 {dimension_numbers = #tpu.dot_dimension_numbers<[1], [0], [0], [1], [0, 0, 1, 1], [], []>} : vector<128x128xbf16>, vector<128x128xbf16>, vector<128x128xf32> -> vector<128x128xf32>
    %120 = arith.addf %114, %119 : vector<128x128xf32>
    %c5_103 = arith.constant 5 : index
    %c0_104 = arith.constant 0 : index
    %c0_105 = arith.constant 0 : index
    %121 = vector.load %arg1[%c5_103, %c0_104, %c0_105] : memref<9x128x128xbf16, #tpu.memory_space<vmem>>, vector<1x128x128xbf16>
    %122 = vector.shape_cast %121 : vector<1x128x128xbf16> to vector<128x128xbf16>
    %c13 = arith.constant 13 : index
    %c0_106 = arith.constant 0 : index
    %c0_107 = arith.constant 0 : index
    %123 = vector.load %arg2[%c13, %c0_106, %c0_107] : memref<16x128x128xbf16, #tpu.memory_space<vmem>>, vector<1x128x128xbf16>
    %124 = vector.shape_cast %123 : vector<1x128x128xbf16> to vector<128x128xbf16>
    %cst_108 = arith.constant dense<0.000000e+00> : vector<128x128xf32>
    %125 = tpu.matmul %122, %124, %cst_108 {dimension_numbers = #tpu.dot_dimension_numbers<[1], [0], [0], [1], [0, 0, 1, 1], [], []>} : vector<128x128xbf16>, vector<128x128xbf16>, vector<128x128xf32> -> vector<128x128xf32>
    %126 = arith.addf %120, %125 : vector<128x128xf32>
    %c7_109 = arith.constant 7 : index
    %c0_110 = arith.constant 0 : index
    %c0_111 = arith.constant 0 : index
    %127 = vector.load %arg1[%c7_109, %c0_110, %c0_111] : memref<9x128x128xbf16, #tpu.memory_space<vmem>>, vector<1x128x128xbf16>
    %128 = vector.shape_cast %127 : vector<1x128x128xbf16> to vector<128x128xbf16>
    %c14 = arith.constant 14 : index
    %c0_112 = arith.constant 0 : index
    %c0_113 = arith.constant 0 : index
    %129 = vector.load %arg2[%c14, %c0_112, %c0_113] : memref<16x128x128xbf16, #tpu.memory_space<vmem>>, vector<1x128x128xbf16>
    %130 = vector.shape_cast %129 : vector<1x128x128xbf16> to vector<128x128xbf16>
    %cst_114 = arith.constant dense<0.000000e+00> : vector<128x128xf32>
    %131 = tpu.matmul %128, %130, %cst_114 {dimension_numbers = #tpu.dot_dimension_numbers<[1], [0], [0], [1], [0, 0, 1, 1], [], []>} : vector<128x128xbf16>, vector<128x128xbf16>, vector<128x128xf32> -> vector<128x128xf32>
    %132 = arith.addf %126, %131 : vector<128x128xf32>
    %c8_115 = arith.constant 8 : index
    %c0_116 = arith.constant 0 : index
    %c0_117 = arith.constant 0 : index
    %133 = vector.load %arg1[%c8_115, %c0_116, %c0_117] : memref<9x128x128xbf16, #tpu.memory_space<vmem>>, vector<1x128x128xbf16>
    %134 = vector.shape_cast %133 : vector<1x128x128xbf16> to vector<128x128xbf16>
    %c15 = arith.constant 15 : index
    %c0_118 = arith.constant 0 : index
    %c0_119 = arith.constant 0 : index
    %135 = vector.load %arg2[%c15, %c0_118, %c0_119] : memref<16x128x128xbf16, #tpu.memory_space<vmem>>, vector<1x128x128xbf16>
    %136 = vector.shape_cast %135 : vector<1x128x128xbf16> to vector<128x128xbf16>
    %cst_120 = arith.constant dense<0.000000e+00> : vector<128x128xf32>
    %137 = tpu.matmul %134, %136, %cst_120 {dimension_numbers = #tpu.dot_dimension_numbers<[1], [0], [0], [1], [0, 0, 1, 1], [], []>} : vector<128x128xbf16>, vector<128x128xbf16>, vector<128x128xf32> -> vector<128x128xf32>
    %138 = arith.addf %132, %137 : vector<128x128xf32>
    %139 = arith.truncf %138 : vector<128x128xf32> to vector<128x128xbf16>
    %c0_121 = arith.constant 0 : index
    %c384 = arith.constant 384 : index
    %140 = vector.load %arg3[%c0_121, %c384] : memref<128x512xbf16, #tpu.memory_space<vmem>>, vector<128x128xbf16>
    tpu.vector_store %arg3[%c0_121, %c384], %139 {strides = array<i32>} : memref<128x512xbf16, #tpu.memory_space<vmem>>, vector<128x128xbf16>,
    %cst_122 = arith.constant dense<0.000000e+00> : vector<128xf32>
    %141 = vector.multi_reduction <add>, %138, %cst_122 [0] : vector<128x128xf32> to vector<128xf32>
    %142 = vector.shape_cast %141 : vector<128xf32> to vector<1x128xf32>
    %143 = vector.shape_cast %142 : vector<1x128xf32> to vector<1x128xf32>
    %144 = vector.broadcast %143 : vector<1x128xf32> to vector<8x128xf32>
    %c0_123 = arith.constant 0 : index
    %c384_124 = arith.constant 384 : index
    %145 = vector.load %arg4[%c0_123, %c384_124] : memref<8x512xf32, #tpu.memory_space<vmem>>, vector<8x128xf32>
    tpu.vector_store %arg4[%c0_123, %c384_124], %144 {strides = array<i32>} : memref<8x512xf32, #tpu.memory_space<vmem>>, vector<8x128xf32>,
    %146 = arith.mulf %138, %138 : vector<128x128xf32>
    %cst_125 = arith.constant dense<0.000000e+00> : vector<128xf32>
    %147 = vector.multi_reduction <add>, %146, %cst_125 [0] : vector<128x128xf32> to vector<128xf32>
    %148 = vector.shape_cast %147 : vector<128xf32> to vector<1x128xf32>
    %149 = vector.shape_cast %148 : vector<1x128xf32> to vector<1x128xf32>
    %150 = vector.broadcast %149 : vector<1x128xf32> to vector<8x128xf32>
    %c0_126 = arith.constant 0 : index
    %c384_127 = arith.constant 384 : index
    %151 = vector.load %arg5[%c0_126, %c384_127] : memref<8x512xf32, #tpu.memory_space<vmem>>, vector<8x128xf32>
    tpu.vector_store %arg5[%c0_126, %c384_127], %150 {strides = array<i32>} : memref<8x512xf32, #tpu.memory_space<vmem>>, vector<8x128xf32>,
    return
  }
  func.func @transform_0(%arg0: i32) -> (i32, i32, i32) {
    %c0_i32 = arith.constant 0 : i32
    %c0_i32_0 = arith.constant 0 : i32
    %c0_i32_1 = arith.constant 0 : i32
    return %c0_i32, %arg0, %c0_i32_0 : i32, i32, i32
  }
  func.func @transform_1(%arg0: i32) -> (i32, i32, i32) {
    %c0_i32 = arith.constant 0 : i32
    %c0_i32_0 = arith.constant 0 : i32
    %c0_i32_1 = arith.constant 0 : i32
    %c0_i32_2 = arith.constant 0 : i32
    return %c0_i32, %c0_i32_0, %c0_i32_1 : i32, i32, i32
  }
  func.func @transform_2(%arg0: i32) -> (i32, i32) {
    %c0_i32 = arith.constant 0 : i32
    %c0_i32_0 = arith.constant 0 : i32
    return %arg0, %c0_i32 : i32, i32
  }
  func.func @transform_3(%arg0: i32) -> (i32, i32) {
    %c0_i32 = arith.constant 0 : i32
    %c0_i32_0 = arith.constant 0 : i32
    return %arg0, %c0_i32 : i32, i32
  }
  func.func @transform_4(%arg0: i32) -> (i32, i32) {
    %c0_i32 = arith.constant 0 : i32
    %c0_i32_0 = arith.constant 0 : i32
    return %arg0, %c0_i32 : i32, i32
  }
}

module attributes {stable_mosaic.version = 11 : i64} {
  func.func @_scale_relu_kernel(%arg0: i32, %arg1: i32, %arg2: memref<128x512xbf16, #tpu.memory_space<vmem>>, %arg3: memref<1x512xf32, #tpu.memory_space<vmem>>, %arg4: memref<1x512xf32, #tpu.memory_space<vmem>>, %arg5: memref<128x512xbf16, #tpu.memory_space<vmem>>) attributes {dimension_semantics = [#tpu.dimension_semantics<parallel>, #tpu.dimension_semantics<parallel>], iteration_bounds = array<i64: 1, 1>, scalar_prefetch = 0 : i64, scratch_operands = 0 : i64, tpu.core_type = #tpu.core_type<tc>, window_params = [{transform_indices = @transform_0, window_bounds = array<i64: 128, 512>}, {transform_indices = @transform_1, window_bounds = array<i64: 1, 512>}, {transform_indices = @transform_2, window_bounds = array<i64: 1, 512>}, {transform_indices = @transform_3, window_bounds = array<i64: 128, 512>}]} {
    %c0 = arith.constant 0 : index
    %c0_0 = arith.constant 0 : index
    %0 = vector.load %arg2[%c0, %c0_0] : memref<128x512xbf16, #tpu.memory_space<vmem>>, vector<128x512xbf16>
    %1 = arith.extf %0 : vector<128x512xbf16> to vector<128x512xf32>
    %c0_1 = arith.constant 0 : index
    %c0_2 = arith.constant 0 : index
    %2 = vector.load %arg3[%c0_1, %c0_2] : memref<1x512xf32, #tpu.memory_space<vmem>>, vector<1x512xf32>
    %3 = vector.broadcast %2 : vector<1x512xf32> to vector<128x512xf32>
    %4 = arith.mulf %1, %3 : vector<128x512xf32>
    %c0_3 = arith.constant 0 : index
    %c0_4 = arith.constant 0 : index
    %5 = vector.load %arg4[%c0_3, %c0_4] : memref<1x512xf32, #tpu.memory_space<vmem>>, vector<1x512xf32>
    %6 = vector.broadcast %5 : vector<1x512xf32> to vector<128x512xf32>
    %7 = arith.addf %4, %6 : vector<128x512xf32>
    %cst = arith.constant 0.000000e+00 : f32
    %8 = vector.broadcast %cst : f32 to vector<128x512xf32>
    %9 = arith.maximumf %7, %8 : vector<128x512xf32>
    %10 = arith.truncf %9 : vector<128x512xf32> to vector<128x512xbf16>
    %c0_5 = arith.constant 0 : index
    %c0_6 = arith.constant 0 : index
    %11 = vector.load %arg5[%c0_5, %c0_6] : memref<128x512xbf16, #tpu.memory_space<vmem>>, vector<128x512xbf16>
    tpu.vector_store %arg5[%c0_5, %c0_6], %10 {strides = array<i32>} : memref<128x512xbf16, #tpu.memory_space<vmem>>, vector<128x512xbf16>,
    return
  }
  func.func @transform_0(%arg0: i32, %arg1: i32) -> (i32, i32) {
    %c0_i32 = arith.constant 0 : i32
    return %arg0, %arg1 : i32, i32
  }
  func.func @transform_1(%arg0: i32, %arg1: i32) -> (i32, i32) {
    %c0_i32 = arith.constant 0 : i32
    %c0_i32_0 = arith.constant 0 : i32
    return %c0_i32, %arg1 : i32, i32
  }
  func.func @transform_2(%arg0: i32, %arg1: i32) -> (i32, i32) {
    %c0_i32 = arith.constant 0 : i32
    %c0_i32_0 = arith.constant 0 : i32
    return %c0_i32, %arg1 : i32, i32
  }
  func.func @transform_3(%arg0: i32, %arg1: i32) -> (i32, i32) {
    %c0_i32 = arith.constant 0 : i32
    return %arg0, %arg1 : i32, i32
  }
}

module attributes {stable_mosaic.version = 11 : i64} {
  func.func @_mmT_tanh_kernel(%arg0: i32, %arg1: memref<9x128x512xbf16, #tpu.memory_space<vmem>>, %arg2: memref<16x8x128xbf16, #tpu.memory_space<vmem>>, %arg3: memref<32x512xf32, #tpu.memory_space<vmem>>) attributes {dimension_semantics = [#tpu.dimension_semantics<parallel>], iteration_bounds = array<i64: 1>, scalar_prefetch = 0 : i64, scratch_operands = 0 : i64, tpu.core_type = #tpu.core_type<tc>, window_params = [{transform_indices = @transform_0, window_bounds = array<i64: 9, 128, 512>}, {pipeline_mode = #tpu.pipeline_mode<synchronous>, transform_indices = @transform_1, window_bounds = array<i64: 16, 8, 128>}, {transform_indices = @transform_2, window_bounds = array<i64: 32, 512>}]} {
    %cst = arith.constant 0.000000e+00 : f32
    %0 = vector.broadcast %cst : f32 to vector<8x512xf32>
    %c0 = arith.constant 0 : index
    %c0_0 = arith.constant 0 : index
    %c0_1 = arith.constant 0 : index
    %1 = vector.load %arg2[%c0, %c0_0, %c0_1] : memref<16x8x128xbf16, #tpu.memory_space<vmem>>, vector<1x8x128xbf16>
    %2 = vector.shape_cast %1 : vector<1x8x128xbf16> to vector<8x128xbf16>
    %c0_2 = arith.constant 0 : index
    %c0_3 = arith.constant 0 : index
    %c0_4 = arith.constant 0 : index
    %3 = vector.load %arg1[%c0_2, %c0_3, %c0_4] : memref<9x128x512xbf16, #tpu.memory_space<vmem>>, vector<1x128x512xbf16>
    %4 = vector.shape_cast %3 : vector<1x128x512xbf16> to vector<128x512xbf16>
    %cst_5 = arith.constant dense<0.000000e+00> : vector<8x512xf32>
    %5 = tpu.matmul %2, %4, %cst_5 {dimension_numbers = #tpu.dot_dimension_numbers<[1], [0], [0], [1], [0, 0, 1, 1], [], []>} : vector<8x128xbf16>, vector<128x512xbf16>, vector<8x512xf32> -> vector<8x512xf32>
    %6 = arith.addf %0, %5 : vector<8x512xf32>
    %c1 = arith.constant 1 : index
    %c0_6 = arith.constant 0 : index
    %c0_7 = arith.constant 0 : index
    %7 = vector.load %arg2[%c1, %c0_6, %c0_7] : memref<16x8x128xbf16, #tpu.memory_space<vmem>>, vector<1x8x128xbf16>
    %8 = vector.shape_cast %7 : vector<1x8x128xbf16> to vector<8x128xbf16>
    %c1_8 = arith.constant 1 : index
    %c0_9 = arith.constant 0 : index
    %c0_10 = arith.constant 0 : index
    %9 = vector.load %arg1[%c1_8, %c0_9, %c0_10] : memref<9x128x512xbf16, #tpu.memory_space<vmem>>, vector<1x128x512xbf16>
    %10 = vector.shape_cast %9 : vector<1x128x512xbf16> to vector<128x512xbf16>
    %cst_11 = arith.constant dense<0.000000e+00> : vector<8x512xf32>
    %11 = tpu.matmul %8, %10, %cst_11 {dimension_numbers = #tpu.dot_dimension_numbers<[1], [0], [0], [1], [0, 0, 1, 1], [], []>} : vector<8x128xbf16>, vector<128x512xbf16>, vector<8x512xf32> -> vector<8x512xf32>
    %12 = arith.addf %6, %11 : vector<8x512xf32>
    %c2 = arith.constant 2 : index
    %c0_12 = arith.constant 0 : index
    %c0_13 = arith.constant 0 : index
    %13 = vector.load %arg2[%c2, %c0_12, %c0_13] : memref<16x8x128xbf16, #tpu.memory_space<vmem>>, vector<1x8x128xbf16>
    %14 = vector.shape_cast %13 : vector<1x8x128xbf16> to vector<8x128xbf16>
    %c3 = arith.constant 3 : index
    %c0_14 = arith.constant 0 : index
    %c0_15 = arith.constant 0 : index
    %15 = vector.load %arg1[%c3, %c0_14, %c0_15] : memref<9x128x512xbf16, #tpu.memory_space<vmem>>, vector<1x128x512xbf16>
    %16 = vector.shape_cast %15 : vector<1x128x512xbf16> to vector<128x512xbf16>
    %cst_16 = arith.constant dense<0.000000e+00> : vector<8x512xf32>
    %17 = tpu.matmul %14, %16, %cst_16 {dimension_numbers = #tpu.dot_dimension_numbers<[1], [0], [0], [1], [0, 0, 1, 1], [], []>} : vector<8x128xbf16>, vector<128x512xbf16>, vector<8x512xf32> -> vector<8x512xf32>
    %18 = arith.addf %12, %17 : vector<8x512xf32>
    %c3_17 = arith.constant 3 : index
    %c0_18 = arith.constant 0 : index
    %c0_19 = arith.constant 0 : index
    %19 = vector.load %arg2[%c3_17, %c0_18, %c0_19] : memref<16x8x128xbf16, #tpu.memory_space<vmem>>, vector<1x8x128xbf16>
    %20 = vector.shape_cast %19 : vector<1x8x128xbf16> to vector<8x128xbf16>
    %c4 = arith.constant 4 : index
    %c0_20 = arith.constant 0 : index
    %c0_21 = arith.constant 0 : index
    %21 = vector.load %arg1[%c4, %c0_20, %c0_21] : memref<9x128x512xbf16, #tpu.memory_space<vmem>>, vector<1x128x512xbf16>
    %22 = vector.shape_cast %21 : vector<1x128x512xbf16> to vector<128x512xbf16>
    %cst_22 = arith.constant dense<0.000000e+00> : vector<8x512xf32>
    %23 = tpu.matmul %20, %22, %cst_22 {dimension_numbers = #tpu.dot_dimension_numbers<[1], [0], [0], [1], [0, 0, 1, 1], [], []>} : vector<8x128xbf16>, vector<128x512xbf16>, vector<8x512xf32> -> vector<8x512xf32>
    %24 = arith.addf %18, %23 : vector<8x512xf32>
    %25 = math.tanh %24 : vector<8x512xf32>
    %c0_23 = arith.constant 0 : index
    %c0_24 = arith.constant 0 : index
    %26 = vector.load %arg3[%c0_23, %c0_24] : memref<32x512xf32, #tpu.memory_space<vmem>>, vector<8x512xf32>
    tpu.vector_store %arg3[%c0_23, %c0_24], %25 {strides = array<i32>} : memref<32x512xf32, #tpu.memory_space<vmem>>, vector<8x512xf32>,
    %cst_25 = arith.constant 0.000000e+00 : f32
    %27 = vector.broadcast %cst_25 : f32 to vector<8x512xf32>
    %c4_26 = arith.constant 4 : index
    %c0_27 = arith.constant 0 : index
    %c0_28 = arith.constant 0 : index
    %28 = vector.load %arg2[%c4_26, %c0_27, %c0_28] : memref<16x8x128xbf16, #tpu.memory_space<vmem>>, vector<1x8x128xbf16>
    %29 = vector.shape_cast %28 : vector<1x8x128xbf16> to vector<8x128xbf16>
    %c1_29 = arith.constant 1 : index
    %c0_30 = arith.constant 0 : index
    %c0_31 = arith.constant 0 : index
    %30 = vector.load %arg1[%c1_29, %c0_30, %c0_31] : memref<9x128x512xbf16, #tpu.memory_space<vmem>>, vector<1x128x512xbf16>
    %31 = vector.shape_cast %30 : vector<1x128x512xbf16> to vector<128x512xbf16>
    %cst_32 = arith.constant dense<0.000000e+00> : vector<8x512xf32>
    %32 = tpu.matmul %29, %31, %cst_32 {dimension_numbers = #tpu.dot_dimension_numbers<[1], [0], [0], [1], [0, 0, 1, 1], [], []>} : vector<8x128xbf16>, vector<128x512xbf16>, vector<8x512xf32> -> vector<8x512xf32>
    %33 = arith.addf %27, %32 : vector<8x512xf32>
    %c5 = arith.constant 5 : index
    %c0_33 = arith.constant 0 : index
    %c0_34 = arith.constant 0 : index
    %34 = vector.load %arg2[%c5, %c0_33, %c0_34] : memref<16x8x128xbf16, #tpu.memory_space<vmem>>, vector<1x8x128xbf16>
    %35 = vector.shape_cast %34 : vector<1x8x128xbf16> to vector<8x128xbf16>
    %c2_35 = arith.constant 2 : index
    %c0_36 = arith.constant 0 : index
    %c0_37 = arith.constant 0 : index
    %36 = vector.load %arg1[%c2_35, %c0_36, %c0_37] : memref<9x128x512xbf16, #tpu.memory_space<vmem>>, vector<1x128x512xbf16>
    %37 = vector.shape_cast %36 : vector<1x128x512xbf16> to vector<128x512xbf16>
    %cst_38 = arith.constant dense<0.000000e+00> : vector<8x512xf32>
    %38 = tpu.matmul %35, %37, %cst_38 {dimension_numbers = #tpu.dot_dimension_numbers<[1], [0], [0], [1], [0, 0, 1, 1], [], []>} : vector<8x128xbf16>, vector<128x512xbf16>, vector<8x512xf32> -> vector<8x512xf32>
    %39 = arith.addf %33, %38 : vector<8x512xf32>
    %c6 = arith.constant 6 : index
    %c0_39 = arith.constant 0 : index
    %c0_40 = arith.constant 0 : index
    %40 = vector.load %arg2[%c6, %c0_39, %c0_40] : memref<16x8x128xbf16, #tpu.memory_space<vmem>>, vector<1x8x128xbf16>
    %41 = vector.shape_cast %40 : vector<1x8x128xbf16> to vector<8x128xbf16>
    %c4_41 = arith.constant 4 : index
    %c0_42 = arith.constant 0 : index
    %c0_43 = arith.constant 0 : index
    %42 = vector.load %arg1[%c4_41, %c0_42, %c0_43] : memref<9x128x512xbf16, #tpu.memory_space<vmem>>, vector<1x128x512xbf16>
    %43 = vector.shape_cast %42 : vector<1x128x512xbf16> to vector<128x512xbf16>
    %cst_44 = arith.constant dense<0.000000e+00> : vector<8x512xf32>
    %44 = tpu.matmul %41, %43, %cst_44 {dimension_numbers = #tpu.dot_dimension_numbers<[1], [0], [0], [1], [0, 0, 1, 1], [], []>} : vector<8x128xbf16>, vector<128x512xbf16>, vector<8x512xf32> -> vector<8x512xf32>
    %45 = arith.addf %39, %44 : vector<8x512xf32>
    %c7 = arith.constant 7 : index
    %c0_45 = arith.constant 0 : index
    %c0_46 = arith.constant 0 : index
    %46 = vector.load %arg2[%c7, %c0_45, %c0_46] : memref<16x8x128xbf16, #tpu.memory_space<vmem>>, vector<1x8x128xbf16>
    %47 = vector.shape_cast %46 : vector<1x8x128xbf16> to vector<8x128xbf16>
    %c5_47 = arith.constant 5 : index
    %c0_48 = arith.constant 0 : index
    %c0_49 = arith.constant 0 : index
    %48 = vector.load %arg1[%c5_47, %c0_48, %c0_49] : memref<9x128x512xbf16, #tpu.memory_space<vmem>>, vector<1x128x512xbf16>
    %49 = vector.shape_cast %48 : vector<1x128x512xbf16> to vector<128x512xbf16>
    %cst_50 = arith.constant dense<0.000000e+00> : vector<8x512xf32>
    %50 = tpu.matmul %47, %49, %cst_50 {dimension_numbers = #tpu.dot_dimension_numbers<[1], [0], [0], [1], [0, 0, 1, 1], [], []>} : vector<8x128xbf16>, vector<128x512xbf16>, vector<8x512xf32> -> vector<8x512xf32>
    %51 = arith.addf %45, %50 : vector<8x512xf32>
    %52 = math.tanh %51 : vector<8x512xf32>
    %c8 = arith.constant 8 : index
    %c0_51 = arith.constant 0 : index
    %53 = vector.load %arg3[%c8, %c0_51] : memref<32x512xf32, #tpu.memory_space<vmem>>, vector<8x512xf32>
    tpu.vector_store %arg3[%c8, %c0_51], %52 {strides = array<i32>} : memref<32x512xf32, #tpu.memory_space<vmem>>, vector<8x512xf32>,
    %cst_52 = arith.constant 0.000000e+00 : f32
    %54 = vector.broadcast %cst_52 : f32 to vector<8x512xf32>
    %c8_53 = arith.constant 8 : index
    %c0_54 = arith.constant 0 : index
    %c0_55 = arith.constant 0 : index
    %55 = vector.load %arg2[%c8_53, %c0_54, %c0_55] : memref<16x8x128xbf16, #tpu.memory_space<vmem>>, vector<1x8x128xbf16>
    %56 = vector.shape_cast %55 : vector<1x8x128xbf16> to vector<8x128xbf16>
    %c3_56 = arith.constant 3 : index
    %c0_57 = arith.constant 0 : index
    %c0_58 = arith.constant 0 : index
    %57 = vector.load %arg1[%c3_56, %c0_57, %c0_58] : memref<9x128x512xbf16, #tpu.memory_space<vmem>>, vector<1x128x512xbf16>
    %58 = vector.shape_cast %57 : vector<1x128x512xbf16> to vector<128x512xbf16>
    %cst_59 = arith.constant dense<0.000000e+00> : vector<8x512xf32>
    %59 = tpu.matmul %56, %58, %cst_59 {dimension_numbers = #tpu.dot_dimension_numbers<[1], [0], [0], [1], [0, 0, 1, 1], [], []>} : vector<8x128xbf16>, vector<128x512xbf16>, vector<8x512xf32> -> vector<8x512xf32>
    %60 = arith.addf %54, %59 : vector<8x512xf32>
    %c9 = arith.constant 9 : index
    %c0_60 = arith.constant 0 : index
    %c0_61 = arith.constant 0 : index
    %61 = vector.load %arg2[%c9, %c0_60, %c0_61] : memref<16x8x128xbf16, #tpu.memory_space<vmem>>, vector<1x8x128xbf16>
    %62 = vector.shape_cast %61 : vector<1x8x128xbf16> to vector<8x128xbf16>
    %c4_62 = arith.constant 4 : index
    %c0_63 = arith.constant 0 : index
    %c0_64 = arith.constant 0 : index
    %63 = vector.load %arg1[%c4_62, %c0_63, %c0_64] : memref<9x128x512xbf16, #tpu.memory_space<vmem>>, vector<1x128x512xbf16>
    %64 = vector.shape_cast %63 : vector<1x128x512xbf16> to vector<128x512xbf16>
    %cst_65 = arith.constant dense<0.000000e+00> : vector<8x512xf32>
    %65 = tpu.matmul %62, %64, %cst_65 {dimension_numbers = #tpu.dot_dimension_numbers<[1], [0], [0], [1], [0, 0, 1, 1], [], []>} : vector<8x128xbf16>, vector<128x512xbf16>, vector<8x512xf32> -> vector<8x512xf32>
    %66 = arith.addf %60, %65 : vector<8x512xf32>
    %c10 = arith.constant 10 : index
    %c0_66 = arith.constant 0 : index
    %c0_67 = arith.constant 0 : index
    %67 = vector.load %arg2[%c10, %c0_66, %c0_67] : memref<16x8x128xbf16, #tpu.memory_space<vmem>>, vector<1x8x128xbf16>
    %68 = vector.shape_cast %67 : vector<1x8x128xbf16> to vector<8x128xbf16>
    %c6_68 = arith.constant 6 : index
    %c0_69 = arith.constant 0 : index
    %c0_70 = arith.constant 0 : index
    %69 = vector.load %arg1[%c6_68, %c0_69, %c0_70] : memref<9x128x512xbf16, #tpu.memory_space<vmem>>, vector<1x128x512xbf16>
    %70 = vector.shape_cast %69 : vector<1x128x512xbf16> to vector<128x512xbf16>
    %cst_71 = arith.constant dense<0.000000e+00> : vector<8x512xf32>
    %71 = tpu.matmul %68, %70, %cst_71 {dimension_numbers = #tpu.dot_dimension_numbers<[1], [0], [0], [1], [0, 0, 1, 1], [], []>} : vector<8x128xbf16>, vector<128x512xbf16>, vector<8x512xf32> -> vector<8x512xf32>
    %72 = arith.addf %66, %71 : vector<8x512xf32>
    %c11 = arith.constant 11 : index
    %c0_72 = arith.constant 0 : index
    %c0_73 = arith.constant 0 : index
    %73 = vector.load %arg2[%c11, %c0_72, %c0_73] : memref<16x8x128xbf16, #tpu.memory_space<vmem>>, vector<1x8x128xbf16>
    %74 = vector.shape_cast %73 : vector<1x8x128xbf16> to vector<8x128xbf16>
    %c7_74 = arith.constant 7 : index
    %c0_75 = arith.constant 0 : index
    %c0_76 = arith.constant 0 : index
    %75 = vector.load %arg1[%c7_74, %c0_75, %c0_76] : memref<9x128x512xbf16, #tpu.memory_space<vmem>>, vector<1x128x512xbf16>
    %76 = vector.shape_cast %75 : vector<1x128x512xbf16> to vector<128x512xbf16>
    %cst_77 = arith.constant dense<0.000000e+00> : vector<8x512xf32>
    %77 = tpu.matmul %74, %76, %cst_77 {dimension_numbers = #tpu.dot_dimension_numbers<[1], [0], [0], [1], [0, 0, 1, 1], [], []>} : vector<8x128xbf16>, vector<128x512xbf16>, vector<8x512xf32> -> vector<8x512xf32>
    %78 = arith.addf %72, %77 : vector<8x512xf32>
    %79 = math.tanh %78 : vector<8x512xf32>
    %c16 = arith.constant 16 : index
    %c0_78 = arith.constant 0 : index
    %80 = vector.load %arg3[%c16, %c0_78] : memref<32x512xf32, #tpu.memory_space<vmem>>, vector<8x512xf32>
    tpu.vector_store %arg3[%c16, %c0_78], %79 {strides = array<i32>} : memref<32x512xf32, #tpu.memory_space<vmem>>, vector<8x512xf32>,
    %cst_79 = arith.constant 0.000000e+00 : f32
    %81 = vector.broadcast %cst_79 : f32 to vector<8x512xf32>
    %c12 = arith.constant 12 : index
    %c0_80 = arith.constant 0 : index
    %c0_81 = arith.constant 0 : index
    %82 = vector.load %arg2[%c12, %c0_80, %c0_81] : memref<16x8x128xbf16, #tpu.memory_space<vmem>>, vector<1x8x128xbf16>
    %83 = vector.shape_cast %82 : vector<1x8x128xbf16> to vector<8x128xbf16>
    %c4_82 = arith.constant 4 : index
    %c0_83 = arith.constant 0 : index
    %c0_84 = arith.constant 0 : index
    %84 = vector.load %arg1[%c4_82, %c0_83, %c0_84] : memref<9x128x512xbf16, #tpu.memory_space<vmem>>, vector<1x128x512xbf16>
    %85 = vector.shape_cast %84 : vector<1x128x512xbf16> to vector<128x512xbf16>
    %cst_85 = arith.constant dense<0.000000e+00> : vector<8x512xf32>
    %86 = tpu.matmul %83, %85, %cst_85 {dimension_numbers = #tpu.dot_dimension_numbers<[1], [0], [0], [1], [0, 0, 1, 1], [], []>} : vector<8x128xbf16>, vector<128x512xbf16>, vector<8x512xf32> -> vector<8x512xf32>
    %87 = arith.addf %81, %86 : vector<8x512xf32>
    %c13 = arith.constant 13 : index
    %c0_86 = arith.constant 0 : index
    %c0_87 = arith.constant 0 : index
    %88 = vector.load %arg2[%c13, %c0_86, %c0_87] : memref<16x8x128xbf16, #tpu.memory_space<vmem>>, vector<1x8x128xbf16>
    %89 = vector.shape_cast %88 : vector<1x8x128xbf16> to vector<8x128xbf16>
    %c5_88 = arith.constant 5 : index
    %c0_89 = arith.constant 0 : index
    %c0_90 = arith.constant 0 : index
    %90 = vector.load %arg1[%c5_88, %c0_89, %c0_90] : memref<9x128x512xbf16, #tpu.memory_space<vmem>>, vector<1x128x512xbf16>
    %91 = vector.shape_cast %90 : vector<1x128x512xbf16> to vector<128x512xbf16>
    %cst_91 = arith.constant dense<0.000000e+00> : vector<8x512xf32>
    %92 = tpu.matmul %89, %91, %cst_91 {dimension_numbers = #tpu.dot_dimension_numbers<[1], [0], [0], [1], [0, 0, 1, 1], [], []>} : vector<8x128xbf16>, vector<128x512xbf16>, vector<8x512xf32> -> vector<8x512xf32>
    %93 = arith.addf %87, %92 : vector<8x512xf32>
    %c14 = arith.constant 14 : index
    %c0_92 = arith.constant 0 : index
    %c0_93 = arith.constant 0 : index
    %94 = vector.load %arg2[%c14, %c0_92, %c0_93] : memref<16x8x128xbf16, #tpu.memory_space<vmem>>, vector<1x8x128xbf16>
    %95 = vector.shape_cast %94 : vector<1x8x128xbf16> to vector<8x128xbf16>
    %c7_94 = arith.constant 7 : index
    %c0_95 = arith.constant 0 : index
    %c0_96 = arith.constant 0 : index
    %96 = vector.load %arg1[%c7_94, %c0_95, %c0_96] : memref<9x128x512xbf16, #tpu.memory_space<vmem>>, vector<1x128x512xbf16>
    %97 = vector.shape_cast %96 : vector<1x128x512xbf16> to vector<128x512xbf16>
    %cst_97 = arith.constant dense<0.000000e+00> : vector<8x512xf32>
    %98 = tpu.matmul %95, %97, %cst_97 {dimension_numbers = #tpu.dot_dimension_numbers<[1], [0], [0], [1], [0, 0, 1, 1], [], []>} : vector<8x128xbf16>, vector<128x512xbf16>, vector<8x512xf32> -> vector<8x512xf32>
    %99 = arith.addf %93, %98 : vector<8x512xf32>
    %c15 = arith.constant 15 : index
    %c0_98 = arith.constant 0 : index
    %c0_99 = arith.constant 0 : index
    %100 = vector.load %arg2[%c15, %c0_98, %c0_99] : memref<16x8x128xbf16, #tpu.memory_space<vmem>>, vector<1x8x128xbf16>
    %101 = vector.shape_cast %100 : vector<1x8x128xbf16> to vector<8x128xbf16>
    %c8_100 = arith.constant 8 : index
    %c0_101 = arith.constant 0 : index
    %c0_102 = arith.constant 0 : index
    %102 = vector.load %arg1[%c8_100, %c0_101, %c0_102] : memref<9x128x512xbf16, #tpu.memory_space<vmem>>, vector<1x128x512xbf16>
    %103 = vector.shape_cast %102 : vector<1x128x512xbf16> to vector<128x512xbf16>
    %cst_103 = arith.constant dense<0.000000e+00> : vector<8x512xf32>
    %104 = tpu.matmul %101, %103, %cst_103 {dimension_numbers = #tpu.dot_dimension_numbers<[1], [0], [0], [1], [0, 0, 1, 1], [], []>} : vector<8x128xbf16>, vector<128x512xbf16>, vector<8x512xf32> -> vector<8x512xf32>
    %105 = arith.addf %99, %104 : vector<8x512xf32>
    %106 = math.tanh %105 : vector<8x512xf32>
    %c24 = arith.constant 24 : index
    %c0_104 = arith.constant 0 : index
    %107 = vector.load %arg3[%c24, %c0_104] : memref<32x512xf32, #tpu.memory_space<vmem>>, vector<8x512xf32>
    tpu.vector_store %arg3[%c24, %c0_104], %106 {strides = array<i32>} : memref<32x512xf32, #tpu.memory_space<vmem>>, vector<8x512xf32>,
    return
  }
  func.func @transform_0(%arg0: i32) -> (i32, i32, i32) {
    %c0_i32 = arith.constant 0 : i32
    %c0_i32_0 = arith.constant 0 : i32
    %c0_i32_1 = arith.constant 0 : i32
    return %c0_i32, %c0_i32_0, %arg0 : i32, i32, i32
  }
  func.func @transform_1(%arg0: i32) -> (i32, i32, i32) {
    %c0_i32 = arith.constant 0 : i32
    %c0_i32_0 = arith.constant 0 : i32
    %c0_i32_1 = arith.constant 0 : i32
    %c0_i32_2 = arith.constant 0 : i32
    return %c0_i32, %c0_i32_0, %c0_i32_1 : i32, i32, i32
  }
  func.func @transform_2(%arg0: i32) -> (i32, i32) {
    %c0_i32 = arith.constant 0 : i32
    %c0_i32_0 = arith.constant 0 : i32
    return %c0_i32, %arg0 : i32, i32
  }
}

</mosaic_0001>

<bundles_post_ra>
// kernel: tile.28
= control target key start
LH: loop header
LB: loop body
LE: loop exit
PB: predicated region body
PF: predicated region fallthrough
CT: control target
= control target key end

     0   :  { %s64_s0 = inlined_call_operand.vmem [shape: f32[128], index: 0, kind: input, shape index: {}]   ;;  %s65_s1 = inlined_call_operand.vmem [shape: f32[64,128], index: 1, kind: output, shape index: {}]  }
   0x1   :  { %v4_v0 = vld [vmem:[%s64_s0] ss:$0 sm:$0xff] }
   0x2   :  { %5 = vst [vmem:[%s65_s1] sm:$0xff] %v4_v0  ;;  %20 = vst [vmem:[%s65_s1 + $0x8] sm:$0xff] %v4_v0 }
   0x3   :  { %21 = vst [vmem:[%s65_s1 + $0x10] sm:$0xff] %v4_v0  ;;  %22 = vst [vmem:[%s65_s1 + $0x18] sm:$0xff] %v4_v0 }
   0x4   :  { %23 = vst [vmem:[%s65_s1 + $0x20] sm:$0xff] %v4_v0  ;;  %24 = vst [vmem:[%s65_s1 + $0x28] sm:$0xff] %v4_v0 }
   0x5   :  { %25 = vst [vmem:[%s65_s1 + $0x30] sm:$0xff] %v4_v0  ;;  %26 = vst [vmem:[%s65_s1 + $0x38] sm:$0xff] %v4_v0 }

// kernel: _lambda_.5
= control target key start
LH: loop header
LB: loop body
LE: loop exit
PB: predicated region body
PF: predicated region fallthrough
CT: control target
= control target key end

     0   :  { %s1035_s12 = smov 0   ;;  %s1037_s13 = smov 0   ;;  %s1217_s0 = inlined_call_operand.vmem [shape: bf16[16,128], index: 0, kind: input, shape index: {}]   ;;  %s1218_s1 = inlined_call_operand.vmem [shape: bf16[128,8192], index: 1, kind: input, shape index: {}]   ;;  %s1219_s2 = inlined_call_operand.vmem [shape: f32[8,8192], index: 2, kind: output, shape index: {0}]   ;;  %s1220_s3 = inlined_call_operand.vmem [shape: f32[8,8192], index: 3, kind: output, shape index: {1}]  }
   0x1   :  { %s1039_s14 = smov 0   ;;  %s1041_s15 = smov 0  }
   0x2   :  { %s1043_s16 = smov 0  }
   0x3 LB: > { %s23_s17 = sadd.s32 1, %s1008_s15  ;;  %p66_p1 = scmp.ne.s32.totalorder %s1000_s13, %s996_s12  ;;  %s1012_s16 = sphi %s1043_s16, %s14_s16   ;;  %s1008_s15 = sphi %s1041_s15, %s1225_s15   ;;  %s1004_s14 = sphi %s1039_s14, %s1224_s14   ;;  %s1000_s13 = sphi %s1037_s13, %s1223_s13   ;;  %s996_s12 = sphi %s1035_s12, %s1222_s12  }
   0x4   : > { %p24_p0 = scmp.ge.s32.totalorder %s23_s17, 16  ;;  %p67_p2 = scmp.eq.s32.totalorder %s1012_s16, 0 }
   0x5   : > { %s59_s19 = sadd.s32 1, %s1000_s13  ;;  %p838_p5 = scmp.ge.s32.totalorder %s1012_s16, 16 }
   0x6   : > { %s1227_s17 = smov (%p24_p0, %s23_s17), 0  ;;  %p68_p3 = por %p67_p2, %p66_p1 }
   0x7   : > { %s56_s18 = ssub.s32 %s1008_s15, %s1227_s17  ;;  %157 = sbr.rel (%p838_p5) target bundleno = 34 (0x22), region = 20 }
   0x8   : > { %p57_p4 = scmp.eq.s32.totalorder %s56_s18, 0 }
   0xa   : > { %s1070_s20 = scalar_select %p57_p4, %s1000_s13, %s59_s19  }
   0xe   : > { %160 = sbr.rel (!%p68_p3) target bundleno = 34 (0x22), region = 24  ;;  %s162_s21 = sand.u32 (%p68_p3), 1, %s1000_s13  }
   0xf   : > { %s883_s22 = sshll.u32 (%p68_p3), %s1008_s15, 4  ;;  %s839_s23 = sshll.u32 (%p68_p3), %s162_s21, 8 }
  0x10   : > { %s1078_s26 = scalar_lea.vmem (%p68_p3), %s1218_s1, %s883_s22  ;;  %s1083_s27 = scalar_lea.vmem (%p68_p3), [#allocation2], %s839_s23 }
  0x11   : > { %v180_v0 = vld [vmem:[%s1078_s26] sm:$0xff] (%p68_p3)  ;;  %v182_v1 = vld [vmem:[%s1078_s26 + $0x8] sm:$0xff] (%p68_p3) }
  0x12   : > { %v184_v2 = vld [vmem:[%s1078_s26 + $0x100] sm:$0xff] (%p68_p3)  ;;  %181 = vst [vmem:[%s1083_s27] sm:$0xff] (%p68_p3), %v180_v0  ;;  %183 = vst [vmem:[%s1083_s27 + $0x8] sm:$0xff] (%p68_p3), %v182_v1  ;;  %v186_v3 = vld [vmem:[%s1078_s26 + $0x108] sm:$0xff] (%p68_p3) }
  0x13   : > { %185 = vst [vmem:[%s1083_s27 + $0x10] sm:$0xff] (%p68_p3), %v184_v2  ;;  %v188_v4 = vld [vmem:[%s1078_s26 + $0x200] sm:$0xff] (%p68_p3)  ;;  %v190_v5 = vld [vmem:[%s1078_s26 + $0x208] sm:$0xff] (%p68_p3)  ;;  %187 = vst [vmem:[%s1083_s27 + $0x18] sm:$0xff] (%p68_p3), %v186_v3 }
  0x14   : > { %189 = vst [vmem:[%s1083_s27 + $0x20] sm:$0xff] (%p68_p3), %v188_v4  ;;  %191 = vst [vmem:[%s1083_s27 + $0x28] sm:$0xff] (%p68_p3), %v190_v5  ;;  %v192_v6 = vld [vmem:[%s1078_s26 + $0x300] sm:$0xff] (%p68_p3)  ;;  %v194_v7 = vld [vmem:[%s1078_s26 + $0x308] sm:$0xff] (%p68_p3) }
  0x15   : > { %v196_v8 = vld [vmem:[%s1078_s26 + $0x400] sm:$0xff]  ;;  %193 = vst [vmem:[%s1083_s27 + $0x30] sm:$0xff] %v192_v6  ;;  %195 = vst [vmem:[%s1083_s27 + $0x38] sm:$0xff] %v194_v7  ;;  %v198_v9 = vld [vmem:[%s1078_s26 + $0x408] sm:$0xff] }
  0x16   : > { %197 = vst [vmem:[%s1083_s27 + $0x40] sm:$0xff] %v196_v8  ;;  %v200_v10 = vld [vmem:[%s1078_s26 + $0x500] sm:$0xff]  ;;  %v202_v11 = vld [vmem:[%s1078_s26 + $0x508] sm:$0xff]  ;;  %199 = vst [vmem:[%s1083_s27 + $0x48] sm:$0xff] %v198_v9 }
  0x17   : > { %201 = vst [vmem:[%s1083_s27 + $0x50] sm:$0xff] %v200_v10  ;;  %203 = vst [vmem:[%s1083_s27 + $0x58] sm:$0xff] %v202_v11  ;;  %v204_v12 = vld [vmem:[%s1078_s26 + $0x600] sm:$0xff]  ;;  %v206_v13 = vld [vmem:[%s1078_s26 + $0x608] sm:$0xff] }
  0x18   : > { %v208_v14 = vld [vmem:[%s1078_s26 + $0x700] sm:$0xff]  ;;  %205 = vst [vmem:[%s1083_s27 + $0x60] sm:$0xff] %v204_v12  ;;  %207 = vst [vmem:[%s1083_s27 + $0x68] sm:$0xff] %v206_v13  ;;  %v210_v15 = vld [vmem:[%s1078_s26 + $0x708] sm:$0xff] }
  0x19   : > { %209 = vst [vmem:[%s1083_s27 + $0x70] sm:$0xff] %v208_v14  ;;  %v212_v16 = vld [vmem:[%s1078_s26 + $0x800] sm:$0xff]  ;;  %v214_v17 = vld [vmem:[%s1078_s26 + $0x808] sm:$0xff]  ;;  %211 = vst [vmem:[%s1083_s27 + $0x78] sm:$0xff] %v210_v15 }
  0x1a   : > { %213 = vst [vmem:[%s1083_s27 + $0x80] sm:$0xff] %v212_v16  ;;  %215 = vst [vmem:[%s1083_s27 + $0x88] sm:$0xff] %v214_v17  ;;  %v216_v18 = vld [vmem:[%s1078_s26 + $0x900] sm:$0xff]  ;;  %v218_v19 = vld [vmem:[%s1078_s26 + $0x908] sm:$0xff] }
  0x1b   : > { %v220_v20 = vld [vmem:[%s1078_s26 + $0xa00] sm:$0xff]  ;;  %217 = vst [vmem:[%s1083_s27 + $0x90] sm:$0xff] %v216_v18  ;;  %219 = vst [vmem:[%s1083_s27 + $0x98] sm:$0xff] %v218_v19  ;;  %v222_v21 = vld [vmem:[%s1078_s26 + $0xa08] sm:$0xff] }
  0x1c   : > { %221 = vst [vmem:[%s1083_s27 + $0xa0] sm:$0xff] %v220_v20  ;;  %v224_v22 = vld [vmem:[%s1078_s26 + $0xb00] sm:$0xff]  ;;  %v226_v23 = vld [vmem:[%s1078_s26 + $0xb08] sm:$0xff]  ;;  %223 = vst [vmem:[%s1083_s27 + $0xa8] sm:$0xff] %v222_v21 }
  0x1d   : > { %225 = vst [vmem:[%s1083_s27 + $0xb0] sm:$0xff] %v224_v22  ;;  %227 = vst [vmem:[%s1083_s27 + $0xb8] sm:$0xff] %v226_v23  ;;  %v228_v24 = vld [vmem:[%s1078_s26 + $0xc00] sm:$0xff]  ;;  %v230_v25 = vld [vmem:[%s1078_s26 + $0xc08] sm:$0xff] }
  0x1e   : > { %v232_v26 = vld [vmem:[%s1078_s26 + $0xd00] sm:$0xff]  ;;  %229 = vst [vmem:[%s1083_s27 + $0xc0] sm:$0xff] %v228_v24  ;;  %231 = vst [vmem:[%s1083_s27 + $0xc8] sm:$0xff] %v230_v25  ;;  %v234_v27 = vld [vmem:[%s1078_s26 + $0xd08] sm:$0xff] }
  0x1f   : > { %233 = vst [vmem:[%s1083_s27 + $0xd0] sm:$0xff] %v232_v26  ;;  %v236_v28 = vld [vmem:[%s1078_s26 + $0xe00] sm:$0xff]  ;;  %v238_v29 = vld [vmem:[%s1078_s26 + $0xe08] sm:$0xff]  ;;  %235 = vst [vmem:[%s1083_s27 + $0xd8] sm:$0xff] %v234_v27 }
  0x20   : > { %237 = vst [vmem:[%s1083_s27 + $0xe0] sm:$0xff] %v236_v28  ;;  %239 = vst [vmem:[%s1083_s27 + $0xe8] sm:$0xff] %v238_v29  ;;  %v240_v30 = vld [vmem:[%s1078_s26 + $0xf00] sm:$0xff]  ;;  %v242_v31 = vld [vmem:[%s1078_s26 + $0xf08] sm:$0xff] }
  0x21   : > { %241 = vst [vmem:[%s1083_s27 + $0xf0] sm:$0xff] %v240_v30  ;;  %243 = vst [vmem:[%s1083_s27 + $0xf8] sm:$0xff] %v242_v31 }
  0x22 PF: > { %p842_p6 = scmp.ge.s32.totalorder %s1012_s16, 1  ;;  %p248_p7 = scmp.lt.s32.totalorder %s1012_s16, 17 }
  0x24   : > { %p249_p8 = pnand %p842_p6, %p248_p7 }
  0x25   : > { %s255_s28 = sand.u32 (!%p249_p8), 1, %s996_s12   ;;  %v1014_v32 = vmov (!%p249_p8), 0   ;;  %v973_v1 = vld [vmem:[%s1217_s0] sm:$0xff] (!%p249_p8)   ;;  %s844_s6 = sshll.u32 (!%p249_p8), %s1004_s14, 2 }
  0x26   : > { %252 = sbr.rel (%p249_p8) target bundleno = 305 (0x131), region = 47  ;;  %s843_s29 = sshll.u32 (!%p249_p8), %s255_s28, 8  ;;  %556 = vmatprep.mubr.bf16.mxu0 (!%p249_p8), %v1014_v32  ;;  %599 = vmatprep.mubr.bf16.mxu1 (!%p249_p8), %v1014_v32 }
  0x27   : > { %s1149_s30 = scalar_lea.vmem (!%p249_p8), [#allocation2], %s843_s29  ;;  %p1187_p9 = scmp.lt.s32.totalorder (!%p249_p8), %s844_s6, 63 }
  0x28   : > { %v925_v33 = vld [vmem:[%s1149_s30 + $0x4] ss:$16 sps:$4 sm:$0xff] (!%p249_p8)   ;;  %v927_v34 = vld [vmem:[%s1149_s30 + $0xc] ss:$16 sps:$4 sm:$0xff] (!%p249_p8)   ;;  %v929_v35 = vld [vmem:[%s1149_s30] ss:$16 sps:$4 sm:$0xff] (!%p249_p8)  }
  0x29   : > { %524 = vmatprep.subr.bf16.mxu0 (!%p249_p8), %v925_v33  ;;  %v930_v36 = vld [vmem:[%s1149_s30 + $0x8] ss:$16 sps:$4 sm:$0xff] (!%p249_p8)   ;;  %567 = vmatprep.subr.bf16.mxu1 (!%p249_p8), %v927_v34  ;;  %v931_v37 = vld [vmem:[%s1149_s30 + $0x24] ss:$16 sps:$4 sm:$0xff] (!%p249_p8)   ;;  %v933_v38 = vld [vmem:[%s1149_s30 + $0x2c] ss:$16 sps:$4 sm:$0xff] (!%p249_p8)  }
  0x2a   : > { %525 = vmatpush1.bf16.msra.mxu0 (!%p249_p8), %v929_v35  ;;  %568 = vmatpush1.bf16.msra.mxu1 (!%p249_p8), %v930_v36  ;;  %v935_v39 = vld [vmem:[%s1149_s30 + $0x20] ss:$16 sps:$4 sm:$0xff] (!%p249_p8)   ;;  %v936_v40 = vld [vmem:[%s1149_s30 + $0x28] ss:$16 sps:$4 sm:$0xff] (!%p249_p8)   ;;  %v937_v41 = vld [vmem:[%s1149_s30 + $0x44] ss:$16 sps:$4 sm:$0xff] (!%p249_p8)  }
  0x2b   : > { %526 = vmatprep.subr.bf16.mxu0 (!%p249_p8), %v931_v37  ;;  %569 = vmatprep.subr.bf16.mxu1 (!%p249_p8), %v933_v38  ;;  %v939_v42 = vld [vmem:[%s1149_s30 + $0x4c] ss:$16 sps:$4 sm:$0xff] (!%p249_p8)   ;;  %v941_v43 = vld [vmem:[%s1149_s30 + $0x40] ss:$16 sps:$4 sm:$0xff] (!%p249_p8)   ;;  %v942_v44 = vld [vmem:[%s1149_s30 + $0x48] ss:$16 sps:$4 sm:$0xff] (!%p249_p8)  }
  0x2c   : > { %v943_v45 = vld [vmem:[%s1149_s30 + $0x64] ss:$16 sps:$4 sm:$0xff] (!%p249_p8)   ;;  %v945_v46 = vld [vmem:[%s1149_s30 + $0x6c] ss:$16 sps:$4 sm:$0xff] (!%p249_p8)   ;;  %v947_v47 = vld [vmem:[%s1149_s30 + $0x60] ss:$16 sps:$4 sm:$0xff] (!%p249_p8)  }
  0x2d   : > { %v948_v48 = vld [vmem:[%s1149_s30 + $0x68] ss:$16 sps:$4 sm:$0xff]   ;;  %v949_v49 = vld [vmem:[%s1149_s30 + $0x84] ss:$16 sps:$4 sm:$0xff]   ;;  %v951_v50 = vld [vmem:[%s1149_s30 + $0x8c] ss:$16 sps:$4 sm:$0xff]  }
  0x2e   : > { %527 = vmatpush1.bf16.msra.mxu0 %v935_v39  ;;  %570 = vmatpush1.bf16.msra.mxu1 %v936_v40  ;;  %v953_v51 = vld [vmem:[%s1149_s30 + $0x80] ss:$16 sps:$4 sm:$0xff]   ;;  %v954_v52 = vld [vmem:[%s1149_s30 + $0x88] ss:$16 sps:$4 sm:$0xff]   ;;  %v955_v53 = vld [vmem:[%s1149_s30 + $0xa4] ss:$16 sps:$4 sm:$0xff]  }
  0x2f   : > { %528 = vmatprep.subr.bf16.mxu0 %v937_v41  ;;  %571 = vmatprep.subr.bf16.mxu1 %v939_v42  ;;  %v957_v54 = vld [vmem:[%s1149_s30 + $0xac] ss:$16 sps:$4 sm:$0xff]   ;;  %v959_v55 = vld [vmem:[%s1149_s30 + $0xa0] ss:$16 sps:$4 sm:$0xff]   ;;  %v960_v56 = vld [vmem:[%s1149_s30 + $0xa8] ss:$16 sps:$4 sm:$0xff]  }
  0x30   : > { %v961_v57 = vld [vmem:[%s1149_s30 + $0xc4] ss:$16 sps:$4 sm:$0xff]   ;;  %v963_v58 = vld [vmem:[%s1149_s30 + $0xcc] ss:$16 sps:$4 sm:$0xff]   ;;  %v965_v59 = vld [vmem:[%s1149_s30 + $0xc0] ss:$16 sps:$4 sm:$0xff]  }
  0x31   : > { %v966_v60 = vld [vmem:[%s1149_s30 + $0xc8] ss:$16 sps:$4 sm:$0xff]   ;;  %v967_v61 = vld [vmem:[%s1149_s30 + $0xe4] ss:$16 sps:$4 sm:$0xff]   ;;  %v969_v62 = vld [vmem:[%s1149_s30 + $0xec] ss:$16 sps:$4 sm:$0xff]  }
  0x32   : > { %529 = vmatpush1.bf16.msra.mxu0 %v941_v43  ;;  %572 = vmatpush1.bf16.msra.mxu1 %v942_v44  ;;  %v971_v63 = vld [vmem:[%s1149_s30 + $0xe0] ss:$16 sps:$4 sm:$0xff]   ;;  %v972_v0 = vld [vmem:[%s1149_s30 + $0xe8] ss:$16 sps:$4 sm:$0xff]   ;;  %s1229_s6 = smov (!%p1187_p9, %s844_s6), 63 }
  0x33   : > { %530 = vmatprep.subr.bf16.mxu0 %v943_v45  ;;  %573 = vmatprep.subr.bf16.mxu1 %v945_v46  ;;  %s845_s8 = sshll.u32 %s1229_s6, 3 }
  0x34   : > { %s311_s11 = scalar_lea.vmem %s1219_s2, %s845_s8  ;;  %s321_s18 = scalar_lea.vmem %s1220_s3, %s845_s8 }
  0x36   : > { %531 = vmatpush1.bf16.msra.mxu0 %v947_v47  ;;  %574 = vmatpush1.bf16.msra.mxu1 %v948_v48 }
  0x37   : > { %532 = vmatprep.subr.bf16.mxu0 %v949_v49  ;;  %575 = vmatprep.subr.bf16.mxu1 %v951_v50 }
  0x3a   : > { %533 = vmatpush1.bf16.msra.mxu0 %v953_v51  ;;  %576 = vmatpush1.bf16.msra.mxu1 %v954_v52 }
  0x3b   : > { %534 = vmatprep.subr.bf16.mxu0 %v955_v53  ;;  %577 = vmatprep.subr.bf16.mxu1 %v957_v54 }
  0x3e   : > { %535 = vmatpush1.bf16.msra.mxu0 %v959_v55  ;;  %578 = vmatpush1.bf16.msra.mxu1 %v960_v56 }
  0x3f   : > { %536 = vmatprep.subr.bf16.mxu0 %v961_v57  ;;  %579 = vmatprep.subr.bf16.mxu1 %v963_v58 }
  0x42   : > { %537 = vmatpush1.bf16.msra.mxu0 %v965_v59  ;;  %580 = vmatpush1.bf16.msra.mxu1 %v966_v60 }
  0x43   : > { %538 = vmatprep.subr.bf16.mxu0 %v967_v61  ;;  %581 = vmatprep.subr.bf16.mxu1 %v969_v62 }
  0x46   : > { %539 = vmatpush1.bf16.msra.mxu0 %v971_v63  ;;  %582 = vmatpush1.bf16.msra.mxu1 %v972_v0 }
  0x49   : > { %557 = vmatmul.mubr.bf16.vlgmr.msra.gmra.mrb[0].mxu0 %v973_v1  ;;  %600 = vmatmul.mubr.bf16.vlgmr.msra.gmra.mrb[0].mxu1 %v973_v1 }
 0x11c   : > { %v558_v2 = vpop.f32.mrb[0].mxu0  ;;  %v601_v3 = vpop.f32.mrb[0].mxu1 }
 0x11d   : > { %v560_v4 = vpop.f32.mrb[1].mxu0  ;;  %v603_v5 = vpop.f32.mrb[1].mxu1  ;;  %v638_v6 = vmul.f32 %v558_v2, %v558_v2  ;;  %v640_v7 = vmul.f32 %v601_v3, %v601_v3 }
 0x11e   : > { %v639_v8 = vmul.f32 %v560_v4, %v560_v4  ;;  %v641_v9 = vmul.f32 %v603_v5, %v603_v5  ;;  %v562_v10 = vpop.f32.mrb[2].mxu0  ;;  %v605_v11 = vpop.f32.mrb[2].mxu1 }
 0x11f   : > { %v610_v12 = vadd.f32 %v562_v10, %v558_v2  ;;  %v642_v13 = vmul.f32 %v562_v10, %v562_v10  ;;  %v624_v14 = vadd.f32 %v605_v11, %v601_v3  ;;  %v644_v15 = vmul.f32 %v605_v11, %v605_v11  ;;  %v564_v16 = vpop.f32.mrb[3].mxu0  ;;  %v607_v17 = vpop.f32.mrb[3].mxu1 }
 0x120   : > { %v617_v18 = vadd.f32 %v564_v16, %v560_v4  ;;  %v643_v19 = vmul.f32 %v564_v16, %v564_v16  ;;  %v631_v20 = vadd.f32 %v607_v17, %v603_v5  ;;  %v645_v21 = vmul.f32 %v607_v17, %v607_v17 }
 0x121   : > { %v611_v22 = vrot.slane %v610_v12, 4  ;;  %v646_v23 = vadd.f32 %v642_v13, %v638_v6  ;;  %v625_v24 = vrot.slane %v624_v14, 4  ;;  %v660_v25 = vadd.f32 %v644_v15, %v640_v7 }
 0x122   : > { %v618_v26 = vrot.slane %v617_v18, 4  ;;  %v653_v27 = vadd.f32 %v643_v19, %v639_v8  ;;  %v632_v28 = vrot.slane %v631_v20, 4  ;;  %v667_v29 = vadd.f32 %v645_v21, %v641_v9 }
 0x123   : > { %v612_v30 = vadd.f32 %v611_v22, %v610_v12  ;;  %v647_v31 = vrot.slane %v646_v23, 4  ;;  %v626_v32 = vadd.f32 %v625_v24, %v624_v14  ;;  %v661_v33 = vrot.slane %v660_v25, 4 }
 0x124   : > { %v619_v34 = vadd.f32 %v618_v26, %v617_v18  ;;  %v654_v35 = vrot.slane %v653_v27, 4  ;;  %v633_v36 = vadd.f32 %v632_v28, %v631_v20  ;;  %v668_v37 = vrot.slane %v667_v29, 4 }
 0x125   : > { %v613_v38 = vrot.slane %v612_v30, 2  ;;  %v648_v39 = vadd.f32 %v647_v31, %v646_v23  ;;  %v627_v40 = vrot.slane %v626_v32, 2  ;;  %v662_v41 = vadd.f32 %v661_v33, %v660_v25 }
 0x126   : > { %v620_v42 = vrot.slane %v619_v34, 2  ;;  %v655_v43 = vadd.f32 %v654_v35, %v653_v27  ;;  %v634_v44 = vrot.slane %v633_v36, 2  ;;  %v669_v45 = vadd.f32 %v668_v37, %v667_v29 }
 0x127   : > { %v614_v46 = vadd.f32 %v613_v38, %v612_v30  ;;  %v649_v47 = vrot.slane %v648_v39, 2  ;;  %v628_v48 = vadd.f32 %v627_v40, %v626_v32  ;;  %v663_v49 = vrot.slane %v662_v41, 2 }
 0x128   : > { %v621_v50 = vadd.f32 %v620_v42, %v619_v34  ;;  %v656_v51 = vrot.slane %v655_v43, 2  ;;  %v635_v52 = vadd.f32 %v634_v44, %v633_v36  ;;  %v670_v53 = vrot.slane %v669_v45, 2 }
 0x129   : > { %v615_v54 = vrot.slane %v614_v46, 1  ;;  %v650_v55 = vadd.f32 %v649_v47, %v648_v39  ;;  %v629_v56 = vrot.slane %v628_v48, 1  ;;  %v664_v57 = vadd.f32 %v663_v49, %v662_v41 }
 0x12a   : > { %v622_v58 = vrot.slane %v621_v50, 1  ;;  %v657_v59 = vadd.f32 %v656_v51, %v655_v43  ;;  %v636_v60 = vrot.slane %v635_v52, 1  ;;  %v671_v61 = vadd.f32 %v670_v53, %v669_v45 }
 0x12b   : > { %v616_v62 = vadd.f32 %v615_v54, %v614_v46  ;;  %v651_v63 = vrot.slane %v650_v55, 1  ;;  %v630_v0 = vadd.f32 %v629_v56, %v628_v48  ;;  %v665_v1 = vrot.slane %v664_v57, 1 }
 0x12c   : > { %v623_v2 = vadd.f32 %v622_v58, %v621_v50  ;;  %v658_v3 = vrot.slane %v657_v59, 1  ;;  %v637_v4 = vadd.f32 %v636_v60, %v635_v52  ;;  %v672_v5 = vrot.slane %v671_v61, 1 }
 0x12d   : > { %v652_v6 = vadd.f32 %v651_v63, %v650_v55  ;;  %674 = vst [vmem:[%s311_s11] sm:$0xff] %v616_v62  ;;  %v666_v7 = vadd.f32 %v665_v1, %v664_v57  ;;  %676 = vst [vmem:[%s311_s11 + $0x10] sm:$0xff] %v630_v0 }
 0x12e   : > { %v659_v8 = vadd.f32 %v658_v3, %v657_v59  ;;  %675 = vst [vmem:[%s311_s11 + $0x8] sm:$0xff] %v623_v2  ;;  %v673_v9 = vadd.f32 %v672_v5, %v671_v61  ;;  %677 = vst [vmem:[%s311_s11 + $0x18] sm:$0xff] %v637_v4 }
 0x12f   : > { %678 = vst [vmem:[%s321_s18] sm:$0xff] %v652_v6  ;;  %680 = vst [vmem:[%s321_s18 + $0x10] sm:$0xff] %v666_v7 }
 0x130   : > { %679 = vst [vmem:[%s321_s18 + $0x8] sm:$0xff] %v659_v8  ;;  %681 = vst [vmem:[%s321_s18 + $0x18] sm:$0xff] %v673_v9 }
 0x131 PF: > { %s14_s16 = sadd.s32 1, %s1012_s16   ;;  %s1222_s12 = smov %s1000_s13 }
 0x132   : > { %p11_p10 = scmp.ge.s32.totalorder %s14_s16, 18   ;;  %s1223_s13 = smov %s1070_s20 }
 0x133   : > { %s1224_s14 = smov %s1008_s15  ;;  %s1225_s15 = smov %s1227_s17 }
 0x134   :  { %13 = sbr.rel (!%p11_p10) target bundleno = 3 (0x3), region = 101 }

// kernel: _lambda_.6
= control target key start
LH: loop header
LB: loop body
LE: loop exit
PB: predicated region body
PF: predicated region fallthrough
CT: control target
= control target key end

     0   :  { %s1088_s15 = smov 0   ;;  %s1090_s16 = smov 0   ;;  %s1276_s0 = inlined_call_operand.vmem [shape: bf16[16,128], index: 0, kind: input, shape index: {}]   ;;  %s1277_s1 = inlined_call_operand.vmem [shape: bf16[128,8192], index: 1, kind: input, shape index: {}]   ;;  %s1278_s2 = inlined_call_operand.vmem [shape: f32[1,8192], index: 2, kind: input, shape index: {}]   ;;  %s1279_s3 = inlined_call_operand.vmem [shape: f32[1,8192], index: 3, kind: input, shape index: {}]   ;;  %s1280_s4 = inlined_call_operand.vmem [shape: bf16[16,8192], index: 4, kind: output, shape index: {}]  }
   0x1   :  { %s1092_s17 = smov 0   ;;  %s1094_s18 = smov 0  }
   0x2   :  { %s1096_s19 = smov 0  }
   0x3 LB: > { %s23_s20 = sadd.s32 1, %s1056_s18  ;;  %s871_s21 = sadd.s32 4294967295, %s1060_s19   ;;  %s1060_s19 = sphi %s1096_s19, %s14_s19   ;;  %s1056_s18 = sphi %s1094_s18, %s1285_s18   ;;  %s1052_s17 = sphi %s1092_s17, %s1284_s17   ;;  %s1048_s16 = sphi %s1090_s16, %s1283_s16   ;;  %s1044_s15 = sphi %s1088_s15, %s1282_s15  }
   0x4   : > { %p24_p0 = scmp.ge.s32.totalorder %s23_s20, 16  ;;  %p66_p1 = scmp.ne.s32.totalorder %s1048_s16, %s1044_s15 }
   0x5   : > { %p67_p2 = scmp.eq.s32.totalorder %s1060_s19, 0  ;;  %p150_p4 = scmp.eq.s32.totalorder %s871_s21, 15 }
   0x6   : > { %s1287_s20 = smov (%p24_p0, %s23_s20), 0  ;;  %s59_s23 = sadd.s32 1, %s1048_s16 }
   0x7   : > { %p68_p3 = por %p67_p2, %p66_p1  ;;  %s56_s22 = ssub.s32 %s1056_s18, %s1287_s20 }
   0x8   : > { %p57_p5 = scmp.eq.s32.totalorder %s56_s22, 0  ;;  %p1123_p6 = por %p150_p4, %p66_p1 }
   0x9   : > { %p875_p7 = scmp.ge.s32.totalorder %s1060_s19, 16 }
   0xa   : > { %s1128_s25 = scalar_select %p57_p5, %s1048_s16, %s59_s23  }
   0xb   : > { %181 = sbr.rel (%p875_p7) target bundleno = 38 (0x26), region = 20 }
  0x12   : > { %184 = sbr.rel (!%p68_p3) target bundleno = 38 (0x26), region = 24  ;;  %s186_s26 = sand.u32 (%p68_p3), 1, %s1048_s16  }
  0x13   : > { %s926_s27 = sshll.u32 (%p68_p3), %s1056_s18, 4  ;;  %s876_s28 = sshll.u32 (%p68_p3), %s186_s26, 8 }
  0x14   : > { %s1136_s5 = scalar_lea.vmem (%p68_p3), %s1277_s1, %s926_s27  ;;  %s1141_s6 = scalar_lea.vmem (%p68_p3), [#allocation2], %s876_s28 }
  0x15   : > { %v204_v0 = vld [vmem:[%s1136_s5] sm:$0xff] (%p68_p3)  ;;  %v206_v1 = vld [vmem:[%s1136_s5 + $0x8] sm:$0xff] (%p68_p3) }
  0x16   : > { %v208_v2 = vld [vmem:[%s1136_s5 + $0x100] sm:$0xff] (%p68_p3)  ;;  %205 = vst [vmem:[%s1141_s6] sm:$0xff] (%p68_p3), %v204_v0  ;;  %207 = vst [vmem:[%s1141_s6 + $0x8] sm:$0xff] (%p68_p3), %v206_v1  ;;  %v210_v3 = vld [vmem:[%s1136_s5 + $0x108] sm:$0xff] (%p68_p3) }
  0x17   : > { %209 = vst [vmem:[%s1141_s6 + $0x10] sm:$0xff] (%p68_p3), %v208_v2  ;;  %v212_v4 = vld [vmem:[%s1136_s5 + $0x200] sm:$0xff] (%p68_p3)  ;;  %v214_v5 = vld [vmem:[%s1136_s5 + $0x208] sm:$0xff] (%p68_p3)  ;;  %211 = vst [vmem:[%s1141_s6 + $0x18] sm:$0xff] (%p68_p3), %v210_v3 }
  0x18   : > { %213 = vst [vmem:[%s1141_s6 + $0x20] sm:$0xff] (%p68_p3), %v212_v4  ;;  %215 = vst [vmem:[%s1141_s6 + $0x28] sm:$0xff] (%p68_p3), %v214_v5  ;;  %v216_v6 = vld [vmem:[%s1136_s5 + $0x300] sm:$0xff] (%p68_p3)  ;;  %v218_v7 = vld [vmem:[%s1136_s5 + $0x308] sm:$0xff] (%p68_p3) }
  0x19   : > { %v220_v8 = vld [vmem:[%s1136_s5 + $0x400] sm:$0xff]  ;;  %217 = vst [vmem:[%s1141_s6 + $0x30] sm:$0xff] %v216_v6  ;;  %219 = vst [vmem:[%s1141_s6 + $0x38] sm:$0xff] %v218_v7  ;;  %v222_v9 = vld [vmem:[%s1136_s5 + $0x408] sm:$0xff] }
  0x1a   : > { %221 = vst [vmem:[%s1141_s6 + $0x40] sm:$0xff] %v220_v8  ;;  %v224_v10 = vld [vmem:[%s1136_s5 + $0x500] sm:$0xff]  ;;  %v226_v11 = vld [vmem:[%s1136_s5 + $0x508] sm:$0xff]  ;;  %223 = vst [vmem:[%s1141_s6 + $0x48] sm:$0xff] %v222_v9 }
  0x1b   : > { %225 = vst [vmem:[%s1141_s6 + $0x50] sm:$0xff] %v224_v10  ;;  %227 = vst [vmem:[%s1141_s6 + $0x58] sm:$0xff] %v226_v11  ;;  %v228_v12 = vld [vmem:[%s1136_s5 + $0x600] sm:$0xff]  ;;  %v230_v13 = vld [vmem:[%s1136_s5 + $0x608] sm:$0xff] }
  0x1c   : > { %v232_v14 = vld [vmem:[%s1136_s5 + $0x700] sm:$0xff]  ;;  %229 = vst [vmem:[%s1141_s6 + $0x60] sm:$0xff] %v228_v12  ;;  %231 = vst [vmem:[%s1141_s6 + $0x68] sm:$0xff] %v230_v13  ;;  %v234_v15 = vld [vmem:[%s1136_s5 + $0x708] sm:$0xff] }
  0x1d   : > { %233 = vst [vmem:[%s1141_s6 + $0x70] sm:$0xff] %v232_v14  ;;  %v236_v16 = vld [vmem:[%s1136_s5 + $0x800] sm:$0xff]  ;;  %v238_v17 = vld [vmem:[%s1136_s5 + $0x808] sm:$0xff]  ;;  %235 = vst [vmem:[%s1141_s6 + $0x78] sm:$0xff] %v234_v15 }
  0x1e   : > { %237 = vst [vmem:[%s1141_s6 + $0x80] sm:$0xff] %v236_v16  ;;  %239 = vst [vmem:[%s1141_s6 + $0x88] sm:$0xff] %v238_v17  ;;  %v240_v18 = vld [vmem:[%s1136_s5 + $0x900] sm:$0xff]  ;;  %v242_v19 = vld [vmem:[%s1136_s5 + $0x908] sm:$0xff] }
  0x1f   : > { %v244_v20 = vld [vmem:[%s1136_s5 + $0xa00] sm:$0xff]  ;;  %241 = vst [vmem:[%s1141_s6 + $0x90] sm:$0xff] %v240_v18  ;;  %243 = vst [vmem:[%s1141_s6 + $0x98] sm:$0xff] %v242_v19  ;;  %v246_v21 = vld [vmem:[%s1136_s5 + $0xa08] sm:$0xff] }
  0x20   : > { %245 = vst [vmem:[%s1141_s6 + $0xa0] sm:$0xff] %v244_v20  ;;  %v248_v22 = vld [vmem:[%s1136_s5 + $0xb00] sm:$0xff]  ;;  %v250_v23 = vld [vmem:[%s1136_s5 + $0xb08] sm:$0xff]  ;;  %247 = vst [vmem:[%s1141_s6 + $0xa8] sm:$0xff] %v246_v21 }
  0x21   : > { %249 = vst [vmem:[%s1141_s6 + $0xb0] sm:$0xff] %v248_v22  ;;  %251 = vst [vmem:[%s1141_s6 + $0xb8] sm:$0xff] %v250_v23  ;;  %v252_v24 = vld [vmem:[%s1136_s5 + $0xc00] sm:$0xff]  ;;  %v254_v25 = vld [vmem:[%s1136_s5 + $0xc08] sm:$0xff] }
  0x22   : > { %v256_v26 = vld [vmem:[%s1136_s5 + $0xd00] sm:$0xff]  ;;  %253 = vst [vmem:[%s1141_s6 + $0xc0] sm:$0xff] %v252_v24  ;;  %255 = vst [vmem:[%s1141_s6 + $0xc8] sm:$0xff] %v254_v25  ;;  %v258_v27 = vld [vmem:[%s1136_s5 + $0xd08] sm:$0xff] }
  0x23   : > { %257 = vst [vmem:[%s1141_s6 + $0xd0] sm:$0xff] %v256_v26  ;;  %v260_v28 = vld [vmem:[%s1136_s5 + $0xe00] sm:$0xff]  ;;  %v262_v29 = vld [vmem:[%s1136_s5 + $0xe08] sm:$0xff]  ;;  %259 = vst [vmem:[%s1141_s6 + $0xd8] sm:$0xff] %v258_v27 }
  0x24   : > { %261 = vst [vmem:[%s1141_s6 + $0xe0] sm:$0xff] %v260_v28  ;;  %263 = vst [vmem:[%s1141_s6 + $0xe8] sm:$0xff] %v262_v29  ;;  %v264_v30 = vld [vmem:[%s1136_s5 + $0xf00] sm:$0xff]  ;;  %v266_v31 = vld [vmem:[%s1136_s5 + $0xf08] sm:$0xff] }
  0x25   : > { %265 = vst [vmem:[%s1141_s6 + $0xf0] sm:$0xff] %v264_v30  ;;  %267 = vst [vmem:[%s1141_s6 + $0xf8] sm:$0xff] %v266_v31 }
  0x26 PF: > { %p879_p8 = scmp.ge.s32.totalorder %s1060_s19, 1  ;;  %p288_p9 = scmp.lt.s32.totalorder %s1060_s19, 17 }
  0x28   : > { %p289_p10 = pnand %p879_p8, %p288_p9 }
  0x29   : > { %s295_s7 = sand.u32 (!%p289_p10), 1, %s1044_s15   ;;  %v1062_v32 = vmov (!%p289_p10), 0   ;;  %v1021_v1 = vld [vmem:[%s1276_s0] sm:$0xff] (!%p289_p10)   ;;  %s882_s12 = sshll.u32 (!%p289_p10), %s1052_s17, 2  ;;  %v640_v2 = vlaneseq (!%p289_p10) }
  0x2a   : > { %292 = sbr.rel (%p289_p10) target bundleno = 309 (0x135), region = 55  ;;  %s880_s8 = sshll.u32 (!%p289_p10), %s295_s7, 8  ;;  %584 = vmatprep.mubr.bf16.mxu0 (!%p289_p10), %v1062_v32  ;;  %627 = vmatprep.mubr.bf16.mxu1 (!%p289_p10), %v1062_v32 }
  0x2b   : > { %s1209_s9 = scalar_lea.vmem (!%p289_p10), [#allocation2], %s880_s8  ;;  %p340_p11 = scmp.lt.s32.totalorder (!%p289_p10), %s882_s12, 63  ;;  %v641_v3 = vshrl.u32 (!%p289_p10), %v640_v2, 7 }
  0x2c   : > { %v973_v33 = vld [vmem:[%s1209_s9 + $0x4] ss:$16 sps:$4 sm:$0xff] (!%p289_p10)   ;;  %v975_v34 = vld [vmem:[%s1209_s9 + $0xc] ss:$16 sps:$4 sm:$0xff] (!%p289_p10)   ;;  %v977_v35 = vld [vmem:[%s1209_s9] ss:$16 sps:$4 sm:$0xff] (!%p289_p10)  }
  0x2d   : > { %552 = vmatprep.subr.bf16.mxu0 (!%p289_p10), %v973_v33  ;;  %v978_v36 = vld [vmem:[%s1209_s9 + $0x8] ss:$16 sps:$4 sm:$0xff] (!%p289_p10)   ;;  %595 = vmatprep.subr.bf16.mxu1 (!%p289_p10), %v975_v34  ;;  %v979_v37 = vld [vmem:[%s1209_s9 + $0x24] ss:$16 sps:$4 sm:$0xff] (!%p289_p10)   ;;  %v981_v38 = vld [vmem:[%s1209_s9 + $0x2c] ss:$16 sps:$4 sm:$0xff] (!%p289_p10)  }
  0x2e   : > { %553 = vmatpush1.bf16.msra.mxu0 (!%p289_p10), %v977_v35  ;;  %596 = vmatpush1.bf16.msra.mxu1 (!%p289_p10), %v978_v36  ;;  %v983_v39 = vld [vmem:[%s1209_s9 + $0x20] ss:$16 sps:$4 sm:$0xff] (!%p289_p10)   ;;  %v984_v40 = vld [vmem:[%s1209_s9 + $0x28] ss:$16 sps:$4 sm:$0xff] (!%p289_p10)   ;;  %v985_v41 = vld [vmem:[%s1209_s9 + $0x44] ss:$16 sps:$4 sm:$0xff] (!%p289_p10)  }
  0x2f   : > { %554 = vmatprep.subr.bf16.mxu0 (!%p289_p10), %v979_v37  ;;  %597 = vmatprep.subr.bf16.mxu1 (!%p289_p10), %v981_v38  ;;  %v987_v42 = vld [vmem:[%s1209_s9 + $0x4c] ss:$16 sps:$4 sm:$0xff] (!%p289_p10)   ;;  %v989_v43 = vld [vmem:[%s1209_s9 + $0x40] ss:$16 sps:$4 sm:$0xff] (!%p289_p10)   ;;  %v990_v44 = vld [vmem:[%s1209_s9 + $0x48] ss:$16 sps:$4 sm:$0xff] (!%p289_p10)  }
  0x30   : > { %v991_v45 = vld [vmem:[%s1209_s9 + $0x64] ss:$16 sps:$4 sm:$0xff] (!%p289_p10)   ;;  %v993_v46 = vld [vmem:[%s1209_s9 + $0x6c] ss:$16 sps:$4 sm:$0xff] (!%p289_p10)   ;;  %v995_v47 = vld [vmem:[%s1209_s9 + $0x60] ss:$16 sps:$4 sm:$0xff] (!%p289_p10)  }
  0x31   : > { %v996_v48 = vld [vmem:[%s1209_s9 + $0x68] ss:$16 sps:$4 sm:$0xff]   ;;  %v997_v49 = vld [vmem:[%s1209_s9 + $0x84] ss:$16 sps:$4 sm:$0xff]   ;;  %v999_v50 = vld [vmem:[%s1209_s9 + $0x8c] ss:$16 sps:$4 sm:$0xff]  }
  0x32   : > { %555 = vmatpush1.bf16.msra.mxu0 %v983_v39  ;;  %598 = vmatpush1.bf16.msra.mxu1 %v984_v40  ;;  %v1001_v51 = vld [vmem:[%s1209_s9 + $0x80] ss:$16 sps:$4 sm:$0xff]   ;;  %v1002_v52 = vld [vmem:[%s1209_s9 + $0x88] ss:$16 sps:$4 sm:$0xff]   ;;  %v1003_v53 = vld [vmem:[%s1209_s9 + $0xa4] ss:$16 sps:$4 sm:$0xff]  }
  0x33   : > { %556 = vmatprep.subr.bf16.mxu0 %v985_v41  ;;  %599 = vmatprep.subr.bf16.mxu1 %v987_v42  ;;  %v1005_v54 = vld [vmem:[%s1209_s9 + $0xac] ss:$16 sps:$4 sm:$0xff]   ;;  %v1007_v55 = vld [vmem:[%s1209_s9 + $0xa0] ss:$16 sps:$4 sm:$0xff]   ;;  %v1008_v56 = vld [vmem:[%s1209_s9 + $0xa8] ss:$16 sps:$4 sm:$0xff]  }
  0x34   : > { %v1009_v57 = vld [vmem:[%s1209_s9 + $0xc4] ss:$16 sps:$4 sm:$0xff]   ;;  %v1011_v58 = vld [vmem:[%s1209_s9 + $0xcc] ss:$16 sps:$4 sm:$0xff]   ;;  %v1013_v59 = vld [vmem:[%s1209_s9 + $0xc0] ss:$16 sps:$4 sm:$0xff]  }
  0x35   : > { %v1014_v60 = vld [vmem:[%s1209_s9 + $0xc8] ss:$16 sps:$4 sm:$0xff]   ;;  %v1015_v61 = vld [vmem:[%s1209_s9 + $0xe4] ss:$16 sps:$4 sm:$0xff]   ;;  %v1017_v62 = vld [vmem:[%s1209_s9 + $0xec] ss:$16 sps:$4 sm:$0xff]  }
  0x36   : > { %557 = vmatpush1.bf16.msra.mxu0 %v989_v43  ;;  %600 = vmatpush1.bf16.msra.mxu1 %v990_v44  ;;  %v1019_v63 = vld [vmem:[%s1209_s9 + $0xe0] ss:$16 sps:$4 sm:$0xff]   ;;  %v1020_v0 = vld [vmem:[%s1209_s9 + $0xe8] ss:$16 sps:$4 sm:$0xff]   ;;  %s1289_s12 = smov (!%p340_p11, %s882_s12), 63  ;;  %v642_v4 = vsub.s32 0, %v641_v3 }
  0x37   : > { %558 = vmatprep.subr.bf16.mxu0 %v991_v45  ;;  %601 = vmatprep.subr.bf16.mxu1 %v993_v46  ;;  %s342_s21 = scalar_lea.vmem %s1278_s2, %s1289_s12  ;;  %s347_s26 = scalar_lea.vmem %s1279_s3, %s1289_s12  ;;  %v650_v5 = vsub.s32 2, %v641_v3  ;;  %v646_v7 = vsub.s32 1, %v641_v3  ;;  %v654_v8 = vsub.s32 3, %v641_v3 }
  0x38   : > { %v638_v6 = vld [vmem:[%s342_s21] sm:$0xf]  ;;  %s881_s27 = sshll.u32 %s295_s7, 5  ;;  %s931_s28 = sshll.u32 (%p1123_p6), %s1052_s17, 4 }
  0x39   : > { %v668_v9 = vld [vmem:[%s347_s26] sm:$0xf]  ;;  %v643_v10 = vrot.slane %v638_v6, %v642_v4  ;;  %v651_v11 = vrot.slane %v638_v6, %v650_v5  ;;  %v647_v12 = vrot.slane %v638_v6, %v646_v7  ;;  %v655_v13 = vrot.slane %v638_v6, %v654_v8  ;;  %s331_s15 = scalar_lea.vmem [#allocation3], %s881_s27  ;;  %s746_s5 = scalar_lea.vmem (%p1123_p6), %s1280_s4, %s931_s28 }
  0x3a   : > { %559 = vmatpush1.bf16.msra.mxu0 %v995_v47  ;;  %602 = vmatpush1.bf16.msra.mxu1 %v996_v48  ;;  %v673_v14 = vrot.slane %v668_v9, %v642_v4  ;;  %v681_v15 = vrot.slane %v668_v9, %v650_v5  ;;  %v677_v18 = vrot.slane %v668_v9, %v646_v7 }
  0x3b   : > { %560 = vmatprep.subr.bf16.mxu0 %v997_v49  ;;  %603 = vmatprep.subr.bf16.mxu1 %v999_v50  ;;  %v685_v19 = vrot.slane %v668_v9, %v654_v8 }
  0x3e   : > { %561 = vmatpush1.bf16.msra.mxu0 %v1001_v51  ;;  %604 = vmatpush1.bf16.msra.mxu1 %v1002_v52 }
  0x3f   : > { %562 = vmatprep.subr.bf16.mxu0 %v1003_v53  ;;  %605 = vmatprep.subr.bf16.mxu1 %v1005_v54 }
  0x42   : > { %563 = vmatpush1.bf16.msra.mxu0 %v1007_v55  ;;  %606 = vmatpush1.bf16.msra.mxu1 %v1008_v56 }
  0x43   : > { %564 = vmatprep.subr.bf16.mxu0 %v1009_v57  ;;  %607 = vmatprep.subr.bf16.mxu1 %v1011_v58 }
  0x46   : > { %565 = vmatpush1.bf16.msra.mxu0 %v1013_v59  ;;  %608 = vmatpush1.bf16.msra.mxu1 %v1014_v60 }
  0x47   : > { %566 = vmatprep.subr.bf16.mxu0 %v1015_v61  ;;  %609 = vmatprep.subr.bf16.mxu1 %v1017_v62 }
  0x4a   : > { %567 = vmatpush1.bf16.msra.mxu0 %v1019_v63  ;;  %610 = vmatpush1.bf16.msra.mxu1 %v1020_v0 }
  0x4d   : > { %585 = vmatmul.mubr.bf16.vlgmr.msra.gmra.mrb[0].mxu0 %v1021_v1  ;;  %628 = vmatmul.mubr.bf16.vlgmr.msra.gmra.mrb[0].mxu1 %v1021_v1 }
 0x120   : > { %v586_v16 = vpop.f32.mrb[0].mxu0  ;;  %v629_v17 = vpop.f32.mrb[0].mxu1 }
 0x121   : > { %v660_v20 = vmul.f32 %v643_v10, %v586_v16  ;;  %v662_v21 = vmul.f32 %v651_v11, %v629_v17  ;;  %v588_v22 = vpop.f32.mrb[1].mxu0  ;;  %v631_v23 = vpop.f32.mrb[1].mxu1 }
 0x122   : > { %v661_v24 = vmul.f32 %v647_v12, %v588_v22  ;;  %v663_v25 = vmul.f32 %v655_v13, %v631_v23  ;;  %v590_v26 = vpop.f32.mrb[2].mxu0  ;;  %v633_v27 = vpop.f32.mrb[2].mxu1 }
 0x123   : > { %v690_v28 = vadd.f32 %v673_v14, %v660_v20  ;;  %v692_v29 = vadd.f32 %v681_v15, %v662_v21  ;;  %v664_v30 = vmul.f32 %v643_v10, %v590_v26  ;;  %v666_v31 = vmul.f32 %v651_v11, %v633_v27  ;;  %v592_v32 = vpop.f32.mrb[3].mxu0  ;;  %v635_v33 = vpop.f32.mrb[3].mxu1 }
 0x124   : > { %v691_v34 = vadd.f32 %v677_v18, %v661_v24  ;;  %v693_v35 = vadd.f32 %v685_v19, %v663_v25  ;;  %v665_v36 = vmul.f32 %v647_v12, %v592_v32  ;;  %v667_v37 = vmul.f32 %v655_v13, %v635_v33 }
 0x125   : > { %v698_v38 = vmax.f32 %v690_v28, 0.0  ;;  %v700_v39 = vmax.f32 %v692_v29, 0.0  ;;  %v694_v40 = vadd.f32 %v673_v14, %v664_v30  ;;  %v696_v41 = vadd.f32 %v681_v15, %v666_v31 }
 0x126   : > { %v699_v42 = vmax.f32 %v691_v34, 0.0  ;;  %v701_v43 = vmax.f32 %v693_v35, 0.0  ;;  %v695_v44 = vadd.f32 %v677_v18, %v665_v36  ;;  %v697_v45 = vadd.f32 %v685_v19, %v667_v37  ;;  %740 = sbr.rel (!%p1123_p6) target bundleno = 309 (0x135), region = 63 }
 0x127   : > { %v702_v46 = vmax.f32 %v694_v40, 0.0  ;;  %v704_v47 = vmax.f32 %v696_v41, 0.0 }
 0x128   : > { %v927_v48 = vpack.c.bf16 %v699_v42, %v698_v38  ;;  %v928_v49 = vpack.c.bf16 %v701_v43, %v700_v39  ;;  %v703_v50 = vmax.f32 %v695_v44, 0.0  ;;  %v705_v51 = vmax.f32 %v697_v45, 0.0 }
 0x12a   : > { %730 = vst [vmem:[%s331_s15] sm:$0xff] %v927_v48  ;;  %731 = vst [vmem:[%s331_s15 + $0x8] sm:$0xff] %v928_v49  ;;  %v929_v52 = vpack.c.bf16 %v703_v50, %v702_v46  ;;  %v930_v53 = vpack.c.bf16 %v705_v51, %v704_v47 }
 0x12c   : > { %732 = vst [vmem:[%s331_s15 + $0x10] sm:$0xff] %v929_v52  ;;  %733 = vst [vmem:[%s331_s15 + $0x18] sm:$0xff] %v930_v53 }
 0x131   : > { %v759_v54 = vld [vmem:[%s331_s15] sm:$0xff]  ;;  %v761_v55 = vld [vmem:[%s331_s15 + $0x8] sm:$0xff] }
 0x132   : > { %760 = vst [vmem:[%s746_s5] sm:$0xff] %v759_v54  ;;  %762 = vst [vmem:[%s746_s5 + $0x8] sm:$0xff] %v761_v55 }
 0x133   : > { %v763_v56 = vld [vmem:[%s331_s15 + $0x10] sm:$0xff]  ;;  %v765_v57 = vld [vmem:[%s331_s15 + $0x18] sm:$0xff] }
 0x134   : > { %764 = vst [vmem:[%s746_s5 + $0x100] sm:$0xff] %v763_v56  ;;  %766 = vst [vmem:[%s746_s5 + $0x108] sm:$0xff] %v765_v57 }
 0x135 PF: > { %s14_s19 = sadd.s32 1, %s1060_s19   ;;  %s1282_s15 = smov %s1048_s16 }
 0x136   : > { %p11_p12 = scmp.ge.s32.totalorder %s14_s19, 18   ;;  %s1283_s16 = smov %s1128_s25 }
 0x137   : > { %s1284_s17 = smov %s1056_s18  ;;  %s1285_s18 = smov %s1287_s20 }
 0x138   :  { %13 = sbr.rel (!%p11_p12) target bundleno = 3 (0x3), region = 126 }

// kernel: tile.38
= control target key start
LH: loop header
LB: loop body
LE: loop exit
PB: predicated region body
PF: predicated region fallthrough
CT: control target
= control target key end

     0   :  { %s22_s0 = inlined_call_operand.vmem [shape: f32[128], index: 0, kind: input, shape index: {}]   ;;  %s23_s1 = inlined_call_operand.vmem [shape: f32[4,128], index: 1, kind: output, shape index: {}]  }
   0x1   :  { %v4_v0 = vld [vmem:[%s22_s0] ss:$0 sm:$0xff] }
   0x2   :  { %5 = vst [vmem:[%s23_s1] sm:$0xf] %v4_v0 }

// kernel: _lambda_.8
= control target key start
LH: loop header
LB: loop body
LE: loop exit
PB: predicated region body
PF: predicated region fallthrough
CT: control target
= control target key end

     0   :  { %v112_v0 = vlaneseq  ;;  %s1000_s0 = inlined_call_operand.vmem [shape: bf16[128,512], index: 0, kind: input, shape index: {}]   ;;  %s1001_s1 = inlined_call_operand.vmem [shape: f32[1,512], index: 1, kind: input, shape index: {}]   ;;  %s1002_s2 = inlined_call_operand.vmem [shape: f32[1,512], index: 2, kind: input, shape index: {}]   ;;  %s1003_s3 = inlined_call_operand.vmem [shape: bf16[128,512], index: 3, kind: output, shape index: {}]  }
   0x1   :  { %v14_v1 = vld [vmem:[%s1000_s0] sm:$0xff]  ;;  %v15_v5 = vld [vmem:[%s1000_s0 + $0x8] sm:$0xff]  ;;  %v16_v6 = vld [vmem:[%s1000_s0 + $0x10] sm:$0xff] }
   0x2   :  { %v46_v2 = vunpack.c.l.bf16 %v14_v1  ;;  %v47_v3 = vunpack.c.h.bf16 %v14_v1  ;;  %v113_v4 = vshrl.u32 %v112_v0, 7  ;;  %v17_v7 = vld [vmem:[%s1000_s0 + $0x18] sm:$0xff]  ;;  %v110_v8 = vld [vmem:[%s1001_s1] sm:$0xf]  ;;  %v48_v10 = vunpack.c.l.bf16 %v15_v5  ;;  %v19_v51 = vld [vmem:[%s1000_s0 + $0x28] sm:$0xff] }
   0x3   :  { %v196_v9 = vld [vmem:[%s1002_s2] sm:$0xf]  ;;  %v49_v11 = vunpack.c.h.bf16 %v15_v5  ;;  %v50_v12 = vunpack.c.l.bf16 %v16_v6  ;;  %v51_v13 = vunpack.c.h.bf16 %v16_v6  ;;  %v52_v19 = vunpack.c.l.bf16 %v17_v7  ;;  %v20_v56 = vld [vmem:[%s1000_s0 + $0x30] sm:$0xff]  ;;  %v21_v61 = vld [vmem:[%s1000_s0 + $0x38] sm:$0xff] }
   0x4   :  { %v18_v14 = vld [vmem:[%s1000_s0 + $0x20] sm:$0xff]  ;;  %v114_v15 = vsub.s32 0, %v113_v4  ;;  %v118_v16 = vsub.s32 1, %v113_v4  ;;  %v122_v17 = vsub.s32 2, %v113_v4  ;;  %v126_v18 = vsub.s32 3, %v113_v4 }
   0x5   :  { %v53_v20 = vunpack.c.h.bf16 %v17_v7  ;;  %v54_v21 = vunpack.c.l.bf16 %v18_v14  ;;  %v55_v22 = vunpack.c.h.bf16 %v18_v14  ;;  %v56_v0 = vunpack.c.l.bf16 %v19_v51 }
   0x6   :  { %v679_v23 = vrot.slane %v110_v8, %v114_v15  ;;  %v681_v24 = vrot.slane %v110_v8, %v118_v16  ;;  %v683_v25 = vrot.slane %v196_v9, %v114_v15  ;;  %v685_v26 = vrot.slane %v196_v9, %v118_v16 }
   0x7   :  { %v687_v27 = vrot.slane %v110_v8, %v122_v17  ;;  %v689_v28 = vrot.slane %v110_v8, %v126_v18  ;;  %v691_v29 = vrot.slane %v196_v9, %v122_v17  ;;  %v693_v30 = vrot.slane %v196_v9, %v126_v18 }
   0x8   :  { %v132_v31 = vmul.f32 %v679_v23, %v46_v2  ;;  %v133_v32 = vmul.f32 %v681_v24, %v47_v3  ;;  %v136_v33 = vmul.f32 %v679_v23, %v50_v12  ;;  %v137_v34 = vmul.f32 %v681_v24, %v51_v13 }
   0x9   :  { %v134_v35 = vmul.f32 %v687_v27, %v48_v10  ;;  %v135_v36 = vmul.f32 %v689_v28, %v49_v11  ;;  %v138_v37 = vmul.f32 %v687_v27, %v52_v19  ;;  %v139_v38 = vmul.f32 %v689_v28, %v53_v20  ;;  %v22_v10 = vld [vmem:[%s1000_s0 + $0x40] sm:$0xff] }
   0xa   :  { %v218_v39 = vadd.f32 %v683_v25, %v132_v31  ;;  %v219_v40 = vadd.f32 %v685_v26, %v133_v32  ;;  %v222_v41 = vadd.f32 %v683_v25, %v136_v33  ;;  %v223_v42 = vadd.f32 %v685_v26, %v137_v34  ;;  %v23_v31 = vld [vmem:[%s1000_s0 + $0x48] sm:$0xff] }
   0xb   :  { %v220_v43 = vadd.f32 %v691_v29, %v134_v35  ;;  %v221_v44 = vadd.f32 %v693_v30, %v135_v36  ;;  %v224_v45 = vadd.f32 %v691_v29, %v138_v37  ;;  %v225_v46 = vadd.f32 %v693_v30, %v139_v38 }
   0xc   :  { %v282_v47 = vmax.f32 %v218_v39, 0.0  ;;  %v283_v48 = vmax.f32 %v219_v40, 0.0  ;;  %v286_v49 = vmax.f32 %v222_v41, 0.0  ;;  %v287_v50 = vmax.f32 %v223_v42, 0.0  ;;  %v24_v40 = vld [vmem:[%s1000_s0 + $0x50] sm:$0xff] }
   0xd   :  { %v284_v52 = vmax.f32 %v220_v43, 0.0  ;;  %v285_v53 = vmax.f32 %v221_v44, 0.0  ;;  %v288_v54 = vmax.f32 %v224_v45, 0.0  ;;  %v289_v55 = vmax.f32 %v225_v46, 0.0  ;;  %v25_v45 = vld [vmem:[%s1000_s0 + $0x58] sm:$0xff] }
   0xe   :  { %v606_v57 = vpack.c.bf16 %v283_v48, %v282_v47  ;;  %v608_v58 = vpack.c.bf16 %v287_v50, %v286_v49  ;;  %v140_v59 = vmul.f32 %v679_v23, %v54_v21  ;;  %v141_v60 = vmul.f32 %v681_v24, %v55_v22 }
   0xf   :  { %v607_v62 = vpack.c.bf16 %v285_v53, %v284_v52  ;;  %v609_v63 = vpack.c.bf16 %v289_v55, %v288_v54  ;;  %v57_v1 = vunpack.c.h.bf16 %v19_v51  ;;  %v58_v4 = vunpack.c.l.bf16 %v20_v56  ;;  %v26_v54 = vld [vmem:[%s1000_s0 + $0x60] sm:$0xff] }
  0x10   :  { %538 = vst [vmem:[%s1003_s3] sm:$0xff] %v606_v57  ;;  %540 = vst [vmem:[%s1003_s3 + $0x10] sm:$0xff] %v608_v58  ;;  %v226_v2 = vadd.f32 %v683_v25, %v140_v59  ;;  %v227_v3 = vadd.f32 %v685_v26, %v141_v60  ;;  %v59_v5 = vunpack.c.h.bf16 %v20_v56  ;;  %v142_v6 = vmul.f32 %v687_v27, %v56_v0 }
  0x11   :  { %539 = vst [vmem:[%s1003_s3 + $0x8] sm:$0xff] %v607_v62  ;;  %541 = vst [vmem:[%s1003_s3 + $0x18] sm:$0xff] %v609_v63  ;;  %v143_v7 = vmul.f32 %v689_v28, %v57_v1  ;;  %v60_v8 = vunpack.c.l.bf16 %v21_v61  ;;  %v61_v9 = vunpack.c.h.bf16 %v21_v61  ;;  %v144_v13 = vmul.f32 %v679_v23, %v58_v4 }
  0x12   :  { %v290_v11 = vmax.f32 %v226_v2, 0.0  ;;  %v291_v12 = vmax.f32 %v227_v3, 0.0  ;;  %v145_v14 = vmul.f32 %v681_v24, %v59_v5  ;;  %v228_v15 = vadd.f32 %v691_v29, %v142_v6 }
  0x13   :  { %v229_v16 = vadd.f32 %v693_v30, %v143_v7  ;;  %v146_v17 = vmul.f32 %v687_v27, %v60_v8  ;;  %v147_v18 = vmul.f32 %v689_v28, %v61_v9  ;;  %v230_v20 = vadd.f32 %v683_v25, %v144_v13  ;;  %v27_v7 = vld [vmem:[%s1000_s0 + $0x68] sm:$0xff] }
  0x14   :  { %v610_v19 = vpack.c.bf16 %v291_v12, %v290_v11  ;;  %v231_v21 = vadd.f32 %v685_v26, %v145_v14  ;;  %v62_v22 = vunpack.c.l.bf16 %v22_v10  ;;  %v292_v32 = vmax.f32 %v228_v15, 0.0 }
  0x15   :  { %v293_v33 = vmax.f32 %v229_v16, 0.0  ;;  %v232_v34 = vadd.f32 %v691_v29, %v146_v17  ;;  %v233_v35 = vadd.f32 %v693_v30, %v147_v18  ;;  %v294_v36 = vmax.f32 %v230_v20, 0.0  ;;  %v28_v16 = vld [vmem:[%s1000_s0 + $0x70] sm:$0xff] }
  0x16   :  { %542 = vst [vmem:[%s1003_s3 + $0x20] sm:$0xff] %v610_v19  ;;  %v295_v37 = vmax.f32 %v231_v21, 0.0  ;;  %v63_v38 = vunpack.c.h.bf16 %v22_v10  ;;  %v148_v39 = vmul.f32 %v679_v23, %v62_v22  ;;  %v64_v44 = vunpack.c.l.bf16 %v23_v31  ;;  %v29_v21 = vld [vmem:[%s1000_s0 + $0x78] sm:$0xff] }
  0x17   :  { %v611_v41 = vpack.c.bf16 %v293_v33, %v292_v32  ;;  %v296_v42 = vmax.f32 %v232_v34, 0.0  ;;  %v297_v43 = vmax.f32 %v233_v35, 0.0  ;;  %v65_v49 = vunpack.c.h.bf16 %v23_v31 }
  0x18   :  { %v612_v46 = vpack.c.bf16 %v295_v37, %v294_v36  ;;  %v149_v47 = vmul.f32 %v681_v24, %v63_v38  ;;  %v234_v48 = vadd.f32 %v683_v25, %v148_v39  ;;  %v150_v51 = vmul.f32 %v687_v27, %v64_v44  ;;  %v30_v38 = vld [vmem:[%s1000_s0 + $0x80] sm:$0xff] }
  0x19   :  { %543 = vst [vmem:[%s1003_s3 + $0x28] sm:$0xff] %v611_v41  ;;  %v613_v50 = vpack.c.bf16 %v297_v43, %v296_v42  ;;  %v66_v52 = vunpack.c.l.bf16 %v24_v40  ;;  %v67_v53 = vunpack.c.h.bf16 %v24_v40  ;;  %v151_v57 = vmul.f32 %v689_v28, %v65_v49 }
  0x1a   :  { %544 = vst [vmem:[%s1003_s3 + $0x30] sm:$0xff] %v612_v46  ;;  %v235_v55 = vadd.f32 %v685_v26, %v149_v47  ;;  %v298_v56 = vmax.f32 %v234_v48, 0.0  ;;  %v68_v58 = vunpack.c.l.bf16 %v25_v45  ;;  %v236_v59 = vadd.f32 %v691_v29, %v150_v51  ;;  %v31_v51 = vld [vmem:[%s1000_s0 + $0x88] sm:$0xff] }
  0x1b   :  { %545 = vst [vmem:[%s1003_s3 + $0x38] sm:$0xff] %v613_v50  ;;  %v152_v60 = vmul.f32 %v679_v23, %v66_v52  ;;  %v153_v61 = vmul.f32 %v681_v24, %v67_v53  ;;  %v69_v62 = vunpack.c.h.bf16 %v25_v45  ;;  %v237_v0 = vadd.f32 %v693_v30, %v151_v57 }
  0x1c   :  { %v299_v63 = vmax.f32 %v235_v55, 0.0  ;;  %v154_v1 = vmul.f32 %v687_v27, %v68_v58  ;;  %v70_v2 = vunpack.c.l.bf16 %v26_v54  ;;  %v300_v3 = vmax.f32 %v236_v59, 0.0 }
  0x1d   :  { %v238_v4 = vadd.f32 %v683_v25, %v152_v60  ;;  %v239_v5 = vadd.f32 %v685_v26, %v153_v61  ;;  %v155_v6 = vmul.f32 %v689_v28, %v69_v62  ;;  %v301_v9 = vmax.f32 %v237_v0, 0.0  ;;  %v32_v0 = vld [vmem:[%s1000_s0 + $0x90] sm:$0xff] }
  0x1e   :  { %v614_v8 = vpack.c.bf16 %v299_v63, %v298_v56  ;;  %v240_v10 = vadd.f32 %v691_v29, %v154_v1  ;;  %v71_v11 = vunpack.c.h.bf16 %v26_v54  ;;  %v156_v15 = vmul.f32 %v679_v23, %v70_v2 }
  0x1f   :  { %v302_v12 = vmax.f32 %v238_v4, 0.0  ;;  %v303_v13 = vmax.f32 %v239_v5, 0.0  ;;  %v241_v14 = vadd.f32 %v693_v30, %v155_v6  ;;  %v615_v17 = vpack.c.bf16 %v301_v9, %v300_v3  ;;  %v33_v5 = vld [vmem:[%s1000_s0 + $0x98] sm:$0xff] }
  0x20   :  { %546 = vst [vmem:[%s1003_s3 + $0x40] sm:$0xff] %v614_v8  ;;  %v304_v18 = vmax.f32 %v240_v10, 0.0  ;;  %v157_v19 = vmul.f32 %v681_v24, %v71_v11  ;;  %v72_v20 = vunpack.c.l.bf16 %v27_v7  ;;  %v242_v32 = vadd.f32 %v683_v25, %v156_v15 }
  0x21   :  { %v616_v22 = vpack.c.bf16 %v303_v13, %v302_v12  ;;  %v305_v31 = vmax.f32 %v241_v14, 0.0  ;;  %v73_v33 = vunpack.c.h.bf16 %v27_v7  ;;  %547 = vst [vmem:[%s1003_s3 + $0x48] sm:$0xff] %v615_v17  ;;  %v74_v36 = vunpack.c.l.bf16 %v28_v16 }
  0x22   :  { %v243_v34 = vadd.f32 %v685_v26, %v157_v19  ;;  %v158_v35 = vmul.f32 %v687_v27, %v72_v20  ;;  %v75_v37 = vunpack.c.h.bf16 %v28_v16  ;;  %v306_v40 = vmax.f32 %v242_v32, 0.0 }
  0x23   :  { %548 = vst [vmem:[%s1003_s3 + $0x50] sm:$0xff] %v616_v22  ;;  %v617_v39 = vpack.c.bf16 %v305_v31, %v304_v18  ;;  %v159_v41 = vmul.f32 %v689_v28, %v73_v33  ;;  %v76_v42 = vunpack.c.l.bf16 %v29_v21  ;;  %v160_v45 = vmul.f32 %v679_v23, %v74_v36  ;;  %v34_v18 = vld [vmem:[%s1000_s0 + $0xa0] sm:$0xff] }
  0x24   :  { %v307_v43 = vmax.f32 %v243_v34, 0.0  ;;  %v244_v44 = vadd.f32 %v691_v29, %v158_v35  ;;  %v161_v46 = vmul.f32 %v681_v24, %v75_v37  ;;  %v77_v48 = vunpack.c.h.bf16 %v29_v21  ;;  %v35_v35 = vld [vmem:[%s1000_s0 + $0xa8] sm:$0xff] }
  0x25   :  { %549 = vst [vmem:[%s1003_s3 + $0x58] sm:$0xff] %v617_v39  ;;  %v245_v47 = vadd.f32 %v693_v30, %v159_v41  ;;  %v162_v49 = vmul.f32 %v687_v27, %v76_v42  ;;  %v78_v50 = vunpack.c.l.bf16 %v30_v38  ;;  %v246_v54 = vadd.f32 %v683_v25, %v160_v45 }
  0x26   :  { %v618_v52 = vpack.c.bf16 %v307_v43, %v306_v40  ;;  %v308_v53 = vmax.f32 %v244_v44, 0.0  ;;  %v247_v55 = vadd.f32 %v685_v26, %v161_v46  ;;  %v163_v57 = vmul.f32 %v689_v28, %v77_v48  ;;  %v36_v48 = vld [vmem:[%s1000_s0 + $0xb0] sm:$0xff] }
  0x27   :  { %v309_v56 = vmax.f32 %v245_v47, 0.0  ;;  %v248_v58 = vadd.f32 %v691_v29, %v162_v49  ;;  %v79_v59 = vunpack.c.h.bf16 %v30_v38  ;;  %v310_v60 = vmax.f32 %v246_v54, 0.0 }
  0x28   :  { %550 = vst [vmem:[%s1003_s3 + $0x60] sm:$0xff] %v618_v52  ;;  %v311_v61 = vmax.f32 %v247_v55, 0.0  ;;  %v164_v62 = vmul.f32 %v679_v23, %v78_v50  ;;  %v80_v63 = vunpack.c.l.bf16 %v31_v51  ;;  %v249_v2 = vadd.f32 %v693_v30, %v163_v57 }
  0x29   :  { %v619_v1 = vpack.c.bf16 %v309_v56, %v308_v53  ;;  %v312_v3 = vmax.f32 %v248_v58, 0.0  ;;  %v165_v4 = vmul.f32 %v681_v24, %v79_v59  ;;  %v81_v8 = vunpack.c.h.bf16 %v31_v51  ;;  %v37_v53 = vld [vmem:[%s1000_s0 + $0xb8] sm:$0xff] }
  0x2a   :  { %v620_v6 = vpack.c.bf16 %v311_v61, %v310_v60  ;;  %v250_v7 = vadd.f32 %v683_v25, %v164_v62  ;;  %v166_v9 = vmul.f32 %v687_v27, %v80_v63  ;;  %v313_v10 = vmax.f32 %v249_v2, 0.0  ;;  %v38_v2 = vld [vmem:[%s1000_s0 + $0xc0] sm:$0xff] }
  0x2b   :  { %551 = vst [vmem:[%s1003_s3 + $0x68] sm:$0xff] %v619_v1  ;;  %v251_v11 = vadd.f32 %v685_v26, %v165_v4  ;;  %v82_v12 = vunpack.c.l.bf16 %v32_v0  ;;  %v83_v13 = vunpack.c.h.bf16 %v32_v0  ;;  %v167_v15 = vmul.f32 %v689_v28, %v81_v8 }
  0x2c   :  { %552 = vst [vmem:[%s1003_s3 + $0x70] sm:$0xff] %v620_v6  ;;  %v314_v14 = vmax.f32 %v250_v7, 0.0  ;;  %v252_v16 = vadd.f32 %v691_v29, %v166_v9  ;;  %v84_v17 = vunpack.c.l.bf16 %v33_v5  ;;  %v621_v19 = vpack.c.bf16 %v313_v10, %v312_v3 }
  0x2d   :  { %v315_v20 = vmax.f32 %v251_v11, 0.0  ;;  %v168_v21 = vmul.f32 %v679_v23, %v82_v12  ;;  %v169_v22 = vmul.f32 %v681_v24, %v83_v13  ;;  %v253_v31 = vadd.f32 %v693_v30, %v167_v15  ;;  %v39_v11 = vld [vmem:[%s1000_s0 + $0xc8] sm:$0xff] }
  0x2e   :  { %v316_v32 = vmax.f32 %v252_v16, 0.0  ;;  %v85_v33 = vunpack.c.h.bf16 %v33_v5  ;;  %v170_v34 = vmul.f32 %v687_v27, %v84_v17  ;;  %553 = vst [vmem:[%s1003_s3 + $0x78] sm:$0xff] %v621_v19  ;;  %v86_v39 = vunpack.c.l.bf16 %v34_v18 }
  0x2f   :  { %v622_v36 = vpack.c.bf16 %v315_v20, %v314_v14  ;;  %v254_v37 = vadd.f32 %v683_v25, %v168_v21  ;;  %v255_v38 = vadd.f32 %v685_v26, %v169_v22  ;;  %v317_v40 = vmax.f32 %v253_v31, 0.0 }
  0x30   :  { %v171_v41 = vmul.f32 %v689_v28, %v85_v33  ;;  %v256_v42 = vadd.f32 %v691_v29, %v170_v34  ;;  %v87_v43 = vunpack.c.h.bf16 %v34_v18  ;;  %v172_v46 = vmul.f32 %v679_v23, %v86_v39 }
  0x31   :  { %554 = vst [vmem:[%s1003_s3 + $0x80] sm:$0xff] %v622_v36  ;;  %v318_v44 = vmax.f32 %v254_v37, 0.0  ;;  %v319_v45 = vmax.f32 %v255_v38, 0.0  ;;  %v88_v47 = vunpack.c.l.bf16 %v35_v35  ;;  %v623_v49 = vpack.c.bf16 %v317_v40, %v316_v32  ;;  %v40_v32 = vld [vmem:[%s1000_s0 + $0xd0] sm:$0xff]  ;;  %v41_v37 = vld [vmem:[%s1000_s0 + $0xd8] sm:$0xff] }
  0x32   :  { %v257_v50 = vadd.f32 %v693_v30, %v171_v41  ;;  %v320_v51 = vmax.f32 %v256_v42, 0.0  ;;  %v173_v52 = vmul.f32 %v681_v24, %v87_v43  ;;  %v258_v55 = vadd.f32 %v683_v25, %v172_v46 }
  0x33   :  { %v624_v54 = vpack.c.bf16 %v319_v45, %v318_v44  ;;  %v89_v56 = vunpack.c.h.bf16 %v35_v35  ;;  %v174_v57 = vmul.f32 %v687_v27, %v88_v47  ;;  %555 = vst [vmem:[%s1003_s3 + $0x88] sm:$0xff] %v623_v49  ;;  %v90_v60 = vunpack.c.l.bf16 %v36_v48 }
  0x34   :  { %v321_v58 = vmax.f32 %v257_v50, 0.0  ;;  %v259_v59 = vadd.f32 %v685_v26, %v173_v52  ;;  %v91_v61 = vunpack.c.h.bf16 %v36_v48  ;;  %v322_v62 = vmax.f32 %v258_v55, 0.0  ;;  %v42_v50 = vld [vmem:[%s1000_s0 + $0xe0] sm:$0xff] }
  0x35   :  { %556 = vst [vmem:[%s1003_s3 + $0x90] sm:$0xff] %v624_v54  ;;  %v175_v63 = vmul.f32 %v689_v28, %v89_v56  ;;  %v260_v0 = vadd.f32 %v691_v29, %v174_v57  ;;  %v92_v1 = vunpack.c.l.bf16 %v37_v53  ;;  %v176_v5 = vmul.f32 %v679_v23, %v90_v60 }
  0x36   :  { %v625_v3 = vpack.c.bf16 %v321_v58, %v320_v51  ;;  %v323_v4 = vmax.f32 %v259_v59, 0.0  ;;  %v177_v6 = vmul.f32 %v681_v24, %v91_v61  ;;  %v93_v9 = vunpack.c.h.bf16 %v37_v53  ;;  %v43_v59 = vld [vmem:[%s1000_s0 + $0xe8] sm:$0xff] }
  0x37   :  { %v261_v7 = vadd.f32 %v693_v30, %v175_v63  ;;  %v324_v8 = vmax.f32 %v260_v0, 0.0  ;;  %v178_v10 = vmul.f32 %v687_v27, %v92_v1  ;;  %v262_v13 = vadd.f32 %v683_v25, %v176_v5 }
  0x38   :  { %557 = vst [vmem:[%s1003_s3 + $0x98] sm:$0xff] %v625_v3  ;;  %v626_v12 = vpack.c.bf16 %v323_v4, %v322_v62  ;;  %v263_v14 = vadd.f32 %v685_v26, %v177_v6  ;;  %v94_v15 = vunpack.c.l.bf16 %v38_v2  ;;  %v179_v17 = vmul.f32 %v689_v28, %v93_v9 }
  0x39   :  { %v325_v16 = vmax.f32 %v261_v7, 0.0  ;;  %v264_v18 = vadd.f32 %v691_v29, %v178_v10  ;;  %v95_v19 = vunpack.c.h.bf16 %v38_v2  ;;  %v326_v20 = vmax.f32 %v262_v13, 0.0  ;;  %v45_v13 = vld [vmem:[%s1000_s0 + $0xf8] sm:$0xff] }
  0x3a   :  { %558 = vst [vmem:[%s1003_s3 + $0xa0] sm:$0xff] %v626_v12  ;;  %v327_v21 = vmax.f32 %v263_v14, 0.0  ;;  %v180_v22 = vmul.f32 %v679_v23, %v94_v15  ;;  %v96_v31 = vunpack.c.l.bf16 %v39_v11  ;;  %v265_v34 = vadd.f32 %v693_v30, %v179_v17 }
  0x3b   :  { %v627_v33 = vpack.c.bf16 %v325_v16, %v324_v8  ;;  %v328_v35 = vmax.f32 %v264_v18, 0.0  ;;  %v181_v36 = vmul.f32 %v681_v24, %v95_v19  ;;  %v97_v40 = vunpack.c.h.bf16 %v39_v11  ;;  %v44_v8 = vld [vmem:[%s1000_s0 + $0xf0] sm:$0xff] }
  0x3c   :  { %v628_v38 = vpack.c.bf16 %v327_v21, %v326_v20  ;;  %v266_v39 = vadd.f32 %v683_v25, %v180_v22  ;;  %v182_v41 = vmul.f32 %v687_v27, %v96_v31  ;;  %v329_v42 = vmax.f32 %v265_v34, 0.0 }
  0x3d   :  { %559 = vst [vmem:[%s1003_s3 + $0xa8] sm:$0xff] %v627_v33  ;;  %v267_v43 = vadd.f32 %v685_v26, %v181_v36  ;;  %v98_v44 = vunpack.c.l.bf16 %v40_v32  ;;  %v99_v45 = vunpack.c.h.bf16 %v40_v32  ;;  %v183_v47 = vmul.f32 %v689_v28, %v97_v40 }
  0x3e   :  { %560 = vst [vmem:[%s1003_s3 + $0xb0] sm:$0xff] %v628_v38  ;;  %v330_v46 = vmax.f32 %v266_v39, 0.0  ;;  %v268_v48 = vadd.f32 %v691_v29, %v182_v41  ;;  %v100_v49 = vunpack.c.l.bf16 %v41_v37  ;;  %v629_v51 = vpack.c.bf16 %v329_v42, %v328_v35 }
  0x3f   :  { %v331_v52 = vmax.f32 %v267_v43, 0.0  ;;  %v184_v53 = vmul.f32 %v679_v23, %v98_v44  ;;  %v185_v54 = vmul.f32 %v681_v24, %v99_v45  ;;  %v269_v55 = vadd.f32 %v693_v30, %v183_v47 }
  0x40   :  { %v332_v56 = vmax.f32 %v268_v48, 0.0  ;;  %v101_v57 = vunpack.c.h.bf16 %v41_v37  ;;  %v186_v58 = vmul.f32 %v687_v27, %v100_v49  ;;  %561 = vst [vmem:[%s1003_s3 + $0xb8] sm:$0xff] %v629_v51  ;;  %v102_v63 = vunpack.c.l.bf16 %v42_v50 }
  0x41   :  { %v630_v60 = vpack.c.bf16 %v331_v52, %v330_v46  ;;  %v270_v61 = vadd.f32 %v683_v25, %v184_v53  ;;  %v271_v62 = vadd.f32 %v685_v26, %v185_v54  ;;  %v333_v0 = vmax.f32 %v269_v55, 0.0 }
  0x42   :  { %v187_v1 = vmul.f32 %v689_v28, %v101_v57  ;;  %v272_v2 = vadd.f32 %v691_v29, %v186_v58  ;;  %v103_v3 = vunpack.c.h.bf16 %v42_v50  ;;  %v188_v6 = vmul.f32 %v679_v23, %v102_v63 }
  0x43   :  { %562 = vst [vmem:[%s1003_s3 + $0xc0] sm:$0xff] %v630_v60  ;;  %v334_v4 = vmax.f32 %v270_v61, 0.0  ;;  %v335_v5 = vmax.f32 %v271_v62, 0.0  ;;  %v104_v7 = vunpack.c.l.bf16 %v43_v59  ;;  %v631_v9 = vpack.c.bf16 %v333_v0, %v332_v56 }
  0x44   :  { %v273_v10 = vadd.f32 %v693_v30, %v187_v1  ;;  %v336_v11 = vmax.f32 %v272_v2, 0.0  ;;  %v189_v12 = vmul.f32 %v681_v24, %v103_v3  ;;  %v274_v15 = vadd.f32 %v683_v25, %v188_v6 }
  0x45   :  { %v632_v14 = vpack.c.bf16 %v335_v5, %v334_v4  ;;  %v105_v16 = vunpack.c.h.bf16 %v43_v59  ;;  %v190_v17 = vmul.f32 %v687_v27, %v104_v7  ;;  %563 = vst [vmem:[%s1003_s3 + $0xc8] sm:$0xff] %v631_v9  ;;  %v106_v20 = vunpack.c.l.bf16 %v44_v8 }
  0x46   :  { %v337_v18 = vmax.f32 %v273_v10, 0.0  ;;  %v275_v19 = vadd.f32 %v685_v26, %v189_v12  ;;  %v107_v21 = vunpack.c.h.bf16 %v44_v8  ;;  %v338_v22 = vmax.f32 %v274_v15, 0.0 }
  0x47   :  { %564 = vst [vmem:[%s1003_s3 + $0xd0] sm:$0xff] %v632_v14  ;;  %v191_v31 = vmul.f32 %v689_v28, %v105_v16  ;;  %v276_v32 = vadd.f32 %v691_v29, %v190_v17  ;;  %v108_v33 = vunpack.c.l.bf16 %v45_v13  ;;  %v192_v36 = vmul.f32 %v679_v23, %v106_v20 }
  0x48   :  { %v633_v34 = vpack.c.bf16 %v337_v18, %v336_v11  ;;  %v339_v35 = vmax.f32 %v275_v19, 0.0  ;;  %v193_v37 = vmul.f32 %v681_v24, %v107_v21  ;;  %v109_v40 = vunpack.c.h.bf16 %v45_v13 }
  0x49   :  { %v277_v38 = vadd.f32 %v693_v30, %v191_v31  ;;  %v340_v39 = vmax.f32 %v276_v32, 0.0  ;;  %v194_v41 = vmul.f32 %v687_v27, %v108_v33  ;;  %v278_v43 = vadd.f32 %v683_v25, %v192_v36 }
  0x4a   :  { %565 = vst [vmem:[%s1003_s3 + $0xd8] sm:$0xff] %v633_v34  ;;  %v634_v42 = vpack.c.bf16 %v339_v35, %v338_v22  ;;  %v279_v44 = vadd.f32 %v685_v26, %v193_v37  ;;  %v195_v23 = vmul.f32 %v689_v28, %v109_v40 }
  0x4b   :  { %v341_v45 = vmax.f32 %v277_v38, 0.0  ;;  %v280_v24 = vadd.f32 %v691_v29, %v194_v41  ;;  %v342_v46 = vmax.f32 %v278_v43, 0.0 }
  0x4c   :  { %566 = vst [vmem:[%s1003_s3 + $0xe0] sm:$0xff] %v634_v42  ;;  %v343_v27 = vmax.f32 %v279_v44, 0.0  ;;  %v281_v48 = vadd.f32 %v693_v30, %v195_v23 }
  0x4d   :  { %v635_v47 = vpack.c.bf16 %v341_v45, %v340_v39  ;;  %v344_v49 = vmax.f32 %v280_v24, 0.0 }
  0x4e   :  { %v636_v50 = vpack.c.bf16 %v343_v27, %v342_v46  ;;  %v345_v25 = vmax.f32 %v281_v48, 0.0 }
  0x4f   :  { %567 = vst [vmem:[%s1003_s3 + $0xe8] sm:$0xff] %v635_v47 }
  0x50   :  { %568 = vst [vmem:[%s1003_s3 + $0xf0] sm:$0xff] %v636_v50  ;;  %v637_v26 = vpack.c.bf16 %v345_v25, %v344_v49 }
  0x52   :  { %569 = vst [vmem:[%s1003_s3 + $0xf8] sm:$0xff] %v637_v26 }

// kernel: _lambda_.7
= control target key start
LH: loop header
LB: loop body
LE: loop exit
PB: predicated region body
PF: predicated region fallthrough
CT: control target
= control target key end

     0   :  { %s7427_s1 = inlined_call_operand.vmem [shape: bf16[16,128,128], index: 1, kind: input, shape index: {}]   ;;  %s7428_s0 = inlined_call_operand.vmem [shape: bf16[9,128,128], index: 0, kind: input, shape index: {}]   ;;  %s7429_s2 = inlined_call_operand.vmem [shape: bf16[128,512], index: 2, kind: output, shape index: {0}]   ;;  %s7430_s3 = inlined_call_operand.vmem [shape: f32[8,512], index: 3, kind: output, shape index: {1}]   ;;  %s7431_s4 = inlined_call_operand.vmem [shape: f32[8,512], index: 4, kind: output, shape index: {2}]  }
   0x1   :  { %v6162_v0 = vld [vmem:[%s7427_s1 + $0x40] sm:$0xff]   ;;  %v6164_v2 = vld [vmem:[%s7427_s1 + $0x48] sm:$0xff]   ;;  %v6166_v4 = vld [vmem:[%s7427_s1 + $0x50] sm:$0xff]  }
   0x2   :  { %v6163_v1 = vld [vmem:[%s7427_s1 + $0x140] sm:$0xff]   ;;  %5458 = vmatprep.subr.bf16.mxu0 %v6162_v0  ;;  %v6165_v3 = vld [vmem:[%s7427_s1 + $0x148] sm:$0xff]   ;;  %v6167_v5 = vld [vmem:[%s7427_s1 + $0x150] sm:$0xff]  }
   0x3   :  { %5586 = vmatprep.subr.bf16.mxu1 %v6163_v1  ;;  %5459 = vmatpush3.bf16.msra.mxu0 %v6162_v0  ;;  %v6168_v6 = vld [vmem:[%s7427_s1 + $0x58] sm:$0xff]   ;;  %v6170_v8 = vld [vmem:[%s7427_s1 + $0x60] sm:$0xff]   ;;  %v6172_v10 = vld [vmem:[%s7427_s1 + $0x68] sm:$0xff]  }
   0x4   :  { %5587 = vmatpush3.bf16.msra.mxu1 %v6163_v1  ;;  %5460 = vmatprep.subr.bf16.mxu0 %v6164_v2  ;;  %v6169_v7 = vld [vmem:[%s7427_s1 + $0x158] sm:$0xff]   ;;  %v6171_v9 = vld [vmem:[%s7427_s1 + $0x160] sm:$0xff]   ;;  %v6173_v11 = vld [vmem:[%s7427_s1 + $0x168] sm:$0xff]  }
   0x5   :  { %5588 = vmatprep.subr.bf16.mxu1 %v6165_v3  ;;  %v6178_v12 = vld [vmem:[%s7428_s0 + $0x40] sm:$0xff]   ;;  %v6174_v14 = vld [vmem:[%s7427_s1 + $0x70] sm:$0xff]   ;;  %v6176_v16 = vld [vmem:[%s7427_s1 + $0x78] sm:$0xff]  }
   0x6   :  { %v6179_v13 = vld [vmem:[%s7428_s0 + $0x80] sm:$0xff]   ;;  %5474 = vmatprep.mubr.bf16.mxu0 %v6178_v12  ;;  %v6175_v15 = vld [vmem:[%s7427_s1 + $0x170] sm:$0xff]   ;;  %v6177_v17 = vld [vmem:[%s7427_s1 + $0x178] sm:$0xff]  }
   0x7   :  { %5461 = vmatpush3.bf16.msra.mxu0 %v6164_v2  ;;  %5602 = vmatprep.mubr.bf16.mxu1 %v6179_v13  ;;  %v6180_v18 = vld [vmem:[%s7428_s0 + $0x48] sm:$0xff]   ;;  %v6181_v19 = vld [vmem:[%s7427_s1] sm:$0xff]   ;;  %v6186_v24 = vld [vmem:[%s7428_s0 + $0x50] sm:$0xff]  }
   0x8   :  { %5589 = vmatpush3.bf16.msra.mxu1 %v6165_v3  ;;  %5462 = vmatprep.subr.bf16.mxu0 %v6166_v4  ;;  %v6183_v20 = vld [vmem:[%s7427_s1 + $0x100] sm:$0xff]   ;;  %v6182_v21 = vld [vmem:[%s7428_s0 + $0x88] sm:$0xff]   ;;  %v6187_v25 = vld [vmem:[%s7428_s0 + $0x90] sm:$0xff]  }
   0x9   :  { %5590 = vmatprep.subr.bf16.mxu1 %v6167_v5  ;;  %v6184_v22 = vld [vmem:[%s7427_s1 + $0x8] sm:$0xff]   ;;  %v6188_v26 = vld [vmem:[%s7428_s0 + $0x58] sm:$0xff]   ;;  %v6189_v27 = vld [vmem:[%s7427_s1 + $0x10] sm:$0xff]  }
   0xa   :  { %v6185_v23 = vld [vmem:[%s7427_s1 + $0x108] sm:$0xff]   ;;  %v6191_v28 = vld [vmem:[%s7427_s1 + $0x110] sm:$0xff]   ;;  %v6190_v29 = vld [vmem:[%s7428_s0 + $0x98] sm:$0xff]  }
   0xb   :  { %5463 = vmatpush3.bf16.msra.mxu0 %v6166_v4  ;;  %v6192_v30 = vld [vmem:[%s7427_s1 + $0x18] sm:$0xff]   ;;  %v6194_v32 = vld [vmem:[%s7428_s0 + $0x60] sm:$0xff]   ;;  %v6196_v34 = vld [vmem:[%s7428_s0 + $0x68] sm:$0xff]  }
   0xc   :  { %5591 = vmatpush3.bf16.msra.mxu1 %v6167_v5  ;;  %5464 = vmatprep.subr.bf16.mxu0 %v6168_v6  ;;  %v6193_v31 = vld [vmem:[%s7427_s1 + $0x118] sm:$0xff]   ;;  %v6195_v33 = vld [vmem:[%s7428_s0 + $0xa0] sm:$0xff]   ;;  %v6198_v37 = vld [vmem:[%s7428_s0 + $0xa8] sm:$0xff]  }
   0xd   :  { %5592 = vmatprep.subr.bf16.mxu1 %v6169_v7  ;;  %v6197_v35 = vld [vmem:[%s7427_s1 + $0x20] sm:$0xff]   ;;  %v6200_v38 = vld [vmem:[%s7427_s1 + $0x28] sm:$0xff]   ;;  %v6202_v40 = vld [vmem:[%s7428_s0 + $0x70] sm:$0xff]  }
   0xe   :  { %v6199_v36 = vld [vmem:[%s7427_s1 + $0x120] sm:$0xff]   ;;  %v6201_v39 = vld [vmem:[%s7427_s1 + $0x128] sm:$0xff]   ;;  %v6203_v41 = vld [vmem:[%s7428_s0 + $0xb0] sm:$0xff]  }
   0xf   :  { %5465 = vmatpush3.bf16.msra.mxu0 %v6168_v6  ;;  %v6204_v42 = vld [vmem:[%s7428_s0 + $0x78] sm:$0xff]   ;;  %v6205_v43 = vld [vmem:[%s7427_s1 + $0x30] sm:$0xff]   ;;  %v6210_v48 = vld [vmem:[%s7428_s0] sm:$0xff]  }
  0x10   :  { %5593 = vmatpush3.bf16.msra.mxu1 %v6169_v7  ;;  %5466 = vmatprep.subr.bf16.mxu0 %v6170_v8  ;;  %v6207_v44 = vld [vmem:[%s7427_s1 + $0x130] sm:$0xff]   ;;  %v6206_v45 = vld [vmem:[%s7428_s0 + $0xb8] sm:$0xff]   ;;  %v6211_v49 = vld [vmem:[%s7428_s0 + $0x40] sm:$0xff]  }
  0x11   :  { %5594 = vmatprep.subr.bf16.mxu1 %v6171_v9  ;;  %v6208_v46 = vld [vmem:[%s7427_s1 + $0x38] sm:$0xff]   ;;  %v6212_v50 = vld [vmem:[%s7428_s0 + $0x8] sm:$0xff]   ;;  %v6213_v51 = vld [vmem:[%s7427_s1 + $0x80] sm:$0xff]  }
  0x12   :  { %v6209_v47 = vld [vmem:[%s7427_s1 + $0x138] sm:$0xff]   ;;  %v6215_v52 = vld [vmem:[%s7427_s1 + $0x180] sm:$0xff]   ;;  %v6214_v53 = vld [vmem:[%s7428_s0 + $0x48] sm:$0xff]  }
  0x13   :  { %5467 = vmatpush3.bf16.msra.mxu0 %v6170_v8  ;;  %v6216_v54 = vld [vmem:[%s7427_s1 + $0x88] sm:$0xff]   ;;  %v6218_v56 = vld [vmem:[%s7428_s0 + $0x10] sm:$0xff]   ;;  %v6220_v58 = vld [vmem:[%s7428_s0 + $0x18] sm:$0xff]  }
  0x14   :  { %5595 = vmatpush3.bf16.msra.mxu1 %v6171_v9  ;;  %5468 = vmatprep.subr.bf16.mxu0 %v6172_v10  ;;  %v6217_v55 = vld [vmem:[%s7427_s1 + $0x188] sm:$0xff]   ;;  %v6219_v57 = vld [vmem:[%s7428_s0 + $0x50] sm:$0xff]   ;;  %v6222_v61 = vld [vmem:[%s7428_s0 + $0x58] sm:$0xff]  }
  0x15   :  { %5596 = vmatprep.subr.bf16.mxu1 %v6173_v11  ;;  %v6221_v59 = vld [vmem:[%s7427_s1 + $0x90] sm:$0xff]   ;;  %v6224_v62 = vld [vmem:[%s7427_s1 + $0x98] sm:$0xff]   ;;  %v6226_v0 = vld [vmem:[%s7428_s0 + $0x20] sm:$0xff]  }
  0x16   :  { %v6223_v60 = vld [vmem:[%s7427_s1 + $0x190] sm:$0xff]   ;;  %v6225_v63 = vld [vmem:[%s7427_s1 + $0x198] sm:$0xff]   ;;  %v6227_v1 = vld [vmem:[%s7428_s0 + $0x60] sm:$0xff]  }
  0x17   :  { %5469 = vmatpush3.bf16.msra.mxu0 %v6172_v10  ;;  %v6228_v2 = vld [vmem:[%s7428_s0 + $0x28] sm:$0xff]   ;;  %v6229_v3 = vld [vmem:[%s7427_s1 + $0xa0] sm:$0xff]   ;;  %v6234_v8 = vld [vmem:[%s7428_s0 + $0x30] sm:$0xff]  }
  0x18   :  { %5597 = vmatpush3.bf16.msra.mxu1 %v6173_v11  ;;  %5470 = vmatprep.subr.bf16.mxu0 %v6174_v14  ;;  %v6231_v4 = vld [vmem:[%s7427_s1 + $0x1a0] sm:$0xff]   ;;  %v6230_v5 = vld [vmem:[%s7428_s0 + $0x68] sm:$0xff]   ;;  %v6235_v9 = vld [vmem:[%s7428_s0 + $0x70] sm:$0xff]  }
  0x19   :  { %5598 = vmatprep.subr.bf16.mxu1 %v6175_v15  ;;  %v6232_v6 = vld [vmem:[%s7427_s1 + $0xa8] sm:$0xff]   ;;  %v6236_v10 = vld [vmem:[%s7428_s0 + $0x38] sm:$0xff]   ;;  %v6237_v11 = vld [vmem:[%s7427_s1 + $0xb0] sm:$0xff]  }
  0x1a   :  { %v6233_v7 = vld [vmem:[%s7427_s1 + $0x1a8] sm:$0xff]   ;;  %v6239_v12 = vld [vmem:[%s7427_s1 + $0x1b0] sm:$0xff]   ;;  %v6238_v13 = vld [vmem:[%s7428_s0 + $0x78] sm:$0xff]  }
  0x1b   :  { %5471 = vmatpush3.bf16.msra.mxu0 %v6174_v14  ;;  %v6240_v14 = vld [vmem:[%s7427_s1 + $0xb8] sm:$0xff]  }
  0x1c   :  { %5599 = vmatpush3.bf16.msra.mxu1 %v6175_v15  ;;  %5472 = vmatprep.subr.bf16.mxu0 %v6176_v16  ;;  %v6241_v15 = vld [vmem:[%s7427_s1 + $0x1b8] sm:$0xff]  }
  0x1d   :  { %5600 = vmatprep.subr.bf16.mxu1 %v6177_v17 }
  0x1f   :  { %5473 = vmatpush3.bf16.msra.mxu0 %v6176_v16  ;;  %v6242_v16 = vld [vmem:[%s7428_s0 + $0xc0] sm:$0xff]  }
  0x20   :  { %5601 = vmatpush3.bf16.msra.mxu1 %v6177_v17  ;;  %5490 = vmatprep.subr.bf16.mxu0 %v6181_v19  ;;  %v6243_v17 = vld [vmem:[%s7428_s0 + $0x100] sm:$0xff]  }
  0x21   :  { %5618 = vmatprep.subr.bf16.mxu1 %v6183_v20 }
  0x22   :  { %5475 = vmatmul.mubr.bf16.vlgmr.msra.gmra.mrb[0].mxu0 %v6180_v18  ;;  %v6244_v18 = vld [vmem:[%s7428_s0 + $0xc8] sm:$0xff]  }
  0x23   :  { %5603 = vmatmul.mubr.bf16.vlgmr.msra.gmra.mrb[0].mxu1 %v6182_v21  ;;  %5491 = vmatpush3.bf16.msra.mxu0 %v6181_v19  ;;  %v6245_v19 = vld [vmem:[%s7427_s1 + $0xc0] sm:$0xff]   ;;  %v6246_v21 = vld [vmem:[%s7428_s0 + $0x108] sm:$0xff]  }
  0x24   :  { %5619 = vmatpush3.bf16.msra.mxu1 %v6183_v20  ;;  %5492 = vmatprep.subr.bf16.mxu0 %v6184_v22  ;;  %v6247_v20 = vld [vmem:[%s7427_s1 + $0x1c0] sm:$0xff]  }
  0x25   :  { %5620 = vmatprep.subr.bf16.mxu1 %v6185_v23  ;;  %5478 = vmatprep.mubr.bf16.mxu0 %v6186_v24  ;;  %v6250_v24 = vld [vmem:[%s7428_s0 + $0xd0] sm:$0xff]  }
  0x26   :  { %5606 = vmatprep.mubr.bf16.mxu1 %v6187_v25  ;;  %v6251_v25 = vld [vmem:[%s7428_s0 + $0x110] sm:$0xff]  }
  0x27   :  { %5493 = vmatpush3.bf16.msra.mxu0 %v6184_v22  ;;  %v6248_v22 = vld [vmem:[%s7427_s1 + $0xc8] sm:$0xff]  }
  0x28   :  { %5621 = vmatpush3.bf16.msra.mxu1 %v6185_v23  ;;  %5494 = vmatprep.subr.bf16.mxu0 %v6189_v27  ;;  %v6249_v23 = vld [vmem:[%s7427_s1 + $0x1c8] sm:$0xff]  }
  0x29   :  { %5622 = vmatprep.subr.bf16.mxu1 %v6191_v28 }
  0x2a   :  { %5479 = vmatmul.mubr.bf16.gmra.mrb[4].mxu0 %v6188_v26  ;;  %v6252_v26 = vld [vmem:[%s7428_s0 + $0xd8] sm:$0xff]  }
  0x2b   :  { %5607 = vmatmul.mubr.bf16.gmra.mrb[4].mxu1 %v6190_v29  ;;  %5495 = vmatpush3.bf16.msra.mxu0 %v6189_v27  ;;  %v6253_v27 = vld [vmem:[%s7427_s1 + $0xd0] sm:$0xff]   ;;  %v6254_v29 = vld [vmem:[%s7428_s0 + $0x118] sm:$0xff]  }
  0x2c   :  { %5623 = vmatpush3.bf16.msra.mxu1 %v6191_v28  ;;  %5496 = vmatprep.subr.bf16.mxu0 %v6192_v30  ;;  %v6255_v28 = vld [vmem:[%s7427_s1 + $0x1d0] sm:$0xff]  }
  0x2d   :  { %5624 = vmatprep.subr.bf16.mxu1 %v6193_v31  ;;  %5482 = vmatprep.mubr.bf16.mxu0 %v6194_v32  ;;  %v6258_v32 = vld [vmem:[%s7428_s0 + $0xe0] sm:$0xff]  }
  0x2e   :  { %5610 = vmatprep.mubr.bf16.mxu1 %v6195_v33  ;;  %v6259_v33 = vld [vmem:[%s7428_s0 + $0x120] sm:$0xff]  }
  0x2f   :  { %5497 = vmatpush3.bf16.msra.mxu0 %v6192_v30  ;;  %v6256_v30 = vld [vmem:[%s7427_s1 + $0xd8] sm:$0xff]  }
  0x30   :  { %5625 = vmatpush3.bf16.msra.mxu1 %v6193_v31  ;;  %5498 = vmatprep.subr.bf16.mxu0 %v6197_v35  ;;  %v6257_v31 = vld [vmem:[%s7427_s1 + $0x1d8] sm:$0xff]  }
  0x31   :  { %5626 = vmatprep.subr.bf16.mxu1 %v6199_v36 }
  0x32   :  { %5483 = vmatmul.mubr.bf16.gmra.mrb[8].mxu0 %v6196_v34  ;;  %v6260_v34 = vld [vmem:[%s7428_s0 + $0xe8] sm:$0xff]  }
  0x33   :  { %5611 = vmatmul.mubr.bf16.gmra.mrb[8].mxu1 %v6198_v37  ;;  %5499 = vmatpush3.bf16.msra.mxu0 %v6197_v35  ;;  %v6261_v35 = vld [vmem:[%s7427_s1 + $0xe0] sm:$0xff]   ;;  %v6262_v37 = vld [vmem:[%s7428_s0 + $0x128] sm:$0xff]  }
  0x34   :  { %5627 = vmatpush3.bf16.msra.mxu1 %v6199_v36  ;;  %5500 = vmatprep.subr.bf16.mxu0 %v6200_v38  ;;  %v6263_v36 = vld [vmem:[%s7427_s1 + $0x1e0] sm:$0xff]  }
  0x35   :  { %5628 = vmatprep.subr.bf16.mxu1 %v6201_v39  ;;  %5486 = vmatprep.mubr.bf16.mxu0 %v6202_v40  ;;  %v6266_v40 = vld [vmem:[%s7428_s0 + $0xf0] sm:$0xff]  }
  0x36   :  { %5614 = vmatprep.mubr.bf16.mxu1 %v6203_v41  ;;  %v6267_v41 = vld [vmem:[%s7428_s0 + $0x130] sm:$0xff]  }
  0x37   :  { %5501 = vmatpush3.bf16.msra.mxu0 %v6200_v38  ;;  %v6264_v38 = vld [vmem:[%s7427_s1 + $0xe8] sm:$0xff]  }
  0x38   :  { %5629 = vmatpush3.bf16.msra.mxu1 %v6201_v39  ;;  %5502 = vmatprep.subr.bf16.mxu0 %v6205_v43  ;;  %v6265_v39 = vld [vmem:[%s7427_s1 + $0x1e8] sm:$0xff]  }
  0x39   :  { %5630 = vmatprep.subr.bf16.mxu1 %v6207_v44 }
  0x3a   :  { %5487 = vmatmul.mubr.bf16.gmra.mrb[12].mxu0 %v6204_v42  ;;  %v6268_v42 = vld [vmem:[%s7428_s0 + $0xf8] sm:$0xff]  }
  0x3b   :  { %5615 = vmatmul.mubr.bf16.gmra.mrb[12].mxu1 %v6206_v45  ;;  %5503 = vmatpush3.bf16.msra.mxu0 %v6205_v43  ;;  %v6269_v43 = vld [vmem:[%s7427_s1 + $0xf0] sm:$0xff]   ;;  %v6270_v45 = vld [vmem:[%s7428_s0 + $0x138] sm:$0xff]  }
  0x3c   :  { %5631 = vmatpush3.bf16.msra.mxu1 %v6207_v44  ;;  %5504 = vmatprep.subr.bf16.mxu0 %v6208_v46  ;;  %v6271_v44 = vld [vmem:[%s7427_s1 + $0x1f0] sm:$0xff]  }
  0x3d   :  { %5632 = vmatprep.subr.bf16.mxu1 %v6209_v47  ;;  %5506 = vmatprep.mubr.bf16.mxu0 %v6210_v48  ;;  %v6274_v48 = vld [vmem:[%s7428_s0 + $0x100] sm:$0xff]  }
  0x3e   :  { %5634 = vmatprep.mubr.bf16.mxu1 %v6211_v49  ;;  %v6275_v49 = vld [vmem:[%s7428_s0 + $0x140] sm:$0xff]  }
  0x3f   :  { %5505 = vmatpush3.bf16.msra.mxu0 %v6208_v46  ;;  %v6272_v46 = vld [vmem:[%s7427_s1 + $0xf8] sm:$0xff]  }
  0x40   :  { %5633 = vmatpush3.bf16.msra.mxu1 %v6209_v47  ;;  %5522 = vmatprep.subr.bf16.mxu0 %v6213_v51  ;;  %v6273_v47 = vld [vmem:[%s7427_s1 + $0x1f8] sm:$0xff]  }
  0x41   :  { %5650 = vmatprep.subr.bf16.mxu1 %v6215_v52 }
  0x42   :  { %5507 = vmatmul.mubr.bf16.vlgmr.msra.gmra.mrb[0].mxu0 %v6212_v50  ;;  %v6276_v50 = vld [vmem:[%s7428_s0 + $0x108] sm:$0xff]  }
  0x43   :  { %5635 = vmatmul.mubr.bf16.vlgmr.msra.gmra.mrb[0].mxu1 %v6214_v53  ;;  %5523 = vmatpush3.bf16.msra.mxu0 %v6213_v51  ;;  %v6278_v51 = vld [vmem:[%s7427_s1 + $0x240] sm:$0xff]   ;;  %v6277_v53 = vld [vmem:[%s7428_s0 + $0x148] sm:$0xff]  }
  0x44   :  { %5651 = vmatpush3.bf16.msra.mxu1 %v6215_v52  ;;  %5524 = vmatprep.subr.bf16.mxu0 %v6216_v54  ;;  %v6279_v52 = vld [vmem:[%s7427_s1 + $0x340] sm:$0xff]  }
  0x45   :  { %5652 = vmatprep.subr.bf16.mxu1 %v6217_v55  ;;  %5510 = vmatprep.mubr.bf16.mxu0 %v6218_v56  ;;  %v6282_v56 = vld [vmem:[%s7428_s0 + $0x110] sm:$0xff]  }
  0x46   :  { %5638 = vmatprep.mubr.bf16.mxu1 %v6219_v57  ;;  %v6283_v57 = vld [vmem:[%s7428_s0 + $0x150] sm:$0xff]  }
  0x47   :  { %5525 = vmatpush3.bf16.msra.mxu0 %v6216_v54  ;;  %v6280_v54 = vld [vmem:[%s7427_s1 + $0x248] sm:$0xff]  }
  0x48   :  { %5653 = vmatpush3.bf16.msra.mxu1 %v6217_v55  ;;  %5526 = vmatprep.subr.bf16.mxu0 %v6221_v59  ;;  %v6281_v55 = vld [vmem:[%s7427_s1 + $0x348] sm:$0xff]  }
  0x49   :  { %5654 = vmatprep.subr.bf16.mxu1 %v6223_v60 }
  0x4a   :  { %5511 = vmatmul.mubr.bf16.gmra.mrb[4].mxu0 %v6220_v58  ;;  %v6284_v58 = vld [vmem:[%s7428_s0 + $0x118] sm:$0xff]  }
  0x4b   :  { %5639 = vmatmul.mubr.bf16.gmra.mrb[4].mxu1 %v6222_v61  ;;  %5527 = vmatpush3.bf16.msra.mxu0 %v6221_v59  ;;  %v6286_v59 = vld [vmem:[%s7427_s1 + $0x250] sm:$0xff]   ;;  %v6285_v61 = vld [vmem:[%s7428_s0 + $0x158] sm:$0xff]  }
  0x4c   :  { %5655 = vmatpush3.bf16.msra.mxu1 %v6223_v60  ;;  %5528 = vmatprep.subr.bf16.mxu0 %v6224_v62  ;;  %v6287_v60 = vld [vmem:[%s7427_s1 + $0x350] sm:$0xff]  }
  0x4d   :  { %5656 = vmatprep.subr.bf16.mxu1 %v6225_v63  ;;  %5514 = vmatprep.mubr.bf16.mxu0 %v6226_v0  ;;  %v6290_v0 = vld [vmem:[%s7428_s0 + $0x120] sm:$0xff]  }
  0x4e   :  { %5642 = vmatprep.mubr.bf16.mxu1 %v6227_v1  ;;  %v6291_v1 = vld [vmem:[%s7428_s0 + $0x160] sm:$0xff]  }
  0x4f   :  { %5529 = vmatpush3.bf16.msra.mxu0 %v6224_v62  ;;  %v6288_v62 = vld [vmem:[%s7427_s1 + $0x258] sm:$0xff]  }
  0x50   :  { %5657 = vmatpush3.bf16.msra.mxu1 %v6225_v63  ;;  %5530 = vmatprep.subr.bf16.mxu0 %v6229_v3  ;;  %v6289_v63 = vld [vmem:[%s7427_s1 + $0x358] sm:$0xff]  }
  0x51   :  { %5658 = vmatprep.subr.bf16.mxu1 %v6231_v4 }
  0x52   :  { %5515 = vmatmul.mubr.bf16.gmra.mrb[8].mxu0 %v6228_v2  ;;  %v6292_v2 = vld [vmem:[%s7428_s0 + $0x128] sm:$0xff]  }
  0x53   :  { %5643 = vmatmul.mubr.bf16.gmra.mrb[8].mxu1 %v6230_v5  ;;  %5531 = vmatpush3.bf16.msra.mxu0 %v6229_v3  ;;  %v6294_v3 = vld [vmem:[%s7427_s1 + $0x260] sm:$0xff]   ;;  %v6293_v5 = vld [vmem:[%s7428_s0 + $0x168] sm:$0xff]  }
  0x54   :  { %5659 = vmatpush3.bf16.msra.mxu1 %v6231_v4  ;;  %5532 = vmatprep.subr.bf16.mxu0 %v6232_v6  ;;  %v6295_v4 = vld [vmem:[%s7427_s1 + $0x360] sm:$0xff]  }
  0x55   :  { %5660 = vmatprep.subr.bf16.mxu1 %v6233_v7  ;;  %5518 = vmatprep.mubr.bf16.mxu0 %v6234_v8  ;;  %v6298_v8 = vld [vmem:[%s7428_s0 + $0x130] sm:$0xff]  }
  0x56   :  { %5646 = vmatprep.mubr.bf16.mxu1 %v6235_v9  ;;  %v6299_v9 = vld [vmem:[%s7428_s0 + $0x170] sm:$0xff]  }
  0x57   :  { %5533 = vmatpush3.bf16.msra.mxu0 %v6232_v6  ;;  %v6296_v6 = vld [vmem:[%s7427_s1 + $0x268] sm:$0xff]  }
  0x58   :  { %5661 = vmatpush3.bf16.msra.mxu1 %v6233_v7  ;;  %5534 = vmatprep.subr.bf16.mxu0 %v6237_v11  ;;  %v6297_v7 = vld [vmem:[%s7427_s1 + $0x368] sm:$0xff]  }
  0x59   :  { %5662 = vmatprep.subr.bf16.mxu1 %v6239_v12 }
  0x5a   :  { %5519 = vmatmul.mubr.bf16.gmra.mrb[12].mxu0 %v6236_v10  ;;  %v6300_v10 = vld [vmem:[%s7428_s0 + $0x138] sm:$0xff]  }
  0x5b   :  { %5647 = vmatmul.mubr.bf16.gmra.mrb[12].mxu1 %v6238_v13  ;;  %5535 = vmatpush3.bf16.msra.mxu0 %v6237_v11  ;;  %v6302_v11 = vld [vmem:[%s7427_s1 + $0x270] sm:$0xff]   ;;  %v6301_v13 = vld [vmem:[%s7428_s0 + $0x178] sm:$0xff]  }
  0x5c   :  { %5663 = vmatpush3.bf16.msra.mxu1 %v6239_v12  ;;  %5536 = vmatprep.subr.bf16.mxu0 %v6240_v14  ;;  %v6303_v12 = vld [vmem:[%s7427_s1 + $0x370] sm:$0xff]  }
  0x5d   :  { %5664 = vmatprep.subr.bf16.mxu1 %v6241_v15  ;;  %5538 = vmatprep.mubr.bf16.mxu0 %v6242_v16  ;;  %v6306_v16 = vld [vmem:[%s7428_s0 + $0x100] sm:$0xff]  }
  0x5e   :  { %5666 = vmatprep.mubr.bf16.mxu1 %v6243_v17  ;;  %v6307_v17 = vld [vmem:[%s7428_s0 + $0x140] sm:$0xff]  }
  0x5f   :  { %5537 = vmatpush3.bf16.msra.mxu0 %v6240_v14  ;;  %v6304_v14 = vld [vmem:[%s7427_s1 + $0x278] sm:$0xff]  }
  0x60   :  { %5665 = vmatpush3.bf16.msra.mxu1 %v6241_v15  ;;  %5554 = vmatprep.subr.bf16.mxu0 %v6245_v19  ;;  %v6305_v15 = vld [vmem:[%s7427_s1 + $0x378] sm:$0xff]  }
  0x61   :  { %5682 = vmatprep.subr.bf16.mxu1 %v6247_v20 }
  0x62   :  { %5539 = vmatmul.mubr.bf16.vlgmr.msra.gmra.mrb[0].mxu0 %v6244_v18  ;;  %v6308_v18 = vld [vmem:[%s7428_s0 + $0x108] sm:$0xff]  }
  0x63   :  { %5667 = vmatmul.mubr.bf16.vlgmr.msra.gmra.mrb[0].mxu1 %v6246_v21  ;;  %5555 = vmatpush3.bf16.msra.mxu0 %v6245_v19  ;;  %v6309_v19 = vld [vmem:[%s7427_s1 + $0x200] sm:$0xff]   ;;  %v6310_v21 = vld [vmem:[%s7428_s0 + $0x148] sm:$0xff]  }
  0x64   :  { %5683 = vmatpush3.bf16.msra.mxu1 %v6247_v20  ;;  %5556 = vmatprep.subr.bf16.mxu0 %v6248_v22  ;;  %v6311_v20 = vld [vmem:[%s7427_s1 + $0x300] sm:$0xff]  }
  0x65   :  { %5684 = vmatprep.subr.bf16.mxu1 %v6249_v23  ;;  %5542 = vmatprep.mubr.bf16.mxu0 %v6250_v24  ;;  %v6314_v24 = vld [vmem:[%s7428_s0 + $0x110] sm:$0xff]  }
  0x66   :  { %5670 = vmatprep.mubr.bf16.mxu1 %v6251_v25  ;;  %v6315_v25 = vld [vmem:[%s7428_s0 + $0x150] sm:$0xff]  }
  0x67   :  { %5557 = vmatpush3.bf16.msra.mxu0 %v6248_v22  ;;  %v6312_v22 = vld [vmem:[%s7427_s1 + $0x208] sm:$0xff]  }
  0x68   :  { %5685 = vmatpush3.bf16.msra.mxu1 %v6249_v23  ;;  %5558 = vmatprep.subr.bf16.mxu0 %v6253_v27  ;;  %v6313_v23 = vld [vmem:[%s7427_s1 + $0x308] sm:$0xff]  }
  0x69   :  { %5686 = vmatprep.subr.bf16.mxu1 %v6255_v28 }
  0x6a   :  { %5543 = vmatmul.mubr.bf16.gmra.mrb[4].mxu0 %v6252_v26  ;;  %v6316_v26 = vld [vmem:[%s7428_s0 + $0x118] sm:$0xff]  }
  0x6b   :  { %5671 = vmatmul.mubr.bf16.gmra.mrb[4].mxu1 %v6254_v29  ;;  %5559 = vmatpush3.bf16.msra.mxu0 %v6253_v27  ;;  %v6317_v27 = vld [vmem:[%s7427_s1 + $0x210] sm:$0xff]   ;;  %v6318_v29 = vld [vmem:[%s7428_s0 + $0x158] sm:$0xff]  }
  0x6c   :  { %5687 = vmatpush3.bf16.msra.mxu1 %v6255_v28  ;;  %5560 = vmatprep.subr.bf16.mxu0 %v6256_v30  ;;  %v6319_v28 = vld [vmem:[%s7427_s1 + $0x310] sm:$0xff]  }
  0x6d   :  { %5688 = vmatprep.subr.bf16.mxu1 %v6257_v31  ;;  %5546 = vmatprep.mubr.bf16.mxu0 %v6258_v32  ;;  %v6322_v32 = vld [vmem:[%s7428_s0 + $0x120] sm:$0xff]  }
  0x6e   :  { %5674 = vmatprep.mubr.bf16.mxu1 %v6259_v33  ;;  %v6323_v33 = vld [vmem:[%s7428_s0 + $0x160] sm:$0xff]  }
  0x6f   :  { %5561 = vmatpush3.bf16.msra.mxu0 %v6256_v30  ;;  %v6320_v30 = vld [vmem:[%s7427_s1 + $0x218] sm:$0xff]  }
  0x70   :  { %5689 = vmatpush3.bf16.msra.mxu1 %v6257_v31  ;;  %5562 = vmatprep.subr.bf16.mxu0 %v6261_v35  ;;  %v6321_v31 = vld [vmem:[%s7427_s1 + $0x318] sm:$0xff]  }
  0x71   :  { %5690 = vmatprep.subr.bf16.mxu1 %v6263_v36 }
  0x72   :  { %5547 = vmatmul.mubr.bf16.gmra.mrb[8].mxu0 %v6260_v34  ;;  %v6324_v34 = vld [vmem:[%s7428_s0 + $0x128] sm:$0xff]  }
  0x73   :  { %5675 = vmatmul.mubr.bf16.gmra.mrb[8].mxu1 %v6262_v37  ;;  %5563 = vmatpush3.bf16.msra.mxu0 %v6261_v35  ;;  %v6325_v35 = vld [vmem:[%s7427_s1 + $0x220] sm:$0xff]   ;;  %v6326_v37 = vld [vmem:[%s7428_s0 + $0x168] sm:$0xff]  }
  0x74   :  { %5691 = vmatpush3.bf16.msra.mxu1 %v6263_v36  ;;  %5564 = vmatprep.subr.bf16.mxu0 %v6264_v38  ;;  %v6327_v36 = vld [vmem:[%s7427_s1 + $0x320] sm:$0xff]  }
  0x75   :  { %5692 = vmatprep.subr.bf16.mxu1 %v6265_v39  ;;  %5550 = vmatprep.mubr.bf16.mxu0 %v6266_v40  ;;  %v6330_v40 = vld [vmem:[%s7428_s0 + $0x130] sm:$0xff]  }
  0x76   :  { %5678 = vmatprep.mubr.bf16.mxu1 %v6267_v41  ;;  %v6331_v41 = vld [vmem:[%s7428_s0 + $0x170] sm:$0xff]  }
  0x77   :  { %5565 = vmatpush3.bf16.msra.mxu0 %v6264_v38  ;;  %v6328_v38 = vld [vmem:[%s7427_s1 + $0x228] sm:$0xff]  }
  0x78   :  { %5693 = vmatpush3.bf16.msra.mxu1 %v6265_v39  ;;  %5566 = vmatprep.subr.bf16.mxu0 %v6269_v43  ;;  %v6329_v39 = vld [vmem:[%s7427_s1 + $0x328] sm:$0xff]  }
  0x79   :  { %5694 = vmatprep.subr.bf16.mxu1 %v6271_v44 }
  0x7a   :  { %5551 = vmatmul.mubr.bf16.gmra.mrb[12].mxu0 %v6268_v42  ;;  %v6332_v42 = vld [vmem:[%s7428_s0 + $0x138] sm:$0xff]  }
  0x7b   :  { %5679 = vmatmul.mubr.bf16.gmra.mrb[12].mxu1 %v6270_v45  ;;  %5567 = vmatpush3.bf16.msra.mxu0 %v6269_v43  ;;  %v6333_v43 = vld [vmem:[%s7427_s1 + $0x230] sm:$0xff]   ;;  %v6334_v45 = vld [vmem:[%s7428_s0 + $0x178] sm:$0xff]  }
  0x7c   :  { %5695 = vmatpush3.bf16.msra.mxu1 %v6271_v44  ;;  %5568 = vmatprep.subr.bf16.mxu0 %v6272_v46  ;;  %v6335_v44 = vld [vmem:[%s7427_s1 + $0x330] sm:$0xff]  }
  0x7d   :  { %5696 = vmatprep.subr.bf16.mxu1 %v6273_v47  ;;  %5570 = vmatprep.mubr.bf16.mxu0 %v6274_v48  ;;  %v6338_v48 = vld [vmem:[%s7428_s0 + $0xc0] sm:$0xff]  }
  0x7e   :  { %5698 = vmatprep.mubr.bf16.mxu1 %v6275_v49  ;;  %v6339_v49 = vld [vmem:[%s7428_s0 + $0x100] sm:$0xff]  }
  0x7f   :  { %5569 = vmatpush3.bf16.msra.mxu0 %v6272_v46  ;;  %v6336_v46 = vld [vmem:[%s7427_s1 + $0x238] sm:$0xff]  }
  0x80   :  { %5697 = vmatpush3.bf16.msra.mxu1 %v6273_v47  ;;  %5714 = vmatprep.subr.bf16.mxu0 %v6278_v51  ;;  %v6337_v47 = vld [vmem:[%s7427_s1 + $0x338] sm:$0xff]  }
  0x81   :  { %5842 = vmatprep.subr.bf16.mxu1 %v6279_v52 }
  0x82   :  { %5571 = vmatmul.mubr.bf16.vlgmr.msra.gmra.mrb[0].mxu0 %v6276_v50  ;;  %v6340_v50 = vld [vmem:[%s7428_s0 + $0xc8] sm:$0xff]  }
  0x83   :  { %5699 = vmatmul.mubr.bf16.vlgmr.msra.gmra.mrb[0].mxu1 %v6277_v53  ;;  %5715 = vmatpush3.bf16.msra.mxu0 %v6278_v51  ;;  %v6341_v51 = vld [vmem:[%s7427_s1 + $0x280] sm:$0xff]   ;;  %v6342_v53 = vld [vmem:[%s7428_s0 + $0x108] sm:$0xff]  }
  0x84   :  { %5843 = vmatpush3.bf16.msra.mxu1 %v6279_v52  ;;  %5716 = vmatprep.subr.bf16.mxu0 %v6280_v54  ;;  %v6343_v52 = vld [vmem:[%s7427_s1 + $0x380] sm:$0xff]  }
  0x85   :  { %5844 = vmatprep.subr.bf16.mxu1 %v6281_v55  ;;  %5574 = vmatprep.mubr.bf16.mxu0 %v6282_v56  ;;  %v6346_v56 = vld [vmem:[%s7428_s0 + $0xd0] sm:$0xff]  }
  0x86   :  { %5702 = vmatprep.mubr.bf16.mxu1 %v6283_v57  ;;  %v6347_v57 = vld [vmem:[%s7428_s0 + $0x110] sm:$0xff]  }
  0x87   :  { %5717 = vmatpush3.bf16.msra.mxu0 %v6280_v54  ;;  %v6344_v54 = vld [vmem:[%s7427_s1 + $0x288] sm:$0xff]  }
  0x88   :  { %5845 = vmatpush3.bf16.msra.mxu1 %v6281_v55  ;;  %5718 = vmatprep.subr.bf16.mxu0 %v6286_v59  ;;  %v6345_v55 = vld [vmem:[%s7427_s1 + $0x388] sm:$0xff]  }
  0x89   :  { %5846 = vmatprep.subr.bf16.mxu1 %v6287_v60 }
  0x8a   :  { %5575 = vmatmul.mubr.bf16.gmra.mrb[4].mxu0 %v6284_v58  ;;  %v6348_v58 = vld [vmem:[%s7428_s0 + $0xd8] sm:$0xff]  }
  0x8b   :  { %5703 = vmatmul.mubr.bf16.gmra.mrb[4].mxu1 %v6285_v61  ;;  %5719 = vmatpush3.bf16.msra.mxu0 %v6286_v59  ;;  %v6349_v59 = vld [vmem:[%s7427_s1 + $0x290] sm:$0xff]   ;;  %v6350_v61 = vld [vmem:[%s7428_s0 + $0x118] sm:$0xff]  }
  0x8c   :  { %5847 = vmatpush3.bf16.msra.mxu1 %v6287_v60  ;;  %5720 = vmatprep.subr.bf16.mxu0 %v6288_v62  ;;  %v6351_v60 = vld [vmem:[%s7427_s1 + $0x390] sm:$0xff]  }
  0x8d   :  { %5848 = vmatprep.subr.bf16.mxu1 %v6289_v63  ;;  %5578 = vmatprep.mubr.bf16.mxu0 %v6290_v0  ;;  %v6354_v0 = vld [vmem:[%s7428_s0 + $0xe0] sm:$0xff]  }
  0x8e   :  { %5706 = vmatprep.mubr.bf16.mxu1 %v6291_v1  ;;  %v6355_v1 = vld [vmem:[%s7428_s0 + $0x120] sm:$0xff]  }
  0x8f   :  { %5721 = vmatpush3.bf16.msra.mxu0 %v6288_v62  ;;  %v6352_v62 = vld [vmem:[%s7427_s1 + $0x298] sm:$0xff]  }
  0x90   :  { %5849 = vmatpush3.bf16.msra.mxu1 %v6289_v63  ;;  %5722 = vmatprep.subr.bf16.mxu0 %v6294_v3  ;;  %v6353_v63 = vld [vmem:[%s7427_s1 + $0x398] sm:$0xff]  }
  0x91   :  { %5850 = vmatprep.subr.bf16.mxu1 %v6295_v4 }
  0x92   :  { %5579 = vmatmul.mubr.bf16.gmra.mrb[8].mxu0 %v6292_v2  ;;  %v6356_v2 = vld [vmem:[%s7428_s0 + $0xe8] sm:$0xff]  }
  0x93   :  { %5707 = vmatmul.mubr.bf16.gmra.mrb[8].mxu1 %v6293_v5  ;;  %5723 = vmatpush3.bf16.msra.mxu0 %v6294_v3  ;;  %v6357_v3 = vld [vmem:[%s7427_s1 + $0x2a0] sm:$0xff]   ;;  %v6358_v5 = vld [vmem:[%s7428_s0 + $0x128] sm:$0xff]  }
  0x94   :  { %5851 = vmatpush3.bf16.msra.mxu1 %v6295_v4  ;;  %5724 = vmatprep.subr.bf16.mxu0 %v6296_v6  ;;  %v6359_v4 = vld [vmem:[%s7427_s1 + $0x3a0] sm:$0xff]  }
  0x95   :  { %5852 = vmatprep.subr.bf16.mxu1 %v6297_v7  ;;  %5582 = vmatprep.mubr.bf16.mxu0 %v6298_v8  ;;  %v6362_v8 = vld [vmem:[%s7428_s0 + $0xf0] sm:$0xff]  }
  0x96   :  { %5710 = vmatprep.mubr.bf16.mxu1 %v6299_v9  ;;  %v6363_v9 = vld [vmem:[%s7428_s0 + $0x130] sm:$0xff]  }
  0x97   :  { %5725 = vmatpush3.bf16.msra.mxu0 %v6296_v6  ;;  %v6360_v6 = vld [vmem:[%s7427_s1 + $0x2a8] sm:$0xff]  }
  0x98   :  { %5853 = vmatpush3.bf16.msra.mxu1 %v6297_v7  ;;  %5726 = vmatprep.subr.bf16.mxu0 %v6302_v11  ;;  %v6361_v7 = vld [vmem:[%s7427_s1 + $0x3a8] sm:$0xff]  }
  0x99   :  { %5854 = vmatprep.subr.bf16.mxu1 %v6303_v12 }
  0x9a   :  { %5583 = vmatmul.mubr.bf16.gmra.mrb[12].mxu0 %v6300_v10  ;;  %v6364_v10 = vld [vmem:[%s7428_s0 + $0xf8] sm:$0xff]  }
  0x9b   :  { %5711 = vmatmul.mubr.bf16.gmra.mrb[12].mxu1 %v6301_v13  ;;  %5727 = vmatpush3.bf16.msra.mxu0 %v6302_v11  ;;  %v6365_v11 = vld [vmem:[%s7427_s1 + $0x2b0] sm:$0xff]   ;;  %v6366_v13 = vld [vmem:[%s7428_s0 + $0x138] sm:$0xff]  }
  0x9c   :  { %5855 = vmatpush3.bf16.msra.mxu1 %v6303_v12  ;;  %5728 = vmatprep.subr.bf16.mxu0 %v6304_v14  ;;  %v6367_v12 = vld [vmem:[%s7427_s1 + $0x3b0] sm:$0xff]  }
  0x9d   :  { %5856 = vmatprep.subr.bf16.mxu1 %v6305_v15  ;;  %5730 = vmatprep.mubr.bf16.mxu0 %v6306_v16  ;;  %v6370_v16 = vld [vmem:[%s7428_s0 + $0x180] sm:$0xff]  }
  0x9e   :  { %5858 = vmatprep.mubr.bf16.mxu1 %v6307_v17  ;;  %v6371_v17 = vld [vmem:[%s7428_s0 + $0x1c0] sm:$0xff]  }
  0x9f   :  { %5729 = vmatpush3.bf16.msra.mxu0 %v6304_v14  ;;  %v6368_v14 = vld [vmem:[%s7427_s1 + $0x2b8] sm:$0xff]  }
  0xa0   :  { %5857 = vmatpush3.bf16.msra.mxu1 %v6305_v15  ;;  %5746 = vmatprep.subr.bf16.mxu0 %v6309_v19  ;;  %v6369_v15 = vld [vmem:[%s7427_s1 + $0x3b8] sm:$0xff]  }
  0xa1   :  { %5874 = vmatprep.subr.bf16.mxu1 %v6311_v20 }
  0xa2   :  { %5731 = vmatmul.mubr.bf16.vlgmr.msra.gmra.mrb[16].mxu0 %v6308_v18  ;;  %v6372_v18 = vld [vmem:[%s7428_s0 + $0x188] sm:$0xff]  }
  0xa3   :  { %5859 = vmatmul.mubr.bf16.vlgmr.msra.gmra.mrb[16].mxu1 %v6310_v21  ;;  %5747 = vmatpush3.bf16.msra.mxu0 %v6309_v19  ;;  %v6373_v19 = vld [vmem:[%s7427_s1 + $0x2c0] sm:$0xff]   ;;  %v6374_v21 = vld [vmem:[%s7428_s0 + $0x1c8] sm:$0xff]  }
  0xa4   :  { %5875 = vmatpush3.bf16.msra.mxu1 %v6311_v20  ;;  %5748 = vmatprep.subr.bf16.mxu0 %v6312_v22  ;;  %v6375_v20 = vld [vmem:[%s7427_s1 + $0x3c0] sm:$0xff]  }
  0xa5   :  { %5876 = vmatprep.subr.bf16.mxu1 %v6313_v23  ;;  %5734 = vmatprep.mubr.bf16.mxu0 %v6314_v24  ;;  %v6378_v24 = vld [vmem:[%s7428_s0 + $0x190] sm:$0xff]  }
  0xa6   :  { %5862 = vmatprep.mubr.bf16.mxu1 %v6315_v25  ;;  %v6379_v25 = vld [vmem:[%s7428_s0 + $0x1d0] sm:$0xff]  }
  0xa7   :  { %5749 = vmatpush3.bf16.msra.mxu0 %v6312_v22  ;;  %v6376_v22 = vld [vmem:[%s7427_s1 + $0x2c8] sm:$0xff]  }
  0xa8   :  { %5877 = vmatpush3.bf16.msra.mxu1 %v6313_v23  ;;  %5750 = vmatprep.subr.bf16.mxu0 %v6317_v27  ;;  %v6377_v23 = vld [vmem:[%s7427_s1 + $0x3c8] sm:$0xff]  }
  0xa9   :  { %5878 = vmatprep.subr.bf16.mxu1 %v6319_v28 }
  0xaa   :  { %5735 = vmatmul.mubr.bf16.gmra.mrb[20].mxu0 %v6316_v26  ;;  %v6380_v26 = vld [vmem:[%s7428_s0 + $0x198] sm:$0xff]  }
  0xab   :  { %5863 = vmatmul.mubr.bf16.gmra.mrb[20].mxu1 %v6318_v29  ;;  %5751 = vmatpush3.bf16.msra.mxu0 %v6317_v27  ;;  %v6381_v27 = vld [vmem:[%s7427_s1 + $0x2d0] sm:$0xff]   ;;  %v6382_v29 = vld [vmem:[%s7428_s0 + $0x1d8] sm:$0xff]  }
  0xac   :  { %5879 = vmatpush3.bf16.msra.mxu1 %v6319_v28  ;;  %5752 = vmatprep.subr.bf16.mxu0 %v6320_v30  ;;  %v6383_v28 = vld [vmem:[%s7427_s1 + $0x3d0] sm:$0xff]  }
  0xad   :  { %5880 = vmatprep.subr.bf16.mxu1 %v6321_v31  ;;  %5738 = vmatprep.mubr.bf16.mxu0 %v6322_v32  ;;  %v6386_v32 = vld [vmem:[%s7428_s0 + $0x1a0] sm:$0xff]  }
  0xae   :  { %5866 = vmatprep.mubr.bf16.mxu1 %v6323_v33  ;;  %v6387_v33 = vld [vmem:[%s7428_s0 + $0x1e0] sm:$0xff]  }
  0xaf   :  { %5753 = vmatpush3.bf16.msra.mxu0 %v6320_v30  ;;  %v6384_v30 = vld [vmem:[%s7427_s1 + $0x2d8] sm:$0xff]  }
  0xb0   :  { %5881 = vmatpush3.bf16.msra.mxu1 %v6321_v31  ;;  %5754 = vmatprep.subr.bf16.mxu0 %v6325_v35  ;;  %v6385_v31 = vld [vmem:[%s7427_s1 + $0x3d8] sm:$0xff]  }
  0xb1   :  { %5882 = vmatprep.subr.bf16.mxu1 %v6327_v36 }
  0xb2   :  { %5739 = vmatmul.mubr.bf16.gmra.mrb[24].mxu0 %v6324_v34  ;;  %v6388_v34 = vld [vmem:[%s7428_s0 + $0x1a8] sm:$0xff]  }
  0xb3   :  { %5867 = vmatmul.mubr.bf16.gmra.mrb[24].mxu1 %v6326_v37  ;;  %5755 = vmatpush3.bf16.msra.mxu0 %v6325_v35  ;;  %v6389_v35 = vld [vmem:[%s7427_s1 + $0x2e0] sm:$0xff]   ;;  %v6390_v37 = vld [vmem:[%s7428_s0 + $0x1e8] sm:$0xff]  }
  0xb4   :  { %5883 = vmatpush3.bf16.msra.mxu1 %v6327_v36  ;;  %5756 = vmatprep.subr.bf16.mxu0 %v6328_v38  ;;  %v6391_v36 = vld [vmem:[%s7427_s1 + $0x3e0] sm:$0xff]  }
  0xb5   :  { %5884 = vmatprep.subr.bf16.mxu1 %v6329_v39  ;;  %5742 = vmatprep.mubr.bf16.mxu0 %v6330_v40  ;;  %v6394_v40 = vld [vmem:[%s7428_s0 + $0x1b0] sm:$0xff]  }
  0xb6   :  { %5870 = vmatprep.mubr.bf16.mxu1 %v6331_v41  ;;  %v6395_v41 = vld [vmem:[%s7428_s0 + $0x1f0] sm:$0xff]  }
  0xb7   :  { %5757 = vmatpush3.bf16.msra.mxu0 %v6328_v38  ;;  %v6392_v38 = vld [vmem:[%s7427_s1 + $0x2e8] sm:$0xff]  }
  0xb8   :  { %5885 = vmatpush3.bf16.msra.mxu1 %v6329_v39  ;;  %5758 = vmatprep.subr.bf16.mxu0 %v6333_v43  ;;  %v6393_v39 = vld [vmem:[%s7427_s1 + $0x3e8] sm:$0xff]  }
  0xb9   :  { %5886 = vmatprep.subr.bf16.mxu1 %v6335_v44 }
  0xba   :  { %5743 = vmatmul.mubr.bf16.gmra.mrb[28].mxu0 %v6332_v42  ;;  %v6396_v42 = vld [vmem:[%s7428_s0 + $0x1b8] sm:$0xff]  }
  0xbb   :  { %5871 = vmatmul.mubr.bf16.gmra.mrb[28].mxu1 %v6334_v45  ;;  %5759 = vmatpush3.bf16.msra.mxu0 %v6333_v43  ;;  %v6397_v43 = vld [vmem:[%s7427_s1 + $0x2f0] sm:$0xff]   ;;  %v6398_v45 = vld [vmem:[%s7428_s0 + $0x1f8] sm:$0xff]  }
  0xbc   :  { %5887 = vmatpush3.bf16.msra.mxu1 %v6335_v44  ;;  %5760 = vmatprep.subr.bf16.mxu0 %v6336_v46  ;;  %v6399_v44 = vld [vmem:[%s7427_s1 + $0x3f0] sm:$0xff]  }
  0xbd   :  { %5888 = vmatprep.subr.bf16.mxu1 %v6337_v47  ;;  %5762 = vmatprep.mubr.bf16.mxu0 %v6338_v48  ;;  %v6402_v48 = vld [vmem:[%s7428_s0 + $0x1c0] sm:$0xff]  }
  0xbe   :  { %5890 = vmatprep.mubr.bf16.mxu1 %v6339_v49  ;;  %v6403_v49 = vld [vmem:[%s7428_s0 + $0x200] sm:$0xff]  }
  0xbf   :  { %5761 = vmatpush3.bf16.msra.mxu0 %v6336_v46  ;;  %v6400_v46 = vld [vmem:[%s7427_s1 + $0x2f8] sm:$0xff]  }
  0xc0   :  { %5889 = vmatpush3.bf16.msra.mxu1 %v6337_v47  ;;  %5778 = vmatprep.subr.bf16.mxu0 %v6341_v51  ;;  %v6401_v47 = vld [vmem:[%s7427_s1 + $0x3f8] sm:$0xff]  }
  0xc1   :  { %5906 = vmatprep.subr.bf16.mxu1 %v6343_v52 }
  0xc2   :  { %5763 = vmatmul.mubr.bf16.vlgmr.msra.gmra.mrb[16].mxu0 %v6340_v50  ;;  %v6404_v50 = vld [vmem:[%s7428_s0 + $0x1c8] sm:$0xff]  }
  0xc3   :  { %5891 = vmatmul.mubr.bf16.vlgmr.msra.gmra.mrb[16].mxu1 %v6342_v53  ;;  %5779 = vmatpush3.bf16.msra.mxu0 %v6341_v51  ;;  %v6405_v51 = vld [vmem:[%s7428_s0 + $0x208] sm:$0xff]   ;;  %v6407_v53 = vld [vmem:[%s7428_s0 + $0x210] sm:$0xff]  }
  0xc4   :  { %5907 = vmatpush3.bf16.msra.mxu1 %v6343_v52  ;;  %5780 = vmatprep.subr.bf16.mxu0 %v6344_v54  ;;  %v6406_v52 = vld [vmem:[%s7428_s0 + $0x1d0] sm:$0xff]  }
  0xc5   :  { %5908 = vmatprep.subr.bf16.mxu1 %v6345_v55  ;;  %5766 = vmatprep.mubr.bf16.mxu0 %v6346_v56  ;;  %v6410_v56 = vld [vmem:[%s7428_s0 + $0x1e0] sm:$0xff]  }
  0xc6   :  { %5894 = vmatprep.mubr.bf16.mxu1 %v6347_v57  ;;  %v6411_v57 = vld [vmem:[%s7428_s0 + $0x220] sm:$0xff]  }
  0xc7   :  { %5781 = vmatpush3.bf16.msra.mxu0 %v6344_v54  ;;  %v6408_v54 = vld [vmem:[%s7428_s0 + $0x1d8] sm:$0xff]  }
  0xc8   :  { %5909 = vmatpush3.bf16.msra.mxu1 %v6345_v55  ;;  %5782 = vmatprep.subr.bf16.mxu0 %v6349_v59  ;;  %v6409_v55 = vld [vmem:[%s7428_s0 + $0x218] sm:$0xff]  }
  0xc9   :  { %5910 = vmatprep.subr.bf16.mxu1 %v6351_v60 }
  0xca   :  { %5767 = vmatmul.mubr.bf16.gmra.mrb[20].mxu0 %v6348_v58  ;;  %v6412_v58 = vld [vmem:[%s7428_s0 + $0x1e8] sm:$0xff]  }
  0xcb   :  { %5895 = vmatmul.mubr.bf16.gmra.mrb[20].mxu1 %v6350_v61  ;;  %5783 = vmatpush3.bf16.msra.mxu0 %v6349_v59  ;;  %v6413_v59 = vld [vmem:[%s7428_s0 + $0x228] sm:$0xff]   ;;  %v6415_v61 = vld [vmem:[%s7428_s0 + $0x230] sm:$0xff]  }
  0xcc   :  { %5911 = vmatpush3.bf16.msra.mxu1 %v6351_v60  ;;  %5784 = vmatprep.subr.bf16.mxu0 %v6352_v62  ;;  %v6414_v60 = vld [vmem:[%s7428_s0 + $0x1f0] sm:$0xff]  }
  0xcd   :  { %5912 = vmatprep.subr.bf16.mxu1 %v6353_v63  ;;  %5770 = vmatprep.mubr.bf16.mxu0 %v6354_v0 }
  0xce   :  { %5898 = vmatprep.mubr.bf16.mxu1 %v6355_v1 }
  0xcf   :  { %5785 = vmatpush3.bf16.msra.mxu0 %v6352_v62  ;;  %v6416_v62 = vld [vmem:[%s7428_s0 + $0x1f8] sm:$0xff]  }
  0xd0   :  { %5913 = vmatpush3.bf16.msra.mxu1 %v6353_v63  ;;  %5786 = vmatprep.subr.bf16.mxu0 %v6357_v3  ;;  %v6417_v63 = vld [vmem:[%s7428_s0 + $0x238] sm:$0xff]  }
  0xd1   :  { %5914 = vmatprep.subr.bf16.mxu1 %v6359_v4 }
  0xd2   :  { %5771 = vmatmul.mubr.bf16.gmra.mrb[24].mxu0 %v6356_v2 }
  0xd3   :  { %5899 = vmatmul.mubr.bf16.gmra.mrb[24].mxu1 %v6358_v5  ;;  %5787 = vmatpush3.bf16.msra.mxu0 %v6357_v3 }
  0xd4   :  { %5915 = vmatpush3.bf16.msra.mxu1 %v6359_v4  ;;  %5788 = vmatprep.subr.bf16.mxu0 %v6360_v6 }
  0xd5   :  { %5916 = vmatprep.subr.bf16.mxu1 %v6361_v7  ;;  %5774 = vmatprep.mubr.bf16.mxu0 %v6362_v8 }
  0xd6   :  { %5902 = vmatprep.mubr.bf16.mxu1 %v6363_v9 }
  0xd7   :  { %5789 = vmatpush3.bf16.msra.mxu0 %v6360_v6 }
  0xd8   :  { %5917 = vmatpush3.bf16.msra.mxu1 %v6361_v7  ;;  %5790 = vmatprep.subr.bf16.mxu0 %v6365_v11 }
  0xd9   :  { %5918 = vmatprep.subr.bf16.mxu1 %v6367_v12 }
  0xda   :  { %5775 = vmatmul.mubr.bf16.gmra.mrb[28].mxu0 %v6364_v10 }
  0xdb   :  { %5903 = vmatmul.mubr.bf16.gmra.mrb[28].mxu1 %v6366_v13  ;;  %5791 = vmatpush3.bf16.msra.mxu0 %v6365_v11 }
  0xdc   :  { %5919 = vmatpush3.bf16.msra.mxu1 %v6367_v12  ;;  %5792 = vmatprep.subr.bf16.mxu0 %v6368_v14 }
  0xdd   :  { %5920 = vmatprep.subr.bf16.mxu1 %v6369_v15  ;;  %5794 = vmatprep.mubr.bf16.mxu0 %v6370_v16 }
  0xde   :  { %5922 = vmatprep.mubr.bf16.mxu1 %v6371_v17 }
  0xdf   :  { %5793 = vmatpush3.bf16.msra.mxu0 %v6368_v14 }
  0xe0   :  { %5921 = vmatpush3.bf16.msra.mxu1 %v6369_v15  ;;  %5810 = vmatprep.subr.bf16.mxu0 %v6373_v19 }
  0xe1   :  { %5938 = vmatprep.subr.bf16.mxu1 %v6375_v20 }
  0xe2   :  { %5795 = vmatmul.mubr.bf16.vlgmr.msra.gmra.mrb[16].mxu0 %v6372_v18 }
  0xe3   :  { %5923 = vmatmul.mubr.bf16.vlgmr.msra.gmra.mrb[16].mxu1 %v6374_v21  ;;  %5811 = vmatpush3.bf16.msra.mxu0 %v6373_v19 }
  0xe4   :  { %5939 = vmatpush3.bf16.msra.mxu1 %v6375_v20  ;;  %5812 = vmatprep.subr.bf16.mxu0 %v6376_v22 }
  0xe5   :  { %5940 = vmatprep.subr.bf16.mxu1 %v6377_v23  ;;  %5798 = vmatprep.mubr.bf16.mxu0 %v6378_v24 }
  0xe6   :  { %5926 = vmatprep.mubr.bf16.mxu1 %v6379_v25 }
  0xe7   :  { %5813 = vmatpush3.bf16.msra.mxu0 %v6376_v22 }
  0xe8   :  { %5941 = vmatpush3.bf16.msra.mxu1 %v6377_v23  ;;  %5814 = vmatprep.subr.bf16.mxu0 %v6381_v27 }
  0xe9   :  { %5942 = vmatprep.subr.bf16.mxu1 %v6383_v28 }
  0xea   :  { %5799 = vmatmul.mubr.bf16.gmra.mrb[20].mxu0 %v6380_v26 }
  0xeb   :  { %5927 = vmatmul.mubr.bf16.gmra.mrb[20].mxu1 %v6382_v29  ;;  %5815 = vmatpush3.bf16.msra.mxu0 %v6381_v27 }
  0xec   :  { %5943 = vmatpush3.bf16.msra.mxu1 %v6383_v28  ;;  %5816 = vmatprep.subr.bf16.mxu0 %v6384_v30 }
  0xed   :  { %5944 = vmatprep.subr.bf16.mxu1 %v6385_v31  ;;  %5802 = vmatprep.mubr.bf16.mxu0 %v6386_v32 }
  0xee   :  { %5930 = vmatprep.mubr.bf16.mxu1 %v6387_v33 }
  0xef   :  { %5817 = vmatpush3.bf16.msra.mxu0 %v6384_v30 }
  0xf0   :  { %5945 = vmatpush3.bf16.msra.mxu1 %v6385_v31  ;;  %5818 = vmatprep.subr.bf16.mxu0 %v6389_v35 }
  0xf1   :  { %5946 = vmatprep.subr.bf16.mxu1 %v6391_v36 }
  0xf2   :  { %5803 = vmatmul.mubr.bf16.gmra.mrb[24].mxu0 %v6388_v34 }
  0xf3   :  { %5931 = vmatmul.mubr.bf16.gmra.mrb[24].mxu1 %v6390_v37  ;;  %5819 = vmatpush3.bf16.msra.mxu0 %v6389_v35 }
  0xf4   :  { %5947 = vmatpush3.bf16.msra.mxu1 %v6391_v36  ;;  %5820 = vmatprep.subr.bf16.mxu0 %v6392_v38 }
  0xf5   :  { %5948 = vmatprep.subr.bf16.mxu1 %v6393_v39  ;;  %5806 = vmatprep.mubr.bf16.mxu0 %v6394_v40 }
  0xf6   :  { %5934 = vmatprep.mubr.bf16.mxu1 %v6395_v41 }
  0xf7   :  { %5821 = vmatpush3.bf16.msra.mxu0 %v6392_v38 }
  0xf8   :  { %5949 = vmatpush3.bf16.msra.mxu1 %v6393_v39  ;;  %5822 = vmatprep.subr.bf16.mxu0 %v6397_v43 }
  0xf9   :  { %5950 = vmatprep.subr.bf16.mxu1 %v6399_v44 }
  0xfa   :  { %5807 = vmatmul.mubr.bf16.gmra.mrb[28].mxu0 %v6396_v42 }
  0xfb   :  { %5935 = vmatmul.mubr.bf16.gmra.mrb[28].mxu1 %v6398_v45  ;;  %5823 = vmatpush3.bf16.msra.mxu0 %v6397_v43 }
  0xfc   :  { %5951 = vmatpush3.bf16.msra.mxu1 %v6399_v44  ;;  %5824 = vmatprep.subr.bf16.mxu0 %v6400_v46 }
  0xfd   :  { %5952 = vmatprep.subr.bf16.mxu1 %v6401_v47  ;;  %5826 = vmatprep.mubr.bf16.mxu0 %v6402_v48 }
  0xfe   :  { %5954 = vmatprep.mubr.bf16.mxu1 %v6403_v49 }
  0xff   :  { %5825 = vmatpush3.bf16.msra.mxu0 %v6400_v46 }
 0x100   :  { %5953 = vmatpush3.bf16.msra.mxu1 %v6401_v47 }
 0x102   :  { %5827 = vmatmul.mubr.bf16.vlgmr.msra.gmra.mrb[16].mxu0 %v6404_v50 }
 0x103   :  { %5955 = vmatmul.mubr.bf16.vlgmr.msra.gmra.mrb[16].mxu1 %v6405_v51  ;;  %5830 = vmatprep.mubr.bf16.mxu0 %v6406_v52 }
 0x104   :  { %5958 = vmatprep.mubr.bf16.mxu1 %v6407_v53 }
 0x10a   :  { %5831 = vmatmul.mubr.bf16.gmra.mrb[20].mxu0 %v6408_v54 }
 0x10b   :  { %5959 = vmatmul.mubr.bf16.gmra.mrb[20].mxu1 %v6409_v55  ;;  %5834 = vmatprep.mubr.bf16.mxu0 %v6410_v56 }
 0x10c   :  { %5962 = vmatprep.mubr.bf16.mxu1 %v6411_v57 }
 0x112   :  { %5835 = vmatmul.mubr.bf16.gmra.mrb[24].mxu0 %v6412_v58 }
 0x113   :  { %5963 = vmatmul.mubr.bf16.gmra.mrb[24].mxu1 %v6413_v59  ;;  %5838 = vmatprep.mubr.bf16.mxu0 %v6414_v60 }
 0x114   :  { %5966 = vmatprep.mubr.bf16.mxu1 %v6415_v61 }
 0x11a   :  { %5839 = vmatmul.mubr.bf16.gmra.mrb[28].mxu0 %v6416_v62 }
 0x11b   :  { %5967 = vmatmul.mubr.bf16.gmra.mrb[28].mxu1 %v6417_v63 }
 0x155   :  { %v5572_v0 = vpop.f32.mrb[0].mxu0 }
 0x156   :  { %v5140_v1 = vpack.c.bf16 %v5572_v0, %v5572_v0  ;;  %v5700_v2 = vpop.f32.mrb[0].mxu1  ;;  %v874_v3 = vpop.f32.mrb[1].mxu0  ;;  %v1057_v22 = vmul.f32 %v5572_v0, %v5572_v0 }
 0x157   :  { %v5156_v4 = vpack.c.bf16 %v5700_v2, %v5700_v2  ;;  %v5138_v5 = vpack.c.bf16 %v874_v3, %v874_v3  ;;  %v1952_v6 = vpop.f32.mrb[1].mxu1  ;;  %v5573_v7 = vpop.f32.mrb[2].mxu0  ;;  %v1055_v8 = vmul.f32 %v874_v3, %v874_v3  ;;  %v2135_v24 = vmul.f32 %v5700_v2, %v5700_v2 }
 0x158   :  { %1019 = vst [vmem:[%s7429_s2 + $0x20] sm:$0xf] %v5140_v1  ;;  %v5154_v9 = vpack.c.bf16 %v1952_v6, %v1952_v6  ;;  %v5141_v10 = vpack.c.bf16 %v5573_v7, %v5573_v7  ;;  %v5701_v11 = vpop.f32.mrb[2].mxu1  ;;  %v877_v12 = vpop.f32.mrb[3].mxu0  ;;  %v2133_v13 = vmul.f32 %v1952_v6, %v1952_v6  ;;  %v1058_v30 = vmul.f32 %v5573_v7, %v5573_v7 }
 0x159   :  { %2097 = vst [vmem:[%s7429_s2 + $0x24] sm:$0xf] %v5156_v4  ;;  %1017 = vst [vmem:[%s7429_s2] sm:$0xf] %v5138_v5  ;;  %v5157_v14 = vpack.c.bf16 %v5701_v11, %v5701_v11  ;;  %v5139_v15 = vpack.c.bf16 %v877_v12, %v877_v12  ;;  %v1033_v16 = vadd.f32 %v877_v12, %v874_v3  ;;  %v1955_v17 = vpop.f32.mrb[3].mxu1 }
 0x15a   :  { %2095 = vst [vmem:[%s7429_s2 + $0x4] sm:$0xf] %v5154_v9  ;;  %1020 = vst [vmem:[%s7429_s2 + $0x30] sm:$0xf] %v5141_v10  ;;  %v1056_v18 = vmul.f32 %v877_v12, %v877_v12  ;;  %v5155_v19 = vpack.c.bf16 %v1955_v17, %v1955_v17  ;;  %v2111_v20 = vadd.f32 %v1955_v17, %v1952_v6 }
 0x15b   :  { %v2134_v21 = vmul.f32 %v1955_v17, %v1955_v17  ;;  %2098 = vst [vmem:[%s7429_s2 + $0x34] sm:$0xf] %v5157_v14  ;;  %1018 = vst [vmem:[%s7429_s2 + $0x10] sm:$0xf] %v5139_v15  ;;  %v1034_v23 = vadd.f32 %v5572_v0, %v1033_v16  ;;  %v2136_v36 = vmul.f32 %v5701_v11, %v5701_v11 }
 0x15c   :  { %v1071_v25 = vadd.f32 %v1056_v18, %v1055_v8  ;;  %2096 = vst [vmem:[%s7429_s2 + $0x14] sm:$0xf] %v5155_v19  ;;  %v2112_v26 = vadd.f32 %v5700_v2, %v2111_v20 }
 0x15d   :  { %v2149_v27 = vadd.f32 %v2134_v21, %v2133_v13  ;;  %v5576_v28 = vpop.f32.mrb[4].mxu0  ;;  %v1035_v29 = vadd.f32 %v5573_v7, %v1034_v23 }
 0x15e   :  { %v1072_v31 = vadd.f32 %v1071_v25, %v1057_v22  ;;  %v5144_v33 = vpack.c.bf16 %v5576_v28, %v5576_v28  ;;  %v5704_v34 = vpop.f32.mrb[4].mxu1  ;;  %v890_v35 = vpop.f32.mrb[5].mxu0  ;;  %v2113_v45 = vadd.f32 %v5701_v11, %v2112_v26  ;;  %v1061_v62 = vmul.f32 %v5576_v28, %v5576_v28 }
 0x15f   :  { %v2150_v32 = vadd.f32 %v2149_v27, %v2135_v24  ;;  %v5160_v37 = vpack.c.bf16 %v5704_v34, %v5704_v34  ;;  %v5142_v38 = vpack.c.bf16 %v890_v35, %v890_v35  ;;  %v1036_v39 = vadd.f32 %v1035_v29, %v890_v35  ;;  %v1968_v40 = vpop.f32.mrb[5].mxu1  ;;  %v5577_v41 = vpop.f32.mrb[6].mxu0 }
 0x160   :  { %1023 = vst [vmem:[%s7429_s2 + $0x60] sm:$0xf] %v5144_v33  ;;  %v1059_v42 = vmul.f32 %v890_v35, %v890_v35  ;;  %v1073_v43 = vadd.f32 %v1072_v31, %v1058_v30  ;;  %v5158_v44 = vpack.c.bf16 %v1968_v40, %v1968_v40  ;;  %v5705_v46 = vpop.f32.mrb[6].mxu1  ;;  %v893_v47 = vpop.f32.mrb[7].mxu0  ;;  %v2137_v48 = vmul.f32 %v1968_v40, %v1968_v40 }
 0x161   :  { %2101 = vst [vmem:[%s7429_s2 + $0x64] sm:$0xf] %v5160_v37  ;;  %1021 = vst [vmem:[%s7429_s2 + $0x40] sm:$0xf] %v5142_v38  ;;  %v2151_v49 = vadd.f32 %v2150_v32, %v2136_v36  ;;  %v5145_v50 = vpack.c.bf16 %v5577_v41, %v5577_v41  ;;  %v1971_v51 = vpop.f32.mrb[7].mxu1  ;;  %v2114_v53 = vadd.f32 %v2113_v45, %v1968_v40 }
 0x162   :  { %v1074_v52 = vadd.f32 %v1073_v43, %v1059_v42  ;;  %2099 = vst [vmem:[%s7429_s2 + $0x44] sm:$0xf] %v5158_v44  ;;  %v5161_v54 = vpack.c.bf16 %v5705_v46, %v5705_v46  ;;  %v5143_v56 = vpack.c.bf16 %v893_v47, %v893_v47  ;;  %v1037_v57 = vadd.f32 %v1036_v39, %v893_v47 }
 0x163   :  { %v2152_v55 = vadd.f32 %v2151_v49, %v2137_v48  ;;  %1024 = vst [vmem:[%s7429_s2 + $0x70] sm:$0xf] %v5145_v50  ;;  %v1060_v58 = vmul.f32 %v893_v47, %v893_v47  ;;  %v5159_v59 = vpack.c.bf16 %v1971_v51, %v1971_v51  ;;  %v2115_v60 = vadd.f32 %v2114_v53, %v1971_v51 }
 0x164   :  { %2102 = vst [vmem:[%s7429_s2 + $0x74] sm:$0xf] %v5161_v54  ;;  %v2138_v61 = vmul.f32 %v1971_v51, %v1971_v51  ;;  %v2139_v63 = vmul.f32 %v5704_v34, %v5704_v34  ;;  %1022 = vst [vmem:[%s7429_s2 + $0x50] sm:$0xf] %v5143_v56  ;;  %v1038_v0 = vadd.f32 %v5576_v28, %v1037_v57 }
 0x165   :  { %v1075_v1 = vadd.f32 %v1074_v52, %v1060_v58  ;;  %v5580_v2 = vpop.f32.mrb[8].mxu0  ;;  %v1062_v3 = vmul.f32 %v5577_v41, %v5577_v41  ;;  %2100 = vst [vmem:[%s7429_s2 + $0x54] sm:$0xf] %v5159_v59  ;;  %v2116_v4 = vadd.f32 %v5704_v34, %v2115_v60  ;;  %v2140_v9 = vmul.f32 %v5705_v46, %v5705_v46 }
 0x166   :  { %v2153_v5 = vadd.f32 %v2152_v55, %v2138_v61  ;;  %v5148_v6 = vpack.c.bf16 %v5580_v2, %v5580_v2  ;;  %v5708_v7 = vpop.f32.mrb[8].mxu1  ;;  %v906_v8 = vpop.f32.mrb[9].mxu0  ;;  %v1039_v16 = vadd.f32 %v5577_v41, %v1038_v0  ;;  %v1065_v36 = vmul.f32 %v5580_v2, %v5580_v2 }
 0x167   :  { %v1076_v10 = vadd.f32 %v1075_v1, %v1061_v62  ;;  %v5164_v11 = vpack.c.bf16 %v5708_v7, %v5708_v7  ;;  %v5146_v12 = vpack.c.bf16 %v906_v8, %v906_v8  ;;  %v1984_v13 = vpop.f32.mrb[9].mxu1  ;;  %v5581_v14 = vpop.f32.mrb[10].mxu0  ;;  %v1063_v17 = vmul.f32 %v906_v8, %v906_v8 }
 0x168   :  { %v2154_v15 = vadd.f32 %v2153_v5, %v2139_v63  ;;  %1027 = vst [vmem:[%s7429_s2 + $0xa0] sm:$0xf] %v5148_v6  ;;  %v5162_v18 = vpack.c.bf16 %v1984_v13, %v1984_v13  ;;  %v5709_v19 = vpop.f32.mrb[10].mxu1  ;;  %v909_v20 = vpop.f32.mrb[11].mxu0  ;;  %v2117_v22 = vadd.f32 %v5705_v46, %v2116_v4  ;;  %v2141_v23 = vmul.f32 %v1984_v13, %v1984_v13 }
 0x169   :  { %2105 = vst [vmem:[%s7429_s2 + $0xa4] sm:$0xf] %v5164_v11  ;;  %1025 = vst [vmem:[%s7429_s2 + $0x80] sm:$0xf] %v5146_v12  ;;  %v1077_v21 = vadd.f32 %v1076_v10, %v1062_v3  ;;  %v5149_v24 = vpack.c.bf16 %v5581_v14, %v5581_v14  ;;  %v1987_v25 = vpop.f32.mrb[11].mxu1  ;;  %v1040_v26 = vadd.f32 %v1039_v16, %v906_v8 }
 0x16a   :  { %2103 = vst [vmem:[%s7429_s2 + $0x84] sm:$0xf] %v5162_v18  ;;  %v2155_v27 = vadd.f32 %v2154_v15, %v2140_v9  ;;  %v5165_v28 = vpack.c.bf16 %v5709_v19, %v5709_v19  ;;  %v2118_v30 = vadd.f32 %v2117_v22, %v1984_v13  ;;  %v5147_v31 = vpack.c.bf16 %v909_v20, %v909_v20 }
 0x16b   :  { %v1078_v29 = vadd.f32 %v1077_v21, %v1063_v17  ;;  %1028 = vst [vmem:[%s7429_s2 + $0xb0] sm:$0xf] %v5149_v24  ;;  %v1041_v33 = vadd.f32 %v1040_v26, %v909_v20  ;;  %v1064_v34 = vmul.f32 %v909_v20, %v909_v20  ;;  %v5163_v35 = vpack.c.bf16 %v1987_v25, %v1987_v25 }
 0x16c   :  { %v2156_v32 = vadd.f32 %v2155_v27, %v2141_v23  ;;  %2106 = vst [vmem:[%s7429_s2 + $0xb4] sm:$0xf] %v5165_v28  ;;  %v2143_v37 = vmul.f32 %v5708_v7, %v5708_v7  ;;  %1026 = vst [vmem:[%s7429_s2 + $0x90] sm:$0xf] %v5147_v31  ;;  %v2119_v38 = vadd.f32 %v2118_v30, %v1987_v25 }
 0x16d   :  { %v2142_v39 = vmul.f32 %v1987_v25, %v1987_v25  ;;  %v5584_v40 = vpop.f32.mrb[12].mxu0  ;;  %v1066_v41 = vmul.f32 %v5581_v14, %v5581_v14  ;;  %v1042_v42 = vadd.f32 %v5580_v2, %v1041_v33  ;;  %v1079_v43 = vadd.f32 %v1078_v29, %v1064_v34  ;;  %2104 = vst [vmem:[%s7429_s2 + $0x94] sm:$0xf] %v5163_v35 }
 0x16e   :  { %v5152_v44 = vpack.c.bf16 %v5584_v40, %v5584_v40  ;;  %v5712_v45 = vpop.f32.mrb[12].mxu1  ;;  %v922_v46 = vpop.f32.mrb[13].mxu0  ;;  %v2144_v47 = vmul.f32 %v5709_v19, %v5709_v19  ;;  %v2120_v48 = vadd.f32 %v5708_v7, %v2119_v38 }
 0x16f   :  { %v2157_v49 = vadd.f32 %v2156_v32, %v2142_v39  ;;  %v5168_v50 = vpack.c.bf16 %v5712_v45, %v5712_v45  ;;  %v2000_v51 = vpop.f32.mrb[13].mxu1  ;;  %v5585_v52 = vpop.f32.mrb[14].mxu0  ;;  %v1080_v53 = vadd.f32 %v1079_v43, %v1065_v36  ;;  %v5150_v54 = vpack.c.bf16 %v922_v46, %v922_v46 }
 0x170   :  { %1031 = vst [vmem:[%s7429_s2 + $0xe0] sm:$0xf] %v5152_v44  ;;  %v1043_v55 = vadd.f32 %v5581_v14, %v1042_v42  ;;  %v1067_v56 = vmul.f32 %v922_v46, %v922_v46  ;;  %v5713_v57 = vpop.f32.mrb[14].mxu1  ;;  %v925_v58 = vpop.f32.mrb[15].mxu0  ;;  %v5166_v60 = vpack.c.bf16 %v2000_v51, %v2000_v51  ;;  %v2121_v61 = vadd.f32 %v5709_v19, %v2120_v48 }
 0x171   :  { %v2158_v59 = vadd.f32 %v2157_v49, %v2143_v37  ;;  %2109 = vst [vmem:[%s7429_s2 + $0xe4] sm:$0xf] %v5168_v50  ;;  %v2145_v62 = vmul.f32 %v2000_v51, %v2000_v51  ;;  %v2003_v63 = vpop.f32.mrb[15].mxu1  ;;  %1029 = vst [vmem:[%s7429_s2 + $0xc0] sm:$0xf] %v5150_v54  ;;  %v1081_v1 = vadd.f32 %v1080_v53, %v1066_v41 }
 0x172   :  { %v1044_v0 = vadd.f32 %v1043_v55, %v922_v46  ;;  %v5153_v2 = vpack.c.bf16 %v5585_v52, %v5585_v52  ;;  %2107 = vst [vmem:[%s7429_s2 + $0xc4] sm:$0xf] %v5166_v60  ;;  %v2122_v3 = vadd.f32 %v2121_v61, %v2000_v51  ;;  %v5169_v5 = vpack.c.bf16 %v5713_v57, %v5713_v57 }
 0x173   :  { %v2159_v4 = vadd.f32 %v2158_v59, %v2144_v47  ;;  %v1082_v6 = vadd.f32 %v1081_v1, %v1067_v56  ;;  %v5151_v7 = vpack.c.bf16 %v925_v58, %v925_v58  ;;  %v1068_v9 = vmul.f32 %v925_v58, %v925_v58 }
 0x174   :  { %1032 = vst [vmem:[%s7429_s2 + $0xf0] sm:$0xf] %v5153_v2  ;;  %v1045_v8 = vadd.f32 %v1044_v0, %v925_v58  ;;  %2110 = vst [vmem:[%s7429_s2 + $0xf4] sm:$0xf] %v5169_v5  ;;  %v5167_v11 = vpack.c.bf16 %v2003_v63, %v2003_v63  ;;  %v2123_v12 = vadd.f32 %v2122_v3, %v2003_v63 }
 0x175   :  { %v2160_v10 = vadd.f32 %v2159_v4, %v2145_v62  ;;  %v2146_v13 = vmul.f32 %v2003_v63, %v2003_v63  ;;  %v1069_v14 = vmul.f32 %v5584_v40, %v5584_v40  ;;  %1030 = vst [vmem:[%s7429_s2 + $0xd0] sm:$0xf] %v5151_v7  ;;  %v1083_v16 = vadd.f32 %v1082_v6, %v1068_v9 }
 0x176   :  { %v1046_v15 = vadd.f32 %v5584_v40, %v1045_v8  ;;  %v2147_v17 = vmul.f32 %v5712_v45, %v5712_v45  ;;  %2108 = vst [vmem:[%s7429_s2 + $0xd4] sm:$0xf] %v5167_v11  ;;  %v2124_v18 = vadd.f32 %v5712_v45, %v2123_v12  ;;  %v1070_v20 = vmul.f32 %v5585_v52, %v5585_v52 }
 0x177   :  { %v2161_v19 = vadd.f32 %v2160_v10, %v2146_v13  ;;  %v1084_v22 = vadd.f32 %v1083_v16, %v1069_v14  ;;  %v2148_v23 = vmul.f32 %v5713_v57, %v5713_v57 }
 0x178   :  { %v1047_v21 = vadd.f32 %v5585_v52, %v1046_v15  ;;  %v2125_v24 = vadd.f32 %v5713_v57, %v2124_v18 }
 0x179   :  { %v2162_v25 = vadd.f32 %v2161_v19, %v2147_v17  ;;  %v1085_v27 = vadd.f32 %v1084_v22, %v1070_v20 }
 0x17a   :  { %v1048_v26 = vrot.slane %v1047_v21, 4  ;;  %v2126_v28 = vrot.slane %v2125_v24, 4 }
 0x17b   :  { %v2163_v29 = vadd.f32 %v2162_v25, %v2148_v23  ;;  %v1086_v31 = vrot.slane %v1085_v27, 4 }
 0x17c   :  { %v1049_v30 = vadd.f32 %v1048_v26, %v1047_v21  ;;  %v2127_v32 = vadd.f32 %v2126_v28, %v2125_v24 }
 0x17d   :  { %v2164_v33 = vrot.slane %v2163_v29, 4  ;;  %v1087_v35 = vadd.f32 %v1086_v31, %v1085_v27 }
 0x17e   :  { %v1050_v34 = vrot.slane %v1049_v30, 2  ;;  %v2128_v36 = vrot.slane %v2127_v32, 2 }
 0x17f   :  { %v2165_v37 = vadd.f32 %v2164_v33, %v2163_v29  ;;  %v1088_v39 = vrot.slane %v1087_v35, 2 }
 0x180   :  { %v1051_v38 = vadd.f32 %v1050_v34, %v1049_v30  ;;  %v2129_v40 = vadd.f32 %v2128_v36, %v2127_v32 }
 0x181   :  { %v2166_v41 = vrot.slane %v2165_v37, 2  ;;  %v1089_v43 = vadd.f32 %v1088_v39, %v1087_v35 }
 0x182   :  { %v1052_v42 = vrot.slane %v1051_v38, 1  ;;  %v2130_v44 = vrot.slane %v2129_v40, 1 }
 0x183   :  { %v2167_v45 = vadd.f32 %v2166_v41, %v2165_v37  ;;  %v1090_v47 = vrot.slane %v1089_v43, 1 }
 0x184   :  { %v1053_v46 = vadd.f32 %v1052_v42, %v1051_v38  ;;  %v2131_v48 = vadd.f32 %v2130_v44, %v2129_v40 }
 0x185   :  { %v2168_v49 = vrot.slane %v2167_v45, 1  ;;  %v1091_v50 = vadd.f32 %v1090_v47, %v1089_v43 }
 0x186   :  { %1054 = vst [vmem:[%s7430_s3] sm:$0xff] %v1053_v46  ;;  %2132 = vst [vmem:[%s7430_s3 + $0x8] sm:$0xff] %v2131_v48 }
 0x187   :  { %v2169_v51 = vadd.f32 %v2168_v49, %v2167_v45  ;;  %1092 = vst [vmem:[%s7431_s4] sm:$0xff] %v1091_v50 }
 0x189   :  { %2170 = vst [vmem:[%s7431_s4 + $0x8] sm:$0xff] %v2169_v51 }
 0x1d5   :  { %v5828_v52 = vpop.f32.mrb[16].mxu0 }
 0x1d6   :  { %v5172_v53 = vpack.c.bf16 %v5828_v52, %v5828_v52  ;;  %v5956_v54 = vpop.f32.mrb[16].mxu1  ;;  %v3030_v55 = vpop.f32.mrb[17].mxu0  ;;  %v3213_v10 = vmul.f32 %v5828_v52, %v5828_v52 }
 0x1d7   :  { %v5188_v56 = vpack.c.bf16 %v5956_v54, %v5956_v54  ;;  %v5170_v57 = vpack.c.bf16 %v3030_v55, %v3030_v55  ;;  %v4107_v58 = vpop.f32.mrb[17].mxu1  ;;  %v5829_v59 = vpop.f32.mrb[18].mxu0  ;;  %v3211_v60 = vmul.f32 %v3030_v55, %v3030_v55  ;;  %v4290_v12 = vmul.f32 %v5956_v54, %v5956_v54 }
 0x1d8   :  { %3175 = vst [vmem:[%s7429_s2 + $0x28] sm:$0xf] %v5172_v53  ;;  %v5186_v61 = vpack.c.bf16 %v4107_v58, %v4107_v58  ;;  %v5173_v62 = vpack.c.bf16 %v5829_v59, %v5829_v59  ;;  %v5957_v63 = vpop.f32.mrb[18].mxu1  ;;  %v3033_v0 = vpop.f32.mrb[19].mxu0  ;;  %v4288_v1 = vmul.f32 %v4107_v58, %v4107_v58  ;;  %v3214_v18 = vmul.f32 %v5829_v59, %v5829_v59 }
 0x1d9   :  { %4252 = vst [vmem:[%s7429_s2 + $0x2c] sm:$0xf] %v5188_v56  ;;  %3173 = vst [vmem:[%s7429_s2 + $0x8] sm:$0xf] %v5170_v57  ;;  %v5189_v2 = vpack.c.bf16 %v5957_v63, %v5957_v63  ;;  %v5171_v3 = vpack.c.bf16 %v3033_v0, %v3033_v0  ;;  %v3189_v4 = vadd.f32 %v3033_v0, %v3030_v55  ;;  %v4110_v5 = vpop.f32.mrb[19].mxu1 }
 0x1da   :  { %4250 = vst [vmem:[%s7429_s2 + $0xc] sm:$0xf] %v5186_v61  ;;  %3176 = vst [vmem:[%s7429_s2 + $0x38] sm:$0xf] %v5173_v62  ;;  %v3212_v6 = vmul.f32 %v3033_v0, %v3033_v0  ;;  %v5187_v7 = vpack.c.bf16 %v4110_v5, %v4110_v5  ;;  %v4266_v8 = vadd.f32 %v4110_v5, %v4107_v58 }
 0x1db   :  { %v4289_v9 = vmul.f32 %v4110_v5, %v4110_v5  ;;  %4253 = vst [vmem:[%s7429_s2 + $0x3c] sm:$0xf] %v5189_v2  ;;  %3174 = vst [vmem:[%s7429_s2 + $0x18] sm:$0xf] %v5171_v3  ;;  %v3190_v11 = vadd.f32 %v5828_v52, %v3189_v4  ;;  %v4291_v24 = vmul.f32 %v5957_v63, %v5957_v63 }
 0x1dc   :  { %v3227_v13 = vadd.f32 %v3212_v6, %v3211_v60  ;;  %4251 = vst [vmem:[%s7429_s2 + $0x1c] sm:$0xf] %v5187_v7  ;;  %v4267_v14 = vadd.f32 %v5956_v54, %v4266_v8 }
 0x1dd   :  { %v4304_v15 = vadd.f32 %v4289_v9, %v4288_v1  ;;  %v5832_v16 = vpop.f32.mrb[20].mxu0  ;;  %v3191_v17 = vadd.f32 %v5829_v59, %v3190_v11 }
 0x1de   :  { %v3228_v19 = vadd.f32 %v3227_v13, %v3213_v10  ;;  %v5176_v21 = vpack.c.bf16 %v5832_v16, %v5832_v16  ;;  %v5960_v22 = vpop.f32.mrb[20].mxu1  ;;  %v3046_v23 = vpop.f32.mrb[21].mxu0  ;;  %v4268_v33 = vadd.f32 %v5957_v63, %v4267_v14  ;;  %v3217_v50 = vmul.f32 %v5832_v16, %v5832_v16 }
 0x1df   :  { %v4305_v20 = vadd.f32 %v4304_v15, %v4290_v12  ;;  %v5192_v25 = vpack.c.bf16 %v5960_v22, %v5960_v22  ;;  %v5174_v26 = vpack.c.bf16 %v3046_v23, %v3046_v23  ;;  %v3192_v27 = vadd.f32 %v3191_v17, %v3046_v23  ;;  %v4123_v28 = vpop.f32.mrb[21].mxu1  ;;  %v5833_v29 = vpop.f32.mrb[22].mxu0 }
 0x1e0   :  { %3179 = vst [vmem:[%s7429_s2 + $0x68] sm:$0xf] %v5176_v21  ;;  %v3215_v30 = vmul.f32 %v3046_v23, %v3046_v23  ;;  %v3229_v31 = vadd.f32 %v3228_v19, %v3214_v18  ;;  %v5190_v32 = vpack.c.bf16 %v4123_v28, %v4123_v28  ;;  %v5961_v34 = vpop.f32.mrb[22].mxu1  ;;  %v3049_v35 = vpop.f32.mrb[23].mxu0  ;;  %v4292_v36 = vmul.f32 %v4123_v28, %v4123_v28 }
 0x1e1   :  { %4256 = vst [vmem:[%s7429_s2 + $0x6c] sm:$0xf] %v5192_v25  ;;  %3177 = vst [vmem:[%s7429_s2 + $0x48] sm:$0xf] %v5174_v26  ;;  %v4306_v37 = vadd.f32 %v4305_v20, %v4291_v24  ;;  %v5177_v38 = vpack.c.bf16 %v5833_v29, %v5833_v29  ;;  %v4126_v39 = vpop.f32.mrb[23].mxu1  ;;  %v4269_v41 = vadd.f32 %v4268_v33, %v4123_v28 }
 0x1e2   :  { %v3230_v40 = vadd.f32 %v3229_v31, %v3215_v30  ;;  %4254 = vst [vmem:[%s7429_s2 + $0x4c] sm:$0xf] %v5190_v32  ;;  %v5193_v42 = vpack.c.bf16 %v5961_v34, %v5961_v34  ;;  %v5175_v44 = vpack.c.bf16 %v3049_v35, %v3049_v35  ;;  %v3193_v45 = vadd.f32 %v3192_v27, %v3049_v35 }
 0x1e3   :  { %v4307_v43 = vadd.f32 %v4306_v37, %v4292_v36  ;;  %3180 = vst [vmem:[%s7429_s2 + $0x78] sm:$0xf] %v5177_v38  ;;  %v3216_v46 = vmul.f32 %v3049_v35, %v3049_v35  ;;  %v5191_v47 = vpack.c.bf16 %v4126_v39, %v4126_v39  ;;  %v4270_v48 = vadd.f32 %v4269_v41, %v4126_v39 }
 0x1e4   :  { %4257 = vst [vmem:[%s7429_s2 + $0x7c] sm:$0xf] %v5193_v42  ;;  %v4293_v49 = vmul.f32 %v4126_v39, %v4126_v39  ;;  %v4294_v51 = vmul.f32 %v5960_v22, %v5960_v22  ;;  %3178 = vst [vmem:[%s7429_s2 + $0x58] sm:$0xf] %v5175_v44  ;;  %v3194_v52 = vadd.f32 %v5832_v16, %v3193_v45 }
 0x1e5   :  { %v3231_v53 = vadd.f32 %v3230_v40, %v3216_v46  ;;  %v5836_v54 = vpop.f32.mrb[24].mxu0  ;;  %v3218_v55 = vmul.f32 %v5833_v29, %v5833_v29  ;;  %4255 = vst [vmem:[%s7429_s2 + $0x5c] sm:$0xf] %v5191_v47  ;;  %v4271_v56 = vadd.f32 %v5960_v22, %v4270_v48  ;;  %v4295_v61 = vmul.f32 %v5961_v34, %v5961_v34 }
 0x1e6   :  { %v4308_v57 = vadd.f32 %v4307_v43, %v4293_v49  ;;  %v5180_v58 = vpack.c.bf16 %v5836_v54, %v5836_v54  ;;  %v5964_v59 = vpop.f32.mrb[24].mxu1  ;;  %v3062_v60 = vpop.f32.mrb[25].mxu0  ;;  %v3195_v4 = vadd.f32 %v5833_v29, %v3194_v52  ;;  %v3221_v24 = vmul.f32 %v5836_v54, %v5836_v54 }
 0x1e7   :  { %v3232_v62 = vadd.f32 %v3231_v53, %v3217_v50  ;;  %v5196_v63 = vpack.c.bf16 %v5964_v59, %v5964_v59  ;;  %v5178_v0 = vpack.c.bf16 %v3062_v60, %v3062_v60  ;;  %v4139_v1 = vpop.f32.mrb[25].mxu1  ;;  %v5837_v2 = vpop.f32.mrb[26].mxu0  ;;  %v3219_v5 = vmul.f32 %v3062_v60, %v3062_v60 }
 0x1e8   :  { %v4309_v3 = vadd.f32 %v4308_v57, %v4294_v51  ;;  %3183 = vst [vmem:[%s7429_s2 + $0xa8] sm:$0xf] %v5180_v58  ;;  %v5194_v6 = vpack.c.bf16 %v4139_v1, %v4139_v1  ;;  %v5965_v7 = vpop.f32.mrb[26].mxu1  ;;  %v3065_v8 = vpop.f32.mrb[27].mxu0  ;;  %v4272_v10 = vadd.f32 %v5961_v34, %v4271_v56  ;;  %v4296_v11 = vmul.f32 %v4139_v1, %v4139_v1 }
 0x1e9   :  { %4260 = vst [vmem:[%s7429_s2 + $0xac] sm:$0xf] %v5196_v63  ;;  %3181 = vst [vmem:[%s7429_s2 + $0x88] sm:$0xf] %v5178_v0  ;;  %v3233_v9 = vadd.f32 %v3232_v62, %v3218_v55  ;;  %v5181_v12 = vpack.c.bf16 %v5837_v2, %v5837_v2  ;;  %v4142_v13 = vpop.f32.mrb[27].mxu1  ;;  %v3196_v14 = vadd.f32 %v3195_v4, %v3062_v60 }
 0x1ea   :  { %4258 = vst [vmem:[%s7429_s2 + $0x8c] sm:$0xf] %v5194_v6  ;;  %v4310_v15 = vadd.f32 %v4309_v3, %v4295_v61  ;;  %v5197_v16 = vpack.c.bf16 %v5965_v7, %v5965_v7  ;;  %v4273_v18 = vadd.f32 %v4272_v10, %v4139_v1  ;;  %v5179_v19 = vpack.c.bf16 %v3065_v8, %v3065_v8 }
 0x1eb   :  { %v3234_v17 = vadd.f32 %v3233_v9, %v3219_v5  ;;  %3184 = vst [vmem:[%s7429_s2 + $0xb8] sm:$0xf] %v5181_v12  ;;  %v3197_v21 = vadd.f32 %v3196_v14, %v3065_v8  ;;  %v3220_v22 = vmul.f32 %v3065_v8, %v3065_v8  ;;  %v5195_v23 = vpack.c.bf16 %v4142_v13, %v4142_v13 }
 0x1ec   :  { %v4311_v20 = vadd.f32 %v4310_v15, %v4296_v11  ;;  %4261 = vst [vmem:[%s7429_s2 + $0xbc] sm:$0xf] %v5197_v16  ;;  %v4298_v25 = vmul.f32 %v5964_v59, %v5964_v59  ;;  %3182 = vst [vmem:[%s7429_s2 + $0x98] sm:$0xf] %v5179_v19  ;;  %v4274_v26 = vadd.f32 %v4273_v18, %v4142_v13 }
 0x1ed   :  { %v4297_v27 = vmul.f32 %v4142_v13, %v4142_v13  ;;  %v5840_v28 = vpop.f32.mrb[28].mxu0  ;;  %v3222_v29 = vmul.f32 %v5837_v2, %v5837_v2  ;;  %v3198_v30 = vadd.f32 %v5836_v54, %v3197_v21  ;;  %v3235_v31 = vadd.f32 %v3234_v17, %v3220_v22  ;;  %4259 = vst [vmem:[%s7429_s2 + $0x9c] sm:$0xf] %v5195_v23 }
 0x1ee   :  { %v5184_v32 = vpack.c.bf16 %v5840_v28, %v5840_v28  ;;  %v5968_v33 = vpop.f32.mrb[28].mxu1  ;;  %v3078_v34 = vpop.f32.mrb[29].mxu0  ;;  %v4299_v35 = vmul.f32 %v5965_v7, %v5965_v7  ;;  %v4275_v36 = vadd.f32 %v5964_v59, %v4274_v26 }
 0x1ef   :  { %v4312_v37 = vadd.f32 %v4311_v20, %v4297_v27  ;;  %v5200_v38 = vpack.c.bf16 %v5968_v33, %v5968_v33  ;;  %v4155_v39 = vpop.f32.mrb[29].mxu1  ;;  %v5841_v40 = vpop.f32.mrb[30].mxu0  ;;  %v3236_v41 = vadd.f32 %v3235_v31, %v3221_v24  ;;  %v5182_v42 = vpack.c.bf16 %v3078_v34, %v3078_v34 }
 0x1f0   :  { %3187 = vst [vmem:[%s7429_s2 + $0xe8] sm:$0xf] %v5184_v32  ;;  %v3199_v43 = vadd.f32 %v5837_v2, %v3198_v30  ;;  %v3223_v44 = vmul.f32 %v3078_v34, %v3078_v34  ;;  %v5969_v45 = vpop.f32.mrb[30].mxu1  ;;  %v3081_v46 = vpop.f32.mrb[31].mxu0  ;;  %v5198_v48 = vpack.c.bf16 %v4155_v39, %v4155_v39  ;;  %v4276_v49 = vadd.f32 %v5965_v7, %v4275_v36 }
 0x1f1   :  { %v4313_v47 = vadd.f32 %v4312_v37, %v4298_v25  ;;  %4264 = vst [vmem:[%s7429_s2 + $0xec] sm:$0xf] %v5200_v38  ;;  %v4300_v50 = vmul.f32 %v4155_v39, %v4155_v39  ;;  %v4158_v51 = vpop.f32.mrb[31].mxu1  ;;  %3185 = vst [vmem:[%s7429_s2 + $0xc8] sm:$0xf] %v5182_v42  ;;  %v3237_v53 = vadd.f32 %v3236_v41, %v3222_v29 }
 0x1f2   :  { %v3200_v52 = vadd.f32 %v3199_v43, %v3078_v34  ;;  %v5185_v54 = vpack.c.bf16 %v5841_v40, %v5841_v40  ;;  %4262 = vst [vmem:[%s7429_s2 + $0xcc] sm:$0xf] %v5198_v48  ;;  %v4277_v55 = vadd.f32 %v4276_v49, %v4155_v39  ;;  %v5201_v57 = vpack.c.bf16 %v5969_v45, %v5969_v45 }
 0x1f3   :  { %v4314_v56 = vadd.f32 %v4313_v47, %v4299_v35  ;;  %v3238_v58 = vadd.f32 %v3237_v53, %v3223_v44  ;;  %v5183_v59 = vpack.c.bf16 %v3081_v46, %v3081_v46  ;;  %v3224_v61 = vmul.f32 %v3081_v46, %v3081_v46 }
 0x1f4   :  { %3188 = vst [vmem:[%s7429_s2 + $0xf8] sm:$0xf] %v5185_v54  ;;  %v3201_v60 = vadd.f32 %v3200_v52, %v3081_v46  ;;  %4265 = vst [vmem:[%s7429_s2 + $0xfc] sm:$0xf] %v5201_v57  ;;  %v5199_v63 = vpack.c.bf16 %v4158_v51, %v4158_v51  ;;  %v4278_v0 = vadd.f32 %v4277_v55, %v4158_v51 }
 0x1f5   :  { %v4315_v62 = vadd.f32 %v4314_v56, %v4300_v50  ;;  %v4301_v1 = vmul.f32 %v4158_v51, %v4158_v51  ;;  %v3225_v2 = vmul.f32 %v5840_v28, %v5840_v28  ;;  %3186 = vst [vmem:[%s7429_s2 + $0xd8] sm:$0xf] %v5183_v59  ;;  %v3239_v4 = vadd.f32 %v3238_v58, %v3224_v61 }
 0x1f6   :  { %v3202_v3 = vadd.f32 %v5840_v28, %v3201_v60  ;;  %v4302_v5 = vmul.f32 %v5968_v33, %v5968_v33  ;;  %4263 = vst [vmem:[%s7429_s2 + $0xdc] sm:$0xf] %v5199_v63  ;;  %v4279_v6 = vadd.f32 %v5968_v33, %v4278_v0  ;;  %v3226_v8 = vmul.f32 %v5841_v40, %v5841_v40 }
 0x1f7   :  { %v4316_v7 = vadd.f32 %v4315_v62, %v4301_v1  ;;  %v3240_v10 = vadd.f32 %v3239_v4, %v3225_v2  ;;  %v4303_v11 = vmul.f32 %v5969_v45, %v5969_v45 }
 0x1f8   :  { %v3203_v9 = vadd.f32 %v5841_v40, %v3202_v3  ;;  %v4280_v12 = vadd.f32 %v5969_v45, %v4279_v6 }
 0x1f9   :  { %v4317_v13 = vadd.f32 %v4316_v7, %v4302_v5  ;;  %v3241_v15 = vadd.f32 %v3240_v10, %v3226_v8 }
 0x1fa   :  { %v3204_v14 = vrot.slane %v3203_v9, 4  ;;  %v4281_v16 = vrot.slane %v4280_v12, 4 }
 0x1fb   :  { %v4318_v17 = vadd.f32 %v4317_v13, %v4303_v11  ;;  %v3242_v19 = vrot.slane %v3241_v15, 4 }
 0x1fc   :  { %v3205_v18 = vadd.f32 %v3204_v14, %v3203_v9  ;;  %v4282_v20 = vadd.f32 %v4281_v16, %v4280_v12 }
 0x1fd   :  { %v4319_v21 = vrot.slane %v4318_v17, 4  ;;  %v3243_v23 = vadd.f32 %v3242_v19, %v3241_v15 }
 0x1fe   :  { %v3206_v22 = vrot.slane %v3205_v18, 2  ;;  %v4283_v24 = vrot.slane %v4282_v20, 2 }
 0x1ff   :  { %v4320_v25 = vadd.f32 %v4319_v21, %v4318_v17  ;;  %v3244_v27 = vrot.slane %v3243_v23, 2 }
 0x200   :  { %v3207_v26 = vadd.f32 %v3206_v22, %v3205_v18  ;;  %v4284_v28 = vadd.f32 %v4283_v24, %v4282_v20 }
 0x201   :  { %v4321_v29 = vrot.slane %v4320_v25, 2  ;;  %v3245_v31 = vadd.f32 %v3244_v27, %v3243_v23 }
 0x202   :  { %v3208_v30 = vrot.slane %v3207_v26, 1  ;;  %v4285_v32 = vrot.slane %v4284_v28, 1 }
 0x203   :  { %v4322_v33 = vadd.f32 %v4321_v29, %v4320_v25  ;;  %v3246_v35 = vrot.slane %v3245_v31, 1 }
 0x204   :  { %v3209_v34 = vadd.f32 %v3208_v30, %v3207_v26  ;;  %v4286_v36 = vadd.f32 %v4285_v32, %v4284_v28 }
 0x205   :  { %v4323_v37 = vrot.slane %v4322_v33, 1  ;;  %v3247_v38 = vadd.f32 %v3246_v35, %v3245_v31 }
 0x206   :  { %3210 = vst [vmem:[%s7430_s3 + $0x10] sm:$0xff] %v3209_v34  ;;  %4287 = vst [vmem:[%s7430_s3 + $0x18] sm:$0xff] %v4286_v36 }
 0x207   :  { %v4324_v39 = vadd.f32 %v4323_v37, %v4322_v33  ;;  %3248 = vst [vmem:[%s7431_s4 + $0x10] sm:$0xff] %v3247_v38 }
 0x209   :  { %4325 = vst [vmem:[%s7431_s4 + $0x18] sm:$0xff] %v4324_v39 }

// kernel: _lambda_.9
= control target key start
LH: loop header
LB: loop body
LE: loop exit
PB: predicated region body
PF: predicated region fallthrough
CT: control target
= control target key end

     0   :  { %v6256_v1 = vmov 0   ;;  %s7954_s0 = inlined_call_operand.vmem [shape: bf16[9,128,512], index: 0, kind: input, shape index: {}]   ;;  %s7955_s1 = inlined_call_operand.vmem [shape: bf16[16,8,128], index: 1, kind: input, shape index: {}]   ;;  %s7956_s2 = inlined_call_operand.vmem [shape: f32[32,512], index: 2, kind: output, shape index: {}]  }
   0x1   :  { %v5607_v0 = vld [vmem:[%s7954_s0 + $0x104] ss:$16 sps:$4 sm:$0xff]   ;;  %272 = vmatprep.mubr.bf16.mxu0 %v6256_v1  ;;  %313 = vmatprep.mubr.bf16.mxu1 %v6256_v1  ;;  %v5609_v2 = vld [vmem:[%s7954_s0 + $0x10c] ss:$16 sps:$4 sm:$0xff]   ;;  %v5611_v3 = vld [vmem:[%s7954_s0 + $0x100] ss:$16 sps:$4 sm:$0xff]  }
   0x2   :  { %240 = vmatprep.subr.bf16.mxu0 %v5607_v0  ;;  %v5612_v4 = vld [vmem:[%s7954_s0 + $0x108] ss:$16 sps:$4 sm:$0xff]   ;;  %281 = vmatprep.subr.bf16.mxu1 %v5609_v2  ;;  %v5613_v5 = vld [vmem:[%s7954_s0 + $0x124] ss:$16 sps:$4 sm:$0xff]   ;;  %v5615_v6 = vld [vmem:[%s7954_s0 + $0x12c] ss:$16 sps:$4 sm:$0xff]  }
   0x3   :  { %241 = vmatpush1.bf16.msra.mxu0 %v5611_v3  ;;  %282 = vmatpush1.bf16.msra.mxu1 %v5612_v4  ;;  %v5617_v7 = vld [vmem:[%s7954_s0 + $0x120] ss:$16 sps:$4 sm:$0xff]   ;;  %v5618_v8 = vld [vmem:[%s7954_s0 + $0x128] ss:$16 sps:$4 sm:$0xff]   ;;  %v5619_v9 = vld [vmem:[%s7954_s0 + $0x144] ss:$16 sps:$4 sm:$0xff]  }
   0x4   :  { %242 = vmatprep.subr.bf16.mxu0 %v5613_v5  ;;  %283 = vmatprep.subr.bf16.mxu1 %v5615_v6  ;;  %v5621_v10 = vld [vmem:[%s7954_s0 + $0x14c] ss:$16 sps:$4 sm:$0xff]   ;;  %v5623_v11 = vld [vmem:[%s7954_s0 + $0x140] ss:$16 sps:$4 sm:$0xff]   ;;  %v5624_v12 = vld [vmem:[%s7954_s0 + $0x148] ss:$16 sps:$4 sm:$0xff]  }
   0x5   :  { %v5625_v13 = vld [vmem:[%s7954_s0 + $0x164] ss:$16 sps:$4 sm:$0xff]   ;;  %v5627_v14 = vld [vmem:[%s7954_s0 + $0x16c] ss:$16 sps:$4 sm:$0xff]   ;;  %v5629_v15 = vld [vmem:[%s7954_s0 + $0x160] ss:$16 sps:$4 sm:$0xff]  }
   0x6   :  { %v5630_v16 = vld [vmem:[%s7954_s0 + $0x168] ss:$16 sps:$4 sm:$0xff]   ;;  %v5631_v17 = vld [vmem:[%s7954_s0 + $0x184] ss:$16 sps:$4 sm:$0xff]   ;;  %v5633_v18 = vld [vmem:[%s7954_s0 + $0x18c] ss:$16 sps:$4 sm:$0xff]  }
   0x7   :  { %243 = vmatpush1.bf16.msra.mxu0 %v5617_v7  ;;  %284 = vmatpush1.bf16.msra.mxu1 %v5618_v8  ;;  %v5635_v19 = vld [vmem:[%s7954_s0 + $0x180] ss:$16 sps:$4 sm:$0xff]   ;;  %v5636_v20 = vld [vmem:[%s7954_s0 + $0x188] ss:$16 sps:$4 sm:$0xff]   ;;  %v5637_v21 = vld [vmem:[%s7954_s0 + $0x1a4] ss:$16 sps:$4 sm:$0xff]  }
   0x8   :  { %244 = vmatprep.subr.bf16.mxu0 %v5619_v9  ;;  %285 = vmatprep.subr.bf16.mxu1 %v5621_v10  ;;  %v5639_v22 = vld [vmem:[%s7954_s0 + $0x1ac] ss:$16 sps:$4 sm:$0xff]   ;;  %v5641_v23 = vld [vmem:[%s7954_s0 + $0x1a0] ss:$16 sps:$4 sm:$0xff]   ;;  %v5642_v24 = vld [vmem:[%s7954_s0 + $0x1a8] ss:$16 sps:$4 sm:$0xff]  }
   0x9   :  { %v5643_v25 = vld [vmem:[%s7954_s0 + $0x1c4] ss:$16 sps:$4 sm:$0xff]   ;;  %v5645_v26 = vld [vmem:[%s7954_s0 + $0x1cc] ss:$16 sps:$4 sm:$0xff]   ;;  %v5647_v27 = vld [vmem:[%s7954_s0 + $0x1c0] ss:$16 sps:$4 sm:$0xff]  }
   0xa   :  { %v5648_v28 = vld [vmem:[%s7954_s0 + $0x1c8] ss:$16 sps:$4 sm:$0xff]   ;;  %v5649_v29 = vld [vmem:[%s7954_s0 + $0x1e4] ss:$16 sps:$4 sm:$0xff]   ;;  %v5651_v30 = vld [vmem:[%s7954_s0 + $0x1ec] ss:$16 sps:$4 sm:$0xff]  }
   0xb   :  { %245 = vmatpush1.bf16.msra.mxu0 %v5623_v11  ;;  %286 = vmatpush1.bf16.msra.mxu1 %v5624_v12  ;;  %v5653_v31 = vld [vmem:[%s7954_s0 + $0x1e0] ss:$16 sps:$4 sm:$0xff]   ;;  %v5654_v32 = vld [vmem:[%s7954_s0 + $0x1e8] ss:$16 sps:$4 sm:$0xff]   ;;  %v5657_v33 = vld [vmem:[%s7954_s0 + $0x4] ss:$16 sps:$4 sm:$0xff]  }
   0xc   :  { %246 = vmatprep.subr.bf16.mxu0 %v5625_v13  ;;  %287 = vmatprep.subr.bf16.mxu1 %v5627_v14  ;;  %v5660_v34 = vld [vmem:[%s7954_s0 + $0xc] ss:$16 sps:$4 sm:$0xff]   ;;  %v5655_v35 = vld [vmem:[%s7954_s0] ss:$16 sps:$4 sm:$0xff]   ;;  %v5658_v36 = vld [vmem:[%s7954_s0 + $0x8] ss:$16 sps:$4 sm:$0xff]  }
   0xd   :  { %v4503_v37 = vld [vmem:[%s7955_s1 + $0x4] sm:$0xf]  ;;  %v5666_v39 = vld [vmem:[%s7954_s0 + $0x2c] ss:$16 sps:$4 sm:$0xff]   ;;  %v5661_v40 = vld [vmem:[%s7954_s0 + $0x20] ss:$16 sps:$4 sm:$0xff]  }
   0xe   :  { %v5663_v38 = vld [vmem:[%s7954_s0 + $0x24] ss:$16 sps:$4 sm:$0xff]   ;;  %v5664_v41 = vld [vmem:[%s7954_s0 + $0x28] ss:$16 sps:$4 sm:$0xff]   ;;  %v5672_v43 = vld [vmem:[%s7954_s0 + $0x4c] ss:$16 sps:$4 sm:$0xff]  }
   0xf   :  { %247 = vmatpush1.bf16.msra.mxu0 %v5629_v15  ;;  %288 = vmatpush1.bf16.msra.mxu1 %v5630_v16  ;;  %v5669_v42 = vld [vmem:[%s7954_s0 + $0x44] ss:$16 sps:$4 sm:$0xff]   ;;  %v5667_v44 = vld [vmem:[%s7954_s0 + $0x40] ss:$16 sps:$4 sm:$0xff]   ;;  %v5670_v45 = vld [vmem:[%s7954_s0 + $0x48] ss:$16 sps:$4 sm:$0xff]  }
  0x10   :  { %248 = vmatprep.subr.bf16.mxu0 %v5631_v17  ;;  %289 = vmatprep.subr.bf16.mxu1 %v5633_v18  ;;  %v5675_v46 = vld [vmem:[%s7954_s0 + $0x64] ss:$16 sps:$4 sm:$0xff]   ;;  %v5678_v47 = vld [vmem:[%s7954_s0 + $0x6c] ss:$16 sps:$4 sm:$0xff]   ;;  %v5673_v48 = vld [vmem:[%s7954_s0 + $0x60] ss:$16 sps:$4 sm:$0xff]  }
  0x11   :  { %v5676_v49 = vld [vmem:[%s7954_s0 + $0x68] ss:$16 sps:$4 sm:$0xff]   ;;  %v5681_v50 = vld [vmem:[%s7954_s0 + $0x84] ss:$16 sps:$4 sm:$0xff]   ;;  %v5684_v51 = vld [vmem:[%s7954_s0 + $0x8c] ss:$16 sps:$4 sm:$0xff]  }
  0x12   :  { %v5679_v52 = vld [vmem:[%s7954_s0 + $0x80] ss:$16 sps:$4 sm:$0xff]   ;;  %v5682_v53 = vld [vmem:[%s7954_s0 + $0x88] ss:$16 sps:$4 sm:$0xff]   ;;  %v5687_v54 = vld [vmem:[%s7954_s0 + $0xa4] ss:$16 sps:$4 sm:$0xff]  }
  0x13   :  { %249 = vmatpush1.bf16.msra.mxu0 %v5635_v19  ;;  %290 = vmatpush1.bf16.msra.mxu1 %v5636_v20  ;;  %v5690_v55 = vld [vmem:[%s7954_s0 + $0xac] ss:$16 sps:$4 sm:$0xff]   ;;  %v5685_v56 = vld [vmem:[%s7954_s0 + $0xa0] ss:$16 sps:$4 sm:$0xff]   ;;  %v5688_v57 = vld [vmem:[%s7954_s0 + $0xa8] ss:$16 sps:$4 sm:$0xff]  }
  0x14   :  { %250 = vmatprep.subr.bf16.mxu0 %v5637_v21  ;;  %291 = vmatprep.subr.bf16.mxu1 %v5639_v22  ;;  %v5693_v58 = vld [vmem:[%s7954_s0 + $0xc4] ss:$16 sps:$4 sm:$0xff]   ;;  %v5696_v59 = vld [vmem:[%s7954_s0 + $0xcc] ss:$16 sps:$4 sm:$0xff]   ;;  %v5691_v60 = vld [vmem:[%s7954_s0 + $0xc0] ss:$16 sps:$4 sm:$0xff]  }
  0x15   :  { %v5694_v61 = vld [vmem:[%s7954_s0 + $0xc8] ss:$16 sps:$4 sm:$0xff]   ;;  %v5699_v62 = vld [vmem:[%s7954_s0 + $0xe4] ss:$16 sps:$4 sm:$0xff]   ;;  %v5702_v63 = vld [vmem:[%s7954_s0 + $0xec] ss:$16 sps:$4 sm:$0xff]  }
  0x16   :  { %v5697_v0 = vld [vmem:[%s7954_s0 + $0xe0] ss:$16 sps:$4 sm:$0xff]   ;;  %v5700_v2 = vld [vmem:[%s7954_s0 + $0xe8] ss:$16 sps:$4 sm:$0xff]   ;;  %v5705_v3 = vld [vmem:[%s7954_s0 + $0x304] ss:$16 sps:$4 sm:$0xff]  }
  0x17   :  { %251 = vmatpush1.bf16.msra.mxu0 %v5641_v23  ;;  %292 = vmatpush1.bf16.msra.mxu1 %v5642_v24  ;;  %v5708_v4 = vld [vmem:[%s7954_s0 + $0x30c] ss:$16 sps:$4 sm:$0xff]   ;;  %v5703_v5 = vld [vmem:[%s7954_s0 + $0x300] ss:$16 sps:$4 sm:$0xff]   ;;  %v5706_v6 = vld [vmem:[%s7954_s0 + $0x308] ss:$16 sps:$4 sm:$0xff]  }
  0x18   :  { %252 = vmatprep.subr.bf16.mxu0 %v5643_v25  ;;  %293 = vmatprep.subr.bf16.mxu1 %v5645_v26  ;;  %v12_v7 = vld [vmem:[%s7955_s1] sm:$0xf]  ;;  %v5711_v8 = vld [vmem:[%s7954_s0 + $0x324] ss:$16 sps:$4 sm:$0xff]   ;;  %v5714_v9 = vld [vmem:[%s7954_s0 + $0x32c] ss:$16 sps:$4 sm:$0xff]  }
  0x19   :  { %v5709_v10 = vld [vmem:[%s7954_s0 + $0x320] ss:$16 sps:$4 sm:$0xff]   ;;  %v5712_v11 = vld [vmem:[%s7954_s0 + $0x328] ss:$16 sps:$4 sm:$0xff]   ;;  %v5717_v12 = vld [vmem:[%s7954_s0 + $0x344] ss:$16 sps:$4 sm:$0xff]  }
  0x1a   :  { %v5720_v13 = vld [vmem:[%s7954_s0 + $0x34c] ss:$16 sps:$4 sm:$0xff]   ;;  %v5715_v14 = vld [vmem:[%s7954_s0 + $0x340] ss:$16 sps:$4 sm:$0xff]   ;;  %v5718_v15 = vld [vmem:[%s7954_s0 + $0x348] ss:$16 sps:$4 sm:$0xff]  }
  0x1b   :  { %253 = vmatpush1.bf16.msra.mxu0 %v5647_v27  ;;  %294 = vmatpush1.bf16.msra.mxu1 %v5648_v28  ;;  %v5723_v16 = vld [vmem:[%s7954_s0 + $0x364] ss:$16 sps:$4 sm:$0xff]   ;;  %v5726_v17 = vld [vmem:[%s7954_s0 + $0x36c] ss:$16 sps:$4 sm:$0xff]   ;;  %v5721_v18 = vld [vmem:[%s7954_s0 + $0x360] ss:$16 sps:$4 sm:$0xff]  }
  0x1c   :  { %254 = vmatprep.subr.bf16.mxu0 %v5649_v29  ;;  %295 = vmatprep.subr.bf16.mxu1 %v5651_v30  ;;  %v5724_v19 = vld [vmem:[%s7954_s0 + $0x368] ss:$16 sps:$4 sm:$0xff]   ;;  %v5729_v20 = vld [vmem:[%s7954_s0 + $0x384] ss:$16 sps:$4 sm:$0xff]   ;;  %v5732_v21 = vld [vmem:[%s7954_s0 + $0x38c] ss:$16 sps:$4 sm:$0xff]  }
  0x1d   :  { %v5727_v22 = vld [vmem:[%s7954_s0 + $0x380] ss:$16 sps:$4 sm:$0xff]   ;;  %v5730_v23 = vld [vmem:[%s7954_s0 + $0x388] ss:$16 sps:$4 sm:$0xff]   ;;  %v5735_v24 = vld [vmem:[%s7954_s0 + $0x3a4] ss:$16 sps:$4 sm:$0xff]  }
  0x1e   :  { %v5738_v25 = vld [vmem:[%s7954_s0 + $0x3ac] ss:$16 sps:$4 sm:$0xff]   ;;  %v5733_v26 = vld [vmem:[%s7954_s0 + $0x3a0] ss:$16 sps:$4 sm:$0xff]   ;;  %v5736_v27 = vld [vmem:[%s7954_s0 + $0x3a8] ss:$16 sps:$4 sm:$0xff]  }
  0x1f   :  { %255 = vmatpush1.bf16.msra.mxu0 %v5653_v31  ;;  %296 = vmatpush1.bf16.msra.mxu1 %v5654_v32  ;;  %v5741_v28 = vld [vmem:[%s7954_s0 + $0x3c4] ss:$16 sps:$4 sm:$0xff]   ;;  %v5744_v29 = vld [vmem:[%s7954_s0 + $0x3cc] ss:$16 sps:$4 sm:$0xff]   ;;  %v5739_v30 = vld [vmem:[%s7954_s0 + $0x3c0] ss:$16 sps:$4 sm:$0xff]  }
  0x20   :  { %482 = vmatprep.subr.bf16.mxu0 %v5657_v33  ;;  %523 = vmatprep.subr.bf16.mxu1 %v5660_v34  ;;  %v5742_v31 = vld [vmem:[%s7954_s0 + $0x3c8] ss:$16 sps:$4 sm:$0xff]   ;;  %v5747_v32 = vld [vmem:[%s7954_s0 + $0x3e4] ss:$16 sps:$4 sm:$0xff]   ;;  %v5750_v33 = vld [vmem:[%s7954_s0 + $0x3ec] ss:$16 sps:$4 sm:$0xff]  }
  0x21   :  { %v5745_v34 = vld [vmem:[%s7954_s0 + $0x3e0] ss:$16 sps:$4 sm:$0xff]  }
  0x22   :  { %273 = vmatmul.mubr.bf16.vlgmr.msra.gmra.mrb[0].mxu0 %v4503_v37  ;;  %314 = vmatmul.mubr.bf16.vlgmr.msra.gmra.mrb[0].mxu1 %v4503_v37  ;;  %v6580_v37 = vld [vmem:[%s7954_s0 + $0x40c] ss:$16 sps:$4 sm:$0xff]  }
  0x23   :  { %483 = vmatpush1.bf16.msra.mxu0 %v5655_v35  ;;  %524 = vmatpush1.bf16.msra.mxu1 %v5658_v36  ;;  %v5748_v35 = vld [vmem:[%s7954_s0 + $0x3e8] ss:$16 sps:$4 sm:$0xff]   ;;  %v6575_v36 = vld [vmem:[%s7954_s0 + $0x404] ss:$16 sps:$4 sm:$0xff]  }
  0x24   :  { %484 = vmatprep.subr.bf16.mxu0 %v5663_v38  ;;  %525 = vmatprep.subr.bf16.mxu1 %v5666_v39  ;;  %v6585_v38 = vld [vmem:[%s7954_s0 + $0x400] ss:$16 sps:$4 sm:$0xff]   ;;  %v6590_v39 = vld [vmem:[%s7954_s0 + $0x408] ss:$16 sps:$4 sm:$0xff]  }
  0x25   :  { %514 = vmatprep.mubr.bf16.mxu0 %v6256_v1  ;;  %555 = vmatprep.mubr.bf16.mxu1 %v6256_v1 }
  0x27   :  { %485 = vmatpush1.bf16.msra.mxu0 %v5661_v40  ;;  %526 = vmatpush1.bf16.msra.mxu1 %v5664_v41  ;;  %v4600_v40 = vld [vmem:[%s7955_s1 + $0x8] sm:$0xf]  ;;  %v6598_v41 = vld [vmem:[%s7954_s0 + $0x424] ss:$16 sps:$4 sm:$0xff]  }
  0x28   :  { %486 = vmatprep.subr.bf16.mxu0 %v5669_v42  ;;  %527 = vmatprep.subr.bf16.mxu1 %v5672_v43  ;;  %v6605_v42 = vld [vmem:[%s7954_s0 + $0x42c] ss:$16 sps:$4 sm:$0xff]   ;;  %v6610_v43 = vld [vmem:[%s7954_s0 + $0x420] ss:$16 sps:$4 sm:$0xff]  }
  0x2b   :  { %487 = vmatpush1.bf16.msra.mxu0 %v5667_v44  ;;  %528 = vmatpush1.bf16.msra.mxu1 %v5670_v45  ;;  %v6615_v44 = vld [vmem:[%s7954_s0 + $0x428] ss:$16 sps:$4 sm:$0xff]   ;;  %v6622_v45 = vld [vmem:[%s7954_s0 + $0x444] ss:$16 sps:$4 sm:$0xff]  }
  0x2c   :  { %488 = vmatprep.subr.bf16.mxu0 %v5675_v46  ;;  %529 = vmatprep.subr.bf16.mxu1 %v5678_v47  ;;  %v6629_v46 = vld [vmem:[%s7954_s0 + $0x44c] ss:$16 sps:$4 sm:$0xff]   ;;  %v6636_v47 = vld [vmem:[%s7954_s0 + $0x440] ss:$16 sps:$4 sm:$0xff]  }
  0x2f   :  { %489 = vmatpush1.bf16.msra.mxu0 %v5673_v48  ;;  %530 = vmatpush1.bf16.msra.mxu1 %v5676_v49  ;;  %v6641_v48 = vld [vmem:[%s7954_s0 + $0x448] ss:$16 sps:$4 sm:$0xff]   ;;  %v6648_v49 = vld [vmem:[%s7954_s0 + $0x464] ss:$16 sps:$4 sm:$0xff]  }
  0x30   :  { %490 = vmatprep.subr.bf16.mxu0 %v5681_v50  ;;  %531 = vmatprep.subr.bf16.mxu1 %v5684_v51  ;;  %v6655_v50 = vld [vmem:[%s7954_s0 + $0x46c] ss:$16 sps:$4 sm:$0xff]   ;;  %v6662_v51 = vld [vmem:[%s7954_s0 + $0x460] ss:$16 sps:$4 sm:$0xff]  }
  0x33   :  { %491 = vmatpush1.bf16.msra.mxu0 %v5679_v52  ;;  %532 = vmatpush1.bf16.msra.mxu1 %v5682_v53  ;;  %v6667_v52 = vld [vmem:[%s7954_s0 + $0x468] ss:$16 sps:$4 sm:$0xff]   ;;  %v6674_v53 = vld [vmem:[%s7954_s0 + $0x484] ss:$16 sps:$4 sm:$0xff]  }
  0x34   :  { %492 = vmatprep.subr.bf16.mxu0 %v5687_v54  ;;  %533 = vmatprep.subr.bf16.mxu1 %v5690_v55  ;;  %v6679_v54 = vld [vmem:[%s7954_s0 + $0x48c] ss:$16 sps:$4 sm:$0xff]   ;;  %v6684_v55 = vld [vmem:[%s7954_s0 + $0x480] ss:$16 sps:$4 sm:$0xff]  }
  0x37   :  { %493 = vmatpush1.bf16.msra.mxu0 %v5685_v56  ;;  %534 = vmatpush1.bf16.msra.mxu1 %v5688_v57  ;;  %v6691_v56 = vld [vmem:[%s7954_s0 + $0x488] ss:$16 sps:$4 sm:$0xff]   ;;  %v6696_v57 = vld [vmem:[%s7954_s0 + $0x4a4] ss:$16 sps:$4 sm:$0xff]  }
  0x38   :  { %494 = vmatprep.subr.bf16.mxu0 %v5693_v58  ;;  %535 = vmatprep.subr.bf16.mxu1 %v5696_v59  ;;  %v6703_v58 = vld [vmem:[%s7954_s0 + $0x4ac] ss:$16 sps:$4 sm:$0xff]   ;;  %v6708_v59 = vld [vmem:[%s7954_s0 + $0x4a0] ss:$16 sps:$4 sm:$0xff]  }
  0x3b   :  { %495 = vmatpush1.bf16.msra.mxu0 %v5691_v60  ;;  %536 = vmatpush1.bf16.msra.mxu1 %v5694_v61  ;;  %v6715_v60 = vld [vmem:[%s7954_s0 + $0x4a8] ss:$16 sps:$4 sm:$0xff]   ;;  %v6720_v61 = vld [vmem:[%s7954_s0 + $0x4c4] ss:$16 sps:$4 sm:$0xff]  }
  0x3c   :  { %496 = vmatprep.subr.bf16.mxu0 %v5699_v62  ;;  %537 = vmatprep.subr.bf16.mxu1 %v5702_v63  ;;  %v6727_v62 = vld [vmem:[%s7954_s0 + $0x4cc] ss:$16 sps:$4 sm:$0xff]   ;;  %v6732_v63 = vld [vmem:[%s7954_s0 + $0x4c0] ss:$16 sps:$4 sm:$0xff]  }
  0x3f   :  { %497 = vmatpush1.bf16.msra.mxu0 %v5697_v0  ;;  %538 = vmatpush1.bf16.msra.mxu1 %v5700_v2  ;;  %v6739_v0 = vld [vmem:[%s7954_s0 + $0x4c8] ss:$16 sps:$4 sm:$0xff]   ;;  %v6744_v2 = vld [vmem:[%s7954_s0 + $0x4e4] ss:$16 sps:$4 sm:$0xff]  }
  0x40   :  { %759 = vmatprep.subr.bf16.mxu0 %v5705_v3  ;;  %800 = vmatprep.subr.bf16.mxu1 %v5708_v4  ;;  %v6751_v3 = vld [vmem:[%s7954_s0 + $0x4ec] ss:$16 sps:$4 sm:$0xff]   ;;  %v6756_v4 = vld [vmem:[%s7954_s0 + $0x4e0] ss:$16 sps:$4 sm:$0xff]  }
  0x42   :  { %515 = vmatmul.mubr.bf16.vlgmr.msra.gmra.mrb[0].mxu0 %v12_v7  ;;  %556 = vmatmul.mubr.bf16.vlgmr.msra.gmra.mrb[0].mxu1 %v12_v7  ;;  %v5804_v7 = vld [vmem:[%s7954_s0 + $0x20c] ss:$16 sps:$4 sm:$0xff]  }
  0x43   :  { %760 = vmatpush1.bf16.msra.mxu0 %v5703_v5  ;;  %801 = vmatpush1.bf16.msra.mxu1 %v5706_v6  ;;  %v6763_v5 = vld [vmem:[%s7954_s0 + $0x4e8] ss:$16 sps:$4 sm:$0xff]   ;;  %v5801_v6 = vld [vmem:[%s7954_s0 + $0x204] ss:$16 sps:$4 sm:$0xff]  }
  0x44   :  { %761 = vmatprep.subr.bf16.mxu0 %v5711_v8  ;;  %802 = vmatprep.subr.bf16.mxu1 %v5714_v9  ;;  %v4665_v8 = vld [vmem:[%s7955_s1 + $0xc] sm:$0xf]  ;;  %v5799_v9 = vld [vmem:[%s7954_s0 + $0x200] ss:$16 sps:$4 sm:$0xff]  }
  0x45   :  { %791 = vmatprep.mubr.bf16.mxu0 %v6256_v1  ;;  %832 = vmatprep.mubr.bf16.mxu1 %v6256_v1 }
  0x47   :  { %762 = vmatpush1.bf16.msra.mxu0 %v5709_v10  ;;  %803 = vmatpush1.bf16.msra.mxu1 %v5712_v11  ;;  %v5802_v10 = vld [vmem:[%s7954_s0 + $0x208] ss:$16 sps:$4 sm:$0xff]   ;;  %v5807_v11 = vld [vmem:[%s7954_s0 + $0x224] ss:$16 sps:$4 sm:$0xff]  }
  0x48   :  { %763 = vmatprep.subr.bf16.mxu0 %v5717_v12  ;;  %804 = vmatprep.subr.bf16.mxu1 %v5720_v13  ;;  %v5810_v12 = vld [vmem:[%s7954_s0 + $0x22c] ss:$16 sps:$4 sm:$0xff]   ;;  %v5805_v13 = vld [vmem:[%s7954_s0 + $0x220] ss:$16 sps:$4 sm:$0xff]  }
  0x4b   :  { %764 = vmatpush1.bf16.msra.mxu0 %v5715_v14  ;;  %805 = vmatpush1.bf16.msra.mxu1 %v5718_v15  ;;  %v5808_v14 = vld [vmem:[%s7954_s0 + $0x228] ss:$16 sps:$4 sm:$0xff]   ;;  %v5813_v15 = vld [vmem:[%s7954_s0 + $0x244] ss:$16 sps:$4 sm:$0xff]  }
  0x4c   :  { %765 = vmatprep.subr.bf16.mxu0 %v5723_v16  ;;  %806 = vmatprep.subr.bf16.mxu1 %v5726_v17  ;;  %v5816_v16 = vld [vmem:[%s7954_s0 + $0x24c] ss:$16 sps:$4 sm:$0xff]   ;;  %v5811_v17 = vld [vmem:[%s7954_s0 + $0x240] ss:$16 sps:$4 sm:$0xff]  }
  0x4f   :  { %766 = vmatpush1.bf16.msra.mxu0 %v5721_v18  ;;  %807 = vmatpush1.bf16.msra.mxu1 %v5724_v19  ;;  %v5814_v18 = vld [vmem:[%s7954_s0 + $0x248] ss:$16 sps:$4 sm:$0xff]   ;;  %v5819_v19 = vld [vmem:[%s7954_s0 + $0x264] ss:$16 sps:$4 sm:$0xff]  }
  0x50   :  { %767 = vmatprep.subr.bf16.mxu0 %v5729_v20  ;;  %808 = vmatprep.subr.bf16.mxu1 %v5732_v21  ;;  %v5822_v20 = vld [vmem:[%s7954_s0 + $0x26c] ss:$16 sps:$4 sm:$0xff]   ;;  %v5817_v21 = vld [vmem:[%s7954_s0 + $0x260] ss:$16 sps:$4 sm:$0xff]  }
  0x53   :  { %768 = vmatpush1.bf16.msra.mxu0 %v5727_v22  ;;  %809 = vmatpush1.bf16.msra.mxu1 %v5730_v23  ;;  %v5820_v22 = vld [vmem:[%s7954_s0 + $0x268] ss:$16 sps:$4 sm:$0xff]   ;;  %v5825_v23 = vld [vmem:[%s7954_s0 + $0x284] ss:$16 sps:$4 sm:$0xff]  }
  0x54   :  { %769 = vmatprep.subr.bf16.mxu0 %v5735_v24  ;;  %810 = vmatprep.subr.bf16.mxu1 %v5738_v25  ;;  %v5828_v24 = vld [vmem:[%s7954_s0 + $0x28c] ss:$16 sps:$4 sm:$0xff]   ;;  %v5823_v25 = vld [vmem:[%s7954_s0 + $0x280] ss:$16 sps:$4 sm:$0xff]  }
  0x57   :  { %770 = vmatpush1.bf16.msra.mxu0 %v5733_v26  ;;  %811 = vmatpush1.bf16.msra.mxu1 %v5736_v27  ;;  %v5826_v26 = vld [vmem:[%s7954_s0 + $0x288] ss:$16 sps:$4 sm:$0xff]   ;;  %v5831_v27 = vld [vmem:[%s7954_s0 + $0x2a4] ss:$16 sps:$4 sm:$0xff]  }
  0x58   :  { %771 = vmatprep.subr.bf16.mxu0 %v5741_v28  ;;  %812 = vmatprep.subr.bf16.mxu1 %v5744_v29  ;;  %v5834_v28 = vld [vmem:[%s7954_s0 + $0x2ac] ss:$16 sps:$4 sm:$0xff]   ;;  %v5829_v29 = vld [vmem:[%s7954_s0 + $0x2a0] ss:$16 sps:$4 sm:$0xff]  }
  0x5b   :  { %772 = vmatpush1.bf16.msra.mxu0 %v5739_v30  ;;  %813 = vmatpush1.bf16.msra.mxu1 %v5742_v31  ;;  %v5832_v30 = vld [vmem:[%s7954_s0 + $0x2a8] ss:$16 sps:$4 sm:$0xff]   ;;  %v5837_v31 = vld [vmem:[%s7954_s0 + $0x2c4] ss:$16 sps:$4 sm:$0xff]  }
  0x5c   :  { %773 = vmatprep.subr.bf16.mxu0 %v5747_v32  ;;  %814 = vmatprep.subr.bf16.mxu1 %v5750_v33  ;;  %v5840_v32 = vld [vmem:[%s7954_s0 + $0x2cc] ss:$16 sps:$4 sm:$0xff]   ;;  %v5835_v33 = vld [vmem:[%s7954_s0 + $0x2c0] ss:$16 sps:$4 sm:$0xff]  }
  0x5f   :  { %774 = vmatpush1.bf16.msra.mxu0 %v5745_v34  ;;  %815 = vmatpush1.bf16.msra.mxu1 %v5748_v35  ;;  %v5838_v34 = vld [vmem:[%s7954_s0 + $0x2c8] ss:$16 sps:$4 sm:$0xff]   ;;  %v5843_v35 = vld [vmem:[%s7954_s0 + $0x2e4] ss:$16 sps:$4 sm:$0xff]  }
  0x60   :  { %1040 = vmatprep.subr.bf16.mxu0 %v6575_v36  ;;  %1081 = vmatprep.subr.bf16.mxu1 %v6580_v37 }
  0x62   :  { %792 = vmatmul.mubr.bf16.vlgmr.msra.gmra.mrb[0].mxu0 %v4600_v40  ;;  %833 = vmatmul.mubr.bf16.vlgmr.msra.gmra.mrb[0].mxu1 %v4600_v40  ;;  %v5846_v40 = vld [vmem:[%s7954_s0 + $0x2ec] ss:$16 sps:$4 sm:$0xff]  }
  0x63   :  { %1041 = vmatpush1.bf16.msra.mxu0 %v6585_v38  ;;  %1082 = vmatpush1.bf16.msra.mxu1 %v6590_v39 }
  0x64   :  { %1042 = vmatprep.subr.bf16.mxu0 %v6598_v41  ;;  %1083 = vmatprep.subr.bf16.mxu1 %v6605_v42 }
  0x65   :  { %1072 = vmatprep.mubr.bf16.mxu0 %v6256_v1  ;;  %1113 = vmatprep.mubr.bf16.mxu1 %v6256_v1 }
  0x67   :  { %1043 = vmatpush1.bf16.msra.mxu0 %v6610_v43  ;;  %1084 = vmatpush1.bf16.msra.mxu1 %v6615_v44 }
  0x68   :  { %1044 = vmatprep.subr.bf16.mxu0 %v6622_v45  ;;  %1085 = vmatprep.subr.bf16.mxu1 %v6629_v46 }
  0x6b   :  { %1045 = vmatpush1.bf16.msra.mxu0 %v6636_v47  ;;  %1086 = vmatpush1.bf16.msra.mxu1 %v6641_v48 }
  0x6c   :  { %1046 = vmatprep.subr.bf16.mxu0 %v6648_v49  ;;  %1087 = vmatprep.subr.bf16.mxu1 %v6655_v50 }
  0x6f   :  { %1047 = vmatpush1.bf16.msra.mxu0 %v6662_v51  ;;  %1088 = vmatpush1.bf16.msra.mxu1 %v6667_v52 }
  0x70   :  { %1048 = vmatprep.subr.bf16.mxu0 %v6674_v53  ;;  %1089 = vmatprep.subr.bf16.mxu1 %v6679_v54 }
  0x73   :  { %1049 = vmatpush1.bf16.msra.mxu0 %v6684_v55  ;;  %1090 = vmatpush1.bf16.msra.mxu1 %v6691_v56 }
  0x74   :  { %1050 = vmatprep.subr.bf16.mxu0 %v6696_v57  ;;  %1091 = vmatprep.subr.bf16.mxu1 %v6703_v58 }
  0x77   :  { %1051 = vmatpush1.bf16.msra.mxu0 %v6708_v59  ;;  %1092 = vmatpush1.bf16.msra.mxu1 %v6715_v60 }
  0x78   :  { %1052 = vmatprep.subr.bf16.mxu0 %v6720_v61  ;;  %1093 = vmatprep.subr.bf16.mxu1 %v6727_v62 }
  0x7b   :  { %1053 = vmatpush1.bf16.msra.mxu0 %v6732_v63  ;;  %1094 = vmatpush1.bf16.msra.mxu1 %v6739_v0 }
  0x7c   :  { %1054 = vmatprep.subr.bf16.mxu0 %v6744_v2  ;;  %1095 = vmatprep.subr.bf16.mxu1 %v6751_v3 }
  0x7f   :  { %1055 = vmatpush1.bf16.msra.mxu0 %v6756_v4  ;;  %1096 = vmatpush1.bf16.msra.mxu1 %v6763_v5 }
  0x80   :  { %1363 = vmatprep.subr.bf16.mxu0 %v5801_v6  ;;  %1404 = vmatprep.subr.bf16.mxu1 %v5804_v7  ;;  %v5841_v6 = vld [vmem:[%s7954_s0 + $0x2e0] ss:$16 sps:$4 sm:$0xff]   ;;  %v5844_v7 = vld [vmem:[%s7954_s0 + $0x2e8] ss:$16 sps:$4 sm:$0xff]  }
  0x82   :  { %1073 = vmatmul.mubr.bf16.vlgmr.msra.gmra.mrb[0].mxu0 %v4665_v8  ;;  %1114 = vmatmul.mubr.bf16.vlgmr.msra.gmra.mrb[0].mxu1 %v4665_v8  ;;  %v4763_v8 = vld [vmem:[%s7955_s1 + $0x14] sm:$0xf] }
  0x83   :  { %1364 = vmatpush1.bf16.msra.mxu0 %v5799_v9  ;;  %1405 = vmatpush1.bf16.msra.mxu1 %v5802_v10  ;;  %v6215_v9 = vld [vmem:[%s7954_s0 + $0x104] ss:$16 sps:$4 sm:$0xff]   ;;  %v6216_v10 = vld [vmem:[%s7954_s0 + $0x10c] ss:$16 sps:$4 sm:$0xff]  }
  0x84   :  { %1365 = vmatprep.subr.bf16.mxu0 %v5807_v11  ;;  %1406 = vmatprep.subr.bf16.mxu1 %v5810_v12  ;;  %v6217_v11 = vld [vmem:[%s7954_s0 + $0x100] ss:$16 sps:$4 sm:$0xff]   ;;  %v6218_v12 = vld [vmem:[%s7954_s0 + $0x108] ss:$16 sps:$4 sm:$0xff]  }
  0x85   :  { %1395 = vmatprep.mubr.bf16.mxu0 %v6256_v1  ;;  %1436 = vmatprep.mubr.bf16.mxu1 %v6256_v1 }
  0x87   :  { %1366 = vmatpush1.bf16.msra.mxu0 %v5805_v13  ;;  %1407 = vmatpush1.bf16.msra.mxu1 %v5808_v14  ;;  %v6219_v13 = vld [vmem:[%s7954_s0 + $0x124] ss:$16 sps:$4 sm:$0xff]   ;;  %v6220_v14 = vld [vmem:[%s7954_s0 + $0x12c] ss:$16 sps:$4 sm:$0xff]  }
  0x88   :  { %1367 = vmatprep.subr.bf16.mxu0 %v5813_v15  ;;  %1408 = vmatprep.subr.bf16.mxu1 %v5816_v16  ;;  %v6221_v15 = vld [vmem:[%s7954_s0 + $0x120] ss:$16 sps:$4 sm:$0xff]   ;;  %v6222_v16 = vld [vmem:[%s7954_s0 + $0x128] ss:$16 sps:$4 sm:$0xff]  }
  0x8b   :  { %1368 = vmatpush1.bf16.msra.mxu0 %v5811_v17  ;;  %1409 = vmatpush1.bf16.msra.mxu1 %v5814_v18  ;;  %v6223_v17 = vld [vmem:[%s7954_s0 + $0x144] ss:$16 sps:$4 sm:$0xff]   ;;  %v6224_v18 = vld [vmem:[%s7954_s0 + $0x14c] ss:$16 sps:$4 sm:$0xff]  }
  0x8c   :  { %1369 = vmatprep.subr.bf16.mxu0 %v5819_v19  ;;  %1410 = vmatprep.subr.bf16.mxu1 %v5822_v20  ;;  %v6225_v19 = vld [vmem:[%s7954_s0 + $0x140] ss:$16 sps:$4 sm:$0xff]   ;;  %v6226_v20 = vld [vmem:[%s7954_s0 + $0x148] ss:$16 sps:$4 sm:$0xff]  }
  0x8f   :  { %1370 = vmatpush1.bf16.msra.mxu0 %v5817_v21  ;;  %1411 = vmatpush1.bf16.msra.mxu1 %v5820_v22  ;;  %v6227_v21 = vld [vmem:[%s7954_s0 + $0x164] ss:$16 sps:$4 sm:$0xff]   ;;  %v6228_v22 = vld [vmem:[%s7954_s0 + $0x16c] ss:$16 sps:$4 sm:$0xff]  }
  0x90   :  { %1371 = vmatprep.subr.bf16.mxu0 %v5825_v23  ;;  %1412 = vmatprep.subr.bf16.mxu1 %v5828_v24  ;;  %v6229_v23 = vld [vmem:[%s7954_s0 + $0x160] ss:$16 sps:$4 sm:$0xff]   ;;  %v6230_v24 = vld [vmem:[%s7954_s0 + $0x168] ss:$16 sps:$4 sm:$0xff]  }
  0x93   :  { %1372 = vmatpush1.bf16.msra.mxu0 %v5823_v25  ;;  %1413 = vmatpush1.bf16.msra.mxu1 %v5826_v26  ;;  %v6231_v25 = vld [vmem:[%s7954_s0 + $0x184] ss:$16 sps:$4 sm:$0xff]   ;;  %v6232_v26 = vld [vmem:[%s7954_s0 + $0x18c] ss:$16 sps:$4 sm:$0xff]  }
  0x94   :  { %1373 = vmatprep.subr.bf16.mxu0 %v5831_v27  ;;  %1414 = vmatprep.subr.bf16.mxu1 %v5834_v28  ;;  %v6233_v27 = vld [vmem:[%s7954_s0 + $0x180] ss:$16 sps:$4 sm:$0xff]   ;;  %v6234_v28 = vld [vmem:[%s7954_s0 + $0x188] ss:$16 sps:$4 sm:$0xff]  }
  0x97   :  { %1374 = vmatpush1.bf16.msra.mxu0 %v5829_v29  ;;  %1415 = vmatpush1.bf16.msra.mxu1 %v5832_v30  ;;  %v6235_v29 = vld [vmem:[%s7954_s0 + $0x1a4] ss:$16 sps:$4 sm:$0xff]   ;;  %v6236_v30 = vld [vmem:[%s7954_s0 + $0x1ac] ss:$16 sps:$4 sm:$0xff]  }
  0x98   :  { %1375 = vmatprep.subr.bf16.mxu0 %v5837_v31  ;;  %1416 = vmatprep.subr.bf16.mxu1 %v5840_v32  ;;  %v6237_v31 = vld [vmem:[%s7954_s0 + $0x1a0] ss:$16 sps:$4 sm:$0xff]   ;;  %v6238_v32 = vld [vmem:[%s7954_s0 + $0x1a8] ss:$16 sps:$4 sm:$0xff]  }
  0x9b   :  { %1376 = vmatpush1.bf16.msra.mxu0 %v5835_v33  ;;  %1417 = vmatpush1.bf16.msra.mxu1 %v5838_v34  ;;  %v6239_v33 = vld [vmem:[%s7954_s0 + $0x1c4] ss:$16 sps:$4 sm:$0xff]   ;;  %v6240_v34 = vld [vmem:[%s7954_s0 + $0x1cc] ss:$16 sps:$4 sm:$0xff]  }
  0x9c   :  { %1377 = vmatprep.subr.bf16.mxu0 %v5843_v35  ;;  %1418 = vmatprep.subr.bf16.mxu1 %v5846_v40  ;;  %v6241_v35 = vld [vmem:[%s7954_s0 + $0x1c0] ss:$16 sps:$4 sm:$0xff]   ;;  %v6242_v40 = vld [vmem:[%s7954_s0 + $0x1c8] ss:$16 sps:$4 sm:$0xff]  }
  0x9f   :  { %1378 = vmatpush1.bf16.msra.mxu0 %v5841_v6  ;;  %1419 = vmatpush1.bf16.msra.mxu1 %v5844_v7  ;;  %v6243_v6 = vld [vmem:[%s7954_s0 + $0x1e4] ss:$16 sps:$4 sm:$0xff]   ;;  %v6244_v7 = vld [vmem:[%s7954_s0 + $0x1ec] ss:$16 sps:$4 sm:$0xff]  }
  0xa0   :  { %1605 = vmatprep.subr.bf16.mxu0 %v6215_v9  ;;  %1646 = vmatprep.subr.bf16.mxu1 %v6216_v10  ;;  %v6246_v9 = vld [vmem:[%s7954_s0 + $0x1e8] ss:$16 sps:$4 sm:$0xff]   ;;  %v4730_v10 = vld [vmem:[%s7955_s1 + $0x10] sm:$0xf] }
  0xa2   :  { %1396 = vmatmul.mubr.bf16.vlgmr.msra.gmra.mrb[4].mxu0 %v4763_v8  ;;  %1437 = vmatmul.mubr.bf16.vlgmr.msra.gmra.mrb[4].mxu1 %v4763_v8  ;;  %v6245_v8 = vld [vmem:[%s7954_s0 + $0x1e0] ss:$16 sps:$4 sm:$0xff]  }
  0xa3   :  { %1606 = vmatpush1.bf16.msra.mxu0 %v6217_v11  ;;  %1647 = vmatpush1.bf16.msra.mxu1 %v6218_v12  ;;  %v5861_v11 = vld [vmem:[%s7954_s0 + $0x544] ss:$16 sps:$4 sm:$0xff]   ;;  %v5864_v12 = vld [vmem:[%s7954_s0 + $0x54c] ss:$16 sps:$4 sm:$0xff]  }
  0xa4   :  { %1607 = vmatprep.subr.bf16.mxu0 %v6219_v13  ;;  %1648 = vmatprep.subr.bf16.mxu1 %v6220_v14  ;;  %v5859_v13 = vld [vmem:[%s7954_s0 + $0x540] ss:$16 sps:$4 sm:$0xff]   ;;  %v5862_v14 = vld [vmem:[%s7954_s0 + $0x548] ss:$16 sps:$4 sm:$0xff]  }
  0xa5   :  { %1637 = vmatprep.mubr.bf16.mxu0 %v6256_v1  ;;  %1678 = vmatprep.mubr.bf16.mxu1 %v6256_v1 }
  0xa7   :  { %1608 = vmatpush1.bf16.msra.mxu0 %v6221_v15  ;;  %1649 = vmatpush1.bf16.msra.mxu1 %v6222_v16  ;;  %v5867_v15 = vld [vmem:[%s7954_s0 + $0x564] ss:$16 sps:$4 sm:$0xff]   ;;  %v5870_v16 = vld [vmem:[%s7954_s0 + $0x56c] ss:$16 sps:$4 sm:$0xff]  }
  0xa8   :  { %1609 = vmatprep.subr.bf16.mxu0 %v6223_v17  ;;  %1650 = vmatprep.subr.bf16.mxu1 %v6224_v18  ;;  %v5865_v17 = vld [vmem:[%s7954_s0 + $0x560] ss:$16 sps:$4 sm:$0xff]   ;;  %v5868_v18 = vld [vmem:[%s7954_s0 + $0x568] ss:$16 sps:$4 sm:$0xff]  }
  0xab   :  { %1610 = vmatpush1.bf16.msra.mxu0 %v6225_v19  ;;  %1651 = vmatpush1.bf16.msra.mxu1 %v6226_v20  ;;  %v5873_v19 = vld [vmem:[%s7954_s0 + $0x584] ss:$16 sps:$4 sm:$0xff]   ;;  %v5876_v20 = vld [vmem:[%s7954_s0 + $0x58c] ss:$16 sps:$4 sm:$0xff]  }
  0xac   :  { %1611 = vmatprep.subr.bf16.mxu0 %v6227_v21  ;;  %1652 = vmatprep.subr.bf16.mxu1 %v6228_v22  ;;  %v5871_v21 = vld [vmem:[%s7954_s0 + $0x580] ss:$16 sps:$4 sm:$0xff]   ;;  %v5874_v22 = vld [vmem:[%s7954_s0 + $0x588] ss:$16 sps:$4 sm:$0xff]  }
  0xaf   :  { %1612 = vmatpush1.bf16.msra.mxu0 %v6229_v23  ;;  %1653 = vmatpush1.bf16.msra.mxu1 %v6230_v24  ;;  %v5879_v23 = vld [vmem:[%s7954_s0 + $0x5a4] ss:$16 sps:$4 sm:$0xff]   ;;  %v5882_v24 = vld [vmem:[%s7954_s0 + $0x5ac] ss:$16 sps:$4 sm:$0xff]  }
  0xb0   :  { %1613 = vmatprep.subr.bf16.mxu0 %v6231_v25  ;;  %1654 = vmatprep.subr.bf16.mxu1 %v6232_v26  ;;  %v5877_v25 = vld [vmem:[%s7954_s0 + $0x5a0] ss:$16 sps:$4 sm:$0xff]   ;;  %v5880_v26 = vld [vmem:[%s7954_s0 + $0x5a8] ss:$16 sps:$4 sm:$0xff]  }
  0xb3   :  { %1614 = vmatpush1.bf16.msra.mxu0 %v6233_v27  ;;  %1655 = vmatpush1.bf16.msra.mxu1 %v6234_v28  ;;  %v5885_v27 = vld [vmem:[%s7954_s0 + $0x5c4] ss:$16 sps:$4 sm:$0xff]   ;;  %v5888_v28 = vld [vmem:[%s7954_s0 + $0x5cc] ss:$16 sps:$4 sm:$0xff]  }
  0xb4   :  { %1615 = vmatprep.subr.bf16.mxu0 %v6235_v29  ;;  %1656 = vmatprep.subr.bf16.mxu1 %v6236_v30  ;;  %v5883_v29 = vld [vmem:[%s7954_s0 + $0x5c0] ss:$16 sps:$4 sm:$0xff]   ;;  %v5886_v30 = vld [vmem:[%s7954_s0 + $0x5c8] ss:$16 sps:$4 sm:$0xff]  }
  0xb7   :  { %1616 = vmatpush1.bf16.msra.mxu0 %v6237_v31  ;;  %1657 = vmatpush1.bf16.msra.mxu1 %v6238_v32  ;;  %v5891_v31 = vld [vmem:[%s7954_s0 + $0x5e4] ss:$16 sps:$4 sm:$0xff]   ;;  %v5894_v32 = vld [vmem:[%s7954_s0 + $0x5ec] ss:$16 sps:$4 sm:$0xff]  }
  0xb8   :  { %1617 = vmatprep.subr.bf16.mxu0 %v6239_v33  ;;  %1658 = vmatprep.subr.bf16.mxu1 %v6240_v34  ;;  %v5889_v33 = vld [vmem:[%s7954_s0 + $0x5e0] ss:$16 sps:$4 sm:$0xff]   ;;  %v5892_v34 = vld [vmem:[%s7954_s0 + $0x5e8] ss:$16 sps:$4 sm:$0xff]  }
  0xbb   :  { %1618 = vmatpush1.bf16.msra.mxu0 %v6241_v35  ;;  %1659 = vmatpush1.bf16.msra.mxu1 %v6242_v40  ;;  %v4925_v35 = vld [vmem:[%s7955_s1 + $0x1c] sm:$0xf]  ;;  %v6247_v40 = vld [vmem:[%s7954_s0 + $0x404] ss:$16 sps:$4 sm:$0xff]  }
  0xbc   :  { %1619 = vmatprep.subr.bf16.mxu0 %v6243_v6  ;;  %1660 = vmatprep.subr.bf16.mxu1 %v6244_v7  ;;  %v6248_v6 = vld [vmem:[%s7954_s0 + $0x40c] ss:$16 sps:$4 sm:$0xff]   ;;  %v6249_v7 = vld [vmem:[%s7954_s0 + $0x400] ss:$16 sps:$4 sm:$0xff]  }
  0xbf   :  { %1620 = vmatpush1.bf16.msra.mxu0 %v6245_v8  ;;  %1661 = vmatpush1.bf16.msra.mxu1 %v6246_v9  ;;  %v6250_v8 = vld [vmem:[%s7954_s0 + $0x408] ss:$16 sps:$4 sm:$0xff]   ;;  %v6251_v9 = vld [vmem:[%s7954_s0 + $0x424] ss:$16 sps:$4 sm:$0xff]  }
  0xc0   :  { %1881 = vmatprep.subr.bf16.mxu0 %v6575_v36  ;;  %1922 = vmatprep.subr.bf16.mxu1 %v6580_v37  ;;  %v5849_v36 = vld [vmem:[%s7954_s0 + $0x504] ss:$16 sps:$4 sm:$0xff]   ;;  %v5852_v37 = vld [vmem:[%s7954_s0 + $0x50c] ss:$16 sps:$4 sm:$0xff]  }
  0xc2   :  { %1638 = vmatmul.mubr.bf16.vlgmr.msra.gmra.mrb[4].mxu0 %v4730_v10  ;;  %1679 = vmatmul.mubr.bf16.vlgmr.msra.gmra.mrb[4].mxu1 %v4730_v10  ;;  %v6252_v10 = vld [vmem:[%s7954_s0 + $0x42c] ss:$16 sps:$4 sm:$0xff]  }
  0xc3   :  { %1882 = vmatpush1.bf16.msra.mxu0 %v6585_v38  ;;  %1923 = vmatpush1.bf16.msra.mxu1 %v6590_v39  ;;  %v5847_v38 = vld [vmem:[%s7954_s0 + $0x500] ss:$16 sps:$4 sm:$0xff]   ;;  %v5850_v39 = vld [vmem:[%s7954_s0 + $0x508] ss:$16 sps:$4 sm:$0xff]  }
  0xc4   :  { %1883 = vmatprep.subr.bf16.mxu0 %v6598_v41  ;;  %1924 = vmatprep.subr.bf16.mxu1 %v6605_v42  ;;  %v4860_v41 = vld [vmem:[%s7955_s1 + $0x18] sm:$0xf]  ;;  %v5855_v42 = vld [vmem:[%s7954_s0 + $0x524] ss:$16 sps:$4 sm:$0xff]  }
  0xc5   :  { %1913 = vmatprep.mubr.bf16.mxu0 %v6256_v1  ;;  %1954 = vmatprep.mubr.bf16.mxu1 %v6256_v1 }
  0xc7   :  { %1884 = vmatpush1.bf16.msra.mxu0 %v6610_v43  ;;  %1925 = vmatpush1.bf16.msra.mxu1 %v6615_v44  ;;  %v5858_v43 = vld [vmem:[%s7954_s0 + $0x52c] ss:$16 sps:$4 sm:$0xff]   ;;  %v5853_v44 = vld [vmem:[%s7954_s0 + $0x520] ss:$16 sps:$4 sm:$0xff]  }
  0xc8   :  { %1885 = vmatprep.subr.bf16.mxu0 %v6622_v45  ;;  %1926 = vmatprep.subr.bf16.mxu1 %v6629_v46  ;;  %v5856_v45 = vld [vmem:[%s7954_s0 + $0x528] ss:$16 sps:$4 sm:$0xff]  }
  0xcb   :  { %1886 = vmatpush1.bf16.msra.mxu0 %v6636_v47  ;;  %1927 = vmatpush1.bf16.msra.mxu1 %v6641_v48 }
  0xcc   :  { %1887 = vmatprep.subr.bf16.mxu0 %v6648_v49  ;;  %1928 = vmatprep.subr.bf16.mxu1 %v6655_v50 }
  0xcf   :  { %1888 = vmatpush1.bf16.msra.mxu0 %v6662_v51  ;;  %1929 = vmatpush1.bf16.msra.mxu1 %v6667_v52 }
  0xd0   :  { %1889 = vmatprep.subr.bf16.mxu0 %v6674_v53  ;;  %1930 = vmatprep.subr.bf16.mxu1 %v6679_v54 }
  0xd3   :  { %1890 = vmatpush1.bf16.msra.mxu0 %v6684_v55  ;;  %1931 = vmatpush1.bf16.msra.mxu1 %v6691_v56 }
  0xd4   :  { %1891 = vmatprep.subr.bf16.mxu0 %v6696_v57  ;;  %1932 = vmatprep.subr.bf16.mxu1 %v6703_v58 }
  0xd7   :  { %1892 = vmatpush1.bf16.msra.mxu0 %v6708_v59  ;;  %1933 = vmatpush1.bf16.msra.mxu1 %v6715_v60 }
  0xd8   :  { %1893 = vmatprep.subr.bf16.mxu0 %v6720_v61  ;;  %1934 = vmatprep.subr.bf16.mxu1 %v6727_v62 }
  0xdb   :  { %1894 = vmatpush1.bf16.msra.mxu0 %v6732_v63  ;;  %1935 = vmatpush1.bf16.msra.mxu1 %v6739_v0 }
  0xdc   :  { %1895 = vmatprep.subr.bf16.mxu0 %v6744_v2  ;;  %1936 = vmatprep.subr.bf16.mxu1 %v6751_v3 }
  0xdf   :  { %1896 = vmatpush1.bf16.msra.mxu0 %v6756_v4  ;;  %1937 = vmatpush1.bf16.msra.mxu1 %v6763_v5 }
  0xe0   :  { %2162 = vmatprep.subr.bf16.mxu0 %v5849_v36  ;;  %2203 = vmatprep.subr.bf16.mxu1 %v5852_v37  ;;  %v6253_v36 = vld [vmem:[%s7954_s0 + $0x420] ss:$16 sps:$4 sm:$0xff]   ;;  %v6254_v37 = vld [vmem:[%s7954_s0 + $0x428] ss:$16 sps:$4 sm:$0xff]  }
  0xe2   :  { %1914 = vmatmul.mubr.bf16.vlgmr.msra.gmra.mrb[4].mxu0 %v4860_v41  ;;  %1955 = vmatmul.mubr.bf16.vlgmr.msra.gmra.mrb[4].mxu1 %v4860_v41  ;;  %v5928_v41 = vld [vmem:[%s7954_s0 + $0x3a8] ss:$16 sps:$4 sm:$0xff]  }
  0xe3   :  { %2163 = vmatpush1.bf16.msra.mxu0 %v5847_v38  ;;  %2204 = vmatpush1.bf16.msra.mxu1 %v5850_v39  ;;  %v6255_v38 = vld [vmem:[%s7954_s0 + $0x444] ss:$16 sps:$4 sm:$0xff]   ;;  %v5925_v39 = vld [vmem:[%s7954_s0 + $0x3a0] ss:$16 sps:$4 sm:$0xff]  }
  0xe4   :  { %2164 = vmatprep.subr.bf16.mxu0 %v5855_v42  ;;  %2205 = vmatprep.subr.bf16.mxu1 %v5858_v43  ;;  %v5933_v42 = vld [vmem:[%s7954_s0 + $0x3c4] ss:$16 sps:$4 sm:$0xff]   ;;  %v5936_v43 = vld [vmem:[%s7954_s0 + $0x3cc] ss:$16 sps:$4 sm:$0xff]  }
  0xe5   :  { %2194 = vmatprep.mubr.bf16.mxu0 %v6256_v1  ;;  %2235 = vmatprep.mubr.bf16.mxu1 %v6256_v1 }
  0xe7   :  { %2165 = vmatpush1.bf16.msra.mxu0 %v5853_v44  ;;  %2206 = vmatpush1.bf16.msra.mxu1 %v5856_v45  ;;  %v5931_v44 = vld [vmem:[%s7954_s0 + $0x3c0] ss:$16 sps:$4 sm:$0xff]   ;;  %v5934_v45 = vld [vmem:[%s7954_s0 + $0x3c8] ss:$16 sps:$4 sm:$0xff]  }
  0xe8   :  { %2166 = vmatprep.subr.bf16.mxu0 %v5861_v11  ;;  %2207 = vmatprep.subr.bf16.mxu1 %v5864_v12  ;;  %v5939_v11 = vld [vmem:[%s7954_s0 + $0x3e4] ss:$16 sps:$4 sm:$0xff]   ;;  %v5942_v12 = vld [vmem:[%s7954_s0 + $0x3ec] ss:$16 sps:$4 sm:$0xff]  }
  0xeb   :  { %2167 = vmatpush1.bf16.msra.mxu0 %v5859_v13  ;;  %2208 = vmatpush1.bf16.msra.mxu1 %v5862_v14  ;;  %v5937_v13 = vld [vmem:[%s7954_s0 + $0x3e0] ss:$16 sps:$4 sm:$0xff]   ;;  %v5940_v14 = vld [vmem:[%s7954_s0 + $0x3e8] ss:$16 sps:$4 sm:$0xff]  }
  0xec   :  { %2168 = vmatprep.subr.bf16.mxu0 %v5867_v15  ;;  %2209 = vmatprep.subr.bf16.mxu1 %v5870_v16  ;;  %v5945_v15 = vld [vmem:[%s7954_s0 + $0x604] ss:$16 sps:$4 sm:$0xff]   ;;  %v5948_v16 = vld [vmem:[%s7954_s0 + $0x60c] ss:$16 sps:$4 sm:$0xff]  }
  0xef   :  { %2169 = vmatpush1.bf16.msra.mxu0 %v5865_v17  ;;  %2210 = vmatpush1.bf16.msra.mxu1 %v5868_v18  ;;  %v5943_v17 = vld [vmem:[%s7954_s0 + $0x600] ss:$16 sps:$4 sm:$0xff]   ;;  %v5946_v18 = vld [vmem:[%s7954_s0 + $0x608] ss:$16 sps:$4 sm:$0xff]  }
  0xf0   :  { %2170 = vmatprep.subr.bf16.mxu0 %v5873_v19  ;;  %2211 = vmatprep.subr.bf16.mxu1 %v5876_v20  ;;  %v4990_v19 = vld [vmem:[%s7955_s1 + $0x20] sm:$0xf]  ;;  %v5951_v20 = vld [vmem:[%s7954_s0 + $0x624] ss:$16 sps:$4 sm:$0xff]  }
  0xf3   :  { %2171 = vmatpush1.bf16.msra.mxu0 %v5871_v21  ;;  %2212 = vmatpush1.bf16.msra.mxu1 %v5874_v22  ;;  %v5954_v21 = vld [vmem:[%s7954_s0 + $0x62c] ss:$16 sps:$4 sm:$0xff]   ;;  %v5949_v22 = vld [vmem:[%s7954_s0 + $0x620] ss:$16 sps:$4 sm:$0xff]  }
  0xf4   :  { %2172 = vmatprep.subr.bf16.mxu0 %v5879_v23  ;;  %2213 = vmatprep.subr.bf16.mxu1 %v5882_v24  ;;  %v5952_v23 = vld [vmem:[%s7954_s0 + $0x628] ss:$16 sps:$4 sm:$0xff]   ;;  %v5957_v24 = vld [vmem:[%s7954_s0 + $0x644] ss:$16 sps:$4 sm:$0xff]  }
  0xf7   :  { %2173 = vmatpush1.bf16.msra.mxu0 %v5877_v25  ;;  %2214 = vmatpush1.bf16.msra.mxu1 %v5880_v26  ;;  %v5960_v25 = vld [vmem:[%s7954_s0 + $0x64c] ss:$16 sps:$4 sm:$0xff]   ;;  %v5955_v26 = vld [vmem:[%s7954_s0 + $0x640] ss:$16 sps:$4 sm:$0xff]  }
  0xf8   :  { %2174 = vmatprep.subr.bf16.mxu0 %v5885_v27  ;;  %2215 = vmatprep.subr.bf16.mxu1 %v5888_v28  ;;  %v5958_v27 = vld [vmem:[%s7954_s0 + $0x648] ss:$16 sps:$4 sm:$0xff]   ;;  %v5963_v28 = vld [vmem:[%s7954_s0 + $0x664] ss:$16 sps:$4 sm:$0xff]  }
  0xfb   :  { %2175 = vmatpush1.bf16.msra.mxu0 %v5883_v29  ;;  %2216 = vmatpush1.bf16.msra.mxu1 %v5886_v30  ;;  %v5966_v29 = vld [vmem:[%s7954_s0 + $0x66c] ss:$16 sps:$4 sm:$0xff]   ;;  %v5961_v30 = vld [vmem:[%s7954_s0 + $0x660] ss:$16 sps:$4 sm:$0xff]  }
  0xfc   :  { %2176 = vmatprep.subr.bf16.mxu0 %v5891_v31  ;;  %2217 = vmatprep.subr.bf16.mxu1 %v5894_v32  ;;  %v5964_v31 = vld [vmem:[%s7954_s0 + $0x668] ss:$16 sps:$4 sm:$0xff]   ;;  %v5969_v32 = vld [vmem:[%s7954_s0 + $0x684] ss:$16 sps:$4 sm:$0xff]  }
  0xff   :  { %2177 = vmatpush1.bf16.msra.mxu0 %v5889_v33  ;;  %2218 = vmatpush1.bf16.msra.mxu1 %v5892_v34  ;;  %v5972_v33 = vld [vmem:[%s7954_s0 + $0x68c] ss:$16 sps:$4 sm:$0xff]   ;;  %v5967_v34 = vld [vmem:[%s7954_s0 + $0x680] ss:$16 sps:$4 sm:$0xff]  }
 0x100   :  { %2484 = vmatprep.subr.bf16.mxu0 %v6247_v40  ;;  %2525 = vmatprep.subr.bf16.mxu1 %v6248_v6  ;;  %v5975_v40 = vld [vmem:[%s7954_s0 + $0x6a4] ss:$16 sps:$4 sm:$0xff]   ;;  %v5978_v6 = vld [vmem:[%s7954_s0 + $0x6ac] ss:$16 sps:$4 sm:$0xff]  }
 0x102   :  { %2195 = vmatmul.mubr.bf16.vlgmr.msra.gmra.mrb[4].mxu0 %v4925_v35  ;;  %2236 = vmatmul.mubr.bf16.vlgmr.msra.gmra.mrb[4].mxu1 %v4925_v35  ;;  %v5970_v35 = vld [vmem:[%s7954_s0 + $0x688] ss:$16 sps:$4 sm:$0xff]  }
 0x103   :  { %2485 = vmatpush1.bf16.msra.mxu0 %v6249_v7  ;;  %2526 = vmatpush1.bf16.msra.mxu1 %v6250_v8  ;;  %v5973_v7 = vld [vmem:[%s7954_s0 + $0x6a0] ss:$16 sps:$4 sm:$0xff]   ;;  %v5976_v8 = vld [vmem:[%s7954_s0 + $0x6a8] ss:$16 sps:$4 sm:$0xff]  }
 0x104   :  { %2486 = vmatprep.subr.bf16.mxu0 %v6251_v9  ;;  %2527 = vmatprep.subr.bf16.mxu1 %v6252_v10  ;;  %v5981_v9 = vld [vmem:[%s7954_s0 + $0x6c4] ss:$16 sps:$4 sm:$0xff]   ;;  %v5984_v10 = vld [vmem:[%s7954_s0 + $0x6cc] ss:$16 sps:$4 sm:$0xff]  }
 0x105   :  { %2516 = vmatprep.mubr.bf16.mxu0 %v6256_v1  ;;  %2557 = vmatprep.mubr.bf16.mxu1 %v6256_v1 }
 0x107   :  { %2487 = vmatpush1.bf16.msra.mxu0 %v6253_v36  ;;  %2528 = vmatpush1.bf16.msra.mxu1 %v6254_v37 }
 0x108   :  { %2488 = vmatprep.subr.bf16.mxu0 %v6255_v38  ;;  %2529 = vmatprep.subr.bf16.mxu1 %v6629_v46  ;;  %v5897_v46 = vld [vmem:[%s7954_s0 + $0x304] ss:$16 sps:$4 sm:$0xff]  }
 0x10b   :  { %2489 = vmatpush1.bf16.msra.mxu0 %v6636_v47  ;;  %2530 = vmatpush1.bf16.msra.mxu1 %v6641_v48  ;;  %v5900_v47 = vld [vmem:[%s7954_s0 + $0x30c] ss:$16 sps:$4 sm:$0xff]   ;;  %v5895_v48 = vld [vmem:[%s7954_s0 + $0x300] ss:$16 sps:$4 sm:$0xff]  }
 0x10c   :  { %2490 = vmatprep.subr.bf16.mxu0 %v6648_v49  ;;  %2531 = vmatprep.subr.bf16.mxu1 %v6655_v50  ;;  %v5898_v49 = vld [vmem:[%s7954_s0 + $0x308] ss:$16 sps:$4 sm:$0xff]   ;;  %v5023_v50 = vld [vmem:[%s7955_s1 + $0x24] sm:$0xf] }
 0x10f   :  { %2491 = vmatpush1.bf16.msra.mxu0 %v6662_v51  ;;  %2532 = vmatpush1.bf16.msra.mxu1 %v6667_v52  ;;  %v5903_v51 = vld [vmem:[%s7954_s0 + $0x324] ss:$16 sps:$4 sm:$0xff]   ;;  %v5906_v52 = vld [vmem:[%s7954_s0 + $0x32c] ss:$16 sps:$4 sm:$0xff]  }
 0x110   :  { %2492 = vmatprep.subr.bf16.mxu0 %v6674_v53  ;;  %2533 = vmatprep.subr.bf16.mxu1 %v6679_v54  ;;  %v5901_v53 = vld [vmem:[%s7954_s0 + $0x320] ss:$16 sps:$4 sm:$0xff]   ;;  %v5904_v54 = vld [vmem:[%s7954_s0 + $0x328] ss:$16 sps:$4 sm:$0xff]  }
 0x113   :  { %2493 = vmatpush1.bf16.msra.mxu0 %v6684_v55  ;;  %2534 = vmatpush1.bf16.msra.mxu1 %v6691_v56  ;;  %v5909_v55 = vld [vmem:[%s7954_s0 + $0x344] ss:$16 sps:$4 sm:$0xff]   ;;  %v5912_v56 = vld [vmem:[%s7954_s0 + $0x34c] ss:$16 sps:$4 sm:$0xff]  }
 0x114   :  { %2494 = vmatprep.subr.bf16.mxu0 %v6696_v57  ;;  %2535 = vmatprep.subr.bf16.mxu1 %v6703_v58  ;;  %v5907_v57 = vld [vmem:[%s7954_s0 + $0x340] ss:$16 sps:$4 sm:$0xff]   ;;  %v5910_v58 = vld [vmem:[%s7954_s0 + $0x348] ss:$16 sps:$4 sm:$0xff]  }
 0x117   :  { %2495 = vmatpush1.bf16.msra.mxu0 %v6708_v59  ;;  %2536 = vmatpush1.bf16.msra.mxu1 %v6715_v60  ;;  %v5915_v59 = vld [vmem:[%s7954_s0 + $0x364] ss:$16 sps:$4 sm:$0xff]   ;;  %v5918_v60 = vld [vmem:[%s7954_s0 + $0x36c] ss:$16 sps:$4 sm:$0xff]  }
 0x118   :  { %2496 = vmatprep.subr.bf16.mxu0 %v6720_v61  ;;  %2537 = vmatprep.subr.bf16.mxu1 %v6727_v62  ;;  %v5913_v61 = vld [vmem:[%s7954_s0 + $0x360] ss:$16 sps:$4 sm:$0xff]   ;;  %v5916_v62 = vld [vmem:[%s7954_s0 + $0x368] ss:$16 sps:$4 sm:$0xff]  }
 0x11b   :  { %2497 = vmatpush1.bf16.msra.mxu0 %v6732_v63  ;;  %2538 = vmatpush1.bf16.msra.mxu1 %v6739_v0  ;;  %v5921_v63 = vld [vmem:[%s7954_s0 + $0x384] ss:$16 sps:$4 sm:$0xff]   ;;  %v5924_v0 = vld [vmem:[%s7954_s0 + $0x38c] ss:$16 sps:$4 sm:$0xff]  }
 0x11c   :  { %2498 = vmatprep.subr.bf16.mxu0 %v6744_v2  ;;  %2539 = vmatprep.subr.bf16.mxu1 %v6751_v3  ;;  %v5919_v2 = vld [vmem:[%s7954_s0 + $0x380] ss:$16 sps:$4 sm:$0xff]   ;;  %v5922_v3 = vld [vmem:[%s7954_s0 + $0x388] ss:$16 sps:$4 sm:$0xff]  }
 0x11f   :  { %2499 = vmatpush1.bf16.msra.mxu0 %v6756_v4  ;;  %2540 = vmatpush1.bf16.msra.mxu1 %v6763_v5  ;;  %v5927_v4 = vld [vmem:[%s7954_s0 + $0x3a4] ss:$16 sps:$4 sm:$0xff]   ;;  %v5930_v5 = vld [vmem:[%s7954_s0 + $0x3ac] ss:$16 sps:$4 sm:$0xff]  }
 0x120   :  { %2726 = vmatprep.subr.bf16.mxu0 %v5897_v46  ;;  %2767 = vmatprep.subr.bf16.mxu1 %v5900_v47 }
 0x122   :  { %2517 = vmatmul.mubr.bf16.vlgmr.msra.gmra.mrb[8].mxu0 %v5023_v50  ;;  %2558 = vmatmul.mubr.bf16.vlgmr.msra.gmra.mrb[8].mxu1 %v5023_v50  ;;  %v5982_v50 = vld [vmem:[%s7954_s0 + $0x6c8] ss:$16 sps:$4 sm:$0xff]  }
 0x123   :  { %2727 = vmatpush1.bf16.msra.mxu0 %v5895_v48  ;;  %2768 = vmatpush1.bf16.msra.mxu1 %v5898_v49  ;;  %v5979_v49 = vld [vmem:[%s7954_s0 + $0x6c0] ss:$16 sps:$4 sm:$0xff]  }
 0x124   :  { %2728 = vmatprep.subr.bf16.mxu0 %v5903_v51  ;;  %2769 = vmatprep.subr.bf16.mxu1 %v5906_v52 }
 0x125   :  { %2758 = vmatprep.mubr.bf16.mxu0 %v6256_v1  ;;  %2799 = vmatprep.mubr.bf16.mxu1 %v6256_v1 }
 0x127   :  { %2729 = vmatpush1.bf16.msra.mxu0 %v5901_v53  ;;  %2770 = vmatpush1.bf16.msra.mxu1 %v5904_v54  ;;  %v5987_v53 = vld [vmem:[%s7954_s0 + $0x6e4] ss:$16 sps:$4 sm:$0xff]   ;;  %v5990_v54 = vld [vmem:[%s7954_s0 + $0x6ec] ss:$16 sps:$4 sm:$0xff]  }
 0x128   :  { %2730 = vmatprep.subr.bf16.mxu0 %v5909_v55  ;;  %2771 = vmatprep.subr.bf16.mxu1 %v5912_v56  ;;  %v5985_v55 = vld [vmem:[%s7954_s0 + $0x6e0] ss:$16 sps:$4 sm:$0xff]   ;;  %v5988_v56 = vld [vmem:[%s7954_s0 + $0x6e8] ss:$16 sps:$4 sm:$0xff]  }
 0x12b   :  { %2731 = vmatpush1.bf16.msra.mxu0 %v5907_v57  ;;  %2772 = vmatpush1.bf16.msra.mxu1 %v5910_v58  ;;  %v7369_v57 = vld [vmem:[%s7954_s0 + $0x704] ss:$16 sps:$4 sm:$0xff]   ;;  %v7374_v58 = vld [vmem:[%s7954_s0 + $0x70c] ss:$16 sps:$4 sm:$0xff]  }
 0x12c   :  { %2732 = vmatprep.subr.bf16.mxu0 %v5915_v59  ;;  %2773 = vmatprep.subr.bf16.mxu1 %v5918_v60  ;;  %v7379_v59 = vld [vmem:[%s7954_s0 + $0x700] ss:$16 sps:$4 sm:$0xff]   ;;  %v7384_v60 = vld [vmem:[%s7954_s0 + $0x708] ss:$16 sps:$4 sm:$0xff]  }
 0x12f   :  { %2733 = vmatpush1.bf16.msra.mxu0 %v5913_v61  ;;  %2774 = vmatpush1.bf16.msra.mxu1 %v5916_v62  ;;  %v5120_v61 = vld [vmem:[%s7955_s1 + $0x28] sm:$0xf] }
 0x130   :  { %2734 = vmatprep.subr.bf16.mxu0 %v5921_v63  ;;  %2775 = vmatprep.subr.bf16.mxu1 %v5924_v0  ;;  %v7394_v63 = vld [vmem:[%s7954_s0 + $0x724] ss:$16 sps:$4 sm:$0xff]   ;;  %v7399_v0 = vld [vmem:[%s7954_s0 + $0x72c] ss:$16 sps:$4 sm:$0xff]  }
 0x133   :  { %2735 = vmatpush1.bf16.msra.mxu0 %v5919_v2  ;;  %2776 = vmatpush1.bf16.msra.mxu1 %v5922_v3 }
 0x134   :  { %2736 = vmatprep.subr.bf16.mxu0 %v5927_v4  ;;  %2777 = vmatprep.subr.bf16.mxu1 %v5930_v5  ;;  %v7415_v5 = vld [vmem:[%s7954_s0 + $0x720] ss:$16 sps:$4 sm:$0xff]  }
 0x137   :  { %2737 = vmatpush1.bf16.msra.mxu0 %v5925_v39  ;;  %2778 = vmatpush1.bf16.msra.mxu1 %v5928_v41  ;;  %v7420_v39 = vld [vmem:[%s7954_s0 + $0x728] ss:$16 sps:$4 sm:$0xff]   ;;  %v7430_v41 = vld [vmem:[%s7954_s0 + $0x744] ss:$16 sps:$4 sm:$0xff]  }
 0x138   :  { %2738 = vmatprep.subr.bf16.mxu0 %v5933_v42  ;;  %2779 = vmatprep.subr.bf16.mxu1 %v5936_v43  ;;  %v7435_v42 = vld [vmem:[%s7954_s0 + $0x74c] ss:$16 sps:$4 sm:$0xff]   ;;  %v7444_v43 = vld [vmem:[%s7954_s0 + $0x740] ss:$16 sps:$4 sm:$0xff]  }
 0x13b   :  { %2739 = vmatpush1.bf16.msra.mxu0 %v5931_v44  ;;  %2780 = vmatpush1.bf16.msra.mxu1 %v5934_v45  ;;  %v7449_v44 = vld [vmem:[%s7954_s0 + $0x748] ss:$16 sps:$4 sm:$0xff]   ;;  %v7456_v45 = vld [vmem:[%s7954_s0 + $0x764] ss:$16 sps:$4 sm:$0xff]  }
 0x13c   :  { %2740 = vmatprep.subr.bf16.mxu0 %v5939_v11  ;;  %2781 = vmatprep.subr.bf16.mxu1 %v5942_v12  ;;  %v7461_v11 = vld [vmem:[%s7954_s0 + $0x76c] ss:$16 sps:$4 sm:$0xff]   ;;  %v7468_v12 = vld [vmem:[%s7954_s0 + $0x760] ss:$16 sps:$4 sm:$0xff]  }
 0x13f   :  { %2741 = vmatpush1.bf16.msra.mxu0 %v5937_v13  ;;  %2782 = vmatpush1.bf16.msra.mxu1 %v5940_v14  ;;  %v7473_v13 = vld [vmem:[%s7954_s0 + $0x768] ss:$16 sps:$4 sm:$0xff]   ;;  %v7480_v14 = vld [vmem:[%s7954_s0 + $0x784] ss:$16 sps:$4 sm:$0xff]  }
 0x140   :  { %3003 = vmatprep.subr.bf16.mxu0 %v5945_v15  ;;  %3044 = vmatprep.subr.bf16.mxu1 %v5948_v16  ;;  %v7485_v15 = vld [vmem:[%s7954_s0 + $0x78c] ss:$16 sps:$4 sm:$0xff]   ;;  %v7492_v16 = vld [vmem:[%s7954_s0 + $0x780] ss:$16 sps:$4 sm:$0xff]  }
 0x142   :  { %2759 = vmatmul.mubr.bf16.vlgmr.msra.gmra.mrb[8].mxu0 %v4990_v19  ;;  %2800 = vmatmul.mubr.bf16.vlgmr.msra.gmra.mrb[8].mxu1 %v4990_v19  ;;  %v7509_v19 = vld [vmem:[%s7954_s0 + $0x7ac] ss:$16 sps:$4 sm:$0xff]  }
 0x143   :  { %3004 = vmatpush1.bf16.msra.mxu0 %v5943_v17  ;;  %3045 = vmatpush1.bf16.msra.mxu1 %v5946_v18  ;;  %v7497_v17 = vld [vmem:[%s7954_s0 + $0x788] ss:$16 sps:$4 sm:$0xff]   ;;  %v7504_v18 = vld [vmem:[%s7954_s0 + $0x7a4] ss:$16 sps:$4 sm:$0xff]  }
 0x144   :  { %3005 = vmatprep.subr.bf16.mxu0 %v5951_v20  ;;  %3046 = vmatprep.subr.bf16.mxu1 %v5954_v21  ;;  %v7516_v20 = vld [vmem:[%s7954_s0 + $0x7a0] ss:$16 sps:$4 sm:$0xff]   ;;  %v7521_v21 = vld [vmem:[%s7954_s0 + $0x7a8] ss:$16 sps:$4 sm:$0xff]  }
 0x145   :  { %3035 = vmatprep.mubr.bf16.mxu0 %v6256_v1  ;;  %3076 = vmatprep.mubr.bf16.mxu1 %v6256_v1 }
 0x147   :  { %3006 = vmatpush1.bf16.msra.mxu0 %v5949_v22  ;;  %3047 = vmatpush1.bf16.msra.mxu1 %v5952_v23  ;;  %v7528_v22 = vld [vmem:[%s7954_s0 + $0x7c4] ss:$16 sps:$4 sm:$0xff]   ;;  %v7533_v23 = vld [vmem:[%s7954_s0 + $0x7cc] ss:$16 sps:$4 sm:$0xff]  }
 0x148   :  { %3007 = vmatprep.subr.bf16.mxu0 %v5957_v24  ;;  %3048 = vmatprep.subr.bf16.mxu1 %v5960_v25  ;;  %v7540_v24 = vld [vmem:[%s7954_s0 + $0x7c0] ss:$16 sps:$4 sm:$0xff]   ;;  %v7545_v25 = vld [vmem:[%s7954_s0 + $0x7c8] ss:$16 sps:$4 sm:$0xff]  }
 0x14b   :  { %3008 = vmatpush1.bf16.msra.mxu0 %v5955_v26  ;;  %3049 = vmatpush1.bf16.msra.mxu1 %v5958_v27  ;;  %v7552_v26 = vld [vmem:[%s7954_s0 + $0x7e4] ss:$16 sps:$4 sm:$0xff]   ;;  %v7557_v27 = vld [vmem:[%s7954_s0 + $0x7ec] ss:$16 sps:$4 sm:$0xff]  }
 0x14c   :  { %3009 = vmatprep.subr.bf16.mxu0 %v5963_v28  ;;  %3050 = vmatprep.subr.bf16.mxu1 %v5966_v29  ;;  %v7564_v28 = vld [vmem:[%s7954_s0 + $0x7e0] ss:$16 sps:$4 sm:$0xff]   ;;  %v7569_v29 = vld [vmem:[%s7954_s0 + $0x7e8] ss:$16 sps:$4 sm:$0xff]  }
 0x14f   :  { %3010 = vmatpush1.bf16.msra.mxu0 %v5961_v30  ;;  %3051 = vmatpush1.bf16.msra.mxu1 %v5964_v31  ;;  %v6041_v30 = vld [vmem:[%s7954_s0 + $0x504] ss:$16 sps:$4 sm:$0xff]   ;;  %v6044_v31 = vld [vmem:[%s7954_s0 + $0x50c] ss:$16 sps:$4 sm:$0xff]  }
 0x150   :  { %3011 = vmatprep.subr.bf16.mxu0 %v5969_v32  ;;  %3052 = vmatprep.subr.bf16.mxu1 %v5972_v33  ;;  %v5185_v32 = vld [vmem:[%s7955_s1 + $0x2c] sm:$0xf]  ;;  %v6039_v33 = vld [vmem:[%s7954_s0 + $0x500] ss:$16 sps:$4 sm:$0xff]  }
 0x153   :  { %3012 = vmatpush1.bf16.msra.mxu0 %v5967_v34  ;;  %3053 = vmatpush1.bf16.msra.mxu1 %v5970_v35  ;;  %v6042_v34 = vld [vmem:[%s7954_s0 + $0x508] ss:$16 sps:$4 sm:$0xff]   ;;  %v6047_v35 = vld [vmem:[%s7954_s0 + $0x524] ss:$16 sps:$4 sm:$0xff]  }
 0x154   :  { %3013 = vmatprep.subr.bf16.mxu0 %v5975_v40  ;;  %3054 = vmatprep.subr.bf16.mxu1 %v5978_v6  ;;  %v6050_v40 = vld [vmem:[%s7954_s0 + $0x52c] ss:$16 sps:$4 sm:$0xff]   ;;  %v6045_v6 = vld [vmem:[%s7954_s0 + $0x520] ss:$16 sps:$4 sm:$0xff]  }
 0x155   :  { %v1074_v36 = vpop.f32.mrb[0].mxu0  ;;  %v1115_v37 = vpop.f32.mrb[0].mxu1 }
 0x156   :  { %6183 = vtanh.f32 %v1074_v36  ;;  %v1076_v38 = vpop.f32.mrb[1].mxu0  ;;  %v1117_v46 = vpop.f32.mrb[1].mxu1  ;;  %v6054_v36 = vld [vmem:[%s7954_s0 + $0x548] ss:$16 sps:$4 sm:$0xff]  }
 0x157   :  { %6185 = vtanh.f32 %v1115_v37  ;;  %v1078_v47 = vpop.f32.mrb[2].mxu0  ;;  %v1119_v48 = vpop.f32.mrb[2].mxu1  ;;  %3014 = vmatpush1.bf16.msra.mxu0 %v5973_v7  ;;  %3055 = vmatpush1.bf16.msra.mxu1 %v5976_v8  ;;  %v6048_v7 = vld [vmem:[%s7954_s0 + $0x528] ss:$16 sps:$4 sm:$0xff]   ;;  %v6053_v8 = vld [vmem:[%s7954_s0 + $0x544] ss:$16 sps:$4 sm:$0xff]  }
 0x158   :  { %6187 = vtanh.f32 %v1076_v38  ;;  %v1079_v51 = vpop.f32.mrb[3].mxu0  ;;  %v1120_v52 = vpop.f32.mrb[3].mxu1  ;;  %3015 = vmatprep.subr.bf16.mxu0 %v5981_v9  ;;  %3056 = vmatprep.subr.bf16.mxu1 %v5984_v10  ;;  %v6056_v9 = vld [vmem:[%s7954_s0 + $0x54c] ss:$16 sps:$4 sm:$0xff]   ;;  %v6051_v10 = vld [vmem:[%s7954_s0 + $0x540] ss:$16 sps:$4 sm:$0xff]  }
 0x159   :  { %6189 = vtanh.f32 %v1117_v46  ;;  %v6059_v37 = vld [vmem:[%s7954_s0 + $0x564] ss:$16 sps:$4 sm:$0xff]   ;;  %v6062_v38 = vld [vmem:[%s7954_s0 + $0x56c] ss:$16 sps:$4 sm:$0xff]   ;;  %v6057_v46 = vld [vmem:[%s7954_s0 + $0x560] ss:$16 sps:$4 sm:$0xff]  }
 0x15a   :  { %v6060_v47 = vld [vmem:[%s7954_s0 + $0x568] ss:$16 sps:$4 sm:$0xff]   ;;  %v6065_v48 = vld [vmem:[%s7954_s0 + $0x584] ss:$16 sps:$4 sm:$0xff]  }
 0x15b   :  { %3016 = vmatpush1.bf16.msra.mxu0 %v5979_v49  ;;  %3057 = vmatpush1.bf16.msra.mxu1 %v5982_v50  ;;  %v6068_v49 = vld [vmem:[%s7954_s0 + $0x58c] ss:$16 sps:$4 sm:$0xff]   ;;  %v6063_v50 = vld [vmem:[%s7954_s0 + $0x580] ss:$16 sps:$4 sm:$0xff]   ;;  %v6066_v51 = vld [vmem:[%s7954_s0 + $0x588] ss:$16 sps:$4 sm:$0xff]  }
 0x15c   :  { %3017 = vmatprep.subr.bf16.mxu0 %v5987_v53  ;;  %3058 = vmatprep.subr.bf16.mxu1 %v5990_v54  ;;  %v6071_v52 = vld [vmem:[%s7954_s0 + $0x5a4] ss:$16 sps:$4 sm:$0xff]   ;;  %v6074_v53 = vld [vmem:[%s7954_s0 + $0x5ac] ss:$16 sps:$4 sm:$0xff]   ;;  %v6069_v54 = vld [vmem:[%s7954_s0 + $0x5a0] ss:$16 sps:$4 sm:$0xff]  }
 0x15f   :  { %3018 = vmatpush1.bf16.msra.mxu0 %v5985_v55  ;;  %3059 = vmatpush1.bf16.msra.mxu1 %v5988_v56  ;;  %v6072_v55 = vld [vmem:[%s7954_s0 + $0x5a8] ss:$16 sps:$4 sm:$0xff]   ;;  %v6077_v56 = vld [vmem:[%s7954_s0 + $0x5c4] ss:$16 sps:$4 sm:$0xff]  }
 0x160   :  { %v6184_v62 = vpop.eup %6183  ;;  %3284 = vmatprep.subr.bf16.mxu0 %v7369_v57  ;;  %3325 = vmatprep.subr.bf16.mxu1 %v7374_v58 }
 0x161   :  { %v6186_v2 = vpop.eup %6185  ;;  %1130 = vst [vmem:[%s7956_s2] sm:$0xff] %v6184_v62  ;;  %v6075_v62 = vld [vmem:[%s7954_s0 + $0x5c0] ss:$16 sps:$4 sm:$0xff]  }
 0x162   :  { %v6188_v3 = vpop.eup %6187  ;;  %1132 = vst [vmem:[%s7956_s2 + $0x10] sm:$0xff] %v6186_v2  ;;  %3036 = vmatmul.mubr.bf16.vlgmr.msra.gmra.mrb[8].mxu0 %v5120_v61  ;;  %3077 = vmatmul.mubr.bf16.vlgmr.msra.gmra.mrb[8].mxu1 %v5120_v61  ;;  %v6080_v61 = vld [vmem:[%s7954_s0 + $0x5cc] ss:$16 sps:$4 sm:$0xff]   ;;  %v6078_v2 = vld [vmem:[%s7954_s0 + $0x5c8] ss:$16 sps:$4 sm:$0xff]  }
 0x163   :  { %v6190_v4 = vpop.eup %6189  ;;  %1131 = vst [vmem:[%s7956_s2 + $0x8] sm:$0xff] %v6188_v3  ;;  %3285 = vmatpush1.bf16.msra.mxu0 %v7379_v59  ;;  %3326 = vmatpush1.bf16.msra.mxu1 %v7384_v60  ;;  %v6083_v3 = vld [vmem:[%s7954_s0 + $0x5e4] ss:$16 sps:$4 sm:$0xff]  }
 0x164   :  { %1133 = vst [vmem:[%s7956_s2 + $0x18] sm:$0xff] %v6190_v4  ;;  %3286 = vmatprep.subr.bf16.mxu0 %v7394_v63  ;;  %3327 = vmatprep.subr.bf16.mxu1 %v7399_v0  ;;  %v6086_v4 = vld [vmem:[%s7954_s0 + $0x5ec] ss:$16 sps:$4 sm:$0xff]  }
 0x165   :  { %3316 = vmatprep.mubr.bf16.mxu0 %v6256_v1  ;;  %3357 = vmatprep.mubr.bf16.mxu1 %v6256_v1 }
 0x167   :  { %3287 = vmatpush1.bf16.msra.mxu0 %v7415_v5  ;;  %3328 = vmatpush1.bf16.msra.mxu1 %v7420_v39 }
 0x168   :  { %3288 = vmatprep.subr.bf16.mxu0 %v7430_v41  ;;  %3329 = vmatprep.subr.bf16.mxu1 %v7435_v42 }
 0x16b   :  { %3289 = vmatpush1.bf16.msra.mxu0 %v7444_v43  ;;  %3330 = vmatpush1.bf16.msra.mxu1 %v7449_v44 }
 0x16c   :  { %3290 = vmatprep.subr.bf16.mxu0 %v7456_v45  ;;  %3331 = vmatprep.subr.bf16.mxu1 %v7461_v11 }
 0x16f   :  { %3291 = vmatpush1.bf16.msra.mxu0 %v7468_v12  ;;  %3332 = vmatpush1.bf16.msra.mxu1 %v7473_v13 }
 0x170   :  { %3292 = vmatprep.subr.bf16.mxu0 %v7480_v14  ;;  %3333 = vmatprep.subr.bf16.mxu1 %v7485_v15 }
 0x173   :  { %3293 = vmatpush1.bf16.msra.mxu0 %v7492_v16  ;;  %3334 = vmatpush1.bf16.msra.mxu1 %v7497_v17 }
 0x174   :  { %3294 = vmatprep.subr.bf16.mxu0 %v7504_v18  ;;  %3335 = vmatprep.subr.bf16.mxu1 %v7509_v19 }
 0x177   :  { %3295 = vmatpush1.bf16.msra.mxu0 %v7516_v20  ;;  %3336 = vmatpush1.bf16.msra.mxu1 %v7521_v21 }
 0x178   :  { %3296 = vmatprep.subr.bf16.mxu0 %v7528_v22  ;;  %3337 = vmatprep.subr.bf16.mxu1 %v7533_v23 }
 0x17b   :  { %3297 = vmatpush1.bf16.msra.mxu0 %v7540_v24  ;;  %3338 = vmatpush1.bf16.msra.mxu1 %v7545_v25 }
 0x17c   :  { %3298 = vmatprep.subr.bf16.mxu0 %v7552_v26  ;;  %3339 = vmatprep.subr.bf16.mxu1 %v7557_v27 }
 0x17f   :  { %3299 = vmatpush1.bf16.msra.mxu0 %v7564_v28  ;;  %3340 = vmatpush1.bf16.msra.mxu1 %v7569_v29 }
 0x180   :  { %3606 = vmatprep.subr.bf16.mxu0 %v6041_v30  ;;  %3647 = vmatprep.subr.bf16.mxu1 %v6044_v31  ;;  %v6081_v30 = vld [vmem:[%s7954_s0 + $0x5e0] ss:$16 sps:$4 sm:$0xff]   ;;  %v6084_v31 = vld [vmem:[%s7954_s0 + $0x5e8] ss:$16 sps:$4 sm:$0xff]  }
 0x182   :  { %3317 = vmatmul.mubr.bf16.vlgmr.msra.gmra.mrb[8].mxu0 %v5185_v32  ;;  %3358 = vmatmul.mubr.bf16.vlgmr.msra.gmra.mrb[8].mxu1 %v5185_v32  ;;  %v6089_v32 = vld [vmem:[%s7954_s0 + $0x404] ss:$16 sps:$4 sm:$0xff]  }
 0x183   :  { %3607 = vmatpush1.bf16.msra.mxu0 %v6039_v33  ;;  %3648 = vmatpush1.bf16.msra.mxu1 %v6042_v34  ;;  %v6092_v33 = vld [vmem:[%s7954_s0 + $0x40c] ss:$16 sps:$4 sm:$0xff]   ;;  %v6087_v34 = vld [vmem:[%s7954_s0 + $0x400] ss:$16 sps:$4 sm:$0xff]  }
 0x184   :  { %3608 = vmatprep.subr.bf16.mxu0 %v6047_v35  ;;  %3649 = vmatprep.subr.bf16.mxu1 %v6050_v40  ;;  %v6090_v35 = vld [vmem:[%s7954_s0 + $0x408] ss:$16 sps:$4 sm:$0xff]   ;;  %v5283_v40 = vld [vmem:[%s7955_s1 + $0x34] sm:$0xf] }
 0x185   :  { %3638 = vmatprep.mubr.bf16.mxu0 %v6256_v1  ;;  %3679 = vmatprep.mubr.bf16.mxu1 %v6256_v1 }
 0x187   :  { %3609 = vmatpush1.bf16.msra.mxu0 %v6045_v6  ;;  %3650 = vmatpush1.bf16.msra.mxu1 %v6048_v7  ;;  %v6095_v6 = vld [vmem:[%s7954_s0 + $0x424] ss:$16 sps:$4 sm:$0xff]   ;;  %v6098_v7 = vld [vmem:[%s7954_s0 + $0x42c] ss:$16 sps:$4 sm:$0xff]  }
 0x188   :  { %3610 = vmatprep.subr.bf16.mxu0 %v6053_v8  ;;  %3651 = vmatprep.subr.bf16.mxu1 %v6056_v9  ;;  %v6093_v8 = vld [vmem:[%s7954_s0 + $0x420] ss:$16 sps:$4 sm:$0xff]   ;;  %v6096_v9 = vld [vmem:[%s7954_s0 + $0x428] ss:$16 sps:$4 sm:$0xff]  }
 0x18b   :  { %3611 = vmatpush1.bf16.msra.mxu0 %v6051_v10  ;;  %3652 = vmatpush1.bf16.msra.mxu1 %v6054_v36  ;;  %v6101_v10 = vld [vmem:[%s7954_s0 + $0x444] ss:$16 sps:$4 sm:$0xff]   ;;  %v6104_v36 = vld [vmem:[%s7954_s0 + $0x44c] ss:$16 sps:$4 sm:$0xff]  }
 0x18c   :  { %3612 = vmatprep.subr.bf16.mxu0 %v6059_v37  ;;  %3653 = vmatprep.subr.bf16.mxu1 %v6062_v38  ;;  %v6099_v37 = vld [vmem:[%s7954_s0 + $0x440] ss:$16 sps:$4 sm:$0xff]   ;;  %v6102_v38 = vld [vmem:[%s7954_s0 + $0x448] ss:$16 sps:$4 sm:$0xff]  }
 0x18f   :  { %3613 = vmatpush1.bf16.msra.mxu0 %v6057_v46  ;;  %3654 = vmatpush1.bf16.msra.mxu1 %v6060_v47  ;;  %v6107_v46 = vld [vmem:[%s7954_s0 + $0x464] ss:$16 sps:$4 sm:$0xff]   ;;  %v6110_v47 = vld [vmem:[%s7954_s0 + $0x46c] ss:$16 sps:$4 sm:$0xff]  }
 0x190   :  { %3614 = vmatprep.subr.bf16.mxu0 %v6065_v48  ;;  %3655 = vmatprep.subr.bf16.mxu1 %v6068_v49  ;;  %v6105_v48 = vld [vmem:[%s7954_s0 + $0x460] ss:$16 sps:$4 sm:$0xff]   ;;  %v6108_v49 = vld [vmem:[%s7954_s0 + $0x468] ss:$16 sps:$4 sm:$0xff]  }
 0x193   :  { %3615 = vmatpush1.bf16.msra.mxu0 %v6063_v50  ;;  %3656 = vmatpush1.bf16.msra.mxu1 %v6066_v51  ;;  %v6113_v50 = vld [vmem:[%s7954_s0 + $0x484] ss:$16 sps:$4 sm:$0xff]   ;;  %v6116_v51 = vld [vmem:[%s7954_s0 + $0x48c] ss:$16 sps:$4 sm:$0xff]  }
 0x194   :  { %3616 = vmatprep.subr.bf16.mxu0 %v6071_v52  ;;  %3657 = vmatprep.subr.bf16.mxu1 %v6074_v53  ;;  %v6111_v52 = vld [vmem:[%s7954_s0 + $0x480] ss:$16 sps:$4 sm:$0xff]   ;;  %v6114_v53 = vld [vmem:[%s7954_s0 + $0x488] ss:$16 sps:$4 sm:$0xff]  }
 0x197   :  { %3617 = vmatpush1.bf16.msra.mxu0 %v6069_v54  ;;  %3658 = vmatpush1.bf16.msra.mxu1 %v6072_v55  ;;  %v6119_v54 = vld [vmem:[%s7954_s0 + $0x4a4] ss:$16 sps:$4 sm:$0xff]   ;;  %v6122_v55 = vld [vmem:[%s7954_s0 + $0x4ac] ss:$16 sps:$4 sm:$0xff]  }
 0x198   :  { %3618 = vmatprep.subr.bf16.mxu0 %v6077_v56  ;;  %3659 = vmatprep.subr.bf16.mxu1 %v6080_v61  ;;  %v6117_v56 = vld [vmem:[%s7954_s0 + $0x4a0] ss:$16 sps:$4 sm:$0xff]   ;;  %v6120_v61 = vld [vmem:[%s7954_s0 + $0x4a8] ss:$16 sps:$4 sm:$0xff]  }
 0x19b   :  { %3619 = vmatpush1.bf16.msra.mxu0 %v6075_v62  ;;  %3660 = vmatpush1.bf16.msra.mxu1 %v6078_v2  ;;  %v6125_v62 = vld [vmem:[%s7954_s0 + $0x4c4] ss:$16 sps:$4 sm:$0xff]   ;;  %v6128_v2 = vld [vmem:[%s7954_s0 + $0x4cc] ss:$16 sps:$4 sm:$0xff]  }
 0x19c   :  { %3620 = vmatprep.subr.bf16.mxu0 %v6083_v3  ;;  %3661 = vmatprep.subr.bf16.mxu1 %v6086_v4  ;;  %v6123_v3 = vld [vmem:[%s7954_s0 + $0x4c0] ss:$16 sps:$4 sm:$0xff]   ;;  %v6126_v4 = vld [vmem:[%s7954_s0 + $0x4c8] ss:$16 sps:$4 sm:$0xff]  }
 0x19f   :  { %3621 = vmatpush1.bf16.msra.mxu0 %v6081_v30  ;;  %3662 = vmatpush1.bf16.msra.mxu1 %v6084_v31  ;;  %v6131_v30 = vld [vmem:[%s7954_s0 + $0x4e4] ss:$16 sps:$4 sm:$0xff]   ;;  %v6134_v31 = vld [vmem:[%s7954_s0 + $0x4ec] ss:$16 sps:$4 sm:$0xff]  }
 0x1a0   :  { %3848 = vmatprep.subr.bf16.mxu0 %v6089_v32  ;;  %3889 = vmatprep.subr.bf16.mxu1 %v6092_v33  ;;  %v6129_v32 = vld [vmem:[%s7954_s0 + $0x4e0] ss:$16 sps:$4 sm:$0xff]   ;;  %v6132_v33 = vld [vmem:[%s7954_s0 + $0x4e8] ss:$16 sps:$4 sm:$0xff]  }
 0x1a2   :  { %3639 = vmatmul.mubr.bf16.vlgmr.msra.gmra.mrb[12].mxu0 %v5283_v40  ;;  %3680 = vmatmul.mubr.bf16.vlgmr.msra.gmra.mrb[12].mxu1 %v5283_v40  ;;  %v6170_v40 = vld [vmem:[%s7954_s0 + $0x8ac] ss:$16 sps:$4 sm:$0xff]  }
 0x1a3   :  { %3849 = vmatpush1.bf16.msra.mxu0 %v6087_v34  ;;  %3890 = vmatpush1.bf16.msra.mxu1 %v6090_v35  ;;  %v5250_v34 = vld [vmem:[%s7955_s1 + $0x30] sm:$0xf]  ;;  %v6167_v35 = vld [vmem:[%s7954_s0 + $0x8a4] ss:$16 sps:$4 sm:$0xff]  }
 0x1a4   :  { %3850 = vmatprep.subr.bf16.mxu0 %v6095_v6  ;;  %3891 = vmatprep.subr.bf16.mxu1 %v6098_v7  ;;  %v6165_v6 = vld [vmem:[%s7954_s0 + $0x8a0] ss:$16 sps:$4 sm:$0xff]   ;;  %v6168_v7 = vld [vmem:[%s7954_s0 + $0x8a8] ss:$16 sps:$4 sm:$0xff]  }
 0x1a5   :  { %3880 = vmatprep.mubr.bf16.mxu0 %v6256_v1  ;;  %3921 = vmatprep.mubr.bf16.mxu1 %v6256_v1 }
 0x1a7   :  { %3851 = vmatpush1.bf16.msra.mxu0 %v6093_v8  ;;  %3892 = vmatpush1.bf16.msra.mxu1 %v6096_v9  ;;  %v6173_v8 = vld [vmem:[%s7954_s0 + $0x8c4] ss:$16 sps:$4 sm:$0xff]   ;;  %v6176_v9 = vld [vmem:[%s7954_s0 + $0x8cc] ss:$16 sps:$4 sm:$0xff]  }
 0x1a8   :  { %3852 = vmatprep.subr.bf16.mxu0 %v6101_v10  ;;  %3893 = vmatprep.subr.bf16.mxu1 %v6104_v36  ;;  %v6171_v10 = vld [vmem:[%s7954_s0 + $0x8c0] ss:$16 sps:$4 sm:$0xff]   ;;  %v6174_v36 = vld [vmem:[%s7954_s0 + $0x8c8] ss:$16 sps:$4 sm:$0xff]  }
 0x1ab   :  { %3853 = vmatpush1.bf16.msra.mxu0 %v6099_v37  ;;  %3894 = vmatpush1.bf16.msra.mxu1 %v6102_v38  ;;  %v6179_v37 = vld [vmem:[%s7954_s0 + $0x8e4] ss:$16 sps:$4 sm:$0xff]   ;;  %v6182_v38 = vld [vmem:[%s7954_s0 + $0x8ec] ss:$16 sps:$4 sm:$0xff]  }
 0x1ac   :  { %3854 = vmatprep.subr.bf16.mxu0 %v6107_v46  ;;  %3895 = vmatprep.subr.bf16.mxu1 %v6110_v47  ;;  %v6177_v46 = vld [vmem:[%s7954_s0 + $0x8e0] ss:$16 sps:$4 sm:$0xff]   ;;  %v6180_v47 = vld [vmem:[%s7954_s0 + $0x8e8] ss:$16 sps:$4 sm:$0xff]  }
 0x1af   :  { %3855 = vmatpush1.bf16.msra.mxu0 %v6105_v48  ;;  %3896 = vmatpush1.bf16.msra.mxu1 %v6108_v49  ;;  %v5445_v48 = vld [vmem:[%s7955_s1 + $0x3c] sm:$0xf] }
 0x1b0   :  { %3856 = vmatprep.subr.bf16.mxu0 %v6113_v50  ;;  %3897 = vmatprep.subr.bf16.mxu1 %v6116_v51 }
 0x1b3   :  { %3857 = vmatpush1.bf16.msra.mxu0 %v6111_v52  ;;  %3898 = vmatpush1.bf16.msra.mxu1 %v6114_v53 }
 0x1b4   :  { %3858 = vmatprep.subr.bf16.mxu0 %v6119_v54  ;;  %3899 = vmatprep.subr.bf16.mxu1 %v6122_v55 }
 0x1b7   :  { %3859 = vmatpush1.bf16.msra.mxu0 %v6117_v56  ;;  %3900 = vmatpush1.bf16.msra.mxu1 %v6120_v61 }
 0x1b8   :  { %3860 = vmatprep.subr.bf16.mxu0 %v6125_v62  ;;  %3901 = vmatprep.subr.bf16.mxu1 %v6128_v2 }
 0x1bb   :  { %3861 = vmatpush1.bf16.msra.mxu0 %v6123_v3  ;;  %3902 = vmatpush1.bf16.msra.mxu1 %v6126_v4 }
 0x1bc   :  { %3862 = vmatprep.subr.bf16.mxu0 %v6131_v30  ;;  %3903 = vmatprep.subr.bf16.mxu1 %v6134_v31 }
 0x1bf   :  { %3863 = vmatpush1.bf16.msra.mxu0 %v6129_v32  ;;  %3904 = vmatpush1.bf16.msra.mxu1 %v6132_v33 }
 0x1c0   :  { %4124 = vmatprep.subr.bf16.mxu0 %v7369_v57  ;;  %4165 = vmatprep.subr.bf16.mxu1 %v7374_v58 }
 0x1c2   :  { %3881 = vmatmul.mubr.bf16.vlgmr.msra.gmra.mrb[12].mxu0 %v5250_v34  ;;  %3922 = vmatmul.mubr.bf16.vlgmr.msra.gmra.mrb[12].mxu1 %v5250_v34 }
 0x1c3   :  { %4125 = vmatpush1.bf16.msra.mxu0 %v7379_v59  ;;  %4166 = vmatpush1.bf16.msra.mxu1 %v7384_v60 }
 0x1c4   :  { %4126 = vmatprep.subr.bf16.mxu0 %v7394_v63  ;;  %4167 = vmatprep.subr.bf16.mxu1 %v7399_v0 }
 0x1c5   :  { %4156 = vmatprep.mubr.bf16.mxu0 %v6256_v1  ;;  %4197 = vmatprep.mubr.bf16.mxu1 %v6256_v1 }
 0x1c7   :  { %4127 = vmatpush1.bf16.msra.mxu0 %v7415_v5  ;;  %4168 = vmatpush1.bf16.msra.mxu1 %v7420_v39 }
 0x1c8   :  { %4128 = vmatprep.subr.bf16.mxu0 %v7430_v41  ;;  %4169 = vmatprep.subr.bf16.mxu1 %v7435_v42  ;;  %v6137_v41 = vld [vmem:[%s7954_s0 + $0x804] ss:$16 sps:$4 sm:$0xff]   ;;  %v6140_v42 = vld [vmem:[%s7954_s0 + $0x80c] ss:$16 sps:$4 sm:$0xff]  }
 0x1cb   :  { %4129 = vmatpush1.bf16.msra.mxu0 %v7444_v43  ;;  %4170 = vmatpush1.bf16.msra.mxu1 %v7449_v44  ;;  %v6135_v43 = vld [vmem:[%s7954_s0 + $0x800] ss:$16 sps:$4 sm:$0xff]   ;;  %v6138_v44 = vld [vmem:[%s7954_s0 + $0x808] ss:$16 sps:$4 sm:$0xff]  }
 0x1cc   :  { %4130 = vmatprep.subr.bf16.mxu0 %v7456_v45  ;;  %4171 = vmatprep.subr.bf16.mxu1 %v7461_v11  ;;  %v5380_v45 = vld [vmem:[%s7955_s1 + $0x38] sm:$0xf] }
 0x1cf   :  { %4131 = vmatpush1.bf16.msra.mxu0 %v7468_v12  ;;  %4172 = vmatpush1.bf16.msra.mxu1 %v7473_v13  ;;  %v6143_v12 = vld [vmem:[%s7954_s0 + $0x824] ss:$16 sps:$4 sm:$0xff]   ;;  %v6146_v13 = vld [vmem:[%s7954_s0 + $0x82c] ss:$16 sps:$4 sm:$0xff]  }
 0x1d0   :  { %4132 = vmatprep.subr.bf16.mxu0 %v7480_v14  ;;  %4173 = vmatprep.subr.bf16.mxu1 %v7485_v15 }
 0x1d3   :  { %4133 = vmatpush1.bf16.msra.mxu0 %v7492_v16  ;;  %4174 = vmatpush1.bf16.msra.mxu1 %v7497_v17  ;;  %v6141_v17 = vld [vmem:[%s7954_s0 + $0x820] ss:$16 sps:$4 sm:$0xff]  }
 0x1d4   :  { %4134 = vmatprep.subr.bf16.mxu0 %v7504_v18  ;;  %4175 = vmatprep.subr.bf16.mxu1 %v7509_v19  ;;  %v6144_v18 = vld [vmem:[%s7954_s0 + $0x828] ss:$16 sps:$4 sm:$0xff]   ;;  %v6149_v19 = vld [vmem:[%s7954_s0 + $0x844] ss:$16 sps:$4 sm:$0xff]  }
 0x1d5   :  { %v2196_v57 = vpop.f32.mrb[4].mxu0  ;;  %v2237_v58 = vpop.f32.mrb[4].mxu1 }
 0x1d6   :  { %6191 = vtanh.f32 %v2196_v57  ;;  %v2198_v59 = vpop.f32.mrb[5].mxu0  ;;  %v2239_v60 = vpop.f32.mrb[5].mxu1 }
 0x1d7   :  { %6193 = vtanh.f32 %v2237_v58  ;;  %v2200_v63 = vpop.f32.mrb[6].mxu0  ;;  %v2241_v0 = vpop.f32.mrb[6].mxu1  ;;  %4135 = vmatpush1.bf16.msra.mxu0 %v7516_v20  ;;  %4176 = vmatpush1.bf16.msra.mxu1 %v7521_v21  ;;  %v6152_v20 = vld [vmem:[%s7954_s0 + $0x84c] ss:$16 sps:$4 sm:$0xff]   ;;  %v6147_v21 = vld [vmem:[%s7954_s0 + $0x840] ss:$16 sps:$4 sm:$0xff]  }
 0x1d8   :  { %6195 = vtanh.f32 %v2198_v59  ;;  %v2201_v5 = vpop.f32.mrb[7].mxu0  ;;  %v2242_v39 = vpop.f32.mrb[7].mxu1  ;;  %4136 = vmatprep.subr.bf16.mxu0 %v7528_v22  ;;  %4177 = vmatprep.subr.bf16.mxu1 %v7533_v23  ;;  %v6150_v22 = vld [vmem:[%s7954_s0 + $0x848] ss:$16 sps:$4 sm:$0xff]   ;;  %v6155_v23 = vld [vmem:[%s7954_s0 + $0x864] ss:$16 sps:$4 sm:$0xff]  }
 0x1d9   :  { %6197 = vtanh.f32 %v2239_v60 }
 0x1db   :  { %4137 = vmatpush1.bf16.msra.mxu0 %v7540_v24  ;;  %4178 = vmatpush1.bf16.msra.mxu1 %v7545_v25  ;;  %v6153_v24 = vld [vmem:[%s7954_s0 + $0x860] ss:$16 sps:$4 sm:$0xff]   ;;  %v6156_v25 = vld [vmem:[%s7954_s0 + $0x868] ss:$16 sps:$4 sm:$0xff]  }
 0x1dc   :  { %4138 = vmatprep.subr.bf16.mxu0 %v7552_v26  ;;  %4179 = vmatprep.subr.bf16.mxu1 %v7557_v27  ;;  %v6161_v26 = vld [vmem:[%s7954_s0 + $0x884] ss:$16 sps:$4 sm:$0xff]   ;;  %v6164_v27 = vld [vmem:[%s7954_s0 + $0x88c] ss:$16 sps:$4 sm:$0xff]  }
 0x1df   :  { %4139 = vmatpush1.bf16.msra.mxu0 %v7564_v28  ;;  %4180 = vmatpush1.bf16.msra.mxu1 %v7569_v29  ;;  %v6159_v28 = vld [vmem:[%s7954_s0 + $0x880] ss:$16 sps:$4 sm:$0xff]   ;;  %v6162_v29 = vld [vmem:[%s7954_s0 + $0x888] ss:$16 sps:$4 sm:$0xff]  }
 0x1e0   :  { %v6192_v11 = vpop.eup %6191  ;;  %4405 = vmatprep.subr.bf16.mxu0 %v6137_v41  ;;  %4446 = vmatprep.subr.bf16.mxu1 %v6140_v42 }
 0x1e1   :  { %v6194_v14 = vpop.eup %6193  ;;  %2252 = vst [vmem:[%s7956_s2 + $0x20] sm:$0xff] %v6192_v11 }
 0x1e2   :  { %v6196_v15 = vpop.eup %6195  ;;  %2254 = vst [vmem:[%s7956_s2 + $0x30] sm:$0xff] %v6194_v14  ;;  %4157 = vmatmul.mubr.bf16.vlgmr.msra.gmra.mrb[12].mxu0 %v5380_v45  ;;  %4198 = vmatmul.mubr.bf16.vlgmr.msra.gmra.mrb[12].mxu1 %v5380_v45 }
 0x1e3   :  { %v6198_v16 = vpop.eup %6197  ;;  %2253 = vst [vmem:[%s7956_s2 + $0x28] sm:$0xff] %v6196_v15  ;;  %4406 = vmatpush1.bf16.msra.mxu0 %v6135_v43  ;;  %4447 = vmatpush1.bf16.msra.mxu1 %v6138_v44 }
 0x1e4   :  { %2255 = vst [vmem:[%s7956_s2 + $0x38] sm:$0xff] %v6198_v16  ;;  %4407 = vmatprep.subr.bf16.mxu0 %v6143_v12  ;;  %4448 = vmatprep.subr.bf16.mxu1 %v6146_v13 }
 0x1e5   :  { %4437 = vmatprep.mubr.bf16.mxu0 %v6256_v1  ;;  %4478 = vmatprep.mubr.bf16.mxu1 %v6256_v1  ;;  %v6158_v1 = vld [vmem:[%s7954_s0 + $0x86c] ss:$16 sps:$4 sm:$0xff]  }
 0x1e7   :  { %4408 = vmatpush1.bf16.msra.mxu0 %v6141_v17  ;;  %4449 = vmatpush1.bf16.msra.mxu1 %v6144_v18 }
 0x1e8   :  { %4409 = vmatprep.subr.bf16.mxu0 %v6149_v19  ;;  %4450 = vmatprep.subr.bf16.mxu1 %v6152_v20 }
 0x1eb   :  { %4410 = vmatpush1.bf16.msra.mxu0 %v6147_v21  ;;  %4451 = vmatpush1.bf16.msra.mxu1 %v6150_v22 }
 0x1ec   :  { %4411 = vmatprep.subr.bf16.mxu0 %v6155_v23  ;;  %4452 = vmatprep.subr.bf16.mxu1 %v6158_v1 }
 0x1ef   :  { %4412 = vmatpush1.bf16.msra.mxu0 %v6153_v24  ;;  %4453 = vmatpush1.bf16.msra.mxu1 %v6156_v25 }
 0x1f0   :  { %4413 = vmatprep.subr.bf16.mxu0 %v6161_v26  ;;  %4454 = vmatprep.subr.bf16.mxu1 %v6164_v27 }
 0x1f3   :  { %4414 = vmatpush1.bf16.msra.mxu0 %v6159_v28  ;;  %4455 = vmatpush1.bf16.msra.mxu1 %v6162_v29 }
 0x1f4   :  { %4415 = vmatprep.subr.bf16.mxu0 %v6167_v35  ;;  %4456 = vmatprep.subr.bf16.mxu1 %v6170_v40 }
 0x1f7   :  { %4416 = vmatpush1.bf16.msra.mxu0 %v6165_v6  ;;  %4457 = vmatpush1.bf16.msra.mxu1 %v6168_v7 }
 0x1f8   :  { %4417 = vmatprep.subr.bf16.mxu0 %v6173_v8  ;;  %4458 = vmatprep.subr.bf16.mxu1 %v6176_v9 }
 0x1fb   :  { %4418 = vmatpush1.bf16.msra.mxu0 %v6171_v10  ;;  %4459 = vmatpush1.bf16.msra.mxu1 %v6174_v36 }
 0x1fc   :  { %4419 = vmatprep.subr.bf16.mxu0 %v6179_v37  ;;  %4460 = vmatprep.subr.bf16.mxu1 %v6182_v38 }
 0x1ff   :  { %4420 = vmatpush1.bf16.msra.mxu0 %v6177_v46  ;;  %4461 = vmatpush1.bf16.msra.mxu1 %v6180_v47 }
 0x202   :  { %4438 = vmatmul.mubr.bf16.vlgmr.msra.gmra.mrb[12].mxu0 %v5445_v48  ;;  %4479 = vmatmul.mubr.bf16.vlgmr.msra.gmra.mrb[12].mxu1 %v5445_v48 }
 0x255   :  { %v3318_v49 = vpop.f32.mrb[8].mxu0  ;;  %v3359_v50 = vpop.f32.mrb[8].mxu1 }
 0x256   :  { %6199 = vtanh.f32 %v3318_v49  ;;  %v3320_v51 = vpop.f32.mrb[9].mxu0  ;;  %v3361_v52 = vpop.f32.mrb[9].mxu1 }
 0x257   :  { %6201 = vtanh.f32 %v3359_v50  ;;  %v3322_v53 = vpop.f32.mrb[10].mxu0  ;;  %v3363_v54 = vpop.f32.mrb[10].mxu1 }
 0x258   :  { %6203 = vtanh.f32 %v3320_v51  ;;  %v3323_v55 = vpop.f32.mrb[11].mxu0  ;;  %v3364_v56 = vpop.f32.mrb[11].mxu1 }
 0x259   :  { %6205 = vtanh.f32 %v3361_v52 }
 0x260   :  { %v6200_v61 = vpop.eup %6199 }
 0x261   :  { %v6202_v62 = vpop.eup %6201  ;;  %3374 = vst [vmem:[%s7956_s2 + $0x40] sm:$0xff] %v6200_v61 }
 0x262   :  { %v6204_v2 = vpop.eup %6203  ;;  %3376 = vst [vmem:[%s7956_s2 + $0x50] sm:$0xff] %v6202_v62 }
 0x263   :  { %v6206_v3 = vpop.eup %6205  ;;  %3375 = vst [vmem:[%s7956_s2 + $0x48] sm:$0xff] %v6204_v2 }
 0x264   :  { %3377 = vst [vmem:[%s7956_s2 + $0x58] sm:$0xff] %v6206_v3 }
 0x2d5   :  { %v4439_v4 = vpop.f32.mrb[12].mxu0  ;;  %v4480_v30 = vpop.f32.mrb[12].mxu1 }
 0x2d6   :  { %6207 = vtanh.f32 %v4439_v4  ;;  %v4441_v31 = vpop.f32.mrb[13].mxu0  ;;  %v4482_v32 = vpop.f32.mrb[13].mxu1 }
 0x2d7   :  { %6209 = vtanh.f32 %v4480_v30  ;;  %v4443_v33 = vpop.f32.mrb[14].mxu0  ;;  %v4484_v34 = vpop.f32.mrb[14].mxu1 }
 0x2d8   :  { %6211 = vtanh.f32 %v4441_v31  ;;  %v4444_v57 = vpop.f32.mrb[15].mxu0  ;;  %v4485_v58 = vpop.f32.mrb[15].mxu1 }
 0x2d9   :  { %6213 = vtanh.f32 %v4482_v32 }
 0x2e0   :  { %v6208_v59 = vpop.eup %6207 }
 0x2e1   :  { %v6210_v60 = vpop.eup %6209  ;;  %4495 = vst [vmem:[%s7956_s2 + $0x60] sm:$0xff] %v6208_v59 }
 0x2e2   :  { %v6212_v63 = vpop.eup %6211  ;;  %4497 = vst [vmem:[%s7956_s2 + $0x70] sm:$0xff] %v6210_v60 }
 0x2e3   :  { %v6214_v0 = vpop.eup %6213  ;;  %4496 = vst [vmem:[%s7956_s2 + $0x68] sm:$0xff] %v6212_v63 }
 0x2e4   :  { %4498 = vst [vmem:[%s7956_s2 + $0x78] sm:$0xff] %v6214_v0 }

</bundles_post_ra>
